<compile_context>
chip_gen: v7x
topology: tpu7x:2x2x1
jax: 0.10.0
libtpu: 0.0.40
codegen_flags: <defaults>
</compile_context>

<pallas_src>
import functools
import math

import jax
import jax.numpy as jnp
from jax.experimental import pallas as pl
from jax.experimental.pallas import tpu as pltpu

LANE = 128


def _round_up(x, m):
    return (x + m - 1) // m * m


def _basic_block_kernel(*refs, conv1_from_pad, has_proj, ho, wo, cin, pp):
    if has_proj:
        (xsrc_ref, w1_ref, s1_ref, b1_ref, w2_ref, s2_ref, b2_ref,
         ws_ref, ss_ref, bs_ref, out_ref, pad_ref) = refs
    else:
        (xsrc_ref, w1_ref, s1_ref, b1_ref, w2_ref, s2_ref, b2_ref,
         out_ref, pad_ref) = refs

    m = ho * wo

    # ---- conv1: one fused (M, 9*Cin) x (9*Cin, P) MXU matmul ---------------
    if conv1_from_pad:
        xp = xsrc_ref[...]                                  # (H+2, W+2, Cin) bf16
        taps = [xp[ky:ky + ho, kx:kx + wo, :].reshape(m, cin)
                for ky in range(3) for kx in range(3)]
        col1 = jnp.concatenate(taps, axis=-1)               # (M, 9*Cin)
        x_res = taps[4]                                     # centre tap == x
    else:
        col1 = xsrc_ref[...]                                # (M, 9*Cin)
        x_res = col1[:, 4 * cin:5 * cin]                    # == x[::s, ::s]

    acc1 = jnp.dot(col1, w1_ref[...], preferred_element_type=jnp.float32)
    out1 = jnp.maximum(acc1 * s1_ref[...] + b1_ref[...], 0.0)   # (M, P) f32

    # ---- conv2: stride 1, pad 1; zero only the 1-px halo of the scratch ----
    zrow = jnp.zeros((1, wo + 2, pp), pad_ref.dtype)
    zcol = jnp.zeros((ho, 1, pp), pad_ref.dtype)
    pad_ref[0:1, :, :] = zrow
    pad_ref[ho + 1:ho + 2, :, :] = zrow
    pad_ref[1:ho + 1, 0:1, :] = zcol
    pad_ref[1:ho + 1, wo + 1:wo + 2, :] = zcol
    pad_ref[1:ho + 1, 1:wo + 1, :] = out1.astype(pad_ref.dtype).reshape(ho, wo, pp)

    taps2 = [pad_ref[ky:ky + ho, kx:kx + wo, :].reshape(m, pp)
             for ky in range(3) for kx in range(3)]
    col2 = jnp.concatenate(taps2, axis=-1)                  # (M, 9*P)
    acc2 = jnp.dot(col2, w2_ref[...], preferred_element_type=jnp.float32)
    out2 = acc2 * s2_ref[...] + b2_ref[...]

    # ---- shortcut ----------------------------------------------------------
    if has_proj:
        sc = jnp.dot(x_res, ws_ref[...], preferred_element_type=jnp.float32)
        sc = sc * ss_ref[...] + bs_ref[...]
    else:
        sc = x_res.astype(jnp.float32)                      # identity residual

    out_ref[...] = jnp.maximum(out2 + sc, 0.0).astype(out_ref.dtype)


def _fold_bn_pad(gamma, beta, mean, var, pp, eps=1e-5):
    scale = gamma / jnp.sqrt(var + eps)
    bias = beta - mean * scale
    pad = pp - scale.shape[0]
    scale = jnp.pad(scale, (0, pad)).reshape(1, pp).astype(jnp.float32)
    bias = jnp.pad(bias, (0, pad)).reshape(1, pp).astype(jnp.float32)
    return scale, bias


def basic_block_forward(x_nchw, params, *, stride=1):
    N, Cin, H, W = x_nchw.shape
    P = params["w1"].shape[0]                    # planes; w1 is OIHW (P, Cin, 3, 3)
    Ho = (H + 2 - 3) // stride + 1
    Wo = (W + 2 - 3) // stride + 1
    M = Ho * Wo

    Cp = _round_up(max(Cin, LANE), LANE)         # lane-dense channel widths
    Pp = _round_up(max(P, LANE), LANE)

    has_proj = (stride != 1) or (Cin != P)
    conv1_from_pad = (stride == 1)

    # NHWC, zero-pad channels to lane width, 1-px spatial pad, bf16 for the MXU
    x = jnp.transpose(x_nchw, (0, 2, 3, 1)).astype(jnp.float32)
    x = jnp.pad(x, ((0, 0), (0, 0), (0, 0), (0, Cp - Cin)))
    xp = jnp.pad(x, ((0, 0), (1, 1), (1, 1), (0, 0))).astype(jnp.bfloat16)

    if conv1_from_pad:
        xsrc = xp                                                  # (N, H+2, W+2, Cp)
        xsrc_spec = pl.BlockSpec((None, H + 2, W + 2, Cp), lambda n: (n, 0, 0, 0))
    else:
        # Strided conv1 (rare): wrapper-side im2col (~9/stride^2 x input bytes).
        taps = [xp[:, ky:ky + (Ho - 1) * stride + 1:stride,
                      kx:kx + (Wo - 1) * stride + 1:stride, :]
                for ky in range(3) for kx in range(3)]
        xsrc = jnp.concatenate(taps, axis=-1).reshape(N, M, 9 * Cp)
        xsrc_spec = pl.BlockSpec((None, M, 9 * Cp), lambda n: (n, 0, 0))

    # conv weights: OIHW -> (3,3,Cin,P) -> zero-pad channels -> (9*C, P), bf16
    w1 = jnp.transpose(params["w1"], (2, 3, 1, 0))
    w1 = jnp.pad(w1, ((0, 0), (0, 0), (0, Cp - Cin), (0, Pp - P)))
    w1 = w1.reshape(9 * Cp, Pp).astype(jnp.bfloat16)
    w2 = jnp.transpose(params["w2"], (2, 3, 1, 0))
    w2 = jnp.pad(w2, ((0, 0), (0, 0), (0, Pp - P), (0, Pp - P)))
    w2 = w2.reshape(9 * Pp, Pp).astype(jnp.bfloat16)

    s1, b1 = _fold_bn_pad(params["bn1_gamma"], params["bn1_beta"],
                          params["bn1_mean"], params["bn1_var"], Pp)
    s2, b2 = _fold_bn_pad(params["bn2_gamma"], params["bn2_beta"],
                          params["bn2_mean"], params["bn2_var"], Pp)

    def full_spec(shape):
        return pl.BlockSpec(shape, lambda *_: (0,) * len(shape))

    in_specs = [xsrc_spec,
                full_spec((9 * Cp, Pp)), full_spec((1, Pp)), full_spec((1, Pp)),
                full_spec((9 * Pp, Pp)), full_spec((1, Pp)), full_spec((1, Pp))]
    args = [xsrc, w1, s1, b1, w2, s2, b2]

    if has_proj:
        ws = jnp.transpose(params["ws"][:, :, 0, 0], (1, 0))       # (Cin, P)
        ws = jnp.pad(ws, ((0, Cp - Cin), (0, Pp - P))).astype(jnp.bfloat16)
        ss, bs = _fold_bn_pad(params["bns_gamma"], params["bns_beta"],
                              params["bns_mean"], params["bns_var"], Pp)
        in_specs += [full_spec((Cp, Pp)), full_spec((1, Pp)), full_spec((1, Pp))]
        args += [ws, ss, bs]

    kernel = functools.partial(_basic_block_kernel,
                               conv1_from_pad=conv1_from_pad, has_proj=has_proj,
                               ho=Ho, wo=Wo, cin=Cp, pp=Pp)

    # Per-step VMEM footprint is a few MiB at these sizes; 32 MiB fits the
    # default scoped budget on v6e/v7x and is well under v5e's physical VMEM.
    out = pl.pallas_call(
        kernel,
        out_shape=jax.ShapeDtypeStruct((N, M, Pp), jnp.float32),
        grid=(N,),
        in_specs=in_specs,
        out_specs=pl.BlockSpec((None, M, Pp), lambda n: (n, 0, 0)),
        scratch_shapes=[pltpu.VMEM((Ho + 2, Wo + 2, Pp), jnp.bfloat16)],
        compiler_params=pltpu.CompilerParams(
            dimension_semantics=("parallel",),
            vmem_limit_bytes=32 * 1024 * 1024),
    )(*args)

    out = out[:, :, :P].reshape(N, Ho, Wo, P)
    return jnp.transpose(out, (0, 3, 1, 2))                        # back to NCHW


# ---------------- deterministic parameter init (synthetic, no checkpoint) ----
def init_params(key, in_planes, planes):
    ks = jax.random.split(key, 16)

    def conv_w(k, out_c, in_c, kh, kw):
        bound = 1.0 / math.sqrt(in_c * kh * kw)
        return jax.random.uniform(k, (out_c, in_c, kh, kw), jnp.float32,
                                  -bound, bound)

    def bn(k):
        k1, k2, k3, k4 = jax.random.split(k, 4)
        gamma = 1.0 + 0.1 * jax.random.normal(k1, (planes,), jnp.float32)
        beta = 0.1 * jax.random.normal(k2, (planes,), jnp.float32)
        mean = 0.1 * jax.random.normal(k3, (planes,), jnp.float32)
        var = jax.random.uniform(k4, (planes,), jnp.float32, 0.5, 1.5)
        return gamma, beta, mean, var

    g1, be1, m1, v1 = bn(ks[1])
    g2, be2, m2, v2 = bn(ks[3])
    gs, bes, ms, vs = bn(ks[5])
    return {
        "w1": conv_w(ks[0], planes, in_planes, 3, 3),
        "bn1_gamma": g1, "bn1_beta": be1, "bn1_mean": m1, "bn1_var": v1,
        "w2": conv_w(ks[2], planes, planes, 3, 3),
        "bn2_gamma": g2, "bn2_beta": be2, "bn2_mean": m2, "bn2_var": v2,
        "ws": conv_w(ks[4], planes, in_planes, 1, 1),
        "bns_gamma": gs, "bns_beta": bes, "bns_mean": ms, "bns_var": vs,
    }


# ---------------- pure-JAX reference (eval-mode BN), for correctness check ---
def ref_forward(x, params, *, stride=1, eps=1e-5):
    def conv(inp, w, s, pad):
        return jax.lax.conv_general_dilated(
            inp, w, (s, s), ((pad, pad), (pad, pad)),
            dimension_numbers=("NCHW", "OIHW", "NCHW"))

    def bn(inp, g, b, m, v):
        g, b, m, v = (a[None, :, None, None] for a in (g, b, m, v))
        return (inp - m) / jnp.sqrt(v + eps) * g + b

    Cin = x.shape[1]
    P = params["w1"].shape[0]
    out = jax.nn.relu(bn(conv(x, params["w1"], stride, 1),
                         params["bn1_gamma"], params["bn1_beta"],
                         params["bn1_mean"], params["bn1_var"]))
    out = bn(conv(out, params["w2"], 1, 1),
             params["bn2_gamma"], params["bn2_beta"],
             params["bn2_mean"], params["bn2_var"])
    if stride != 1 or Cin != P:
        sc = bn(conv(x, params["ws"], stride, 0),
                params["bns_gamma"], params["bns_beta"],
                params["bns_mean"], params["bns_var"])
    else:
        sc = x
    return jax.nn.relu(out + sc)


if __name__ == "__main__":
    key = jax.random.PRNGKey(0)

    configs = [
        (4, 8, 1),    # projection shortcut (Cin != planes), stride 1
        (8, 8, 1),    # identity shortcut (specialized path, no 1x1 matmul)
        (4, 8, 2),    # strided conv1 + projection shortcut
    ]
    for idx, (in_planes, planes, stride) in enumerate(configs):
        kx, kp = jax.random.split(jax.random.fold_in(key, idx))
        x = jax.random.normal(kx, (2, in_planes, 16, 16), jnp.float32)  # NCHW
        params = init_params(kp, in_planes, planes)

        out = jax.block_until_ready(basic_block_forward(x, params, stride=stride))
        ref = ref_forward(x, params, stride=stride)
        assert out.shape == ref.shape, (out.shape, ref.shape)
        # Tolerances sized for bf16 MXU inputs with f32 accumulation.
        max_err = float(jnp.max(jnp.abs(out - ref)))
        mean_err = float(jnp.mean(jnp.abs(out - ref)))
        assert max_err < 1e-1, f"config {idx}: max abs err {max_err}"
        assert mean_err < 1e-2, f"config {idx}: mean abs err {mean_err}"

    print("KERNEL_OK")
</pallas_src>

<mosaic_0001>
module attributes {stable_mosaic.version = 11 : i64} {
  func.func @_basic_block_kernel(%arg0: i32, %arg1: memref<1x18x18x128xbf16, #tpu.memory_space<vmem>>, %arg2: memref<1152x128xbf16, #tpu.memory_space<vmem>>, %arg3: memref<1x128xf32, #tpu.memory_space<vmem>>, %arg4: memref<1x128xf32, #tpu.memory_space<vmem>>, %arg5: memref<1152x128xbf16, #tpu.memory_space<vmem>>, %arg6: memref<1x128xf32, #tpu.memory_space<vmem>>, %arg7: memref<1x128xf32, #tpu.memory_space<vmem>>, %arg8: memref<128x128xbf16, #tpu.memory_space<vmem>>, %arg9: memref<1x128xf32, #tpu.memory_space<vmem>>, %arg10: memref<1x128xf32, #tpu.memory_space<vmem>>, %arg11: memref<1x256x128xf32, #tpu.memory_space<vmem>>, %arg12: memref<18x18x128xbf16, #tpu.memory_space<vmem>>) attributes {dimension_semantics = [#tpu.dimension_semantics<parallel>], iteration_bounds = array<i64: 2>, scalar_prefetch = 0 : i64, scratch_operands = 1 : i64, tpu.core_type = #tpu.core_type<tc>, window_params = [{transform_indices = @transform_0, window_bounds = array<i64: 1, 18, 18, 128>}, {pipeline_mode = #tpu.pipeline_mode<synchronous>, transform_indices = @transform_1, window_bounds = array<i64: 1152, 128>}, {pipeline_mode = #tpu.pipeline_mode<synchronous>, transform_indices = @transform_2, window_bounds = array<i64: 1, 128>}, {pipeline_mode = #tpu.pipeline_mode<synchronous>, transform_indices = @transform_3, window_bounds = array<i64: 1, 128>}, {pipeline_mode = #tpu.pipeline_mode<synchronous>, transform_indices = @transform_4, window_bounds = array<i64: 1152, 128>}, {pipeline_mode = #tpu.pipeline_mode<synchronous>, transform_indices = @transform_5, window_bounds = array<i64: 1, 128>}, {pipeline_mode = #tpu.pipeline_mode<synchronous>, transform_indices = @transform_6, window_bounds = array<i64: 1, 128>}, {pipeline_mode = #tpu.pipeline_mode<synchronous>, transform_indices = @transform_7, window_bounds = array<i64: 128, 128>}, {pipeline_mode = #tpu.pipeline_mode<synchronous>, transform_indices = @transform_8, window_bounds = array<i64: 1, 128>}, {pipeline_mode = #tpu.pipeline_mode<synchronous>, transform_indices = @transform_9, window_bounds = array<i64: 1, 128>}, {transform_indices = @transform_10, window_bounds = array<i64: 1, 256, 128>}]} {
    %c0 = arith.constant 0 : index
    %c0_0 = arith.constant 0 : index
    %c0_1 = arith.constant 0 : index
    %c0_2 = arith.constant 0 : index
    %0 = vector.load %arg1[%c0, %c0_0, %c0_1, %c0_2] : memref<1x18x18x128xbf16, #tpu.memory_space<vmem>>, vector<1x18x18x128xbf16>
    %1 = vector.shape_cast %0 : vector<1x18x18x128xbf16> to vector<18x18x128xbf16>
    %2 = vector.extract_strided_slice %1 {offsets = [0, 0, 0], sizes = [16, 16, 128], strides = [1, 1, 1]} : vector<18x18x128xbf16> to vector<16x16x128xbf16>
    %3 = vector.shape_cast %2 : vector<16x16x128xbf16> to vector<256x128xbf16>
    %4 = vector.extract_strided_slice %1 {offsets = [0, 1, 0], sizes = [16, 16, 128], strides = [1, 1, 1]} : vector<18x18x128xbf16> to vector<16x16x128xbf16>
    %5 = vector.shape_cast %4 : vector<16x16x128xbf16> to vector<256x128xbf16>
    %6 = vector.extract_strided_slice %1 {offsets = [0, 2, 0], sizes = [16, 16, 128], strides = [1, 1, 1]} : vector<18x18x128xbf16> to vector<16x16x128xbf16>
    %7 = vector.shape_cast %6 : vector<16x16x128xbf16> to vector<256x128xbf16>
    %8 = vector.extract_strided_slice %1 {offsets = [1, 0, 0], sizes = [16, 16, 128], strides = [1, 1, 1]} : vector<18x18x128xbf16> to vector<16x16x128xbf16>
    %9 = vector.shape_cast %8 : vector<16x16x128xbf16> to vector<256x128xbf16>
    %10 = vector.extract_strided_slice %1 {offsets = [1, 1, 0], sizes = [16, 16, 128], strides = [1, 1, 1]} : vector<18x18x128xbf16> to vector<16x16x128xbf16>
    %11 = vector.shape_cast %10 : vector<16x16x128xbf16> to vector<256x128xbf16>
    %12 = vector.extract_strided_slice %1 {offsets = [1, 2, 0], sizes = [16, 16, 128], strides = [1, 1, 1]} : vector<18x18x128xbf16> to vector<16x16x128xbf16>
    %13 = vector.shape_cast %12 : vector<16x16x128xbf16> to vector<256x128xbf16>
    %14 = vector.extract_strided_slice %1 {offsets = [2, 0, 0], sizes = [16, 16, 128], strides = [1, 1, 1]} : vector<18x18x128xbf16> to vector<16x16x128xbf16>
    %15 = vector.shape_cast %14 : vector<16x16x128xbf16> to vector<256x128xbf16>
    %16 = vector.extract_strided_slice %1 {offsets = [2, 1, 0], sizes = [16, 16, 128], strides = [1, 1, 1]} : vector<18x18x128xbf16> to vector<16x16x128xbf16>
    %17 = vector.shape_cast %16 : vector<16x16x128xbf16> to vector<256x128xbf16>
    %18 = vector.extract_strided_slice %1 {offsets = [2, 2, 0], sizes = [16, 16, 128], strides = [1, 1, 1]} : vector<18x18x128xbf16> to vector<16x16x128xbf16>
    %19 = vector.shape_cast %18 : vector<16x16x128xbf16> to vector<256x128xbf16>
    %20 = tpu.concatenate %3, %5, %7, %9, %11, %13, %15, %17, %19 in 1 : vector<256x128xbf16>, vector<256x128xbf16>, vector<256x128xbf16>, vector<256x128xbf16>, vector<256x128xbf16>, vector<256x128xbf16>, vector<256x128xbf16>, vector<256x128xbf16>, vector<256x128xbf16> -> vector<256x1152xbf16>
    %c0_3 = arith.constant 0 : index
    %c0_4 = arith.constant 0 : index
    %21 = vector.load %arg2[%c0_3, %c0_4] : memref<1152x128xbf16, #tpu.memory_space<vmem>>, vector<1152x128xbf16>
    %cst = arith.constant dense<0.000000e+00> : vector<256x128xf32>
    %22 = tpu.matmul %20, %21, %cst {dimension_numbers = #tpu.dot_dimension_numbers<[1], [0], [0], [1], [0, 0, 1, 1], [], []>} : vector<256x1152xbf16>, vector<1152x128xbf16>, vector<256x128xf32> -> vector<256x128xf32>
    %c0_5 = arith.constant 0 : index
    %c0_6 = arith.constant 0 : index
    %23 = vector.load %arg3[%c0_5, %c0_6] : memref<1x128xf32, #tpu.memory_space<vmem>>, vector<1x128xf32>
    %24 = vector.broadcast %23 : vector<1x128xf32> to vector<256x128xf32>
    %25 = arith.mulf %22, %24 : vector<256x128xf32>
    %c0_7 = arith.constant 0 : index
    %c0_8 = arith.constant 0 : index
    %26 = vector.load %arg4[%c0_7, %c0_8] : memref<1x128xf32, #tpu.memory_space<vmem>>, vector<1x128xf32>
    %27 = vector.broadcast %26 : vector<1x128xf32> to vector<256x128xf32>
    %28 = arith.addf %25, %27 : vector<256x128xf32>
    %cst_9 = arith.constant 0.000000e+00 : f32
    %29 = vector.broadcast %cst_9 : f32 to vector<256x128xf32>
    %30 = arith.maximumf %28, %29 : vector<256x128xf32>
    %cst_10 = arith.constant 0.000000e+00 : bf16
    %31 = vector.broadcast %cst_10 : bf16 to vector<1x18x128xbf16>
    %cst_11 = arith.constant 0.000000e+00 : bf16
    %32 = vector.broadcast %cst_11 : bf16 to vector<16x1x128xbf16>
    %c0_12 = arith.constant 0 : index
    %c0_13 = arith.constant 0 : index
    %c0_14 = arith.constant 0 : index
    %33 = vector.load %arg12[%c0_12, %c0_13, %c0_14] : memref<18x18x128xbf16, #tpu.memory_space<vmem>>, vector<1x18x128xbf16>
    tpu.vector_store %arg12[%c0_12, %c0_13, %c0_14], %31 {strides = array<i32>} : memref<18x18x128xbf16, #tpu.memory_space<vmem>>, vector<1x18x128xbf16>,
    %c17 = arith.constant 17 : index
    %c0_15 = arith.constant 0 : index
    %c0_16 = arith.constant 0 : index
    %34 = vector.load %arg12[%c17, %c0_15, %c0_16] : memref<18x18x128xbf16, #tpu.memory_space<vmem>>, vector<1x18x128xbf16>
    tpu.vector_store %arg12[%c17, %c0_15, %c0_16], %31 {strides = array<i32>} : memref<18x18x128xbf16, #tpu.memory_space<vmem>>, vector<1x18x128xbf16>,
    %c1 = arith.constant 1 : index
    %c0_17 = arith.constant 0 : index
    %c0_18 = arith.constant 0 : index
    %35 = vector.load %arg12[%c1, %c0_17, %c0_18] : memref<18x18x128xbf16, #tpu.memory_space<vmem>>, vector<16x1x128xbf16>
    tpu.vector_store %arg12[%c1, %c0_17, %c0_18], %32 {strides = array<i32>} : memref<18x18x128xbf16, #tpu.memory_space<vmem>>, vector<16x1x128xbf16>,
    %c1_19 = arith.constant 1 : index
    %c17_20 = arith.constant 17 : index
    %c0_21 = arith.constant 0 : index
    %36 = vector.load %arg12[%c1_19, %c17_20, %c0_21] : memref<18x18x128xbf16, #tpu.memory_space<vmem>>, vector<16x1x128xbf16>
    tpu.vector_store %arg12[%c1_19, %c17_20, %c0_21], %32 {strides = array<i32>} : memref<18x18x128xbf16, #tpu.memory_space<vmem>>, vector<16x1x128xbf16>,
    %37 = arith.truncf %30 : vector<256x128xf32> to vector<256x128xbf16>
    %38 = vector.shape_cast %37 : vector<256x128xbf16> to vector<16x16x128xbf16>
    %c1_22 = arith.constant 1 : index
    %c1_23 = arith.constant 1 : index
    %c0_24 = arith.constant 0 : index
    %39 = vector.load %arg12[%c1_22, %c1_23, %c0_24] : memref<18x18x128xbf16, #tpu.memory_space<vmem>>, vector<16x16x128xbf16>
    tpu.vector_store %arg12[%c1_22, %c1_23, %c0_24], %38 {strides = array<i32>} : memref<18x18x128xbf16, #tpu.memory_space<vmem>>, vector<16x16x128xbf16>,
    %c0_25 = arith.constant 0 : index
    %c0_26 = arith.constant 0 : index
    %c0_27 = arith.constant 0 : index
    %40 = vector.load %arg12[%c0_25, %c0_26, %c0_27] : memref<18x18x128xbf16, #tpu.memory_space<vmem>>, vector<16x16x128xbf16>
    %41 = vector.shape_cast %40 : vector<16x16x128xbf16> to vector<256x128xbf16>
    %c0_28 = arith.constant 0 : index
    %c1_29 = arith.constant 1 : index
    %c0_30 = arith.constant 0 : index
    %42 = vector.load %arg12[%c0_28, %c1_29, %c0_30] : memref<18x18x128xbf16, #tpu.memory_space<vmem>>, vector<16x16x128xbf16>
    %43 = vector.shape_cast %42 : vector<16x16x128xbf16> to vector<256x128xbf16>
    %c0_31 = arith.constant 0 : index
    %c2 = arith.constant 2 : index
    %c0_32 = arith.constant 0 : index
    %44 = vector.load %arg12[%c0_31, %c2, %c0_32] : memref<18x18x128xbf16, #tpu.memory_space<vmem>>, vector<16x16x128xbf16>
    %45 = vector.shape_cast %44 : vector<16x16x128xbf16> to vector<256x128xbf16>
    %c1_33 = arith.constant 1 : index
    %c0_34 = arith.constant 0 : index
    %c0_35 = arith.constant 0 : index
    %46 = vector.load %arg12[%c1_33, %c0_34, %c0_35] : memref<18x18x128xbf16, #tpu.memory_space<vmem>>, vector<16x16x128xbf16>
    %47 = vector.shape_cast %46 : vector<16x16x128xbf16> to vector<256x128xbf16>
    %c1_36 = arith.constant 1 : index
    %c1_37 = arith.constant 1 : index
    %c0_38 = arith.constant 0 : index
    %48 = vector.load %arg12[%c1_36, %c1_37, %c0_38] : memref<18x18x128xbf16, #tpu.memory_space<vmem>>, vector<16x16x128xbf16>
    %49 = vector.shape_cast %48 : vector<16x16x128xbf16> to vector<256x128xbf16>
    %c1_39 = arith.constant 1 : index
    %c2_40 = arith.constant 2 : index
    %c0_41 = arith.constant 0 : index
    %50 = vector.load %arg12[%c1_39, %c2_40, %c0_41] : memref<18x18x128xbf16, #tpu.memory_space<vmem>>, vector<16x16x128xbf16>
    %51 = vector.shape_cast %50 : vector<16x16x128xbf16> to vector<256x128xbf16>
    %c2_42 = arith.constant 2 : index
    %c0_43 = arith.constant 0 : index
    %c0_44 = arith.constant 0 : index
    %52 = vector.load %arg12[%c2_42, %c0_43, %c0_44] : memref<18x18x128xbf16, #tpu.memory_space<vmem>>, vector<16x16x128xbf16>
    %53 = vector.shape_cast %52 : vector<16x16x128xbf16> to vector<256x128xbf16>
    %c2_45 = arith.constant 2 : index
    %c1_46 = arith.constant 1 : index
    %c0_47 = arith.constant 0 : index
    %54 = vector.load %arg12[%c2_45, %c1_46, %c0_47] : memref<18x18x128xbf16, #tpu.memory_space<vmem>>, vector<16x16x128xbf16>
    %55 = vector.shape_cast %54 : vector<16x16x128xbf16> to vector<256x128xbf16>
    %c2_48 = arith.constant 2 : index
    %c2_49 = arith.constant 2 : index
    %c0_50 = arith.constant 0 : index
    %56 = vector.load %arg12[%c2_48, %c2_49, %c0_50] : memref<18x18x128xbf16, #tpu.memory_space<vmem>>, vector<16x16x128xbf16>
    %57 = vector.shape_cast %56 : vector<16x16x128xbf16> to vector<256x128xbf16>
    %58 = tpu.concatenate %41, %43, %45, %47, %49, %51, %53, %55, %57 in 1 : vector<256x128xbf16>, vector<256x128xbf16>, vector<256x128xbf16>, vector<256x128xbf16>, vector<256x128xbf16>, vector<256x128xbf16>, vector<256x128xbf16>, vector<256x128xbf16>, vector<256x128xbf16> -> vector<256x1152xbf16>
    %c0_51 = arith.constant 0 : index
    %c0_52 = arith.constant 0 : index
    %59 = vector.load %arg5[%c0_51, %c0_52] : memref<1152x128xbf16, #tpu.memory_space<vmem>>, vector<1152x128xbf16>
    %cst_53 = arith.constant dense<0.000000e+00> : vector<256x128xf32>
    %60 = tpu.matmul %58, %59, %cst_53 {dimension_numbers = #tpu.dot_dimension_numbers<[1], [0], [0], [1], [0, 0, 1, 1], [], []>} : vector<256x1152xbf16>, vector<1152x128xbf16>, vector<256x128xf32> -> vector<256x128xf32>
    %c0_54 = arith.constant 0 : index
    %c0_55 = arith.constant 0 : index
    %61 = vector.load %arg6[%c0_54, %c0_55] : memref<1x128xf32, #tpu.memory_space<vmem>>, vector<1x128xf32>
    %62 = vector.broadcast %61 : vector<1x128xf32> to vector<256x128xf32>
    %63 = arith.mulf %60, %62 : vector<256x128xf32>
    %c0_56 = arith.constant 0 : index
    %c0_57 = arith.constant 0 : index
    %64 = vector.load %arg7[%c0_56, %c0_57] : memref<1x128xf32, #tpu.memory_space<vmem>>, vector<1x128xf32>
    %65 = vector.broadcast %64 : vector<1x128xf32> to vector<256x128xf32>
    %66 = arith.addf %63, %65 : vector<256x128xf32>
    %c0_58 = arith.constant 0 : index
    %c0_59 = arith.constant 0 : index
    %67 = vector.load %arg8[%c0_58, %c0_59] : memref<128x128xbf16, #tpu.memory_space<vmem>>, vector<128x128xbf16>
    %cst_60 = arith.constant dense<0.000000e+00> : vector<256x128xf32>
    %68 = tpu.matmul %11, %67, %cst_60 {dimension_numbers = #tpu.dot_dimension_numbers<[1], [0], [0], [1], [0, 0, 1, 1], [], []>} : vector<256x128xbf16>, vector<128x128xbf16>, vector<256x128xf32> -> vector<256x128xf32>
    %c0_61 = arith.constant 0 : index
    %c0_62 = arith.constant 0 : index
    %69 = vector.load %arg9[%c0_61, %c0_62] : memref<1x128xf32, #tpu.memory_space<vmem>>, vector<1x128xf32>
    %70 = vector.broadcast %69 : vector<1x128xf32> to vector<256x128xf32>
    %71 = arith.mulf %68, %70 : vector<256x128xf32>
    %c0_63 = arith.constant 0 : index
    %c0_64 = arith.constant 0 : index
    %72 = vector.load %arg10[%c0_63, %c0_64] : memref<1x128xf32, #tpu.memory_space<vmem>>, vector<1x128xf32>
    %73 = vector.broadcast %72 : vector<1x128xf32> to vector<256x128xf32>
    %74 = arith.addf %71, %73 : vector<256x128xf32>
    %75 = arith.addf %66, %74 : vector<256x128xf32>
    %cst_65 = arith.constant 0.000000e+00 : f32
    %76 = vector.broadcast %cst_65 : f32 to vector<256x128xf32>
    %77 = arith.maximumf %75, %76 : vector<256x128xf32>
    %c0_66 = arith.constant 0 : index
    %c0_67 = arith.constant 0 : index
    %c0_68 = arith.constant 0 : index
    %78 = vector.load %arg11[%c0_66, %c0_67, %c0_68] : memref<1x256x128xf32, #tpu.memory_space<vmem>>, vector<1x256x128xf32>
    %79 = vector.shape_cast %78 : vector<1x256x128xf32> to vector<256x128xf32>
    %80 = vector.shape_cast %77 : vector<256x128xf32> to vector<1x256x128xf32>
    tpu.vector_store %arg11[%c0_66, %c0_67, %c0_68], %80 {strides = array<i32>} : memref<1x256x128xf32, #tpu.memory_space<vmem>>, vector<1x256x128xf32>,
    return
  }
  func.func @transform_0(%arg0: i32) -> (i32, i32, i32, i32) {
    %c0_i32 = arith.constant 0 : i32
    %c0_i32_0 = arith.constant 0 : i32
    %c0_i32_1 = arith.constant 0 : i32
    %c0_i32_2 = arith.constant 0 : i32
    return %arg0, %c0_i32, %c0_i32_0, %c0_i32_1 : i32, i32, i32, i32
  }
  func.func @transform_1(%arg0: i32) -> (i32, i32) {
    %c0_i32 = arith.constant 0 : i32
    %c0_i32_0 = arith.constant 0 : i32
    %c0_i32_1 = arith.constant 0 : i32
    return %c0_i32, %c0_i32_0 : i32, i32
  }
  func.func @transform_2(%arg0: i32) -> (i32, i32) {
    %c0_i32 = arith.constant 0 : i32
    %c0_i32_0 = arith.constant 0 : i32
    %c0_i32_1 = arith.constant 0 : i32
    return %c0_i32, %c0_i32_0 : i32, i32
  }
  func.func @transform_3(%arg0: i32) -> (i32, i32) {
    %c0_i32 = arith.constant 0 : i32
    %c0_i32_0 = arith.constant 0 : i32
    %c0_i32_1 = arith.constant 0 : i32
    return %c0_i32, %c0_i32_0 : i32, i32
  }
  func.func @transform_4(%arg0: i32) -> (i32, i32) {
    %c0_i32 = arith.constant 0 : i32
    %c0_i32_0 = arith.constant 0 : i32
    %c0_i32_1 = arith.constant 0 : i32
    return %c0_i32, %c0_i32_0 : i32, i32
  }
  func.func @transform_5(%arg0: i32) -> (i32, i32) {
    %c0_i32 = arith.constant 0 : i32
    %c0_i32_0 = arith.constant 0 : i32
    %c0_i32_1 = arith.constant 0 : i32
    return %c0_i32, %c0_i32_0 : i32, i32
  }
  func.func @transform_6(%arg0: i32) -> (i32, i32) {
    %c0_i32 = arith.constant 0 : i32
    %c0_i32_0 = arith.constant 0 : i32
    %c0_i32_1 = arith.constant 0 : i32
    return %c0_i32, %c0_i32_0 : i32, i32
  }
  func.func @transform_7(%arg0: i32) -> (i32, i32) {
    %c0_i32 = arith.constant 0 : i32
    %c0_i32_0 = arith.constant 0 : i32
    %c0_i32_1 = arith.constant 0 : i32
    return %c0_i32, %c0_i32_0 : i32, i32
  }
  func.func @transform_8(%arg0: i32) -> (i32, i32) {
    %c0_i32 = arith.constant 0 : i32
    %c0_i32_0 = arith.constant 0 : i32
    %c0_i32_1 = arith.constant 0 : i32
    return %c0_i32, %c0_i32_0 : i32, i32
  }
  func.func @transform_9(%arg0: i32) -> (i32, i32) {
    %c0_i32 = arith.constant 0 : i32
    %c0_i32_0 = arith.constant 0 : i32
    %c0_i32_1 = arith.constant 0 : i32
    return %c0_i32, %c0_i32_0 : i32, i32
  }
  func.func @transform_10(%arg0: i32) -> (i32, i32, i32) {
    %c0_i32 = arith.constant 0 : i32
    %c0_i32_0 = arith.constant 0 : i32
    %c0_i32_1 = arith.constant 0 : i32
    return %arg0, %c0_i32, %c0_i32_0 : i32, i32, i32
  }
}

</mosaic_0001>

<bundles_post_ra>
// kernel: tpu_custom_call.1
= control target key start
LH: loop header
LB: loop body
LE: loop exit
PB: predicated region body
PF: predicated region fallthrough
CT: control target
= control target key end

     0   :  { %15 = vsyncpa [#allocation4], 0  ;;  %s13595_s0 = inlined_call_operand.vmem [shape: bf16[2,18,18,128], index: 0, kind: input, shape index: {}]   ;;  %s13596_s1 = inlined_call_operand.vmem [shape: bf16[1152,128], index: 1, kind: input, shape index: {}]   ;;  %s13597_s2 = inlined_call_operand.vmem [shape: f32[1,128], index: 2, kind: input, shape index: {}]   ;;  %s13598_s3 = inlined_call_operand.vmem [shape: f32[1,128], index: 3, kind: input, shape index: {}]   ;;  %s13599_s4 = inlined_call_operand.hbm [shape: bf16[1152,128], index: 4, kind: input, shape index: {}]   ;;  %s13600_s5 = inlined_call_operand.vmem [shape: f32[1,128], index: 5, kind: input, shape index: {}]   ;;  %s13601_s6 = inlined_call_operand.vmem [shape: f32[1,128], index: 6, kind: input, shape index: {}]   ;;  %s13602_s7 = inlined_call_operand.vmem [shape: bf16[128,128], index: 7, kind: input, shape index: {}]   ;;  %s13603_s8 = inlined_call_operand.vmem [shape: f32[1,128], index: 8, kind: input, shape index: {}]   ;;  %s13604_s9 = inlined_call_operand.vmem [shape: f32[1,128], index: 9, kind: input, shape index: {}]   ;;  %s13605_s10 = inlined_call_operand.hbm [shape: f32[2,256,128], index: 10, kind: output, shape index: {}]  }
   0x1   :  { %16 = vsyncpa [#allocation5], 0 }
   0x2   :  { %18 = vsyncpa [#allocation5 + $0x1], 0  ;;  %s9890_s13 = smov 0   ;;  %s9892_s14 = smov 0  }
   0x3   :  { %s9894_s15 = smov 0   ;;  %s9896_s16 = smov 0  }
   0x4 LB: > { %s9911_s17 = sadd.s32 4294967295, %s9826_s16   ;;  %s7789_s18 = sadd.s32 4294967294, %s9826_s16   ;;  %s9826_s16 = sphi %s9896_s16, %s13912_s16   ;;  %s9822_s15 = sphi %s9894_s15, %s13911_s15   ;;  %s9818_s14 = sphi %s9892_s14, %s13910_s14   ;;  %s9814_s13 = sphi %s9890_s13, %s13909_s13  }
   0x5   : > { %s9915_s19 = sadd.s32 1, %s9826_s16   ;;  %s246_s20 = sadd.s32 1, %s9822_s15 }
   0x6   : > { %s243_s21 = ssub.s32 %s9826_s16, %s9915_s19  ;;  %p256_p0 = scmp.ne.s32.totalorder %s9822_s15, %s9818_s14 }
   0x7   : > { %p244_p1 = scmp.eq.s32.totalorder %s243_s21, 0  ;;  %p257_p2 = scmp.eq.s32.totalorder %s9911_s17, 1 }
   0x8   : > { %p262_p3 = scmp.ne.s32.totalorder %s9818_s14, %s9814_s13  ;;  %p263_p4 = scmp.eq.s32.totalorder %s7789_s18, 1 }
   0x9   : > { %s9926_s22 = scalar_select %p244_p1, %s9822_s15, %s246_s20  }
   0xa   : > { %p9928_p5 = por %p257_p2, %p256_p0  ;;  %p9932_p6 = por %p263_p4, %p262_p3 }
   0xb   : > { %p7790_p7 = scmp.ge.s32.totalorder %s9826_s16, 1  ;;  %p270_p8 = scmp.lt.s32.totalorder %s9826_s16, 3 }
   0xc   : > { %s13672_s23 = scalar_select %p9928_p5, 1, 0 }
   0xd   : > { %s13673_s24 = scalar_select %p9932_p6, 1, 0 }
   0xe   : > { %p13606_p9 = scmp.eq.s32.totalorder %s9911_s17, 0  ;;  %p9939_p10 = pnand %p7790_p7, %p270_p8 }
   0xf   : > { %s9828_s26 = smov [#allocation3]   ;;  %s9732_s11 = scalar_lea.hbm %s13599_s4, 9216 }
  0x10   : > { %s13674_s25 = scalar_select %p9939_p10, 1, 0 }
  0x11   : > { %s291_s27 = sshll.u32 %s9828_s26, 4  ;;  %p9424_p11 = pneg %p9939_p10  ;;  %s292_s27 = int_to_ptr.vmem [resolvable:$true] %s291_s27 }
  0x12   : > { %p9733_p13 = scmp.ne.s32.totalorder %s13599_s4, %s9732_s11  ;;  %p9739_p3 = scmp.lt.u32.totalorder %s9732_s11, %s13599_s4 }
  0x13   : > { %p9947_p12 = pnand %p13606_p9, %p9424_p11 }
  0x15   : > { %p9734_p0 = pneg %p9947_p12 }
  0x17   : > { %p9735_p1 = pnand %p9734_p0, %p9733_p13 }
  0x19   : > { %p9736_p2 = pneg %p9735_p1 }
  0x1b   : > { %p9741_p4 = pnand %p9739_p3, %p9736_p2 }
  0x1d   : > { %9744 = shalt.err (!%p9741_p4)
}
  0x1e   : > { %s9745_s26 = scalar_lea.vmem %s292_s27, 9216  ;;  %p9753_p9 = scmp.lt.s32.totalorder %s292_s27, %s292_s27 }
  0x1f   : > { %p9746_p7 = scmp.ne.s32.totalorder %s292_s27, %s9745_s26  ;;  %p9754_p6 = scmp.lt.s32.totalorder %s9745_s26, %s9745_s26 }
  0x21   : > { %p9748_p8 = pnand %p9746_p7, %p9734_p0  ;;  %p9755_p5 = por %p9754_p6, %p9753_p9 }
  0x23   : > { %p9749_p11 = pneg %p9748_p8 }
  0x25   : > { %p9756_p10 = pnand %p9755_p5, %p9749_p11 }
  0x27   : > { %9759 = shalt.err (!%p9756_p10)
}
  0x28   : > { %s9829_s29 = smov 64   ;;  %s9830_s30 = smov 4  }
  0x29   : > { %9427 = dma.hbm_to_vmem [thread:$0]  (!%p9947_p12), %s13599_s4, 9216, %s292_s27, [#allocation4], %s9829_s29, %s9829_s29, %s9830_s30  }
  0x2a   : > { %p13676_p13 = scmp.ne.s32.totalorder %s13674_s25, 0 }
  0x2c   : > { %330 = sbr.rel (%p13676_p13) target bundleno = 1223 (0x4c7), region = 60 }
  0x33   : > { %p13677_p1 = scmp.eq.s32.totalorder %s9911_s17, 0 }
  0x35   : > { %9805 = dma.done.wait (%p13677_p1), [#allocation4], 9216   ;;  %p13678_p0 = pmov %p13677_p1 }
  0x36   : > { %v9473_v0 = vld [vmem:[%s13596_s1 + $0x40] sm:$0xff]   ;;  %p368_p5 = scmp.lt.s32.totalorder %s9911_s17, 1  ;;  %v9475_v2 = vld [vmem:[%s13596_s1 + $0x48] sm:$0xff]   ;;  %v9477_v4 = vld [vmem:[%s13596_s1 + $0x50] sm:$0xff]   ;;  %vm428_vm0 = vsmask.f32 3328 }
  0x37   : > { %9807 = vsyncadd (%p13678_p0), [#allocation4], 4294958080  ;;  %v9474_v1 = vld [vmem:[%s13596_s1] sm:$0xff]   ;;  %8289 = vmatprep.subr.bf16.mxu0 %v9473_v0  ;;  %9401 = vmatprep.subr.bf16.mxu1 %v9473_v0  ;;  %v9476_v3 = vld [vmem:[%s13596_s1 + $0x8] sm:$0xff]   ;;  %vm429_vm1 = vsmask.f32 7440 }
  0x38   : > { %8290 = vmatpush3.bf16.msra.mxu0 %v9474_v1  ;;  %9409 = vmatpush3.bf16.msra.mxu1 %v9474_v1  ;;  %s369_s18 = scalar_select %p368_p5, %s9911_s17, 1  ;;  %v9478_v5 = vld [vmem:[%s13596_s1 + $0x10] sm:$0xff]   ;;  %v9479_v6 = vld [vmem:[%s13596_s1 + $0x58] sm:$0xff]   ;;  %v9481_v8 = vld [vmem:[%s13596_s1 + $0x60] sm:$0xff]   ;;  %v13679_v38 = vmov 0  ;;  %vm863_vm3 = vcmask 1042432  }
  0x39   : > { %8291 = vmatprep.subr.bf16.mxu0 %v9475_v2  ;;  %9402 = vmatprep.subr.bf16.mxu1 %v9475_v2  ;;  %v9480_v7 = vld [vmem:[%s13596_s1 + $0x18] sm:$0xff]   ;;  %v9482_v9 = vld [vmem:[%s13596_s1 + $0x20] sm:$0xff]   ;;  %v9483_v10 = vld [vmem:[%s13596_s1 + $0x68] sm:$0xff]   ;;  %vm864_vm4 = vcmask 1046532   ;;  %vm2761_vm6 = vcmask 1040384   ;;  %vm3280_vm11 = vcmask 1043456  }
  0x3a   : > { %s9417_s25 = smul.u32 216, %s369_s18  ;;  %v9484_v19 = vld [vmem:[%s13596_s1 + $0x28] sm:$0xff]   ;;  %v9485_v20 = vld [vmem:[%s13596_s1 + $0x70] sm:$0xff]   ;;  %v9487_v37 = vld [vmem:[%s13596_s1 + $0x78] sm:$0xff]   ;;  %vm2762_vm7 = vsmask.f32 256 }
  0x3b   : > { %v9486_v32 = vld [vmem:[%s13596_s1 + $0x30] sm:$0xff]   ;;  %vm10053_vm2 = vmor %vm428_vm0, %vm429_vm1  ;;  %v9488_v50 = vld [vmem:[%s13596_s1 + $0x38] sm:$0xff]   ;;  %vm2812_vm9 = vsmask.f32 7938  ;;  %vm2958_vm12 = vsmask.f32 4368 }
  0x3c   : > { %8292 = vmatpush3.bf16.msra.mxu0 %v9476_v3  ;;  %9410 = vmatpush3.bf16.msra.mxu1 %v9476_v3  ;;  %s10005_s20 = scalar_lea.vmem %s13595_s0, %s9417_s25  ;;  %v13680_v38 = vsel %vm10053_vm2, 4294967295, %v13679_v38  ;;  %v9491_v56 = vld [vmem:[%s13596_s1 + $0xc0] sm:$0xff]   ;;  %vm10252_vm5 = vmor %vm863_vm3, %vm864_vm4  ;;  %s365_s26 = sand.u32 1, %s9818_s14  }
  0x3d   : > { %8293 = vmatprep.subr.bf16.mxu0 %v9477_v4  ;;  %9403 = vmatprep.subr.bf16.mxu1 %v9477_v4  ;;  %v10014_v11 = vld [vmem:[%s10005_s20] sm:$0xf]  ;;  %v10017_v12 = vld [vmem:[%s10005_s20 + $0x4] sm:$0xf]  ;;  %v10020_v13 = vld [vmem:[%s10005_s20 + $0x8] sm:$0x1] }
  0x3e   : > { %v432_v14 = vshrl.u32 %v10014_v11, 16  ;;  %v435_v15 = vshll.u32 %v10014_v11, 16  ;;  %v441_v16 = vshll.u32 %v10017_v12, 16  ;;  %v445_v17 = vshrl.u32 %v10017_v12, 16  ;;  %v10027_v18 = vld [vmem:[%s10005_s20 + $0x90] sm:$0xf]  ;;  %vm11100_vm8 = vmand %vm2761_vm6, %vm2762_vm7 }
  0x3f   : > { %v451_v21 = vshll.u32 %v10020_v13, 16  ;;  %v10037_v22 = vld [vmem:[%s10005_s20 + $0x94] sm:$0xf]  ;;  %v412_v27 = vld [vmem:[%s10005_s20 + $0x98] sm:$0x1]  ;;  %v7797_v29 = vrot.slane %v10014_v11, 9  ;;  %v7815_v61 = vcombine.low %v10014_v11, %v10017_v12  ;;  %vm11107_vm10 = vmand %vm2761_vm6, %vm2812_vm9 }
  0x40   : > { %8294 = vmatpush3.bf16.msra.mxu0 %v9478_v5  ;;  %9411 = vmatpush3.bf16.msra.mxu1 %v9478_v5  ;;  %v434_v23 = vrot.slane %v432_v14, 4  ;;  %v437_v24 = vrot.slane %v435_v15, 5  ;;  %v443_v25 = vrot.slane %v441_v16, 5  ;;  %v447_v26 = vrot.slane %v445_v17, 4  ;;  %13681 = vst [vmem:[#allocation9_spill] sm:$0xff] %v13680_v38  ;;  %v9492_v58 = vld [vmem:[%s13596_s1 + $0x140] sm:$0xff]   ;;  %vm11416_vm13 = vmand %vm3280_vm11, %vm2812_vm9 }
  0x41   : > { %8295 = vmatprep.subr.bf16.mxu0 %v9479_v6  ;;  %9404 = vmatprep.subr.bf16.mxu1 %v9479_v6  ;;  %v453_v28 = vrot.slane %v451_v21, 5  ;;  %v720_v30 = vshrl.u32 %v10027_v18, 16  ;;  %v723_v31 = vshll.u32 %v10027_v18, 16  ;;  %v729_v35 = vshll.u32 %v10037_v22, 16  ;;  %v10073_v59 = vld [vmem:[%s10005_s20 + $0xc] sm:$0xf]  ;;  %vm11423_vm14 = vmor %vm2762_vm7, %vm2958_vm12 }
  0x42   : > { %v438_v33 = vor.u32 %v437_v24, %v434_v23  ;;  %v448_v34 = vor.u32 %v447_v26, %v443_v25  ;;  %v733_v36 = vshrl.u32 %v10037_v22, 16  ;;  %v868_v39 = vrot.slane %v10017_v12, 5  ;;  %v10080_v62 = vld [vmem:[%s10005_s20 + $0x10] sm:$0xf]  ;;  %v10083_v63 = vld [vmem:[%s10005_s20 + $0x14] sm:$0x1] }
  0x43   : > { %v722_v40 = vrot.slane %v720_v30, 4  ;;  %v725_v41 = vrot.slane %v723_v31, 5  ;;  %v739_v42 = vshll.u32 %v412_v27, 16  ;;  %v731_v45 = vrot.slane %v729_v35, 5  ;;  %v9493_v3 = vld [vmem:[%s13596_s1 + $0x80] sm:$0xff]   ;;  %v9495_v24 = vld [vmem:[%s13596_s1 + $0xc8] sm:$0xff]  }
  0x44   : > { %8296 = vmatpush3.bf16.msra.mxu0 %v9480_v7  ;;  %9412 = vmatpush3.bf16.msra.mxu1 %v9480_v7  ;;  %v439_v43 = vrot.slane %v438_v33, 4  ;;  %v449_v44 = vrot.slane %v448_v34, 4  ;;  %v735_v46 = vrot.slane %v733_v36, 4  ;;  %v871_v47 = vrot.slane %v10020_v13, 5  ;;  %v9494_v4 = vld [vmem:[%s13596_s1 + $0x100] sm:$0xff]   ;;  %v9496_v27 = vld [vmem:[%s13596_s1 + $0x88] sm:$0xff]  }
  0x45   : > { %8297 = vmatprep.subr.bf16.mxu0 %v9481_v8  ;;  %9405 = vmatprep.subr.bf16.mxu1 %v9481_v8  ;;  %v726_v48 = vor.u32 %v725_v41, %v722_v40  ;;  %v741_v49 = vrot.slane %v739_v42, 5  ;;  %v456_v0 = vshrl.u32 %v10073_v59, 16  ;;  %v459_v1 = vshll.u32 %v10073_v59, 16  ;;  %v413_v8 = vld [vmem:[%s10005_s20 + $0x9c] sm:$0xf]  ;;  %v9499_v40 = vld [vmem:[%s13596_s1 + $0xd0] sm:$0xff]  }
  0x46   : > { %v444_v51 = vsel %vm10053_vm2, %v439_v43, %v443_v25  ;;  %v454_v52 = vsel %vm10053_vm2, %v449_v44, %v453_v28  ;;  %v736_v53 = vor.u32 %v735_v46, %v731_v45  ;;  %v465_v5 = vshll.u32 %v10080_v62, 16  ;;  %v414_v16 = vld [vmem:[%s10005_s20 + $0xa0] sm:$0xf]  ;;  %v415_v17 = vld [vmem:[%s10005_s20 + $0xa4] sm:$0x1]  ;;  %v9502_v41 = vld [vmem:[%s13596_s1 + $0x148] sm:$0xff]  }
  0x47   : > { %v7831_v54 = vcombine.low %v444_v51, %v454_v52  ;;  %v727_v55 = vrot.slane %v726_v48, 4  ;;  %v469_v6 = vshrl.u32 %v10080_v62, 16  ;;  %v475_v7 = vshll.u32 %v10083_v63, 16  ;;  %s7795_s30 = sshll.u32 %s365_s26, 8  ;;  %s8288_s11 = sshll.u32 %s9911_s17, 12 }
  0x48   : > { %8298 = vmatpush3.bf16.msra.mxu0 %v9482_v9  ;;  %9413 = vmatpush3.bf16.msra.mxu1 %v9482_v9  ;;  %v737_v57 = vrot.slane %v736_v53, 4  ;;  %v458_v14 = vrot.slane %v456_v0, 4  ;;  %v461_v15 = vrot.slane %v459_v1, 5  ;;  %v744_v23 = vshrl.u32 %v413_v8, 16  ;;  %v9501_v53 = vld [vmem:[%s13596_s1 + $0xd8] sm:$0xff]   ;;  %s13376_s12 = scalar_lea.vmem [#allocation6], %s7795_s30  ;;  %s13545_s27 = scalar_lea.hbm %s13605_s10, %s8288_s11 }
  0x49   : > { %8299 = vmatprep.subr.bf16.mxu0 %v9483_v10  ;;  %9406 = vmatprep.subr.bf16.mxu1 %v9483_v10  ;;  %v732_v60 = vsel %vm10053_vm2, %v727_v55, %v731_v45  ;;  %v10103_v10 = vcombine.low %v10027_v18, %v10037_v22  ;;  %v477_v21 = vrot.slane %v475_v7, 5  ;;  %v747_v18 = vshll.u32 %v413_v8, 16  ;;  %s7715_s18 = sshll.u32 %s13376_s12, 4  ;;  %s13554_s17 = scalar_lea.sflag [#allocation5], %s365_s26  ;;  %s13547_s18 = int_to_ptr.vmem [resolvable:$true] %s7715_s18 }
  0x4a   : > { %1870 = vmatprep.mubr.bf16.mxu0 %v7831_v54  ;;  %v742_v2 = vsel %vm10053_vm2, %v737_v57, %v741_v49  ;;  %v462_v25 = vor.u32 %v461_v15, %v458_v14  ;;  %v753_v22 = vshll.u32 %v414_v16, 16  ;;  %v757_v26 = vshrl.u32 %v414_v16, 16  ;;  %v9500_v49 = vld [vmem:[%s13596_s1 + $0x90] sm:$0xff]   ;;  %v9504_v54 = vld [vmem:[%s13596_s1 + $0x108] sm:$0xff]   ;;  %v10148_v57 = vld [vmem:[%s10005_s20 + $0x18] sm:$0xf] }
  0x4b   : > { %v10099_v9 = vcombine.low %v732_v60, %v742_v2  ;;  %v746_v30 = vrot.slane %v744_v23, 4  ;;  %v763_v31 = vshll.u32 %v415_v17, 16  ;;  %v749_v33 = vrot.slane %v747_v18, 5  ;;  %v10154_v60 = vld [vmem:[%s10005_s20 + $0x20] sm:$0x1]  ;;  %s9760_s25 = scalar_lea.vmem %s13547_s18, 4096 }
  0x4c   : > { %8300 = vmatpush3.bf16.msra.mxu0 %v9484_v19  ;;  %9414 = vmatpush3.bf16.msra.mxu1 %v9484_v19  ;;  %v467_v19 = vrot.slane %v465_v5, 5  ;;  %v755_v34 = vrot.slane %v753_v22, 5  ;;  %v759_v35 = vrot.slane %v757_v26, 4  ;;  %v10125_v45 = vrot.slane %v868_v39, 4  ;;  %v418_v15 = vld [vmem:[%s10005_s20 + $0xb0] sm:$0x1]  ;;  %p9761_p6 = scmp.ne.s32.totalorder %s13547_s18, %s9760_s25 }
  0x4d   : > { %8301 = vmatprep.subr.bf16.mxu0 %v9485_v20  ;;  %9407 = vmatprep.subr.bf16.mxu1 %v9485_v20  ;;  %13682 = vst [vmem:[#allocation10_spill] sm:$0xff] %v10099_v9  ;;  %v471_v20 = vrot.slane %v469_v6, 4  ;;  %v750_v43 = vor.u32 %v749_v33, %v746_v30  ;;  %v10131_v48 = vcombine.low %v10073_v59, %v10080_v62  ;;  %v7798_v55 = vrot.slane %v10073_v59, 9  ;;  %v9503_v6 = vld [vmem:[%s13596_s1 + $0x98] sm:$0xff]   ;;  %p13907_p9 = scmp.ne.s32.totalorder %s13672_s23, 0 }
  0x4e   : > { %1966 = vmatprep.mubr.bf16.mxu1 %v10099_v9  ;;  %v760_v44 = vor.u32 %v759_v35, %v755_v34  ;;  %v480_v1 = vshrl.u32 %v10148_v57, 16  ;;  %v483_v2 = vshll.u32 %v10148_v57, 16  ;;  %v499_v14 = vshll.u32 %v10154_v60, 16  ;;  %v10552_v9 = vld [vmem:[%s10005_s20 + $0x88] sm:$0xf] }
  0x4f   : > { %v472_v28 = vor.u32 %v471_v20, %v467_v19  ;;  %v751_v51 = vrot.slane %v750_v43, 4  ;;  %p9762_p10 = pnand %p9761_p6, %p13907_p9 }
  0x50   : > { %8302 = vmatpush3.bf16.msra.mxu0 %v9486_v32  ;;  %9415 = vmatpush3.bf16.msra.mxu1 %v9486_v32  ;;  %v463_v32 = vrot.slane %v462_v25, 4  ;;  %v761_v52 = vrot.slane %v760_v44, 4  ;;  %v485_v17 = vrot.slane %v483_v2, 5 }
  0x51   : > { %8303 = vmatprep.subr.bf16.mxu0 %v9487_v37  ;;  %9408 = vmatprep.subr.bf16.mxu1 %v9487_v37  ;;  %v473_v36 = vrot.slane %v472_v28, 4  ;;  %v765_v37 = vrot.slane %v763_v31, 5  ;;  %v9507_v28 = vld [vmem:[%s13596_s1 + $0xe0] sm:$0xff]   ;;  %p9763_p12 = pneg %p9762_p10 }
  0x52   : > { %v468_v42 = vsel %vm10053_vm2, %v463_v32, %v467_v19  ;;  %v787_v32 = vshll.u32 %v418_v15, 16  ;;  %v10223_v15 = vld [vmem:[%s10005_s20 + $0xb8] sm:$0xf] }
  0x53   : > { %v478_v46 = vsel %vm10053_vm2, %v473_v36, %v477_v21  ;;  %v766_v0 = vsel %vm10053_vm2, %v761_v52, %v765_v37  ;;  %v10198_v52 = vld [vmem:[%s10005_s20 + $0x28] sm:$0xf]  ;;  %v973_v38 = vrot.slane %v10223_v15, 5 }
  0x54   : > { %8304 = vmatpush3.bf16.msra.mxu0 %v9488_v50  ;;  %9416 = vmatpush3.bf16.msra.mxu1 %v9488_v50  ;;  %v10136_v50 = vcombine.low %v468_v42, %v478_v46  ;;  %v789_v37 = vrot.slane %v787_v32, 5  ;;  %v9509_v42 = vld [vmem:[%s13596_s1 + $0xe8] sm:$0xff]  }
  0x55   : > { %8401 = vmatprep.subr.bf16.mxu1 %v9491_v56  ;;  %8513 = vmatprep.subr.bf16.mxu0 %v9492_v58  ;;  %v10145_v56 = vcombine.low %v413_v8, %v414_v16  ;;  %v10151_v58 = vld [vmem:[%s10005_s20 + $0x1c] sm:$0xf]  ;;  %v482_v16 = vrot.slane %v480_v1, 4 }
  0x56   : > { %13683 = vst [vmem:[#allocation11_spill] sm:$0xff] %v10136_v50  ;;  %v489_v7 = vshll.u32 %v10151_v58, 16  ;;  %v493_v8 = vshrl.u32 %v10151_v58, 16 }
  0x57   : > { %1871 = vmatmul.mubr.bf16.vlgmr.msra.gmra.mrb[0].mxu0 %v7815_v61  ;;  %1967 = vmatmul.mubr.bf16.vlgmr.msra.gmra.mrb[0].mxu1 %v10103_v10  ;;  %v756_v61 = vsel %vm10053_vm2, %v751_v51, %v755_v34  ;;  %v486_v18 = vor.u32 %v485_v17, %v482_v16  ;;  %v10195_v51 = vld [vmem:[%s10005_s20 + $0x24] sm:$0xf]  ;;  %v9513_v16 = vld [vmem:[%s13596_s1 + $0xf0] sm:$0xff]  }
  0x58   : > { %8402 = vmatpush3.bf16.msra.mxu1 %v9493_v3  ;;  %8514 = vmatpush3.bf16.msra.mxu0 %v9494_v4  ;;  %v416_v3 = vld [vmem:[%s10005_s20 + $0xa8] sm:$0xf]  ;;  %v417_v4 = vld [vmem:[%s10005_s20 + $0xac] sm:$0xf]  ;;  %v10165_v5 = vcombine.low %v756_v61, %v766_v0  ;;  %v491_v21 = vrot.slane %v489_v7, 5  ;;  %v495_v23 = vrot.slane %v493_v8, 4 }
  0x59   : > { %8403 = vmatprep.subr.bf16.mxu1 %v9495_v24  ;;  %8515 = vmatprep.subr.bf16.mxu0 %v9502_v41  ;;  %v768_v19 = vshrl.u32 %v416_v3, 16  ;;  %v771_v20 = vshll.u32 %v416_v3, 16  ;;  %v501_v24 = vrot.slane %v499_v14, 5  ;;  %v777_v25 = vshll.u32 %v417_v4, 16  ;;  %v9508_v41 = vld [vmem:[%s13596_s1 + $0xa0] sm:$0xff]   ;;  %v9510_v61 = vld [vmem:[%s13596_s1 + $0xa8] sm:$0xff]  }
  0x5a   : > { %1878 = vmatprep.mubr.bf16.mxu0 %v10136_v50  ;;  %13684 = vst [vmem:[#allocation12_spill] sm:$0xff] %v10165_v5  ;;  %1974 = vmatprep.mubr.bf16.mxu1 %v10165_v5  ;;  %v496_v30 = vor.u32 %v495_v23, %v491_v21  ;;  %v487_v33 = vrot.slane %v486_v18, 4  ;;  %v10209_v0 = vld [vmem:[%s10005_s20 + $0x2c] sm:$0x1]  ;;  %v504_v1 = vshrl.u32 %v10195_v51, 16  ;;  %v507_v2 = vshll.u32 %v10195_v51, 16 }
  0x5b   : > { %v770_v22 = vrot.slane %v768_v19, 4  ;;  %v773_v26 = vrot.slane %v771_v20, 5  ;;  %v779_v31 = vrot.slane %v777_v25, 5  ;;  %v517_v8 = vshrl.u32 %v10198_v52, 16  ;;  %v10220_v14 = vld [vmem:[%s10005_s20 + $0xb4] sm:$0xf] }
  0x5c   : > { %8404 = vmatpush3.bf16.msra.mxu1 %v9496_v27  ;;  %8516 = vmatpush3.bf16.msra.mxu0 %v9504_v54  ;;  %v781_v27 = vshrl.u32 %v417_v4, 16  ;;  %v497_v36 = vrot.slane %v496_v30, 4  ;;  %v492_v43 = vsel %vm10053_vm2, %v487_v33, %v491_v21  ;;  %v506_v17 = vrot.slane %v504_v1, 4  ;;  %v421_v23 = vld [vmem:[%s10005_s20 + $0xbc] sm:$0x1] }
  0x5d   : > { %8405 = vmatprep.subr.bf16.mxu1 %v9499_v40  ;;  %v774_v34 = vor.u32 %v773_v26, %v770_v22  ;;  %v10182_v40 = vcombine.low %v10148_v57, %v10151_v58  ;;  %v509_v19 = vrot.slane %v507_v2, 5  ;;  %v523_v21 = vshll.u32 %v10209_v0, 16  ;;  %v9516_v26 = vld [vmem:[%s13596_s1 + $0x110] sm:$0xff]   ;;  %v9518_v2 = vld [vmem:[%s13596_s1 + $0xb8] sm:$0xff]  }
  0x5e   : > { %v783_v35 = vrot.slane %v781_v27, 4  ;;  %v502_v54 = vsel %vm10053_vm2, %v497_v36, %v501_v24  ;;  %v519_v25 = vrot.slane %v517_v8, 4  ;;  %v792_v18 = vshrl.u32 %v10220_v14, 16  ;;  %v9515_v36 = vld [vmem:[%s13596_s1 + $0xb0] sm:$0xff]  }
  0x5f   : > { %1879 = vmatmul.mubr.bf16.gmra.mrb[4].mxu0 %v10131_v48  ;;  %1975 = vmatmul.mubr.bf16.gmra.mrb[4].mxu1 %v10145_v56  ;;  %13685 = vst [vmem:[#allocation13_spill] sm:$0xff] %v10182_v40  ;;  %v775_v44 = vrot.slane %v774_v34, 4  ;;  %v795_v22 = vshll.u32 %v10220_v14, 16  ;;  %v525_v30 = vrot.slane %v523_v21, 5  ;;  %v10284_v21 = vld [vmem:[%s10005_s20 + $0x30] sm:$0xf]  ;;  %v10319_v12 = vcombine.low %v10220_v14, %v10223_v15 }
  0x60   : > { %8406 = vmatpush3.bf16.msra.mxu1 %v9500_v49  ;;  %v784_v46 = vor.u32 %v783_v35, %v779_v31  ;;  %v10192_v49 = vcombine.low %v416_v3, %v417_v4  ;;  %v513_v3 = vshll.u32 %v10198_v52, 16  ;;  %v10214_v4 = vcombine.low %v492_v43, %v502_v54  ;;  %v9517_v43 = vld [vmem:[%s13596_s1 + $0xf8] sm:$0xff]  }
  0x61   : > { %8407 = vmatprep.subr.bf16.mxu1 %v9501_v53  ;;  %v9514_v53 = vld [vmem:[%s13596_s1 + $0x150] sm:$0xff]   ;;  %v794_v33 = vrot.slane %v792_v18, 4  ;;  %v797_v34 = vrot.slane %v795_v22, 5  ;;  %v805_v35 = vshrl.u32 %v10223_v15, 16  ;;  %v10292_v18 = vld [vmem:[%s10005_s20 + $0x38] sm:$0x1] }
  0x62   : > { %13686 = vst [vmem:[#allocation14_spill] sm:$0xff] %v10214_v4  ;;  %v785_v7 = vrot.slane %v784_v46, 4  ;;  %8517 = vmatprep.subr.bf16.mxu0 %v9514_v53  ;;  %v515_v20 = vrot.slane %v513_v3, 5  ;;  %1886 = vmatprep.mubr.bf16.mxu0 %v10214_v4  ;;  %v9520_v3 = vld [vmem:[%s13596_s1 + $0x158] sm:$0xff]   ;;  %v528_v13 = vshrl.u32 %v10284_v21, 16 }
  0x63   : > { %8518 = vmatpush3.bf16.msra.mxu0 %v9516_v26  ;;  %v798_v53 = vor.u32 %v797_v34, %v794_v33  ;;  %v807_v54 = vrot.slane %v805_v35, 4  ;;  %v10329_v14 = vld [vmem:[%s10005_s20 + $0x3c] sm:$0xf] }
  0x64   : > { %8408 = vmatpush3.bf16.msra.mxu1 %v9503_v6  ;;  %v780_v6 = vsel %vm10053_vm2, %v775_v44, %v779_v31  ;;  %v790_v24 = vsel %vm10053_vm2, %v785_v7, %v789_v37  ;;  %v801_v31 = vshll.u32 %v10223_v15, 16  ;;  %v520_v32 = vor.u32 %v519_v25, %v515_v20  ;;  %8519 = vmatprep.subr.bf16.mxu0 %v9520_v3 }
  0x65   : > { %8409 = vmatprep.subr.bf16.mxu1 %v9507_v28  ;;  %v10238_v27 = vcombine.low %v780_v6, %v790_v24  ;;  %v510_v28 = vor.u32 %v509_v19, %v506_v17  ;;  %v799_v7 = vrot.slane %v798_v53, 4  ;;  %v9521_v17 = vld [vmem:[%s13596_s1 + $0x118] sm:$0xff]   ;;  %v10279_v19 = vsel %vm10252_vm5, %v10125_v45, %v871_v47  ;;  %v9524_v45 = vld [vmem:[%s13596_s1 + $0x160] sm:$0xff]  }
  0x66   : > { %v521_v46 = vrot.slane %v520_v32, 4  ;;  %v531_v47 = vshll.u32 %v10284_v21, 16  ;;  %v530_v11 = vrot.slane %v528_v13, 4  ;;  %v552_v53 = vshrl.u32 %v10329_v14, 16 }
  0x67   : > { %13687 = vst [vmem:[#allocation15_spill] sm:$0xff] %v10238_v27  ;;  %1887 = vmatmul.mubr.bf16.gmra.mrb[8].mxu0 %v10182_v40  ;;  %1982 = vmatprep.mubr.bf16.mxu1 %v10238_v27  ;;  %v511_v37 = vrot.slane %v510_v28, 4  ;;  %v547_v28 = vshll.u32 %v10292_v18, 16 }
  0x68   : > { %8410 = vmatpush3.bf16.msra.mxu1 %v9508_v41  ;;  %v803_v41 = vrot.slane %v801_v31, 5  ;;  %v526_v6 = vsel %vm10053_vm2, %v521_v46, %v525_v30  ;;  %8520 = vmatpush3.bf16.msra.mxu0 %v9521_v17  ;;  %v10309_v30 = vsel %vm10252_vm5, %v7797_v29, %v868_v39  ;;  %v9525_v31 = vld [vmem:[%s13596_s1 + $0x120] sm:$0xff]   ;;  %v533_v33 = vrot.slane %v531_v47, 5  ;;  %v10355_v17 = vld [vmem:[%s10005_s20 + $0x4c] sm:$0xf] }
  0x69   : > { %8411 = vmatprep.subr.bf16.mxu1 %v9509_v42  ;;  %v811_v42 = vshll.u32 %v421_v23, 16  ;;  %1983 = vmatmul.mubr.bf16.gmra.mrb[8].mxu1 %v10192_v49  ;;  %v10287_v23 = vld [vmem:[%s10005_s20 + $0x34] sm:$0xf]  ;;  %v549_v35 = vrot.slane %v547_v28, 5 }
  0x6a   : > { %v808_v8 = vor.u32 %v807_v54, %v803_v41  ;;  %v804_v24 = vsel %vm10053_vm2, %v799_v7, %v803_v41  ;;  %v537_v22 = vshll.u32 %v10287_v23, 16  ;;  %v541_v26 = vshrl.u32 %v10287_v23, 16  ;;  %8521 = vmatprep.subr.bf16.mxu0 %v9524_v45  ;;  %v10362_v45 = vld [vmem:[%s10005_s20 + $0x50] sm:$0x1] }
  0x6b   : > { %v813_v1 = vrot.slane %v811_v42, 5  ;;  %v7847_v41 = vcombine.low %v10309_v30, %v10279_v19  ;;  %v10332_v42 = vld [vmem:[%s10005_s20 + $0x40] sm:$0xf]  ;;  %v555_v54 = vshll.u32 %v10329_v14, 16  ;;  %v9531_v19 = vld [vmem:[%s13596_s1 + $0x170] sm:$0xff]   ;;  %v875_v30 = vrot.slane %v10080_v62, 5 }
  0x6c   : > { %8412 = vmatpush3.bf16.msra.mxu1 %v9510_v61  ;;  %v516_v61 = vsel %vm10053_vm2, %v511_v37, %v515_v20  ;;  %v809_v25 = vrot.slane %v808_v8, 4  ;;  %v539_v39 = vrot.slane %v537_v22, 5  ;;  %v543_v34 = vrot.slane %v541_v26, 4  ;;  %8522 = vmatpush3.bf16.msra.mxu0 %v9525_v31  ;;  %v9532_v31 = vld [vmem:[%s13596_s1 + $0x130] sm:$0xff]  }
  0x6d   : > { %8413 = vmatprep.subr.bf16.mxu1 %v9513_v16  ;;  %v10269_v16 = vcombine.low %v10195_v51, %v10198_v52  ;;  %v10281_v20 = vcombine.low %v516_v61, %v526_v6  ;;  %v534_v37 = vor.u32 %v533_v33, %v530_v11  ;;  %v561_v61 = vshll.u32 %v10332_v42, 16 }
  0x6e   : > { %v814_v32 = vsel %vm10053_vm2, %v809_v25, %v813_v1  ;;  %v544_v46 = vor.u32 %v543_v34, %v539_v39  ;;  %v10342_v1 = vld [vmem:[%s10005_s20 + $0x48] sm:$0xf]  ;;  %v10350_v6 = vcombine.low %v10284_v21, %v10287_v23  ;;  %v565_v7 = vshrl.u32 %v10332_v42, 16 }
  0x6f   : > { %13690 = vst [vmem:[#allocation16_spill] sm:$0xff] %v10269_v16  ;;  %13691 = vst [vmem:[#allocation17_spill] sm:$0xff] %v10281_v20  ;;  %1894 = vmatprep.mubr.bf16.mxu0 %v10281_v20  ;;  %v10321_v29 = vcombine.low %v804_v24, %v814_v32  ;;  %v535_v3 = vrot.slane %v534_v37, 4  ;;  %v554_v25 = vrot.slane %v552_v53, 4  ;;  %v557_v13 = vrot.slane %v555_v54, 5 }
  0x70   : > { %8414 = vmatpush3.bf16.msra.mxu1 %v9515_v36  ;;  %1895 = vmatmul.mubr.bf16.gmra.mrb[12].mxu0 %v10269_v16  ;;  %v9527_v36 = vld [vmem:[%s13596_s1 + $0x168] sm:$0xff]   ;;  %13693 = vst [vmem:[#allocation19_spill] sm:$0xff] %v10350_v6  ;;  %v545_v24 = vrot.slane %v544_v46, 4  ;;  %v563_v47 = vrot.slane %v561_v61, 5  ;;  %v567_v26 = vrot.slane %v565_v7, 4  ;;  %v878_v11 = vrot.slane %v10083_v63, 5 }
  0x71   : > { %8415 = vmatprep.subr.bf16.mxu1 %v9517_v43  ;;  %13692 = vst [vmem:[#allocation18_spill] sm:$0xff] %v10321_v29  ;;  %v10335_v43 = vld [vmem:[%s10005_s20 + $0x44] sm:$0x1]  ;;  %1990 = vmatprep.mubr.bf16.mxu1 %v10321_v29  ;;  %v540_v22 = vsel %vm10053_vm2, %v535_v3, %v539_v39  ;;  %v558_v32 = vor.u32 %v557_v13, %v554_v25  ;;  %v576_v33 = vshrl.u32 %v10342_v1, 16  ;;  %v579_v63 = vshll.u32 %v10342_v1, 16  ;;  %v9535_v7 = vld [vmem:[%s13596_s1 + $0x138] sm:$0xff]  }
  0x72   : > { %8523 = vmatprep.subr.bf16.mxu0 %v9527_v36  ;;  %1991 = vmatmul.mubr.bf16.gmra.mrb[12].mxu1 %v10319_v12  ;;  %v571_v8 = vshll.u32 %v10335_v43, 16  ;;  %v568_v34 = vor.u32 %v567_v26, %v563_v47  ;;  %v876_v62 = vsel %vm10252_vm5, %v7798_v55, %v875_v30  ;;  %v877_v36 = vrot.slane %v875_v30, 4  ;;  %v10386_v54 = vld [vmem:[%s10005_s20 + $0x54] sm:$0xf]  ;;  %v10394_v3 = vld [vmem:[%s10005_s20 + $0x58] sm:$0xf] }
  0x73   : > { %2031 = vmatprep.mubr.bf16.mxu1 %v10131_v48  ;;  %v550_v48 = vsel %vm10053_vm2, %v545_v24, %v549_v35  ;;  %v9534_v35 = vld [vmem:[%s13596_s1 + $0x178] sm:$0xff]   ;;  %v559_v37 = vrot.slane %v558_v32, 4  ;;  %v578_v46 = vrot.slane %v576_v33, 4  ;;  %v585_v53 = vshll.u32 %v10355_v17, 16 }
  0x74   : > { %8416 = vmatpush3.bf16.msra.mxu1 %v9518_v2  ;;  %v9528_v2 = vld [vmem:[%s13596_s1 + $0x128] sm:$0xff]   ;;  %v573_v28 = vrot.slane %v571_v8, 5  ;;  %v10374_v39 = vcombine.low %v540_v22, %v550_v48  ;;  %v569_v61 = vrot.slane %v568_v34, 4  ;;  %v879_v59 = vsel %vm10252_vm5, %v877_v36, %v878_v11  ;;  %v9537_v34 = vld [vmem:[%s13596_s1 + $0x1c0] sm:$0xff]  }
  0x75   : > { %8524 = vmatpush3.bf16.msra.mxu0 %v9528_v2  ;;  %v589_v55 = vshrl.u32 %v10355_v17, 16  ;;  %v595_v2 = vshll.u32 %v10362_v45, 16  ;;  %v564_v8 = vsel %vm10053_vm2, %v559_v37, %v563_v47  ;;  %v587_v24 = vrot.slane %v585_v53, 5  ;;  %8625 = vmatprep.subr.bf16.mxu1 %v9537_v34  ;;  %v9540_v34 = vld [vmem:[%s13596_s1 + $0x1c8] sm:$0xff]  }
  0x76   : > { %8525 = vmatprep.subr.bf16.mxu0 %v9531_v19  ;;  %13694 = vst [vmem:[#allocation20_spill] sm:$0xff] %v10374_v39  ;;  %1902 = vmatprep.mubr.bf16.mxu0 %v10374_v39  ;;  %v581_v19 = vrot.slane %v579_v63, 5  ;;  %v574_v25 = vsel %vm10053_vm2, %v569_v61, %v573_v28  ;;  %v10406_v13 = vcombine.low %v10329_v14, %v10332_v42  ;;  %v882_v48 = vrot.slane %v10151_v58, 5  ;;  %v10416_v28 = vld [vmem:[%s10005_s20 + $0x5c] sm:$0x1] }
  0x77   : > { %v10408_v22 = vcombine.low %v876_v62, %v879_v59  ;;  %v591_v26 = vrot.slane %v589_v55, 4  ;;  %v10410_v30 = vcombine.low %v564_v8, %v574_v25  ;;  %v600_v11 = vshrl.u32 %v10386_v54, 16  ;;  %v10431_v61 = vld [vmem:[%s10005_s20 + $0x60] sm:$0xf]  ;;  %v13717_v15 = vld [vmem:[#allocation19_spill] sm:$0xff] }
  0x78   : > { %1903 = vmatmul.mubr.bf16.gmra.mrb[16].mxu0 %v10350_v6  ;;  %13695 = vst [vmem:[#allocation21_spill] sm:$0xff] %v10406_v13  ;;  %v582_v47 = vor.u32 %v581_v19, %v578_v46  ;;  %v603_v33 = vshll.u32 %v10386_v54, 16  ;;  %v884_v58 = vrot.slane %v882_v48, 4  ;;  %v885_v36 = vrot.slane %v10154_v60, 5 }
  0x79   : > { %8526 = vmatpush3.bf16.msra.mxu0 %v9532_v31  ;;  %13696 = vst [vmem:[#allocation22_spill] sm:$0xff] %v10410_v30  ;;  %v597_v31 = vrot.slane %v595_v2, 5  ;;  %v592_v32 = vor.u32 %v591_v26, %v587_v24  ;;  %1910 = vmatprep.mubr.bf16.mxu0 %v10410_v30  ;;  %v602_v46 = vrot.slane %v600_v11, 4  ;;  %v613_v53 = vshrl.u32 %v10394_v3, 16  ;;  %v10437_v2 = vld [vmem:[%s10005_s20 + $0x64] sm:$0xf] }
  0x7a   : > { %8527 = vmatprep.subr.bf16.mxu0 %v9534_v35  ;;  %2032 = vmatmul.mubr.bf16.vlgmr.msra.gmra.mrb[16].mxu1 %v7847_v41  ;;  %v7799_v41 = vrot.slane %v10148_v57, 9  ;;  %v583_v62 = vrot.slane %v582_v47, 4  ;;  %v609_v57 = vshll.u32 %v10394_v3, 16  ;;  %v9538_v35 = vld [vmem:[%s13596_s1 + $0x180] sm:$0xff]   ;;  %v605_v63 = vrot.slane %v603_v33, 5 }
  0x7b   : > { %2039 = vmatprep.mubr.bf16.mxu1 %v10182_v40  ;;  %v593_v37 = vrot.slane %v592_v32, 4  ;;  %v619_v60 = vshll.u32 %v10416_v28, 16  ;;  %8626 = vmatpush3.bf16.msra.mxu1 %v9538_v35  ;;  %v615_v25 = vrot.slane %v613_v53, 4  ;;  %v10446_v26 = vld [vmem:[%s13596_s1 + $0x200] sm:$0xff]   ;;  %v886_v47 = vsel %vm10252_vm5, %v884_v58, %v885_v36 }
  0x7c   : > { %v588_v59 = vsel %vm10053_vm2, %v583_v62, %v587_v24  ;;  %v611_v55 = vrot.slane %v609_v57, 5  ;;  %v883_v8 = vsel %vm10252_vm5, %v7799_v41, %v882_v48  ;;  %v606_v19 = vor.u32 %v605_v63, %v602_v46  ;;  %v10464_v62 = vld [vmem:[%s10005_s20 + $0x68] sm:$0x1]  ;;  %8627 = vmatprep.subr.bf16.mxu1 %v9540_v34 }
  0x7d   : > { %8528 = vmatpush3.bf16.msra.mxu0 %v9535_v7  ;;  %v598_v7 = vsel %vm10053_vm2, %v593_v37, %v597_v31  ;;  %v621_v32 = vrot.slane %v619_v60, 5  ;;  %v7800_v31 = vrot.slane %v10195_v51, 9  ;;  %v889_v11 = vrot.slane %v10198_v52, 5 }
  0x7e   : > { %v10449_v24 = vcombine.low %v588_v59, %v598_v7  ;;  %v607_v48 = vrot.slane %v606_v19, 4  ;;  %v616_v41 = vor.u32 %v615_v25, %v611_v55  ;;  %v892_v33 = vrot.slane %v10209_v0, 5  ;;  %9257 = vmatprep.subr.bf16.mxu0 %v10446_v26  ;;  %v10482_v25 = vld [vmem:[%s10005_s20 + $0x6c] sm:$0xf] }
  0x7f   : > { %v624_v51 = vshrl.u32 %v10431_v61, 16  ;;  %v627_v58 = vshll.u32 %v10431_v61, 16  ;;  %v633_v52 = vshll.u32 %v10437_v2, 16  ;;  %v637_v0 = vshrl.u32 %v10437_v2, 16 }
  0x80   : > { %1911 = vmatmul.mubr.bf16.gmra.mrb[20].mxu0 %v10406_v13  ;;  %13697 = vst [vmem:[#allocation23_spill] sm:$0xff] %v10449_v24  ;;  %v10472_v36 = vcombine.low %v10342_v1, %v10355_v17  ;;  %v612_v57 = vsel %vm10053_vm2, %v607_v48, %v611_v55  ;;  %v617_v35 = vrot.slane %v616_v41, 4  ;;  %v891_v37 = vrot.slane %v889_v11, 4  ;;  %v9541_v55 = vld [vmem:[%s13596_s1 + $0x188] sm:$0xff]  }
  0x81   : > { %1918 = vmatprep.mubr.bf16.mxu0 %v10449_v24  ;;  %v626_v46 = vrot.slane %v624_v51, 4  ;;  %v629_v63 = vrot.slane %v627_v58, 5  ;;  %v635_v53 = vrot.slane %v633_v52, 5  ;;  %v639_v59 = vrot.slane %v637_v0, 4  ;;  %v10499_v0 = vld [vmem:[%s10005_s20 + $0x74] sm:$0x1]  ;;  %8628 = vmatpush3.bf16.msra.mxu1 %v9541_v55 }
  0x82   : > { %2040 = vmatmul.mubr.bf16.gmra.mrb[20].mxu1 %v10408_v22  ;;  %v10476_v60 = vcombine.low %v883_v8, %v886_v47  ;;  %v622_v7 = vsel %vm10053_vm2, %v617_v35, %v621_v32  ;;  %v643_v19 = vshll.u32 %v10464_v62, 16  ;;  %v890_v41 = vsel %vm10252_vm5, %v7800_v31, %v889_v11  ;;  %v10492_v8 = vld [vmem:[%s10005_s20 + $0x70] sm:$0xf]  ;;  %v10518_v55 = vld [vmem:[%s10005_s20 + $0x7c] sm:$0xf] }
  0x83   : > { %2047 = vmatprep.mubr.bf16.mxu1 %v10269_v16  ;;  %v10487_v48 = vcombine.low %v612_v57, %v622_v7  ;;  %v630_v34 = vor.u32 %v629_v63, %v626_v46  ;;  %v640_v51 = vor.u32 %v639_v59, %v635_v53  ;;  %v893_v47 = vsel %vm10252_vm5, %v891_v37, %v892_v33  ;;  %v10510_v46 = vld [vmem:[%s10005_s20 + $0x78] sm:$0xf] }
  0x84   : > { %v645_v32 = vrot.slane %v643_v19, 5  ;;  %v7801_v58 = vrot.slane %v10284_v21, 9  ;;  %v896_v52 = vrot.slane %v10287_v23, 5  ;;  %v648_v11 = vshrl.u32 %v10482_v25, 16 }
  0x85   : > { %13698 = vst [vmem:[#allocation24_spill] sm:$0xff] %v10487_v48  ;;  %v631_v57 = vrot.slane %v630_v34, 4  ;;  %v641_v31 = vrot.slane %v640_v51, 4  ;;  %v651_v35 = vshll.u32 %v10482_v25, 16  ;;  %v899_v21 = vrot.slane %v10292_v18, 5 }
  0x86   : > { %v898_v33 = vrot.slane %v896_v52, 4  ;;  %v657_v23 = vshll.u32 %v10492_v8, 16  ;;  %v661_v37 = vshrl.u32 %v10492_v8, 16  ;;  %v650_v7 = vrot.slane %v648_v11, 4  ;;  %v10533_v11 = vld [vmem:[%s10005_s20 + $0x80] sm:$0x1] }
  0x87   : > { %v636_v63 = vsel %vm10053_vm2, %v631_v57, %v635_v53  ;;  %v646_v59 = vsel %vm10053_vm2, %v641_v31, %v645_v32  ;;  %v653_v19 = vrot.slane %v651_v35, 5  ;;  %v10522_v51 = vcombine.low %v10386_v54, %v10394_v3  ;;  %v9543_v53 = vld [vmem:[%s13596_s1 + $0x1d0] sm:$0xff]  }
  0x88   : > { %1919 = vmatmul.mubr.bf16.gmra.mrb[24].mxu0 %v10472_v36  ;;  %v659_v18 = vrot.slane %v657_v23, 5  ;;  %v663_v34 = vrot.slane %v661_v37, 4  ;;  %v667_v27 = vshll.u32 %v10499_v0, 16  ;;  %v10528_v57 = vcombine.low %v890_v41, %v893_v47  ;;  %v9544_v35 = vld [vmem:[%s13596_s1 + $0x190] sm:$0xff]   ;;  %8629 = vmatprep.subr.bf16.mxu1 %v9543_v53 }
  0x89   : > { %1926 = vmatprep.mubr.bf16.mxu0 %v10487_v48  ;;  %v654_v29 = vor.u32 %v653_v19, %v650_v7  ;;  %v10530_v32 = vcombine.low %v636_v63, %v646_v59  ;;  %v672_v7 = vshrl.u32 %v10510_v46, 16  ;;  %v675_v19 = vshll.u32 %v10510_v46, 16  ;;  %8630 = vmatpush3.bf16.msra.mxu1 %v9544_v35 }
  0x8a   : > { %2048 = vmatmul.mubr.bf16.gmra.mrb[24].mxu1 %v10476_v60  ;;  %v664_v31 = vor.u32 %v663_v34, %v659_v18  ;;  %v669_v37 = vrot.slane %v667_v27, 5  ;;  %v897_v41 = vsel %vm10252_vm5, %v7801_v58, %v896_v52  ;;  %v903_v63 = vrot.slane %v10332_v42, 5  ;;  %v10545_v34 = vld [vmem:[%s10005_s20 + $0x84] sm:$0xf]  ;;  %v9546_v42 = vld [vmem:[%s13596_s1 + $0x1d8] sm:$0xff]  }
  0x8b   : > { %2055 = vmatprep.mubr.bf16.mxu1 %v10350_v6  ;;  %13699 = vst [vmem:[#allocation25_spill] sm:$0xff] %v10530_v32  ;;  %v655_v23 = vrot.slane %v654_v29, 4  ;;  %v681_v59 = vshll.u32 %v10518_v55, 16  ;;  %v900_v27 = vsel %vm10252_vm5, %v898_v33, %v899_v21  ;;  %v674_v29 = vrot.slane %v672_v7, 4  ;;  %8631 = vmatprep.subr.bf16.mxu1 %v9546_v42  ;;  %v9547_v7 = vld [vmem:[%s13596_s1 + $0x198] sm:$0xff]  }
  0x8c   : > { %v665_v47 = vrot.slane %v664_v31, 4  ;;  %v677_v5 = vrot.slane %v675_v19, 5  ;;  %v685_v53 = vshrl.u32 %v10518_v55, 16  ;;  %v691_v52 = vshll.u32 %v10533_v11, 16 }
  0x8d   : > { %v683_v58 = vrot.slane %v681_v59, 5  ;;  %v660_v33 = vsel %vm10053_vm2, %v655_v23, %v659_v18  ;;  %v10570_v19 = vcombine.low %v10431_v61, %v10437_v2  ;;  %v10572_v59 = vcombine.low %v897_v41, %v900_v27  ;;  %8632 = vmatpush3.bf16.msra.mxu1 %v9547_v7 }
  0x8e   : > { %v670_v21 = vsel %vm10053_vm2, %v665_v47, %v669_v37  ;;  %v678_v31 = vor.u32 %v677_v5, %v674_v29  ;;  %v687_v35 = vrot.slane %v685_v53, 4  ;;  %v906_v18 = vrot.slane %v10335_v43, 5  ;;  %v9548_v5 = vld [vmem:[%s13596_s1 + $0x1e0] sm:$0xff]  }
  0x8f   : > { %13700 = vst [vmem:[#allocation26_spill] sm:$0xff] %v10570_v19  ;;  %v905_v23 = vrot.slane %v903_v63, 4  ;;  %v693_v47 = vrot.slane %v691_v52, 5  ;;  %v696_v29 = vshrl.u32 %v10545_v34, 16  ;;  %v10580_v53 = vcombine.low %v660_v33, %v670_v21  ;;  %8633 = vmatprep.subr.bf16.mxu1 %v9548_v5  ;;  %v9550_v43 = vld [vmem:[%s13596_s1 + $0x1a0] sm:$0xff]   ;;  %v9551_v52 = vld [vmem:[%s13596_s1 + $0x1e8] sm:$0xff]  }
  0x90   : > { %1927 = vmatmul.mubr.bf16.gmra.mrb[28].mxu0 %v10522_v51  ;;  %v688_v37 = vor.u32 %v687_v35, %v683_v58  ;;  %v679_v42 = vrot.slane %v678_v31, 4  ;;  %v699_v41 = vshll.u32 %v10545_v34, 16  ;;  %v709_v35 = vshrl.u32 %v10552_v9, 16  ;;  %v10592_v33 = vld [vmem:[%s10005_s20 + $0x8c] sm:$0x1] }
  0x91   : > { %1934 = vmatprep.mubr.bf16.mxu0 %v10530_v32  ;;  %13701 = vst [vmem:[#allocation27_spill] sm:$0xff] %v10580_v53  ;;  %v698_v6 = vrot.slane %v696_v29, 4  ;;  %8634 = vmatpush3.bf16.msra.mxu1 %v9550_v43  ;;  %v9552_v5 = vld [vmem:[%s13596_s1 + $0x1a8] sm:$0xff]   ;;  %v907_v29 = vsel %vm10252_vm5, %v905_v23, %v906_v18  ;;  %v9554_v43 = vld [vmem:[%s13596_s1 + $0x1f0] sm:$0xff]   ;;  %v7803_v23 = vrot.slane %v10342_v1, 9 }
  0x92   : > { %2056 = vmatmul.mubr.bf16.gmra.mrb[28].mxu1 %v10528_v57  ;;  %v689_v27 = vrot.slane %v688_v37, 4  ;;  %v701_v21 = vrot.slane %v699_v41, 5  ;;  %v711_v7 = vrot.slane %v709_v35, 4  ;;  %v684_v41 = vsel %vm10053_vm2, %v679_v42, %v683_v58  ;;  %8635 = vmatprep.subr.bf16.mxu1 %v9551_v52 }
  0x93   : > { %2063 = vmatprep.mubr.bf16.mxu1 %v10406_v13  ;;  %v7802_v13 = vrot.slane %v10329_v14, 9  ;;  %v705_v14 = vshll.u32 %v10552_v9, 16 }
  0x94   : > { %v694_v35 = vsel %vm10053_vm2, %v689_v27, %v693_v47  ;;  %v702_v16 = vor.u32 %v701_v21, %v698_v6  ;;  %v913_v6 = vrot.slane %v10362_v45, 5  ;;  %v9556_v21 = vld [vmem:[%s13596_s1 + $0x1f8] sm:$0xff]  }
  0x95   : > { %v707_v31 = vrot.slane %v705_v14, 5  ;;  %v904_v37 = vsel %vm10252_vm5, %v7802_v13, %v903_v63  ;;  %v910_v14 = vrot.slane %v10355_v17, 5  ;;  %v715_v13 = vshll.u32 %v10592_v33, 16  ;;  %8636 = vmatpush3.bf16.msra.mxu1 %v9552_v5  ;;  %v9555_v17 = vld [vmem:[%s13596_s1 + $0x1b0] sm:$0xff]  }
  0x96   : > { %v10616_v63 = vcombine.low %v10482_v25, %v10492_v8  ;;  %v10621_v58 = vcombine.low %v904_v37, %v907_v29  ;;  %v10623_v18 = vcombine.low %v684_v41, %v694_v35  ;;  %8637 = vmatprep.subr.bf16.mxu1 %v9554_v43  ;;  %v703_v42 = vrot.slane %v702_v16, 4 }
  0x97   : > { %v712_v40 = vor.u32 %v711_v7, %v707_v31  ;;  %v912_v47 = vrot.slane %v910_v14, 4  ;;  %v717_v52 = vrot.slane %v715_v13, 5  ;;  %v9557_v7 = vld [vmem:[%s13596_s1 + $0x1b8] sm:$0xff]   ;;  %v911_v16 = vsel %vm10252_vm5, %v7803_v23, %v910_v14 }
  0x98   : > { %1935 = vmatmul.mubr.bf16.gmra.mrb[32].mxu0 %v10570_v19  ;;  %13702 = vst [vmem:[#allocation28_spill] sm:$0xff] %v10623_v18  ;;  %v708_v45 = vsel %vm10053_vm2, %v703_v42, %v707_v31  ;;  %v10648_v37 = vcombine.low %v10510_v46, %v10518_v55  ;;  %v7804_v29 = vrot.slane %v10386_v54, 9  ;;  %v920_v43 = vrot.slane %v10416_v28, 5 }
  0x99   : > { %1942 = vmatprep.mubr.bf16.mxu0 %v10580_v53  ;;  %v713_v27 = vrot.slane %v712_v40, 4  ;;  %8638 = vmatpush3.bf16.msra.mxu1 %v9555_v17  ;;  %v917_v40 = vrot.slane %v10394_v3, 5  ;;  %v914_v1 = vsel %vm10252_vm5, %v912_v47, %v913_v6  ;;  %v924_v31 = vrot.slane %v10437_v2, 5  ;;  %v10673_v47 = vld [vmem:[%s10005_s20 + $0x94] sm:$0xf] }
  0x9a   : > { %2064 = vmatmul.mubr.bf16.gmra.mrb[32].mxu1 %v10572_v59  ;;  %8639 = vmatprep.subr.bf16.mxu1 %v9556_v21  ;;  %v10651_v3 = vcombine.low %v911_v16, %v914_v1  ;;  %v931_v35 = vrot.slane %v10492_v8, 5  ;;  %v7805_v13 = vrot.slane %v10431_v61, 9  ;;  %v927_v17 = vrot.slane %v10464_v62, 5  ;;  %v10695_v1 = vld [vmem:[%s10005_s20 + $0x90] sm:$0xf] }
  0x9b   : > { %2071 = vmatprep.mubr.bf16.mxu1 %v10472_v36  ;;  %v718_v5 = vsel %vm10053_vm2, %v713_v27, %v717_v52  ;;  %v919_v14 = vrot.slane %v917_v40, 4  ;;  %v13623_v54 = vrot.slane %v10518_v55, 5  ;;  %v918_v28 = vsel %vm10252_vm5, %v7804_v29, %v917_v40  ;;  %v10689_v40 = vld [vmem:[%s10005_s20 + $0xa0] sm:$0xf] }
  0x9c   : > { %v10653_v41 = vcombine.low %v708_v45, %v718_v5  ;;  %v7806_v8 = vrot.slane %v10482_v25, 9  ;;  %v13621_v61 = vrot.slane %v10552_v9, 5  ;;  %v926_v62 = vrot.slane %v924_v31, 4  ;;  %v10699_v5 = vld [vmem:[%s10005_s20 + $0x98] sm:$0x1] }
  0x9d   : > { %8640 = vmatpush3.bf16.msra.mxu1 %v9557_v7  ;;  %v921_v2 = vsel %vm10252_vm5, %v919_v14, %v920_v43  ;;  %v933_v23 = vrot.slane %v931_v35, 4  ;;  %v934_v6 = vrot.slane %v10499_v0, 5  ;;  %v13622_v42 = vrot.slane %v10673_v47, 5  ;;  %v10703_v14 = vld [vmem:[%s10005_s20 + $0x9c] sm:$0xf] }
  0x9e   : > { %13703 = vst [vmem:[#allocation29_spill] sm:$0xff] %v10653_v41  ;;  %v7807_v27 = vrot.slane %v10510_v46, 9  ;;  %v941_v52 = vrot.slane %v10533_v11, 5  ;;  %v10682_v7 = vcombine.low %v10545_v34, %v10552_v9  ;;  %v10684_v0 = vcombine.low %v918_v28, %v921_v2  ;;  %v10711_v2 = vld [vmem:[%s10005_s20 + $0xa4] sm:$0x1] }
  0x9f   : > { %v940_v16 = vrot.slane %v13623_v54, 4  ;;  %v13624_v46 = vrot.slane %v10689_v40, 5  ;;  %v947_v11 = vrot.slane %v13621_v61, 4  ;;  %v10708_v28 = vrot.slane %v13622_v42, 4  ;;  %v10715_v25 = vld [vmem:[%s10005_s20 + $0xa8] sm:$0xf] }
  0xa0   : > { %1943 = vmatmul.mubr.bf16.gmra.mrb[36].mxu0 %v10616_v63  ;;  %v10719_v61 = vld [vmem:[%s10005_s20 + $0xac] sm:$0xf]  ;;  %v10728_v42 = vld [vmem:[%s10005_s20 + $0xb0] sm:$0x1]  ;;  %v925_v45 = vsel %vm10252_vm5, %v7805_v13, %v924_v31  ;;  %v928_v21 = vsel %vm10252_vm5, %v926_v62, %v927_v17  ;;  %v932_v13 = vsel %vm10252_vm5, %v7806_v8, %v931_v35  ;;  %v935_v17 = vsel %vm10252_vm5, %v933_v23, %v934_v6 }
  0xa1   : > { %1950 = vmatprep.mubr.bf16.mxu0 %v10623_v18  ;;  %v966_v29 = vrot.slane %v10719_v61, 5  ;;  %v10725_v43 = vrot.slane %v13624_v46, 4  ;;  %v969_v54 = vrot.slane %v10728_v42, 5  ;;  %v9545_v31 = vld [vmem:[%s13596_s1 + $0x210] sm:$0xff]   ;;  %v10760_v62 = vcombine.low %v932_v13, %v935_v17  ;;  %v9561_v17 = vld [vmem:[%s13596_s1 + $0x238] sm:$0xff]  }
  0xa2   : > { %2072 = vmatmul.mubr.bf16.gmra.mrb[36].mxu1 %v10621_v58  ;;  %v13704_v35 = vrot.slane %v10518_v55, 5  ;;  %v942_v23 = vsel %vm10252_vm5, %v940_v16, %v941_v52  ;;  %v9560_v55 = vld [vmem:[%s13596_s1 + $0x230] sm:$0xff]   ;;  %v13706_v52 = vrot.slane %v10545_v34, 9  ;;  %v13709_v34 = vrot.slane %v10695_v1, 9 }
  0xa3   : > { %2079 = vmatprep.mubr.bf16.mxu1 %v10522_v51  ;;  %v10740_v46 = vrot.slane %v966_v29, 4  ;;  %v13712_v1 = vrot.slane %v10703_v14, 9  ;;  %v975_v61 = vrot.slane %v973_v38, 4 }
  0xa4   : > { %v939_v8 = vsel %vm10252_vm5, %v7807_v27, %v13704_v35  ;;  %v13705_v27 = vrot.slane %v10552_v9, 5  ;;  %v13708_v9 = vrot.slane %v10673_v47, 5  ;;  %v13711_v47 = vrot.slane %v10689_v40, 5 }
  0xa5   : > { %v10778_v6 = vcombine.low %v939_v8, %v942_v23  ;;  %v13714_v40 = vrot.slane %v10715_v25, 9  ;;  %v423_v23 = vld [vmem:[%s10005_s20 + $0xc4] sm:$0xf]  ;;  %v9701_v25 = vld [vmem:[%s10005_s20 + $0xbc] sm:$0x1] }
  0xa6   : > { %v946_v16 = vsel %vm10252_vm5, %v13706_v52, %v13705_v27  ;;  %v9700_v27 = vld [vmem:[%s10005_s20 + $0xb4] sm:$0xf] }
  0xa7   : > { %v967_v14 = vsel %vm10252_vm5, %v13714_v40, %v966_v29  ;;  %v7812_v52 = vrot.slane %v9700_v27, 9  ;;  %v13715_v29 = vld [vmem:[#allocation13_spill] sm:$0xff]  ;;  %v13721_v27 = vld [vmem:[#allocation15_spill] sm:$0xff] }
  0xa8   : > { %1951 = vmatmul.mubr.bf16.gmra.mrb[40].mxu0 %v10648_v37 }
  0xa9   : > { %1958 = vmatprep.mubr.bf16.mxu0 %v10653_v41 }
  0xaa   : > { %2080 = vmatmul.mubr.bf16.gmra.mrb[40].mxu1 %v10651_v3 }
  0xab   : > { %2087 = vmatprep.mubr.bf16.mxu1 %v10570_v19  ;;  %v10743_v19 = vcombine.low %v925_v45, %v928_v21  ;;  %v9549_v21 = vld [vmem:[%s13596_s1 + $0x218] sm:$0xff]   ;;  %v9559_v45 = vld [vmem:[%s13596_s1 + $0x228] sm:$0xff]  }
  0xb0   : > { %1959 = vmatmul.mubr.bf16.gmra.mrb[44].mxu0 %v10682_v7 }
  0xb1   : > { %2192 = vmatprep.mubr.bf16.mxu0 %v10408_v22  ;;  %v9542_v22 = vld [vmem:[%s13596_s1 + $0x208] sm:$0xff]  }
  0xb2   : > { %2088 = vmatmul.mubr.bf16.gmra.mrb[44].mxu1 %v10684_v0 }
  0xb3   : > { %2095 = vmatprep.mubr.bf16.mxu1 %v10616_v63 }
  0xb8   : > { %2193 = vmatmul.mubr.bf16.vlgmr.msra.gmra.mrb[48].mxu0 %v10136_v50 }
  0xb9   : > { %9258 = vmatpush3.bf16.msra.mxu0 %v10446_v26  ;;  %2200 = vmatprep.mubr.bf16.mxu0 %v10476_v60  ;;  %v9558_v26 = vld [vmem:[%s13596_s1 + $0x220] sm:$0xff]  }
  0xba   : > { %2096 = vmatmul.mubr.bf16.gmra.mrb[48].mxu1 %v10743_v19  ;;  %9259 = vmatprep.subr.bf16.mxu0 %v9542_v22 }
  0xbb   : > { %2103 = vmatprep.mubr.bf16.mxu1 %v10648_v37 }
  0xbd   : > { %9260 = vmatpush3.bf16.msra.mxu0 %v9542_v22  ;;  %v13707_v22 = vrot.slane %v10592_v33, 5  ;;  %v953_v33 = vsel %vm10252_vm5, %v13709_v34, %v13708_v9 }
  0xbe   : > { %9261 = vmatprep.subr.bf16.mxu0 %v9545_v31 }
  0xc0   : > { %2201 = vmatmul.mubr.bf16.gmra.mrb[52].mxu0 %v10214_v4 }
  0xc1   : > { %2208 = vmatprep.mubr.bf16.mxu0 %v10528_v57  ;;  %9262 = vmatpush3.bf16.msra.mxu0 %v9545_v31  ;;  %v949_v31 = vsel %vm10252_vm5, %v947_v11, %v13707_v22  ;;  %v13710_v11 = vrot.slane %v10699_v5, 5  ;;  %v960_v5 = vsel %vm10252_vm5, %v13712_v1, %v13711_v47  ;;  %v13718_v22 = vld [vmem:[#allocation10_spill] sm:$0xff]  ;;  %v424_v47 = vld [vmem:[%s10005_s20 + $0xc8] sm:$0x1] }
  0xc2   : > { %2104 = vmatmul.mubr.bf16.gmra.mrb[52].mxu1 %v10760_v62  ;;  %9263 = vmatprep.subr.bf16.mxu0 %v9549_v21  ;;  %v10800_v13 = vcombine.low %v946_v16, %v949_v31  ;;  %v976_v16 = vrot.slane %v9701_v25, 5  ;;  %v13719_v31 = vld [vmem:[#allocation21_spill] sm:$0xff] }
  0xc3   : > { %2111 = vmatprep.mubr.bf16.mxu1 %v10682_v7 }
  0xc4   : > { %v977_v42 = vsel %vm10252_vm5, %v975_v61, %v976_v16  ;;  %v998_v61 = vshll.u32 %v424_v47, 16 }
  0xc5   : > { %9264 = vmatpush3.bf16.msra.mxu0 %v9549_v21  ;;  %v956_v21 = vsel %vm10252_vm5, %v10708_v28, %v13710_v11  ;;  %v13713_v28 = vrot.slane %v10711_v2, 5  ;;  %v422_v2 = vld [vmem:[%s10005_s20 + $0xc0] sm:$0xf]  ;;  %v988_v11 = vshll.u32 %v423_v23, 16 }
  0xc6   : > { %9265 = vmatprep.subr.bf16.mxu0 %v9558_v26  ;;  %v979_v9 = vshrl.u32 %v422_v2, 16  ;;  %v982_v34 = vshll.u32 %v422_v2, 16  ;;  %v7813_v40 = vrot.slane %v422_v2, 9 }
  0xc7   : > { %v963_v35 = vsel %vm10252_vm5, %v10725_v43, %v13713_v28  ;;  %v970_v43 = vsel %vm10252_vm5, %v10740_v46, %v969_v54  ;;  %v974_v54 = vsel %vm10252_vm5, %v7812_v52, %v973_v38  ;;  %v13716_v38 = vld [vmem:[#allocation16_spill] sm:$0xff]  ;;  %v990_v28 = vrot.slane %v988_v11, 5 }
  0xc8   : > { %2209 = vmatmul.mubr.bf16.gmra.mrb[56].mxu0 %v10281_v20  ;;  %v10837_v8 = vcombine.low %v960_v5, %v963_v35  ;;  %v10874_v46 = vcombine.low %v974_v54, %v977_v42  ;;  %v981_v1 = vrot.slane %v979_v9, 4  ;;  %v984_v5 = vrot.slane %v982_v34, 5 }
  0xc9   : > { %2216 = vmatprep.mubr.bf16.mxu0 %v10572_v59  ;;  %9266 = vmatpush3.bf16.msra.mxu0 %v9558_v26  ;;  %v10820_v26 = vcombine.low %v953_v33, %v956_v21  ;;  %v992_v33 = vshrl.u32 %v423_v23, 16  ;;  %v1007_v21 = vrot.slane %v423_v23, 5 }
  0xca   : > { %2112 = vmatmul.mubr.bf16.gmra.mrb[56].mxu1 %v10778_v6  ;;  %9267 = vmatprep.subr.bf16.mxu0 %v9559_v45 }
  0xcb   : > { %2119 = vmatprep.mubr.bf16.mxu1 %v10103_v10  ;;  %v994_v35 = vrot.slane %v992_v33, 4 }
  0xcd   : > { %9268 = vmatpush3.bf16.msra.mxu0 %v9559_v45  ;;  %v10856_v45 = vcombine.low %v967_v14, %v970_v43  ;;  %v1009_v14 = vrot.slane %v1007_v21, 4  ;;  %v1010_v43 = vrot.slane %v424_v47, 5  ;;  %v995_v52 = vor.u32 %v994_v35, %v990_v28  ;;  %v13722_v47 = vld [vmem:[#allocation18_spill] sm:$0xff] }
  0xce   : > { %9269 = vmatprep.subr.bf16.mxu0 %v9560_v55  ;;  %v13723_v35 = vld [vmem:[#allocation26_spill] sm:$0xff] }
  0xcf   : > { %v1011_v25 = vsel %vm10252_vm5, %v1009_v14, %v1010_v43 }
  0xd0   : > { %2217 = vmatmul.mubr.bf16.gmra.mrb[60].mxu0 %v10374_v39 }
  0xd1   : > { %2224 = vmatprep.mubr.bf16.mxu0 %v10621_v58  ;;  %9270 = vmatpush3.bf16.msra.mxu0 %v9560_v55  ;;  %v10858_v55 = vcombine.low %v422_v2, %v423_v23  ;;  %v1008_v23 = vsel %vm10252_vm5, %v7813_v40, %v1007_v21 }
  0xd2   : > { %2120 = vmatmul.mubr.bf16.gmra.mrb[60].mxu1 %v10800_v13  ;;  %9271 = vmatprep.subr.bf16.mxu0 %v9561_v17  ;;  %v10909_v42 = vcombine.low %v1008_v23, %v1011_v25 }
  0xd3   : > { %2127 = vmatprep.mubr.bf16.mxu1 %v10145_v56 }
  0xd5   : > { %9272 = vmatpush3.bf16.msra.mxu0 %v9561_v17  ;;  %v13720_v17 = vld [vmem:[#allocation12_spill] sm:$0xff] }
  0xd8   : > { %2225 = vmatmul.mubr.bf16.gmra.mrb[64].mxu0 %v10410_v30 }
  0xd9   : > { %2232 = vmatprep.mubr.bf16.mxu0 %v10651_v3 }
  0xda   : > { %2128 = vmatmul.mubr.bf16.gmra.mrb[64].mxu1 %v10820_v26 }
  0xdb   : > { %2135 = vmatprep.mubr.bf16.mxu1 %v10192_v49 }
  0xe0   : > { %2233 = vmatmul.mubr.bf16.gmra.mrb[68].mxu0 %v10449_v24 }
  0xe1   : > { %2240 = vmatprep.mubr.bf16.mxu0 %v10684_v0 }
  0xe2   : > { %2136 = vmatmul.mubr.bf16.gmra.mrb[68].mxu1 %v10837_v8 }
  0xe3   : > { %2143 = vmatprep.mubr.bf16.mxu1 %v10319_v12 }
  0xe8   : > { %2241 = vmatmul.mubr.bf16.gmra.mrb[72].mxu0 %v10487_v48 }
  0xe9   : > { %2248 = vmatprep.mubr.bf16.mxu0 %v10743_v19 }
  0xea   : > { %2144 = vmatmul.mubr.bf16.gmra.mrb[72].mxu1 %v10856_v45 }
  0xeb   : > { %2151 = vmatprep.mubr.bf16.mxu1 %v10858_v55 }
  0xf0   : > { %2249 = vmatmul.mubr.bf16.gmra.mrb[76].mxu0 %v10530_v32 }
  0xf1   : > { %2256 = vmatprep.mubr.bf16.mxu0 %v10760_v62 }
  0xf2   : > { %2152 = vmatmul.mubr.bf16.gmra.mrb[76].mxu1 %v10874_v46 }
  0xf3   : > { %2353 = vmatprep.mubr.bf16.mxu1 %v10214_v4 }
  0xf8   : > { %2257 = vmatmul.mubr.bf16.gmra.mrb[80].mxu0 %v10580_v53 }
  0xf9   : > { %2264 = vmatprep.mubr.bf16.mxu0 %v10778_v6 }
  0xfa   : > { %2354 = vmatmul.mubr.bf16.vlgmr.msra.gmra.mrb[80].mxu1 %v13715_v29 }
  0xfb   : > { %2361 = vmatprep.mubr.bf16.mxu1 %v10281_v20 }
 0x100   : > { %2265 = vmatmul.mubr.bf16.gmra.mrb[84].mxu0 %v10623_v18 }
 0x101   : > { %2272 = vmatprep.mubr.bf16.mxu0 %v10800_v13 }
 0x102   : > { %2362 = vmatmul.mubr.bf16.gmra.mrb[84].mxu1 %v13716_v38  ;;  %v1000_v38 = vrot.slane %v998_v61, 5 }
 0x103   : > { %2369 = vmatprep.mubr.bf16.mxu1 %v10374_v39 }
 0x108   : > { %2273 = vmatmul.mubr.bf16.gmra.mrb[88].mxu0 %v10653_v41 }
 0x109   : > { %2280 = vmatprep.mubr.bf16.mxu0 %v10820_v26 }
 0x10a   : > { %2370 = vmatmul.mubr.bf16.gmra.mrb[88].mxu1 %v13717_v15 }
 0x10b   : > { %2377 = vmatprep.mubr.bf16.mxu1 %v10410_v30 }
 0x110   : > { %2281 = vmatmul.mubr.bf16.gmra.mrb[92].mxu0 %v13718_v22 }
 0x111   : > { %2288 = vmatprep.mubr.bf16.mxu0 %v10837_v8 }
 0x112   : > { %2378 = vmatmul.mubr.bf16.gmra.mrb[92].mxu1 %v13719_v31 }
 0x113   : > { %2385 = vmatprep.mubr.bf16.mxu1 %v10449_v24 }
 0x118   : > { %2289 = vmatmul.mubr.bf16.gmra.mrb[96].mxu0 %v13720_v17 }
 0x119   : > { %2296 = vmatprep.mubr.bf16.mxu0 %v10856_v45 }
 0x11a   : > { %2386 = vmatmul.mubr.bf16.gmra.mrb[96].mxu1 %v10472_v36  ;;  %v985_v36 = vor.u32 %v984_v5, %v981_v1 }
 0x11b   : > { %2393 = vmatprep.mubr.bf16.mxu1 %v10487_v48 }
 0x11c   : > { %v986_v29 = vrot.slane %v985_v36, 4 }
 0x11e   : > { %v991_v14 = vsel %vm10053_vm2, %v986_v29, %v990_v28 }
 0x120   : > { %2297 = vmatmul.mubr.bf16.gmra.mrb[100].mxu0 %v13721_v27 }
 0x121   : > { %2304 = vmatprep.mubr.bf16.mxu0 %v10874_v46 }
 0x122   : > { %2394 = vmatmul.mubr.bf16.gmra.mrb[100].mxu1 %v10522_v51  ;;  %v996_v51 = vrot.slane %v995_v52, 4 }
 0x123   : > { %2401 = vmatprep.mubr.bf16.mxu1 %v10530_v32 }
 0x124   : > { %v1001_v43 = vsel %vm10053_vm2, %v996_v51, %v1000_v38  ;;  %v9563_v51 = vld [vmem:[#allocation3 + $0x40] sm:$0xff]  }
 0x125   : > { %v10927_v36 = vcombine.low %v991_v14, %v1001_v43  ;;  %v9564_v38 = vld [vmem:[#allocation3] sm:$0xff]   ;;  %8761 = vmatprep.subr.bf16.mxu1 %v9563_v51 }
 0x126   : > { %8762 = vmatpush3.bf16.msra.mxu1 %v9564_v38 }
 0x127   : > { %13725 = vst [vmem:[#allocation13_spill] sm:$0xff] %v10927_v36 }
 0x128   : > { %2305 = vmatmul.mubr.bf16.gmra.mrb[104].mxu0 %v13722_v47 }
 0x129   : > { %2312 = vmatprep.mubr.bf16.mxu0 %v10909_v42 }
 0x12a   : > { %v8305_v2 = vpop.f32.mrb[0].mxu0  ;;  %v8377_v16 = vpop.f32.mrb[0].mxu1  ;;  %2402 = vmatmul.mubr.bf16.gmra.mrb[104].mxu1 %v13723_v35 }
 0x12b   : > { %v8306_v54 = vpop.f32.mrb[1].mxu0  ;;  %v8378_v15 = vpop.f32.mrb[1].mxu1  ;;  %2409 = vmatprep.mubr.bf16.mxu1 %v10580_v53 }
 0x12c   : > { %v10911_v31 = vadd.f32 %v8306_v54, %v8305_v2  ;;  %v8308_v9 = vpop.f32.mrb[2].mxu0  ;;  %v10913_v34 = vadd.f32 %v8378_v15, %v8377_v16  ;;  %v8380_v33 = vpop.f32.mrb[2].mxu1 }
 0x12d   : > { %v8309_v11 = vpop.f32.mrb[3].mxu0  ;;  %v8381_v21 = vpop.f32.mrb[3].mxu1 }
 0x12e   : > { %v10916_v1 = vadd.f32 %v8309_v11, %v8308_v9  ;;  %v10918_v5 = vadd.f32 %v8381_v21, %v8380_v33 }
 0x130   : > { %2313 = vmatmul.mubr.bf16.gmra.mrb[108].mxu0 %v10927_v36 }
 0x131   : > { %9273 = vmatprep.mubr.bf16.mxu0 %v10476_v60 }
 0x132   : > { %v8311_v52 = vpop.f32.mrb[4].mxu0  ;;  %v8383_v2 = vpop.f32.mrb[4].mxu1  ;;  %2410 = vmatmul.mubr.bf16.gmra.mrb[108].mxu1 %v10616_v63 }
 0x133   : > { %v8312_v61 = vpop.f32.mrb[5].mxu0  ;;  %v8384_v54 = vpop.f32.mrb[5].mxu1  ;;  %2417 = vmatprep.mubr.bf16.mxu1 %v10623_v18 }
 0x134   : > { %v10929_v23 = vadd.f32 %v8312_v61, %v8311_v52  ;;  %v8314_v25 = vpop.f32.mrb[6].mxu0  ;;  %v10934_v28 = vadd.f32 %v8384_v54, %v8383_v2  ;;  %v8386_v29 = vpop.f32.mrb[6].mxu1  ;;  %v9566_v54 = vld [vmem:[#allocation3 + $0x8] sm:$0xff]  }
 0x135   : > { %v8315_v16 = vpop.f32.mrb[7].mxu0  ;;  %v8387_v9 = vpop.f32.mrb[7].mxu1 }
 0x136   : > { %v10932_v15 = vadd.f32 %v8315_v16, %v8314_v25  ;;  %v10939_v33 = vadd.f32 %v8387_v9, %v8386_v29  ;;  %v9565_v16 = vld [vmem:[#allocation3 + $0x48] sm:$0xff]  }
 0x137   : > { %8763 = vmatprep.subr.bf16.mxu1 %v9565_v16 }
 0x138   : > { %9274 = vmatmul.mubr.bf16.vlgmr.msra.gmra.mrb[112].mxu0 %v10528_v57  ;;  %8764 = vmatpush3.bf16.msra.mxu1 %v9566_v54 }
 0x139   : > { %9277 = vmatprep.mubr.bf16.mxu0 %v10572_v59 }
 0x13a   : > { %v8317_v11 = vpop.f32.mrb[8].mxu0  ;;  %2418 = vmatmul.mubr.bf16.gmra.mrb[112].mxu1 %v10648_v37 }
 0x13b   : > { %v8318_v21 = vpop.f32.mrb[9].mxu0  ;;  %2425 = vmatprep.mubr.bf16.mxu1 %v10653_v41 }
 0x13c   : > { %v10943_v35 = vadd.f32 %v8318_v21, %v8317_v11  ;;  %v8320_v14 = vpop.f32.mrb[10].mxu0  ;;  %v8389_v60 = vpop.f32.mrb[8].mxu1 }
 0x13d   : > { %v8321_v63 = vpop.f32.mrb[11].mxu0  ;;  %v8390_v52 = vpop.f32.mrb[9].mxu1 }
 0x13e   : > { %v10947_v43 = vadd.f32 %v8321_v63, %v8320_v14  ;;  %v10949_v61 = vadd.f32 %v8390_v52, %v8389_v60  ;;  %v8392_v25 = vpop.f32.mrb[10].mxu1 }
 0x13f   : > { %v8393_v2 = vpop.f32.mrb[11].mxu1 }
 0x140   : > { %v10951_v57 = vadd.f32 %v8393_v2, %v8392_v25  ;;  %9278 = vmatmul.mubr.bf16.gmra.mrb[116].mxu0 %v10621_v58 }
 0x141   : > { %9281 = vmatprep.mubr.bf16.mxu0 %v10651_v3 }
 0x142   : > { %2426 = vmatmul.mubr.bf16.gmra.mrb[116].mxu1 %v10682_v7 }
 0x143   : > { %v8323_v37 = vpop.f32.mrb[12].mxu0  ;;  %2433 = vmatprep.mubr.bf16.mxu1 %v13718_v22 }
 0x144   : > { %v8324_v59 = vpop.f32.mrb[13].mxu0 }
 0x145   : > { %v10956_v29 = vadd.f32 %v8324_v59, %v8323_v37  ;;  %v8326_v51 = vpop.f32.mrb[14].mxu0  ;;  %v8395_v11 = vpop.f32.mrb[12].mxu1 }
 0x146   : > { %v8327_v38 = vpop.f32.mrb[15].mxu0  ;;  %v8396_v58 = vpop.f32.mrb[13].mxu1 }
 0x147   : > { %v10959_v9 = vadd.f32 %v8327_v38, %v8326_v51  ;;  %v10961_v21 = vadd.f32 %v8396_v58, %v8395_v11  ;;  %v8398_v14 = vpop.f32.mrb[14].mxu1  ;;  %v10974_v38 = vld [vmem:[%s10005_s20 + $0xcc] sm:$0xf]  ;;  %v10978_v58 = vld [vmem:[%s10005_s20 + $0xd0] sm:$0xf] }
 0x148   : > { %v8399_v63 = vpop.f32.mrb[15].mxu1  ;;  %9282 = vmatmul.mubr.bf16.gmra.mrb[120].mxu0 %v10684_v0 }
 0x149   : > { %v10964_v3 = vadd.f32 %v8399_v63, %v8398_v14  ;;  %9285 = vmatprep.mubr.bf16.mxu0 %v10743_v19  ;;  %v9568_v19 = vld [vmem:[#allocation3 + $0x10] sm:$0xff]   ;;  %v1013_v63 = vshrl.u32 %v10974_v38, 16 }
 0x14a   : > { %2434 = vmatmul.mubr.bf16.gmra.mrb[120].mxu1 %v10103_v10  ;;  %v9567_v10 = vld [vmem:[#allocation3 + $0x50] sm:$0xff]  }
 0x14b   : > { %2441 = vmatprep.mubr.bf16.mxu1 %v13720_v17  ;;  %v8329_v7 = vpop.f32.mrb[16].mxu0  ;;  %8765 = vmatprep.subr.bf16.mxu1 %v9567_v10 }
 0x14c   : > { %v8330_v52 = vpop.f32.mrb[17].mxu0  ;;  %8766 = vmatpush3.bf16.msra.mxu1 %v9568_v19  ;;  %v427_v19 = vld [vmem:[%s10005_s20 + $0xd4] sm:$0x1]  ;;  %s9832_s20 = smov [#allocation6]  }
 0x14d   : > { %v8417_v60 = vpop.f32.mrb[16].mxu1  ;;  %v10969_v25 = vadd.f32 %v8330_v52, %v8329_v7  ;;  %v8332_v37 = vpop.f32.mrb[18].mxu0  ;;  %v1022_v52 = vshll.u32 %v10978_v58, 16  ;;  %s9764_s29 = sshll.u32 %s9832_s20, 4  ;;  %s9765_s29 = int_to_ptr.vmem [resolvable:$false] %s9764_s29 }
 0x14e   : > { %v8418_v2 = vpop.f32.mrb[17].mxu1  ;;  %v8333_v0 = vpop.f32.mrb[19].mxu0  ;;  %s9766_s30 = scalar_lea.vmem %s9765_s29, 8192  ;;  %p9767_p2 = scmp.lt.s32.totalorder %s13547_s18, %s9765_s29 }
 0x14f   : > { %v8419_v16 = vadd.f32 %v8418_v2, %v8417_v60  ;;  %v8420_v54 = vpop.f32.mrb[18].mxu1  ;;  %v10971_v59 = vadd.f32 %v8333_v0, %v8332_v37  ;;  %v1024_v17 = vrot.slane %v1022_v52, 5  ;;  %p9768_p3 = scmp.lt.s32.totalorder %s9766_s30, %s9760_s25 }
 0x150   : > { %v8421_v51 = vpop.f32.mrb[19].mxu1  ;;  %9286 = vmatmul.mubr.bf16.gmra.mrb[124].mxu0 %v10760_v62  ;;  %v1016_v62 = vshll.u32 %v10974_v38, 16 }
 0x151   : > { %v8422_v11 = vadd.f32 %v8421_v51, %v8420_v54  ;;  %v10981_v14 = vadd.f32 %v8419_v16, %v10911_v31  ;;  %9289 = vmatprep.mubr.bf16.mxu0 %v10778_v6  ;;  %v1026_v31 = vshrl.u32 %v10978_v58, 16  ;;  %v1015_v51 = vrot.slane %v1013_v63, 4  ;;  %p9769_p4 = por %p9768_p3, %p9767_p2 }
 0x152   : > { %2442 = vmatmul.mubr.bf16.gmra.mrb[124].mxu1 %v10145_v56 }
 0x153   : > { %2449 = vmatprep.mubr.bf16.mxu1 %v13721_v27  ;;  %v10988_v7 = vadd.f32 %v8422_v11, %v10916_v1  ;;  %v8335_v60 = vpop.f32.mrb[20].mxu0  ;;  %v1018_v27 = vrot.slane %v1016_v62, 5  ;;  %v1028_v22 = vrot.slane %v1026_v31, 4  ;;  %v1032_v31 = vshll.u32 %v427_v19, 16  ;;  %p9770_p7 = pnand %p9769_p4, %p9763_p12 }
 0x154   : > { %v8336_v56 = vpop.f32.mrb[21].mxu0 }
 0x155   : > { %v8423_v2 = vpop.f32.mrb[20].mxu1  ;;  %v10993_v6 = vadd.f32 %v8336_v56, %v8335_v60  ;;  %v8338_v16 = vpop.f32.mrb[22].mxu0  ;;  %v1019_v62 = vor.u32 %v1018_v27, %v1015_v51  ;;  %v1029_v52 = vor.u32 %v1028_v22, %v1024_v17  ;;  %v1041_v51 = vrot.slane %v10978_v58, 5 }
 0x156   : > { %v8424_v37 = vpop.f32.mrb[21].mxu1  ;;  %v8339_v1 = vpop.f32.mrb[23].mxu0 }
 0x157   : > { %v8425_v54 = vadd.f32 %v8424_v37, %v8423_v2  ;;  %v8426_v0 = vpop.f32.mrb[22].mxu1  ;;  %v10995_v10 = vadd.f32 %v8339_v1, %v8338_v16  ;;  %v1020_v1 = vrot.slane %v1019_v62, 4 }
 0x158   : > { %v8427_v11 = vpop.f32.mrb[23].mxu1  ;;  %9290 = vmatmul.mubr.bf16.gmra.mrb[128].mxu0 %v10800_v13 }
 0x159   : > { %v8428_v41 = vadd.f32 %v8427_v11, %v8426_v0  ;;  %v11000_v18 = vadd.f32 %v8425_v54, %v10929_v23  ;;  %9293 = vmatprep.mubr.bf16.mxu0 %v10820_v26  ;;  %v1030_v11 = vrot.slane %v1029_v52, 4  ;;  %v1025_v52 = vsel %vm10053_vm2, %v1020_v1, %v1024_v17 }
 0x15a   : > { %2450 = vmatmul.mubr.bf16.gmra.mrb[128].mxu1 %v10192_v49 }
 0x15b   : > { %2457 = vmatprep.mubr.bf16.mxu1 %v13722_v47  ;;  %v11006_v63 = vadd.f32 %v8428_v41, %v10932_v15  ;;  %v8341_v60 = vpop.f32.mrb[24].mxu0  ;;  %v1034_v41 = vrot.slane %v1032_v31, 5  ;;  %v9569_v15 = vld [vmem:[#allocation3 + $0x58] sm:$0xff]  }
 0x15c   : > { %v8342_v56 = vpop.f32.mrb[25].mxu0  ;;  %v9570_v47 = vld [vmem:[#allocation3 + $0x18] sm:$0xff]   ;;  %8767 = vmatprep.subr.bf16.mxu1 %v9569_v15 }
 0x15d   : > { %v8429_v2 = vpop.f32.mrb[24].mxu1  ;;  %v11008_v13 = vadd.f32 %v8342_v56, %v8341_v60  ;;  %v8344_v23 = vpop.f32.mrb[26].mxu0  ;;  %8768 = vmatpush3.bf16.msra.mxu1 %v9570_v47  ;;  %v7814_v56 = vrot.slane %v10974_v38, 9 }
 0x15e   : > { %v8430_v37 = vpop.f32.mrb[25].mxu1  ;;  %v8345_v49 = vpop.f32.mrb[27].mxu0 }
 0x15f   : > { %v8431_v16 = vadd.f32 %v8430_v37, %v8429_v2  ;;  %v8432_v54 = vpop.f32.mrb[26].mxu1  ;;  %v11010_v0 = vadd.f32 %v8345_v49, %v8344_v23  ;;  %v1043_v37 = vrot.slane %v1041_v51, 4 }
 0x160   : > { %v8433_v26 = vpop.f32.mrb[27].mxu1  ;;  %9294 = vmatmul.mubr.bf16.gmra.mrb[132].mxu0 %v10837_v8  ;;  %v1035_v8 = vsel %vm10053_vm2, %v1030_v11, %v1034_v41 }
 0x161   : > { %v8434_v27 = vadd.f32 %v8433_v26, %v8432_v54  ;;  %v11014_v22 = vadd.f32 %v8431_v16, %v10943_v35  ;;  %9297 = vmatprep.mubr.bf16.mxu0 %v10856_v45  ;;  %v7867_v49 = vcombine.low %v1025_v52, %v1035_v8 }
 0x162   : > { %2458 = vmatmul.mubr.bf16.gmra.mrb[132].mxu1 %v10319_v12 }
 0x163   : > { %2465 = vmatprep.mubr.bf16.mxu1 %v10927_v36  ;;  %v11021_v60 = vadd.f32 %v8434_v27, %v10947_v43  ;;  %v8347_v62 = vpop.f32.mrb[28].mxu0  ;;  %v1044_v43 = vrot.slane %v427_v19, 5  ;;  %v1042_v19 = vsel %vm10252_vm5, %v7814_v56, %v1041_v51  ;;  %v2770_v36 = vld [vmem:[#allocation2 + $0x24] sm:$0x1] }
 0x164   : > { %v8348_v12 = vpop.f32.mrb[29].mxu0 }
 0x165   : > { %v8435_v35 = vpop.f32.mrb[28].mxu1  ;;  %v11027_v31 = vadd.f32 %v8348_v12, %v8347_v62  ;;  %v8350_v2 = vpop.f32.mrb[30].mxu0  ;;  %v1045_v11 = vsel %vm10252_vm5, %v1043_v37, %v1044_v43  ;;  %v9573_v43 = vld [vmem:[#allocation3 + $0xc0] sm:$0xff]  }
 0x166   : > { %v8436_v45 = vpop.f32.mrb[29].mxu1  ;;  %v8351_v54 = vpop.f32.mrb[31].mxu0  ;;  %v7868_v62 = vcombine.low %v1042_v19, %v1045_v11  ;;  %8873 = vmatprep.subr.bf16.mxu0 %v9573_v43 }
 0x167   : > { %v8437_v23 = vadd.f32 %v8436_v45, %v8435_v35  ;;  %v8438_v16 = vpop.f32.mrb[30].mxu1  ;;  %v11030_v26 = vadd.f32 %v8351_v54, %v8350_v2  ;;  %v9571_v2 = vld [vmem:[#allocation3 + $0x60] sm:$0xff]  }
 0x168   : > { %v8439_v17 = vpop.f32.mrb[31].mxu1  ;;  %9298 = vmatmul.mubr.bf16.gmra.mrb[136].mxu0 %v10874_v46  ;;  %8769 = vmatprep.subr.bf16.mxu1 %v9571_v2 }
 0x169   : > { %v8440_v1 = vadd.f32 %v8439_v17, %v8438_v16  ;;  %v11034_v47 = vadd.f32 %v8437_v23, %v10956_v29  ;;  %9301 = vmatprep.mubr.bf16.mxu0 %v10909_v42  ;;  %v7866_v42 = vcombine.low %v10974_v38, %v10978_v58  ;;  %v9574_v23 = vld [vmem:[#allocation3 + $0x80] sm:$0xff]  }
 0x16a   : > { %2466 = vmatmul.mubr.bf16.gmra.mrb[136].mxu1 %v10858_v55  ;;  %8874 = vmatpush3.bf16.msra.mxu0 %v9574_v23 }
 0x16b   : > { %2473 = vmatprep.mubr.bf16.mxu1 %v7867_v49  ;;  %v11043_v41 = vadd.f32 %v8440_v1, %v10959_v9  ;;  %v8353_v15 = vpop.f32.mrb[32].mxu0  ;;  %v9572_v9 = vld [vmem:[#allocation3 + $0x20] sm:$0xff]  }
 0x16c   : > { %v8354_v46 = vpop.f32.mrb[33].mxu0  ;;  %8770 = vmatpush3.bf16.msra.mxu1 %v9572_v9 }
 0x16d   : > { %v8441_v27 = vpop.f32.mrb[32].mxu1  ;;  %v11045_v29 = vadd.f32 %v8354_v46, %v8353_v15  ;;  %v8356_v55 = vpop.f32.mrb[34].mxu0 }
 0x16e   : > { %v8442_v52 = vpop.f32.mrb[33].mxu1  ;;  %v8357_v35 = vpop.f32.mrb[35].mxu0 }
 0x16f   : > { %v8443_v8 = vadd.f32 %v8442_v52, %v8441_v27  ;;  %v8444_v51 = vpop.f32.mrb[34].mxu1  ;;  %v11049_v12 = vadd.f32 %v8357_v35, %v8356_v55  ;;  %v9576_v52 = vld [vmem:[#allocation3 + $0x88] sm:$0xff]  }
 0x170   : > { %v8445_v45 = vpop.f32.mrb[35].mxu1  ;;  %9302 = vmatmul.mubr.bf16.gmra.mrb[140].mxu0 %v7868_v62  ;;  %v9575_v62 = vld [vmem:[#allocation3 + $0xc8] sm:$0xff]  }
 0x171   : > { %v8446_v56 = vadd.f32 %v8445_v45, %v8444_v51  ;;  %v11052_v37 = vadd.f32 %v8443_v8, %v10969_v25  ;;  %8875 = vmatprep.subr.bf16.mxu0 %v9575_v62 }
 0x172   : > { %2474 = vmatmul.mubr.bf16.gmra.mrb[140].mxu1 %v7866_v42  ;;  %8876 = vmatpush3.bf16.msra.mxu0 %v9576_v52 }
 0x173   : > { %v11055_v16 = vadd.f32 %v8446_v56, %v10971_v59  ;;  %v8359_v38 = vpop.f32.mrb[36].mxu0 }
 0x174   : > { %v8360_v54 = vpop.f32.mrb[37].mxu0 }
 0x175   : > { %v8447_v58 = vpop.f32.mrb[36].mxu1  ;;  %v11057_v49 = vadd.f32 %v8360_v54, %v8359_v38  ;;  %v8362_v1 = vpop.f32.mrb[38].mxu0  ;;  %v9577_v38 = vld [vmem:[#allocation3 + $0x68] sm:$0xff]  }
 0x176   : > { %v8448_v17 = vpop.f32.mrb[37].mxu1  ;;  %v8363_v11 = vpop.f32.mrb[39].mxu0  ;;  %8771 = vmatprep.subr.bf16.mxu1 %v9577_v38 }
 0x177   : > { %v8449_v19 = vadd.f32 %v8448_v17, %v8447_v58  ;;  %v8450_v25 = vpop.f32.mrb[38].mxu1  ;;  %v11059_v15 = vadd.f32 %v8363_v11, %v8362_v1  ;;  %v9578_v58 = vld [vmem:[#allocation3 + $0x28] sm:$0xff]   ;;  %v9579_v17 = vld [vmem:[#allocation3 + $0xd0] sm:$0xff]  }
 0x178   : > { %v8451_v27 = vpop.f32.mrb[39].mxu1  ;;  %v9580_v1 = vld [vmem:[#allocation3 + $0x90] sm:$0xff]   ;;  %8772 = vmatpush3.bf16.msra.mxu1 %v9578_v58  ;;  %8877 = vmatprep.subr.bf16.mxu0 %v9579_v17 }
 0x179   : > { %v8452_v46 = vadd.f32 %v8451_v27, %v8450_v25  ;;  %v11062_v59 = vadd.f32 %v8449_v19, %v10993_v6  ;;  %8878 = vmatpush3.bf16.msra.mxu0 %v9580_v1 }
 0x17b   : > { %v11065_v55 = vadd.f32 %v8452_v46, %v10995_v10  ;;  %v8365_v42 = vpop.f32.mrb[40].mxu0 }
 0x17c   : > { %v8366_v51 = vpop.f32.mrb[41].mxu0 }
 0x17d   : > { %v8453_v8 = vpop.f32.mrb[40].mxu1  ;;  %v11067_v35 = vadd.f32 %v8366_v51, %v8365_v42  ;;  %v8368_v2 = vpop.f32.mrb[42].mxu0 }
 0x17e   : > { %v8454_v45 = vpop.f32.mrb[41].mxu1  ;;  %v8369_v43 = vpop.f32.mrb[43].mxu0 }
 0x17f   : > { %v8455_v9 = vadd.f32 %v8454_v45, %v8453_v8  ;;  %v8456_v56 = vpop.f32.mrb[42].mxu1  ;;  %v11069_v23 = vadd.f32 %v8369_v43, %v8368_v2 }
 0x180   : > { %v8457_v6 = vpop.f32.mrb[43].mxu1 }
 0x181   : > { %v8458_v54 = vadd.f32 %v8457_v6, %v8456_v56  ;;  %v11072_v10 = vadd.f32 %v8455_v9, %v11008_v13  ;;  %v9581_v9 = vld [vmem:[#allocation3 + $0xd8] sm:$0xff]  }
 0x182   : > { %v9582_v56 = vld [vmem:[#allocation3 + $0x98] sm:$0xff]   ;;  %8879 = vmatprep.subr.bf16.mxu0 %v9581_v9 }
 0x183   : > { %v11075_v19 = vadd.f32 %v8458_v54, %v11010_v0  ;;  %v8371_v25 = vpop.f32.mrb[44].mxu0  ;;  %8880 = vmatpush3.bf16.msra.mxu0 %v9582_v56 }
 0x184   : > { %v8372_v27 = vpop.f32.mrb[45].mxu0 }
 0x185   : > { %v8459_v11 = vpop.f32.mrb[44].mxu1  ;;  %v11077_v46 = vadd.f32 %v8372_v27, %v8371_v25  ;;  %v8374_v52 = vpop.f32.mrb[46].mxu0 }
 0x186   : > { %v8460_v62 = vpop.f32.mrb[45].mxu1  ;;  %v8375_v13 = vpop.f32.mrb[47].mxu0 }
 0x187   : > { %v8461_v42 = vadd.f32 %v8460_v62, %v8459_v11  ;;  %v8462_v8 = vpop.f32.mrb[46].mxu1  ;;  %v11079_v51 = vadd.f32 %v8375_v13, %v8374_v52 }
 0x188   : > { %v8463_v45 = vpop.f32.mrb[47].mxu1 }
 0x189   : > { %v8464_v2 = vadd.f32 %v8463_v45, %v8462_v8  ;;  %v11082_v0 = vadd.f32 %v8461_v42, %v11027_v31  ;;  %v2767_v45 = vld [vmem:[#allocation2 + $0x18] sm:$0x1] }
 0x18a   : > { %v2768_v56 = vsel %vm11100_vm8, 0, %v2767_v45 }
 0x18b   : > { %v11085_v43 = vadd.f32 %v8464_v2, %v11030_v26  ;;  %v8529_v6 = vpop.f32.mrb[48].mxu0  ;;  %2769 = vst [vmem:[#allocation2 + $0x18] sm:$0x1] %v2768_v56 }
 0x18c   : > { %v8530_v58 = vpop.f32.mrb[49].mxu0 }
 0x18d   : > { %v8465_v38 = vpop.f32.mrb[48].mxu1  ;;  %v8531_v17 = vadd.f32 %v8530_v58, %v8529_v6  ;;  %v8532_v1 = vpop.f32.mrb[50].mxu0 }
 0x18e   : > { %v8466_v54 = vpop.f32.mrb[49].mxu1  ;;  %v8533_v27 = vpop.f32.mrb[51].mxu0 }
 0x18f   : > { %v8467_v25 = vadd.f32 %v8466_v54, %v8465_v38  ;;  %v8468_v11 = vpop.f32.mrb[50].mxu1  ;;  %v11088_v62 = vadd.f32 %v8531_v17, %v10981_v14  ;;  %v8534_v52 = vadd.f32 %v8533_v27, %v8532_v1  ;;  %v2817_v17 = vld [vmem:[#allocation2 + $0x20] sm:$0x1] }
 0x190   : > { %v8469_v31 = vpop.f32.mrb[51].mxu1  ;;  %v2818_v27 = vsel %vm11107_vm10, 0, %v2817_v17 }
 0x191   : > { %v11091_v42 = vadd.f32 %v8467_v25, %v11045_v29  ;;  %v8470_v26 = vadd.f32 %v8469_v31, %v8468_v11  ;;  %v11094_v8 = vadd.f32 %v8534_v52, %v10988_v7  ;;  %v13728_v7 = vmov 0  ;;  %v2814_v31 = vld [vmem:[#allocation2 + $0x14] sm:$0x1]  ;;  %2819 = vst [vmem:[#allocation2 + $0x20] sm:$0x1] %v2818_v27 }
 0x192   : > { %v13729_v7 = vsel %vm11107_vm10, 4294967295, %v13728_v7 }
 0x193   : > { %v11097_v13 = vadd.f32 %v8470_v26, %v11049_v12  ;;  %v8535_v2 = vpop.f32.mrb[52].mxu0  ;;  %13730 = vst [vmem:[#allocation16_spill] sm:$0xff] %v13729_v7  ;;  %v2764_v12 = vld [vmem:[#allocation2 + $0xc] sm:$0x1] }
 0x194   : > { %v8536_v29 = vpop.f32.mrb[53].mxu0  ;;  %v2765_v54 = vsel %vm11100_vm8, 0, %v2764_v12 }
 0x195   : > { %v8471_v9 = vpop.f32.mrb[52].mxu1  ;;  %v8537_v38 = vadd.f32 %v8536_v29, %v8535_v2  ;;  %v8538_v58 = vpop.f32.mrb[54].mxu0  ;;  %2766 = vst [vmem:[#allocation2 + $0xc] sm:$0x1] %v2765_v54  ;;  %v2815_v2 = vsel %vm11107_vm10, 0, %v2814_v31 }
 0x196   : > { %v8472_v6 = vpop.f32.mrb[53].mxu1  ;;  %v8539_v11 = vpop.f32.mrb[55].mxu0  ;;  %2816 = vst [vmem:[#allocation2 + $0x14] sm:$0x1] %v2815_v2  ;;  %v2773_v54 = vld [vmem:[#allocation2 + $0x30] sm:$0x1] }
 0x197   : > { %v8473_v1 = vadd.f32 %v8472_v6, %v8471_v9  ;;  %v8474_v25 = vpop.f32.mrb[54].mxu1  ;;  %v11116_v52 = vadd.f32 %v8537_v38, %v11000_v18  ;;  %v8540_v45 = vadd.f32 %v8539_v11, %v8538_v58  ;;  %v9585_v6 = vld [vmem:[#allocation3 + $0xe0] sm:$0xff]   ;;  %v2774_v11 = vsel %vm11100_vm8, 0, %v2773_v54 }
 0x198   : > { %v8475_v26 = vpop.f32.mrb[55].mxu1  ;;  %v9586_v38 = vld [vmem:[#allocation3 + $0xa0] sm:$0xff]   ;;  %8881 = vmatprep.subr.bf16.mxu0 %v9585_v6  ;;  %2775 = vst [vmem:[#allocation2 + $0x30] sm:$0x1] %v2774_v11  ;;  %v3293_v4 = vld [vmem:[#allocation2 + $0x20] sm:$0x1] }
 0x199   : > { %v11121_v29 = vadd.f32 %v8473_v1, %v11057_v49  ;;  %v8476_v9 = vadd.f32 %v8475_v26, %v8474_v25  ;;  %v11124_v56 = vadd.f32 %v8540_v45, %v11006_v63  ;;  %8882 = vmatpush3.bf16.msra.mxu0 %v9586_v38 }
 0x19b   : > { %v11127_v12 = vadd.f32 %v8476_v9, %v11059_v15  ;;  %v8541_v18 = vpop.f32.mrb[56].mxu0  ;;  %v9583_v15 = vld [vmem:[#allocation3 + $0x70] sm:$0xff]  }
 0x19c   : > { %v8542_v17 = vpop.f32.mrb[57].mxu0  ;;  %v9584_v9 = vld [vmem:[#allocation3 + $0x30] sm:$0xff]   ;;  %8773 = vmatprep.subr.bf16.mxu1 %v9583_v15  ;;  %v9587_v15 = vld [vmem:[#allocation3 + $0xe8] sm:$0xff]  }
 0x19d   : > { %v8477_v58 = vpop.f32.mrb[56].mxu1  ;;  %v8543_v1 = vadd.f32 %v8542_v17, %v8541_v18  ;;  %v8544_v25 = vpop.f32.mrb[58].mxu0  ;;  %v2771_v18 = vsel %vm11100_vm8, 0, %v2770_v36  ;;  %8774 = vmatpush3.bf16.msra.mxu1 %v9584_v9  ;;  %v9831_v17 = vmov 0   ;;  %8883 = vmatprep.subr.bf16.mxu0 %v9587_v15 }
 0x19e   : > { %v8478_v49 = vpop.f32.mrb[57].mxu1  ;;  %v8545_v31 = vpop.f32.mrb[59].mxu0  ;;  %2772 = vst [vmem:[#allocation2 + $0x24] sm:$0x1] %v2771_v18  ;;  %2753 = vst [vmem:[#allocation2] sm:$0xf] %v9831_v17 }
 0x19f   : > { %v8479_v63 = vadd.f32 %v8478_v49, %v8477_v58  ;;  %v8480_v27 = vpop.f32.mrb[58].mxu1  ;;  %v11132_v26 = vadd.f32 %v8543_v1, %v11014_v22  ;;  %v8546_v2 = vadd.f32 %v8545_v31, %v8544_v25  ;;  %2754 = vst [vmem:[#allocation2 + $0x4] sm:$0xf] %v9831_v17  ;;  %2755 = vst [vmem:[#allocation2 + $0x8] sm:$0x1] %v9831_v17  ;;  %v9588_v18 = vld [vmem:[#allocation3 + $0xa8] sm:$0xff]  }
 0x1a0   : > { %v8481_v45 = vpop.f32.mrb[59].mxu1  ;;  %2757 = vst [vmem:[#allocation2 + $0xcc] sm:$0xf] %v9831_v17  ;;  %2758 = vst [vmem:[#allocation2 + $0xd0] sm:$0xf] %v9831_v17  ;;  %8884 = vmatpush3.bf16.msra.mxu0 %v9588_v18  ;;  %v9590_v18 = vld [vmem:[#allocation3 + $0x38] sm:$0xff]  }
 0x1a1   : > { %v11135_v6 = vadd.f32 %v8479_v63, %v11067_v35  ;;  %v8482_v54 = vadd.f32 %v8481_v45, %v8480_v27  ;;  %v11140_v38 = vadd.f32 %v8546_v2, %v11021_v60  ;;  %2759 = vst [vmem:[#allocation2 + $0xd4] sm:$0x1] %v9831_v17  ;;  %v2823_v60 = vld [vmem:[#allocation2 + $0x38] sm:$0x1]  ;;  %v2820_v31 = vld [vmem:[#allocation2 + $0x2c] sm:$0x1] }
 0x1a3   : > { %v11143_v22 = vadd.f32 %v8482_v54, %v11069_v23  ;;  %v8547_v58 = vpop.f32.mrb[60].mxu0  ;;  %v2824_v23 = vsel %vm11107_vm10, 0, %v2823_v60  ;;  %v2821_v54 = vsel %vm11107_vm10, 0, %v2820_v31 }
 0x1a4   : > { %v8548_v11 = vpop.f32.mrb[61].mxu0  ;;  %2825 = vst [vmem:[#allocation2 + $0x38] sm:$0x1] %v2824_v23  ;;  %2822 = vst [vmem:[#allocation2 + $0x2c] sm:$0x1] %v2821_v54 }
 0x1a5   : > { %v8483_v35 = vpop.f32.mrb[60].mxu1  ;;  %v8549_v36 = vadd.f32 %v8548_v11, %v8547_v58  ;;  %v8550_v1 = vpop.f32.mrb[62].mxu0  ;;  %v11161_v11 = vld [vmem:[#allocation2] sm:$0xf]  ;;  %v2776_v23 = vld [vmem:[#allocation2 + $0x3c] sm:$0x1] }
 0x1a6   : > { %v8484_v49 = vpop.f32.mrb[61].mxu1  ;;  %v8551_v27 = vpop.f32.mrb[63].mxu0  ;;  %v3443_v60 = vshrl.u32 %v11161_v11, 16  ;;  %v2829_v54 = vld [vmem:[#allocation2 + $0x50] sm:$0x1] }
 0x1a7   : > { %v8485_v25 = vadd.f32 %v8484_v49, %v8483_v35  ;;  %v8486_v63 = vpop.f32.mrb[62].mxu1  ;;  %v11148_v45 = vadd.f32 %v8549_v36, %v11034_v47  ;;  %v8552_v9 = vadd.f32 %v8551_v27, %v8550_v1  ;;  %v11163_v49 = vld [vmem:[#allocation2 + $0x4] sm:$0xf]  ;;  %v2779_v1 = vld [vmem:[#allocation2 + $0x48] sm:$0x1]  ;;  %v2830_v48 = vsel %vm11107_vm10, 0, %v2829_v54 }
 0x1a8   : > { %v8487_v2 = vpop.f32.mrb[63].mxu1  ;;  %2831 = vst [vmem:[#allocation2 + $0x50] sm:$0x1] %v2830_v48 }
 0x1a9   : > { %v11153_v58 = vadd.f32 %v8485_v25, %v11077_v46  ;;  %v8488_v17 = vadd.f32 %v8487_v2, %v8486_v63  ;;  %v11156_v35 = vadd.f32 %v8552_v9, %v11043_v41  ;;  %v3446_v46 = vshll.u32 %v11161_v11, 16 }
 0x1aa   : > { %v3452_v25 = vshll.u32 %v11163_v49, 16  ;;  %v2780_v41 = vsel %vm11100_vm8, 0, %v2779_v1  ;;  %v2777_v9 = vsel %vm11100_vm8, 0, %v2776_v23  ;;  %v9591_v1 = vld [vmem:[#allocation3 + $0xf0] sm:$0xff]  }
 0x1ab   : > { %v11159_v47 = vadd.f32 %v8488_v17, %v11079_v51  ;;  %v8553_v36 = vpop.f32.mrb[64].mxu0  ;;  %v9589_v51 = vld [vmem:[#allocation3 + $0x78] sm:$0xff]   ;;  %2781 = vst [vmem:[#allocation2 + $0x48] sm:$0x1] %v2780_v41  ;;  %2778 = vst [vmem:[#allocation2 + $0x3c] sm:$0x1] %v2777_v9  ;;  %8885 = vmatprep.subr.bf16.mxu0 %v9591_v1 }
 0x1ac   : > { %v8554_v27 = vpop.f32.mrb[65].mxu0  ;;  %8775 = vmatprep.subr.bf16.mxu1 %v9589_v51  ;;  %v9592_v41 = vld [vmem:[#allocation3 + $0xb0] sm:$0xff]   ;;  %v2826_v9 = vld [vmem:[#allocation2 + $0x44] sm:$0x1]  ;;  %v3445_v51 = vrot.slane %v3443_v60, 4  ;;  %v3448_v30 = vrot.slane %v3446_v46, 5 }
 0x1ad   : > { %v8489_v63 = vpop.f32.mrb[64].mxu1  ;;  %v8555_v15 = vadd.f32 %v8554_v27, %v8553_v36  ;;  %v8556_v2 = vpop.f32.mrb[66].mxu0  ;;  %8776 = vmatpush3.bf16.msra.mxu1 %v9590_v18  ;;  %v11177_v23 = vld [vmem:[#allocation2 + $0x8] sm:$0x1]  ;;  %8886 = vmatpush3.bf16.msra.mxu0 %v9592_v41  ;;  %v3454_v48 = vrot.slane %v3452_v25, 5  ;;  %v9593_v60 = vld [vmem:[#allocation3 + $0xf8] sm:$0xff]  }
 0x1ae   : > { %v8490_v31 = vpop.f32.mrb[65].mxu1  ;;  %v8557_v32 = vpop.f32.mrb[67].mxu0  ;;  %v2785_v25 = vld [vmem:[#allocation2 + $0x60] sm:$0x1]  ;;  %8887 = vmatprep.subr.bf16.mxu0 %v9593_v60 }
 0x1af   : > { %v8491_v17 = vadd.f32 %v8490_v31, %v8489_v63  ;;  %v8492_v53 = vpop.f32.mrb[66].mxu1  ;;  %v11175_v24 = vadd.f32 %v8555_v15, %v11052_v37  ;;  %v8558_v27 = vadd.f32 %v8557_v32, %v8556_v2  ;;  %v2827_v37 = vsel %vm11107_vm10, 0, %v2826_v9 }
 0x1b0   : > { %v8493_v36 = vpop.f32.mrb[67].mxu1  ;;  %v3456_v32 = vshrl.u32 %v11163_v49, 16  ;;  %2828 = vst [vmem:[#allocation2 + $0x44] sm:$0x1] %v2827_v37 }
 0x1b1   : > { %v11180_v63 = vadd.f32 %v8491_v17, %v10913_v34  ;;  %v8494_v31 = vadd.f32 %v8493_v36, %v8492_v53  ;;  %v11183_v54 = vadd.f32 %v8558_v27, %v11055_v16  ;;  %v3449_v34 = vor.u32 %v3448_v30, %v3445_v51  ;;  %v9594_v17 = vld [vmem:[#allocation3 + $0xb8] sm:$0xff]  }
 0x1b2   : > { %v3462_v53 = vshll.u32 %v11177_v23, 16  ;;  %v3458_v46 = vrot.slane %v3456_v32, 4  ;;  %v2786_v30 = vsel %vm11100_vm8, 0, %v2785_v25  ;;  %8888 = vmatpush3.bf16.msra.mxu0 %v9594_v17  ;;  %v8023_v17 = vcombine.low %v11161_v11, %v11163_v49 }
 0x1b3   : > { %v11189_v15 = vadd.f32 %v8494_v31, %v10918_v5  ;;  %v8559_v2 = vpop.f32.mrb[68].mxu0  ;;  %v3450_v1 = vrot.slane %v3449_v34, 4  ;;  %2787 = vst [vmem:[#allocation2 + $0x60] sm:$0x1] %v2786_v30 }
 0x1b4   : > { %v8560_v16 = vpop.f32.mrb[69].mxu0  ;;  %v3459_v9 = vor.u32 %v3458_v46, %v3454_v48  ;;  %v3464_v51 = vrot.slane %v3462_v53, 5 }
 0x1b5   : > { %v8495_v18 = vpop.f32.mrb[68].mxu1  ;;  %v8561_v27 = vadd.f32 %v8560_v16, %v8559_v2  ;;  %v8562_v41 = vpop.f32.mrb[70].mxu0  ;;  %v3455_v34 = vsel %vm10053_vm2, %v3450_v1, %v3454_v48 }
 0x1b6   : > { %v8496_v36 = vpop.f32.mrb[69].mxu1  ;;  %v8563_v31 = vpop.f32.mrb[71].mxu0  ;;  %v3460_v2 = vrot.slane %v3459_v9, 4 }
 0x1b7   : > { %v8497_v39 = vadd.f32 %v8496_v36, %v8495_v18  ;;  %v8498_v5 = vpop.f32.mrb[70].mxu1  ;;  %v11195_v37 = vadd.f32 %v8561_v27, %v11062_v59  ;;  %v8564_v20 = vadd.f32 %v8563_v31, %v8562_v41  ;;  %v2782_v18 = vld [vmem:[#allocation2 + $0x54] sm:$0x1] }
 0x1b8   : > { %v8499_v32 = vpop.f32.mrb[71].mxu1  ;;  %v2783_v53 = vsel %vm11100_vm8, 0, %v2782_v18  ;;  %v3465_v59 = vsel %vm10053_vm2, %v3460_v2, %v3464_v51 }
 0x1b9   : > { %v11200_v60 = vadd.f32 %v8497_v39, %v10934_v28  ;;  %v8500_v46 = vadd.f32 %v8499_v32, %v8498_v5  ;;  %v11203_v16 = vadd.f32 %v8564_v20, %v11065_v55  ;;  %2784 = vst [vmem:[#allocation2 + $0x54] sm:$0x1] %v2783_v53  ;;  %v2835_v39 = vld [vmem:[#allocation2 + $0x68] sm:$0x1]  ;;  %v8039_v28 = vcombine.low %v3455_v34, %v3465_v59  ;;  %v2832_v55 = vld [vmem:[#allocation2 + $0x5c] sm:$0x1] }
 0x1ba   : > { %v2836_v20 = vsel %vm11107_vm10, 0, %v2835_v39  ;;  %v2833_v41 = vsel %vm11107_vm10, 0, %v2832_v55 }
 0x1bb   : > { %v11212_v48 = vadd.f32 %v8500_v46, %v10939_v33  ;;  %v8565_v1 = vpop.f32.mrb[72].mxu0  ;;  %2837 = vst [vmem:[#allocation2 + $0x68] sm:$0x1] %v2836_v20  ;;  %6451 = vmatprep.mubr.bf16.mxu1 %v8039_v28  ;;  %2834 = vst [vmem:[#allocation2 + $0x5c] sm:$0x1] %v2833_v41 }
 0x1bc   : > { %v8566_v27 = vpop.f32.mrb[73].mxu0  ;;  %6452 = vmatmul.mubr.bf16.vlgmr.msra.gmra.mrb[144].mxu1 %v8023_v17 }
 0x1bd   : > { %v8501_v36 = vpop.f32.mrb[72].mxu1  ;;  %v8567_v11 = vadd.f32 %v8566_v27, %v8565_v1  ;;  %v8568_v9 = vpop.f32.mrb[74].mxu0 }
 0x1be   : > { %v8502_v25 = vpop.f32.mrb[73].mxu1  ;;  %v8569_v31 = vpop.f32.mrb[75].mxu0 }
 0x1bf   : > { %v8503_v33 = vadd.f32 %v8502_v25, %v8501_v36  ;;  %v8504_v5 = vpop.f32.mrb[74].mxu1  ;;  %v11219_v30 = vadd.f32 %v8567_v11, %v11072_v10  ;;  %v8570_v32 = vadd.f32 %v8569_v31, %v8568_v9 }
 0x1c0   : > { %v8505_v51 = vpop.f32.mrb[75].mxu1 }
 0x1c1   : > { %v11222_v34 = vadd.f32 %v8503_v33, %v10949_v61  ;;  %v8506_v2 = vadd.f32 %v8505_v51, %v8504_v5  ;;  %v11225_v46 = vadd.f32 %v8570_v32, %v11075_v19 }
 0x1c3   : > { %v11228_v18 = vadd.f32 %v8506_v2, %v10951_v57  ;;  %v8571_v53 = vpop.f32.mrb[76].mxu0  ;;  %v2791_v57 = vld [vmem:[#allocation2 + $0x78] sm:$0x1]  ;;  %v3892_v2 = vrot.slane %v11163_v49, 5 }
 0x1c4   : > { %v8572_v17 = vpop.f32.mrb[77].mxu0  ;;  %v2792_v11 = vsel %vm11100_vm8, 0, %v2791_v57 }
 0x1c5   : > { %v8507_v59 = vpop.f32.mrb[76].mxu1  ;;  %v8573_v28 = vadd.f32 %v8572_v17, %v8571_v53  ;;  %v8574_v1 = vpop.f32.mrb[78].mxu0  ;;  %2793 = vst [vmem:[#allocation2 + $0x78] sm:$0x1] %v2792_v11  ;;  %v3826_v17 = vld [vmem:[#allocation2] sm:$0xe] }
 0x1c6   : > { %v8508_v39 = vpop.f32.mrb[77].mxu1  ;;  %v8575_v55 = vpop.f32.mrb[79].mxu0 }
 0x1c7   : > { %v8509_v10 = vadd.f32 %v8508_v39, %v8507_v59  ;;  %v8510_v20 = vpop.f32.mrb[78].mxu1  ;;  %v11231_v36 = vadd.f32 %v8573_v28, %v11082_v0  ;;  %v8576_v27 = vadd.f32 %v8575_v55, %v8574_v1  ;;  %v7975_v1 = vrot.slane %v3826_v17, 9 }
 0x1c8   : > { %v8511_v61 = vpop.f32.mrb[79].mxu1 }
 0x1c9   : > { %v11234_v19 = vadd.f32 %v8509_v10, %v10961_v21  ;;  %v8512_v41 = vadd.f32 %v8511_v61, %v8510_v20  ;;  %v11237_v25 = vadd.f32 %v8576_v27, %v11085_v43  ;;  %v3895_v21 = vrot.slane %v11177_v23, 5 }
 0x1ca   : > { %v3894_v10 = vrot.slane %v3892_v2, 4  ;;  %v11257_v49 = vsel %vm10252_vm5, %v7975_v1, %v3892_v2  ;;  %v9599_v1 = vld [vmem:[#allocation3 + $0x100] sm:$0xff]  }
 0x1cb   : > { %v11242_v9 = vadd.f32 %v8512_v41, %v10964_v3  ;;  %v8577_v33 = vpop.f32.mrb[80].mxu0 }
 0x1cc   : > { %v8578_v5 = vpop.f32.mrb[81].mxu0  ;;  %v11261_v23 = vsel %vm10252_vm5, %v3894_v10, %v3895_v21  ;;  %v2838_v10 = vld [vmem:[#allocation2 + $0x74] sm:$0x1] }
 0x1cd   : > { %v8641_v0 = vpop.f32.mrb[80].mxu1  ;;  %v8579_v31 = vadd.f32 %v8578_v5, %v8577_v33  ;;  %v8580_v32 = vpop.f32.mrb[82].mxu0  ;;  %v9598_v33 = vld [vmem:[#allocation3 + $0x140] sm:$0xff]  }
 0x1ce   : > { %v8642_v51 = vpop.f32.mrb[81].mxu1  ;;  %v8581_v59 = vpop.f32.mrb[83].mxu0  ;;  %8985 = vmatprep.subr.bf16.mxu1 %v9598_v33 }
 0x1cf   : > { %v8643_v53 = vadd.f32 %v8642_v51, %v8641_v0  ;;  %v8644_v43 = vpop.f32.mrb[82].mxu1  ;;  %v11247_v39 = vadd.f32 %v8579_v31, %v11091_v42  ;;  %v8582_v3 = vadd.f32 %v8581_v59, %v8580_v32  ;;  %v2841_v0 = vld [vmem:[#allocation2 + $0x80] sm:$0x1]  ;;  %8986 = vmatpush3.bf16.msra.mxu1 %v9599_v1 }
 0x1d0   : > { %v8645_v28 = vpop.f32.mrb[83].mxu1 }
 0x1d1   : > { %v8646_v20 = vadd.f32 %v8645_v28, %v8644_v43  ;;  %v11250_v55 = vadd.f32 %v8643_v53, %v11088_v62  ;;  %v11253_v61 = vadd.f32 %v8582_v3, %v11097_v13  ;;  %v2788_v62 = vld [vmem:[#allocation2 + $0x6c] sm:$0x1] }
 0x1d2   : > { %v2789_v13 = vsel %vm11100_vm8, 0, %v2788_v62  ;;  %v2839_v62 = vsel %vm11107_vm10, 0, %v2838_v10 }
 0x1d3   : > { %v11264_v42 = vadd.f32 %v8646_v20, %v11094_v8  ;;  %v8583_v41 = vpop.f32.mrb[84].mxu0  ;;  %2790 = vst [vmem:[#allocation2 + $0x6c] sm:$0x1] %v2789_v13  ;;  %v2842_v8 = vsel %vm11107_vm10, 0, %v2841_v0  ;;  %v9600_v20 = vld [vmem:[#allocation3 + $0x1c0] sm:$0xff]  }
 0x1d4   : > { %v8584_v11 = vpop.f32.mrb[85].mxu0  ;;  %2843 = vst [vmem:[#allocation2 + $0x80] sm:$0x1] %v2842_v8  ;;  %2840 = vst [vmem:[#allocation2 + $0x74] sm:$0x1] %v2839_v62  ;;  %9097 = vmatprep.subr.bf16.mxu0 %v9600_v20 }
 0x1d5   : > { %v8647_v57 = vpop.f32.mrb[84].mxu1  ;;  %v8585_v5 = vadd.f32 %v8584_v11, %v8583_v41  ;;  %v8586_v51 = vpop.f32.mrb[86].mxu0 }
 0x1d6   : > { %v8648_v31 = vpop.f32.mrb[85].mxu1  ;;  %v8587_v2 = vpop.f32.mrb[87].mxu0 }
 0x1d7   : > { %v8649_v32 = vadd.f32 %v8648_v31, %v8647_v57  ;;  %v8650_v21 = vpop.f32.mrb[86].mxu1  ;;  %v11273_v53 = vadd.f32 %v8585_v5, %v11121_v29  ;;  %v8588_v43 = vadd.f32 %v8587_v2, %v8586_v51  ;;  %v2797_v29 = vld [vmem:[#allocation2 + $0x90] sm:$0x1] }
 0x1d8   : > { %v8651_v59 = vpop.f32.mrb[87].mxu1 }
 0x1d9   : > { %v8652_v17 = vadd.f32 %v8651_v59, %v8650_v21  ;;  %v11276_v3 = vadd.f32 %v8649_v32, %v11116_v52  ;;  %v11279_v28 = vadd.f32 %v8588_v43, %v11127_v12  ;;  %v2798_v52 = vsel %vm11100_vm8, 0, %v2797_v29 }
 0x1da   : > { %2799 = vst [vmem:[#allocation2 + $0x90] sm:$0x1] %v2798_v52 }
 0x1db   : > { %v11282_v41 = vadd.f32 %v8652_v17, %v11124_v56  ;;  %v8589_v57 = vpop.f32.mrb[88].mxu0  ;;  %v2794_v17 = vld [vmem:[#allocation2 + $0x84] sm:$0x1] }
 0x1dc   : > { %v8590_v12 = vpop.f32.mrb[89].mxu0  ;;  %v2795_v10 = vsel %vm11100_vm8, 0, %v2794_v17 }
 0x1dd   : > { %v8653_v11 = vpop.f32.mrb[88].mxu1  ;;  %v8591_v13 = vadd.f32 %v8590_v12, %v8589_v57  ;;  %v8592_v0 = vpop.f32.mrb[90].mxu0  ;;  %2796 = vst [vmem:[#allocation2 + $0x84] sm:$0x1] %v2795_v10 }
 0x1de   : > { %v8654_v33 = vpop.f32.mrb[89].mxu1  ;;  %v8593_v31 = vpop.f32.mrb[91].mxu0 }
 0x1df   : > { %v8655_v5 = vadd.f32 %v8654_v33, %v8653_v11  ;;  %v8656_v56 = vpop.f32.mrb[90].mxu1  ;;  %v11289_v51 = vadd.f32 %v8591_v13, %v11135_v6  ;;  %v8594_v8 = vadd.f32 %v8593_v31, %v8592_v0 }
 0x1e0   : > { %v8657_v32 = vpop.f32.mrb[91].mxu1 }
 0x1e1   : > { %v8658_v21 = vadd.f32 %v8657_v32, %v8656_v56  ;;  %v11292_v2 = vadd.f32 %v8655_v5, %v11132_v26  ;;  %v11295_v43 = vadd.f32 %v8594_v8, %v11143_v22 }
 0x1e3   : > { %v11298_v59 = vadd.f32 %v8658_v21, %v11140_v38  ;;  %v8595_v1 = vpop.f32.mrb[92].mxu0 }
 0x1e4   : > { %v8596_v6 = vpop.f32.mrb[93].mxu0 }
 0x1e5   : > { %v8659_v20 = vpop.f32.mrb[92].mxu1  ;;  %v8597_v62 = vadd.f32 %v8596_v6, %v8595_v1  ;;  %v8598_v57 = vpop.f32.mrb[94].mxu0 }
 0x1e6   : > { %v8660_v29 = vpop.f32.mrb[93].mxu1  ;;  %v8599_v11 = vpop.f32.mrb[95].mxu0 }
 0x1e7   : > { %v8661_v52 = vadd.f32 %v8660_v29, %v8659_v20  ;;  %v8662_v26 = vpop.f32.mrb[94].mxu1  ;;  %v11303_v22 = vadd.f32 %v8597_v62, %v11153_v58  ;;  %v8600_v12 = vadd.f32 %v8599_v11, %v8598_v57  ;;  %v2847_v58 = vld [vmem:[#allocation2 + $0x98] sm:$0x1] }
 0x1e8   : > { %v8663_v38 = vpop.f32.mrb[95].mxu1 }
 0x1e9   : > { %v8664_v13 = vadd.f32 %v8663_v38, %v8662_v26  ;;  %v11306_v33 = vadd.f32 %v8661_v52, %v11148_v45  ;;  %v11309_v0 = vadd.f32 %v8600_v12, %v11159_v47  ;;  %v2848_v45 = vsel %vm11107_vm10, 0, %v2847_v58 }
 0x1ea   : > { %2849 = vst [vmem:[#allocation2 + $0x98] sm:$0x1] %v2848_v45 }
 0x1eb   : > { %v11312_v5 = vadd.f32 %v8664_v13, %v11156_v35  ;;  %v8601_v56 = vpop.f32.mrb[96].mxu0  ;;  %v2844_v35 = vld [vmem:[#allocation2 + $0x8c] sm:$0x1]  ;;  %v2803_v13 = vld [vmem:[#allocation2 + $0xa8] sm:$0x1] }
 0x1ec   : > { %v8602_v8 = vpop.f32.mrb[97].mxu0  ;;  %v2845_v52 = vsel %vm11107_vm10, 0, %v2844_v35 }
 0x1ed   : > { %v8665_v31 = vpop.f32.mrb[96].mxu1  ;;  %v8603_v32 = vadd.f32 %v8602_v8, %v8601_v56  ;;  %v8604_v17 = vpop.f32.mrb[98].mxu0  ;;  %2846 = vst [vmem:[#allocation2 + $0x8c] sm:$0x1] %v2845_v52  ;;  %v2800_v56 = vld [vmem:[#allocation2 + $0x9c] sm:$0x1] }
 0x1ee   : > { %v8666_v21 = vpop.f32.mrb[97].mxu1  ;;  %v8605_v20 = vpop.f32.mrb[99].mxu0 }
 0x1ef   : > { %v8667_v1 = vadd.f32 %v8666_v21, %v8665_v31  ;;  %v8668_v10 = vpop.f32.mrb[98].mxu1  ;;  %v11317_v6 = vadd.f32 %v8603_v32, %v11180_v63  ;;  %v8606_v47 = vadd.f32 %v8605_v20, %v8604_v17  ;;  %v2801_v21 = vsel %vm11100_vm8, 0, %v2800_v56 }
 0x1f0   : > { %v8669_v62 = vpop.f32.mrb[99].mxu1  ;;  %2802 = vst [vmem:[#allocation2 + $0x9c] sm:$0x1] %v2801_v21 }
 0x1f1   : > { %13731 = vst [vmem:[#allocation19_spill] sm:$0xff] %v11317_v6  ;;  %v8670_v29 = vadd.f32 %v8669_v62, %v8668_v10  ;;  %v11320_v57 = vadd.f32 %v8667_v1, %v11175_v24  ;;  %v11325_v26 = vadd.f32 %v8606_v47, %v11189_v15  ;;  %v2804_v24 = vsel %vm11100_vm8, 0, %v2803_v13 }
 0x1f2   : > { %2805 = vst [vmem:[#allocation2 + $0xa8] sm:$0x1] %v2804_v24 }
 0x1f3   : > { %13732 = vst [vmem:[#allocation21_spill] sm:$0xff] %v11325_v26  ;;  %v11328_v11 = vadd.f32 %v8670_v29, %v11183_v54  ;;  %v8607_v63 = vpop.f32.mrb[100].mxu0 }
 0x1f4   : > { %v8608_v38 = vpop.f32.mrb[101].mxu0 }
 0x1f5   : > { %v8671_v12 = vpop.f32.mrb[100].mxu1  ;;  %v8609_v31 = vadd.f32 %v8608_v38, %v8607_v63  ;;  %v8610_v32 = vpop.f32.mrb[102].mxu0 }
 0x1f6   : > { %v8672_v8 = vpop.f32.mrb[101].mxu1  ;;  %v8611_v58 = vpop.f32.mrb[103].mxu0 }
 0x1f7   : > { %v8673_v15 = vadd.f32 %v8672_v8, %v8671_v12  ;;  %v8674_v17 = vpop.f32.mrb[102].mxu1  ;;  %v11335_v54 = vadd.f32 %v8609_v31, %v11200_v60  ;;  %v8612_v1 = vadd.f32 %v8611_v58, %v8610_v32  ;;  %v9606_v31 = vld [vmem:[#allocation3 + $0x148] sm:$0xff]   ;;  %v2853_v8 = vld [vmem:[#allocation2 + $0xb0] sm:$0x1] }
 0x1f8   : > { %v8675_v10 = vpop.f32.mrb[103].mxu1  ;;  %8987 = vmatprep.subr.bf16.mxu1 %v9606_v31  ;;  %v2809_v31 = vld [vmem:[#allocation2 + $0xc0] sm:$0x1] }
 0x1f9   : > { %13733 = vst [vmem:[#allocation26_spill] sm:$0xff] %v11335_v54  ;;  %v8676_v20 = vadd.f32 %v8675_v10, %v8674_v17  ;;  %v11338_v45 = vadd.f32 %v8673_v15, %v11195_v37  ;;  %v11341_v47 = vadd.f32 %v8612_v1, %v11212_v48  ;;  %v2850_v1 = vld [vmem:[#allocation2 + $0xa4] sm:$0x1]  ;;  %v9601_v54 = vld [vmem:[#allocation3 + $0x180] sm:$0xff]  }
 0x1fb   : > { %13734 = vst [vmem:[#allocation9_spill] sm:$0xff] %v11341_v47  ;;  %v11344_v62 = vadd.f32 %v8676_v20, %v11203_v16  ;;  %v8613_v35 = vpop.f32.mrb[104].mxu0  ;;  %v2854_v16 = vsel %vm11107_vm10, 0, %v2853_v8 }
 0x1fc   : > { %v8614_v52 = vpop.f32.mrb[105].mxu0  ;;  %2855 = vst [vmem:[#allocation2 + $0xb0] sm:$0x1] %v2854_v16 }
 0x1fd   : > { %v8677_v29 = vpop.f32.mrb[104].mxu1  ;;  %v8615_v63 = vadd.f32 %v8614_v52, %v8613_v35  ;;  %v8616_v38 = vpop.f32.mrb[106].mxu0  ;;  %v2851_v35 = vsel %vm11107_vm10, 0, %v2850_v1 }
 0x1fe   : > { %v8678_v12 = vpop.f32.mrb[105].mxu1  ;;  %v8617_v56 = vpop.f32.mrb[107].mxu0  ;;  %2852 = vst [vmem:[#allocation2 + $0xa4] sm:$0x1] %v2851_v35 }
 0x1ff   : > { %v8679_v60 = vadd.f32 %v8678_v12, %v8677_v29  ;;  %v8680_v13 = vpop.f32.mrb[106].mxu1  ;;  %v11347_v37 = vadd.f32 %v8615_v63, %v11222_v34  ;;  %v8618_v32 = vadd.f32 %v8617_v56, %v8616_v38  ;;  %v9607_v34 = vld [vmem:[#allocation3 + $0x108] sm:$0xff]  }
 0x200   : > { %v8681_v48 = vpop.f32.mrb[107].mxu1  ;;  %8988 = vmatpush3.bf16.msra.mxu1 %v9607_v34 }
 0x201   : > { %13735 = vst [vmem:[#allocation30_spill] sm:$0xff] %v11347_v37  ;;  %v8682_v24 = vadd.f32 %v8681_v48, %v8680_v13  ;;  %v11352_v21 = vadd.f32 %v8679_v60, %v11219_v30  ;;  %v11355_v15 = vadd.f32 %v8618_v32, %v11228_v18  ;;  %v2810_v32 = vsel %vm11100_vm8, 0, %v2809_v31  ;;  %v2806_v31 = vld [vmem:[#allocation2 + $0xb4] sm:$0x1] }
 0x202   : > { %2811 = vst [vmem:[#allocation2 + $0xc0] sm:$0x1] %v2810_v32 }
 0x203   : > { %13736 = vst [vmem:[#allocation31_spill] sm:$0xff] %v11355_v15  ;;  %v11358_v17 = vadd.f32 %v8682_v24, %v11225_v46  ;;  %v8619_v58 = vpop.f32.mrb[108].mxu0 }
 0x204   : > { %v8620_v20 = vpop.f32.mrb[109].mxu0 }
 0x205   : > { %v8683_v10 = vpop.f32.mrb[108].mxu1  ;;  %v8621_v29 = vadd.f32 %v8620_v20, %v8619_v58  ;;  %v8622_v30 = vpop.f32.mrb[110].mxu0 }
 0x206   : > { %v8684_v52 = vpop.f32.mrb[109].mxu1  ;;  %v8623_v18 = vpop.f32.mrb[111].mxu0 }
 0x207   : > { %v8685_v63 = vadd.f32 %v8684_v52, %v8683_v10  ;;  %v8686_v12 = vpop.f32.mrb[110].mxu1  ;;  %v11363_v38 = vadd.f32 %v8621_v29, %v11234_v19  ;;  %v8624_v46 = vadd.f32 %v8623_v18, %v8622_v30  ;;  %v11379_v19 = vld [vmem:[%s13597_s2] ss:$0 sm:$0xff] }
 0x208   : > { %v8687_v60 = vpop.f32.mrb[111].mxu1 }
 0x209   : > { %13737 = vst [vmem:[#allocation32_spill] sm:$0xff] %v11363_v38  ;;  %v8688_v13 = vadd.f32 %v8687_v60, %v8686_v12  ;;  %v11366_v56 = vadd.f32 %v8685_v63, %v11231_v36  ;;  %v11369_v8 = vadd.f32 %v8624_v46, %v11242_v9  ;;  %v11385_v9 = vld [vmem:[%s13598_s3] ss:$0 sm:$0xff] }
 0x20b   : > { %13738 = vst [vmem:[#allocation33_spill] sm:$0xff] %v11369_v8  ;;  %v11374_v48 = vadd.f32 %v8688_v13, %v11237_v25  ;;  %v9275_v16 = vpop.f32.mrb[112].mxu0 }
 0x20c   : > { %v2525_v36 = vadd.f32 %v9275_v16, %v11276_v3  ;;  %v2516_v58 = vpop.f32.mrb[113].mxu0 }
 0x20d   : > { %v8689_v24 = vpop.f32.mrb[112].mxu1  ;;  %v2517_v25 = vadd.f32 %v2516_v58, %v11250_v55  ;;  %v9276_v1 = vpop.f32.mrb[114].mxu0  ;;  %v2859_v58 = vld [vmem:[#allocation2 + $0xc8] sm:$0x1] }
 0x20e   : > { %v8690_v34 = vpop.f32.mrb[113].mxu1  ;;  %v2652_v10 = vmul.f32 %v11379_v19, %v2525_v36  ;;  %v2528_v29 = vadd.f32 %v9276_v1, %v11282_v41  ;;  %v2519_v52 = vpop.f32.mrb[115].mxu0 }
 0x20f   : > { %v8691_v20 = vadd.f32 %v8690_v34, %v8689_v24  ;;  %v8692_v35 = vpop.f32.mrb[114].mxu1  ;;  %v2650_v30 = vmul.f32 %v11379_v19, %v2517_v25  ;;  %v2520_v63 = vadd.f32 %v2519_v52, %v11264_v42  ;;  %v2807_v42 = vsel %vm11100_vm8, 0, %v2806_v31 }
 0x210   : > { %v8693_v3 = vpop.f32.mrb[115].mxu1  ;;  %v2691_v12 = vadd.f32 %v11385_v9, %v2652_v10  ;;  %v2653_v18 = vmul.f32 %v11379_v19, %v2528_v29  ;;  %2808 = vst [vmem:[#allocation2 + $0xb4] sm:$0x1] %v2807_v42 }
 0x211   : > { %v8694_v46 = vadd.f32 %v8693_v3, %v8692_v35  ;;  %v11395_v55 = vadd.f32 %v8691_v20, %v11247_v39  ;;  %v2689_v60 = vadd.f32 %v11385_v9, %v2650_v30  ;;  %v2651_v13 = vmul.f32 %v11379_v19, %v2520_v63 }
 0x212   : > { %v2723_v41 = vmax.f32 %v2691_v12, 0.0  ;;  %v2692_v32 = vadd.f32 %v11385_v9, %v2653_v18 }
 0x213   : > { %v11401_v16 = vadd.f32 %v8694_v46, %v11253_v61  ;;  %v2721_v24 = vmax.f32 %v2689_v60, 0.0  ;;  %v2690_v36 = vadd.f32 %v11385_v9, %v2651_v13  ;;  %v9279_v39 = vpop.f32.mrb[116].mxu0  ;;  %v2860_v61 = vsel %vm11107_vm10, 0, %v2859_v58 }
 0x214   : > { %v8258_v34 = vpack.c.bf16 %v2723_v41, %v2723_v41  ;;  %v2724_v25 = vmax.f32 %v2692_v32, 0.0  ;;  %v2541_v10 = vadd.f32 %v9279_v39, %v11306_v33  ;;  %v2532_v20 = vpop.f32.mrb[117].mxu0  ;;  %2861 = vst [vmem:[#allocation2 + $0xc8] sm:$0x1] %v2860_v61 }
 0x215   : > { %v8695_v1 = vpop.f32.mrb[116].mxu1  ;;  %v8256_v35 = vpack.c.bf16 %v2721_v24, %v2721_v24  ;;  %v2722_v29 = vmax.f32 %v2690_v36, 0.0  ;;  %v2533_v30 = vadd.f32 %v2532_v20, %v11292_v2  ;;  %v9280_v3 = vpop.f32.mrb[118].mxu0 }
 0x216   : > { %v8696_v52 = vpop.f32.mrb[117].mxu1  ;;  %v2978_v63 = vshrl.u32 %v8258_v34, 16  ;;  %v2981_v12 = vshll.u32 %v8258_v34, 16  ;;  %v8259_v18 = vpack.c.bf16 %v2724_v25, %v2724_v25  ;;  %v2656_v46 = vmul.f32 %v11379_v19, %v2541_v10  ;;  %v2535_v13 = vpop.f32.mrb[119].mxu0  ;;  %v3289_v34 = vld [vmem:[#allocation2 + $0x18] sm:$0xf] }
 0x217   : > { %v8698_v60 = vpop.f32.mrb[118].mxu1  ;;  %v2961_v33 = vshrl.u32 %v8256_v35, 16  ;;  %v2964_v31 = vshll.u32 %v8256_v35, 16  ;;  %v8257_v41 = vpack.c.bf16 %v2722_v29, %v2722_v29  ;;  %v11411_v32 = vadd.f32 %v8696_v52, %v8695_v1  ;;  %v3282_v29 = vld [vmem:[#allocation2 + $0xc] sm:$0xf] }
 0x218   : > { %v8699_v42 = vpop.f32.mrb[119].mxu1  ;;  %v2980_v24 = vrot.slane %v2978_v63, 7  ;;  %v2986_v36 = vshrl.u32 %v8259_v18, 16  ;;  %v2989_v39 = vshll.u32 %v8259_v18, 16  ;;  %v2695_v2 = vadd.f32 %v11385_v9, %v2656_v46 }
 0x219   : > { %v2963_v25 = vrot.slane %v2961_v33, 7  ;;  %v2969_v10 = vshrl.u32 %v8257_v41, 16  ;;  %v2972_v20 = vshll.u32 %v8257_v41, 16  ;;  %v2654_v61 = vmul.f32 %v11379_v19, %v2533_v30 }
 0x21a   : > { %v2983_v1 = vor.u32 %v2981_v12, %v2980_v24  ;;  %v2984_v35 = vrot.slane %v2980_v24, 4  ;;  %v2988_v52 = vrot.slane %v2986_v36, 7  ;;  %v2727_v63 = vmax.f32 %v2695_v2, 0.0  ;;  %v3286_v36 = vld [vmem:[#allocation2 + $0x14] sm:$0x1] }
 0x21b   : > { %v2966_v18 = vor.u32 %v2964_v31, %v2963_v25  ;;  %v2967_v27 = vrot.slane %v2963_v25, 4  ;;  %v2971_v50 = vrot.slane %v2969_v10, 7  ;;  %v2693_v33 = vadd.f32 %v11385_v9, %v2654_v61  ;;  %v9283_v41 = vpop.f32.mrb[120].mxu0 }
 0x21c   : > { %v3290_v30 = vsel %vm11416_vm13, %v2983_v1, %v3289_v34  ;;  %v2991_v12 = vor.u32 %v2989_v39, %v2988_v52  ;;  %v2993_v24 = vrot.slane %v2988_v52, 4  ;;  %v8262_v2 = vpack.c.bf16 %v2727_v63, %v2727_v63  ;;  %v2548_v25 = vpop.f32.mrb[121].mxu0 }
 0x21d   : > { %v8701_v31 = vpop.f32.mrb[120].mxu1  ;;  %3291 = vst [vmem:[#allocation2 + $0x18] sm:$0xf] %v3290_v30  ;;  %v3283_v7 = vsel %vm11416_vm13, %v2966_v18, %v3282_v29  ;;  %v2974_v8 = vor.u32 %v2972_v20, %v2971_v50  ;;  %v2976_v15 = vrot.slane %v2971_v50, 4  ;;  %v2725_v38 = vmax.f32 %v2693_v33, 0.0  ;;  %v9284_v37 = vpop.f32.mrb[122].mxu0 }
 0x21e   : > { %v8702_v10 = vpop.f32.mrb[121].mxu1  ;;  %3284 = vst [vmem:[#allocation2 + $0xc] sm:$0xf] %v3283_v7  ;;  %v2992_v61 = vsel %vm11423_vm14, %v2984_v35, %v2991_v12  ;;  %v3294_v39 = vsel %vm11100_vm8, %v2993_v24, %v3293_v4  ;;  %v3012_v34 = vshrl.u32 %v8262_v2, 16  ;;  %v3015_v1 = vshll.u32 %v8262_v2, 16  ;;  %v2551_v63 = vpop.f32.mrb[123].mxu0 }
 0x21f   : > { %v8704_v52 = vpop.f32.mrb[122].mxu1  ;;  %3292 = vst [vmem:[#allocation2 + $0x1c] sm:$0xf] %v2992_v61  ;;  %3295 = vst [vmem:[#allocation2 + $0x20] sm:$0x1] %v3294_v39  ;;  %v2975_v20 = vsel %vm11423_vm14, %v2967_v27, %v2974_v8  ;;  %v3287_v50 = vsel %vm11100_vm8, %v2976_v15, %v3286_v36  ;;  %v8260_v29 = vpack.c.bf16 %v2725_v38, %v2725_v38  ;;  %v9614_v35 = vld [vmem:[#allocation3 + $0x150] sm:$0xff]  }
 0x220   : > { %v2544_v7 = vadd.f32 %v9280_v3, %v11312_v5  ;;  %v8705_v18 = vpop.f32.mrb[123].mxu1  ;;  %3285 = vst [vmem:[#allocation2 + $0x10] sm:$0xf] %v2975_v20  ;;  %3288 = vst [vmem:[#allocation2 + $0x14] sm:$0x1] %v3287_v50  ;;  %v11441_v4 = vrot.slane %v3012_v34, 7  ;;  %v11443_v33 = vadd.f32 %v8699_v42, %v8698_v60  ;;  %v2536_v30 = vadd.f32 %v2535_v13, %v11298_v59 }
 0x221   : > { %v2557_v12 = vadd.f32 %v9283_v41, %v11338_v45  ;;  %v9615_v24 = vld [vmem:[#allocation3 + $0x110] sm:$0xff]   ;;  %v3303_v27 = vld [vmem:[#allocation2 + $0x30] sm:$0xf]  ;;  %v2995_v8 = vshrl.u32 %v8260_v29, 16  ;;  %v2998_v2 = vshll.u32 %v8260_v29, 16  ;;  %v11448_v38 = vadd.f32 %v8702_v10, %v8701_v31  ;;  %8989 = vmatprep.subr.bf16.mxu1 %v9614_v35 }
 0x222   : > { %v2657_v15 = vmul.f32 %v11379_v19, %v2544_v7  ;;  %v3017_v5 = vor.u32 %v3015_v1, %v11441_v4  ;;  %v2655_v60 = vmul.f32 %v11379_v19, %v2536_v30  ;;  %8990 = vmatpush3.bf16.msra.mxu1 %v9615_v24  ;;  %v2549_v13 = vadd.f32 %v2548_v25, %v11320_v57  ;;  %v3296_v10 = vld [vmem:[#allocation2 + $0x24] sm:$0xf] }
 0x223   : > { %v2660_v42 = vmul.f32 %v11379_v19, %v2557_v12  ;;  %v11454_v59 = vrot.slane %v2995_v8, 7  ;;  %v2560_v41 = vadd.f32 %v9284_v37, %v11344_v62  ;;  %v9287_v36 = vpop.f32.mrb[124].mxu0  ;;  %v11463_v34 = vadd.f32 %v8705_v18, %v8704_v52 }
 0x224   : > { %v2696_v45 = vadd.f32 %v11385_v9, %v2657_v15  ;;  %v3304_v31 = vsel %vm11416_vm13, %v3017_v5, %v3303_v27  ;;  %v2694_v61 = vadd.f32 %v11385_v9, %v2655_v60  ;;  %v11465_v20 = vpop.f32.mrb[125].mxu0  ;;  %v2658_v37 = vmul.f32 %v11379_v19, %v2549_v13 }
 0x225   : > { %v2699_v39 = vadd.f32 %v11385_v9, %v2660_v42  ;;  %13743 = vst [vmem:[#allocation34_spill] sm:$0xff] %v11463_v34  ;;  %v8707_v1 = vpop.f32.mrb[124].mxu1  ;;  %3305 = vst [vmem:[#allocation2 + $0x30] sm:$0xf] %v3304_v31  ;;  %v3000_v50 = vor.u32 %v2998_v2, %v11454_v59  ;;  %v11470_v29 = vpop.f32.mrb[126].mxu0  ;;  %v2661_v30 = vmul.f32 %v11379_v19, %v2560_v41 }
 0x226   : > { %v2728_v62 = vmax.f32 %v2696_v45, 0.0  ;;  %v8708_v25 = vpop.f32.mrb[125].mxu1  ;;  %v2726_v7 = vmax.f32 %v2694_v61, 0.0  ;;  %v2552_v52 = vadd.f32 %v2551_v63, %v11328_v11  ;;  %v11476_v12 = vpop.f32.mrb[127].mxu0  ;;  %v2697_v8 = vadd.f32 %v11385_v9, %v2658_v37  ;;  %v3307_v31 = vld [vmem:[#allocation2 + $0x38] sm:$0x1] }
 0x227   : > { %v2731_v35 = vmax.f32 %v2699_v39, 0.0  ;;  %v11474_v18 = vpop.f32.mrb[126].mxu1  ;;  %v3297_v24 = vsel %vm11416_vm13, %v3000_v50, %v3296_v10  ;;  %v2573_v2 = vadd.f32 %v9287_v36, %v11366_v56  ;;  %v2700_v42 = vadd.f32 %v11385_v9, %v2661_v30  ;;  %v3300_v36 = vld [vmem:[#allocation2 + $0x2c] sm:$0x1] }
 0x228   : > { %v8263_v27 = vpack.c.bf16 %v2728_v62, %v2728_v62  ;;  %v11482_v15 = vpop.f32.mrb[127].mxu1  ;;  %3298 = vst [vmem:[#allocation2 + $0x24] sm:$0xf] %v3297_v24  ;;  %v8261_v5 = vpack.c.bf16 %v2726_v7, %v2726_v7  ;;  %v2659_v11 = vmul.f32 %v11379_v19, %v2552_v52  ;;  %v2729_v13 = vmax.f32 %v2697_v8, 0.0  ;;  %v3317_v24 = vld [vmem:[#allocation2 + $0x48] sm:$0xf] }
 0x229   : > { %v8266_v60 = vpack.c.bf16 %v2731_v35, %v2731_v35  ;;  %v2664_v41 = vmul.f32 %v11379_v19, %v2573_v2  ;;  %v2732_v37 = vmax.f32 %v2700_v42, 0.0  ;;  %v11493_v8 = vadd.f32 %v8708_v25, %v8707_v1 }
 0x22a   : > { %v3020_v63 = vshrl.u32 %v8263_v27, 16  ;;  %v3023_v45 = vshll.u32 %v8263_v27, 16  ;;  %v3003_v10 = vshrl.u32 %v8261_v5, 16  ;;  %v3006_v61 = vshll.u32 %v8261_v5, 16 }
 0x22b   : > { %v3046_v39 = vshrl.u32 %v8266_v60, 16  ;;  %v3049_v50 = vshll.u32 %v8266_v60, 16  ;;  %v8264_v62 = vpack.c.bf16 %v2729_v13, %v2729_v13  ;;  %v2698_v7 = vadd.f32 %v11385_v9, %v2659_v11  ;;  %v11488_v35 = vpop.f32.mrb[128].mxu0 }
 0x22c   : > { %v3022_v56 = vrot.slane %v3020_v63, 7  ;;  %v3005_v30 = vrot.slane %v3003_v10, 7  ;;  %v2703_v27 = vadd.f32 %v11385_v9, %v2664_v41  ;;  %v11497_v5 = vpop.f32.mrb[129].mxu0  ;;  %v9622_v10 = vld [vmem:[#allocation3 + $0x158] sm:$0xff]  }
 0x22d   : > { %v11490_v52 = vrot.slane %v3046_v39, 7  ;;  %v11495_v2 = vpop.f32.mrb[128].mxu1  ;;  %v3029_v13 = vshrl.u32 %v8264_v62, 16  ;;  %v3032_v42 = vshll.u32 %v8264_v62, 16  ;;  %v11501_v11 = vpop.f32.mrb[130].mxu0  ;;  %8991 = vmatprep.subr.bf16.mxu1 %v9622_v10 }
 0x22e   : > { %v3025_v60 = vor.u32 %v3023_v45, %v3022_v56  ;;  %v3027_v63 = vrot.slane %v3022_v56, 4  ;;  %v11499_v57 = vpop.f32.mrb[129].mxu1  ;;  %v3008_v39 = vor.u32 %v3006_v61, %v3005_v30  ;;  %v3010_v3 = vrot.slane %v3005_v30, 4  ;;  %v11507_v41 = vpop.f32.mrb[131].mxu0 }
 0x22f   : > { %v3051_v26 = vor.u32 %v3049_v50, %v11490_v52  ;;  %v3052_v1 = vrot.slane %v11490_v52, 4  ;;  %v11505_v25 = vpop.f32.mrb[130].mxu1  ;;  %v13744_v45 = vrot.slane %v11441_v4, 4  ;;  %v11515_v47 = vrot.slane %v3029_v13, 7 }
 0x230   : > { %v3308_v62 = vsel %vm11100_vm8, %v3027_v63, %v3307_v31  ;;  %v8267_v61 = vpack.c.bf16 %v2732_v37, %v2732_v37  ;;  %v11517_v30 = vpop.f32.mrb[131].mxu1  ;;  %v13745_v50 = vrot.slane %v11454_v59, 4  ;;  %v3301_v4 = vsel %vm11100_vm8, %v3010_v3, %v3300_v36  ;;  %v3310_v31 = vld [vmem:[#allocation2 + $0x3c] sm:$0xf] }
 0x231   : > { %v3026_v56 = vsel %vm11423_vm14, %v13744_v45, %v3025_v60  ;;  %3309 = vst [vmem:[#allocation2 + $0x38] sm:$0x1] %v3308_v62  ;;  %v3318_v60 = vsel %vm11416_vm13, %v3051_v26, %v3317_v24  ;;  %v2730_v63 = vmax.f32 %v2698_v7, 0.0  ;;  %3302 = vst [vmem:[#allocation2 + $0x2c] sm:$0x1] %v3301_v4  ;;  %v3034_v37 = vor.u32 %v3032_v42, %v11515_v47 }
 0x232   : > { %3306 = vst [vmem:[#allocation2 + $0x34] sm:$0xf] %v3026_v56  ;;  %v3009_v52 = vsel %vm11423_vm14, %v13745_v50, %v3008_v39  ;;  %3319 = vst [vmem:[#allocation2 + $0x48] sm:$0xf] %v3318_v60  ;;  %v3035_v13 = vrot.slane %v11515_v47, 4  ;;  %v3054_v10 = vshrl.u32 %v8267_v61, 16  ;;  %v2565_v39 = vadd.f32 %v11465_v20, %v11352_v21 }
 0x233   : > { %3299 = vst [vmem:[#allocation2 + $0x28] sm:$0xf] %v3009_v52  ;;  %v3057_v59 = vshll.u32 %v8267_v61, 16  ;;  %v8265_v45 = vpack.c.bf16 %v2730_v63, %v2730_v63  ;;  %v2735_v56 = vmax.f32 %v2703_v27, 0.0  ;;  %v2576_v3 = vadd.f32 %v11470_v29, %v11374_v48  ;;  %v11541_v24 = vpop.f32.mrb[132].mxu0  ;;  %v9623_v27 = vld [vmem:[#allocation3 + $0x118] sm:$0xff]  }
 0x234   : > { %v3311_v26 = vsel %vm11416_vm13, %v3034_v37, %v3310_v31  ;;  %v3056_v36 = vrot.slane %v3054_v10, 7  ;;  %v11537_v7 = vadd.f32 %v11482_v15, %v11474_v18  ;;  %v2568_v47 = vadd.f32 %v11476_v12, %v11358_v17  ;;  %v3321_v42 = vld [vmem:[#allocation2 + $0x50] sm:$0x1]  ;;  %v11546_v61 = vpop.f32.mrb[133].mxu0  ;;  %v11550_v12 = vld [vmem:[#allocation2 + $0xc] sm:$0xf]  ;;  %8992 = vmatpush3.bf16.msra.mxu1 %v9623_v27 }
 0x235   : > { %3312 = vst [vmem:[#allocation2 + $0x3c] sm:$0xf] %v3311_v26  ;;  %v3037_v21 = vshrl.u32 %v8265_v45, 16  ;;  %v3040_v20 = vshll.u32 %v8265_v45, 16  ;;  %v8270_v62 = vpack.c.bf16 %v2735_v56, %v2735_v56  ;;  %v2662_v48 = vmul.f32 %v11379_v19, %v2565_v39  ;;  %v11544_v29 = vpop.f32.mrb[132].mxu1  ;;  %v11554_v4 = vpop.f32.mrb[134].mxu0 }
 0x236   : > { %v3059_v50 = vor.u32 %v3057_v59, %v3056_v36  ;;  %v3061_v18 = vrot.slane %v3056_v36, 4  ;;  %v2665_v15 = vmul.f32 %v11379_v19, %v2576_v3  ;;  %v2663_v17 = vmul.f32 %v11379_v19, %v2568_v47  ;;  %v11552_v52 = vpop.f32.mrb[133].mxu1  ;;  %v11559_v59 = vpop.f32.mrb[135].mxu0  ;;  %v3314_v39 = vld [vmem:[#allocation2 + $0x44] sm:$0x1] }
 0x237   : > { %v3039_v60 = vrot.slane %v3037_v21, 7  ;;  %v3080_v31 = vshrl.u32 %v8270_v62, 16  ;;  %v3083_v63 = vshll.u32 %v8270_v62, 16  ;;  %v2701_v37 = vadd.f32 %v11385_v9, %v2662_v48  ;;  %v11557_v10 = vpop.f32.mrb[134].mxu1  ;;  %13746 = vst [vmem:[#allocation35_spill] sm:$0xff] %v11559_v59 }
 0x238   : > { %v3060_v45 = vsel %vm11423_vm14, %v3052_v1, %v3059_v50  ;;  %v3322_v56 = vsel %vm11100_vm8, %v3061_v18, %v3321_v42  ;;  %v2704_v3 = vadd.f32 %v11385_v9, %v2665_v15  ;;  %v2702_v26 = vadd.f32 %v11385_v9, %v2663_v17  ;;  %v11567_v36 = vpop.f32.mrb[135].mxu1  ;;  %v3331_v62 = vld [vmem:[#allocation2 + $0x60] sm:$0xf]  ;;  %v4003_v50 = vld [vmem:[#allocation2 + $0x10] sm:$0xf] }
 0x239   : > { %3320 = vst [vmem:[#allocation2 + $0x4c] sm:$0xf] %v3060_v45  ;;  %3323 = vst [vmem:[#allocation2 + $0x50] sm:$0x1] %v3322_v56  ;;  %v3042_v47 = vor.u32 %v3040_v20, %v3039_v60  ;;  %v3044_v27 = vrot.slane %v3039_v60, 4  ;;  %v11569_v21 = vrot.slane %v3080_v31, 7 }
 0x23a   : > { %v2733_v48 = vmax.f32 %v2701_v37, 0.0  ;;  %v2736_v6 = vmax.f32 %v2704_v3, 0.0  ;;  %v2734_v1 = vmax.f32 %v2702_v26, 0.0  ;;  %v4051_v42 = vshrl.u32 %v11550_v12, 16 }
 0x23b   : > { %v4054_v18 = vshll.u32 %v11550_v12, 16  ;;  %v3043_v15 = vsel %vm11423_vm14, %v3035_v13, %v3042_v47  ;;  %v3315_v17 = vsel %vm11100_vm8, %v3044_v27, %v3314_v39  ;;  %v3085_v20 = vor.u32 %v3083_v63, %v11569_v21  ;;  %v11580_v56 = vpop.f32.mrb[136].mxu0  ;;  %v9630_v63 = vld [vmem:[#allocation3 + $0x160] sm:$0xff]  }
 0x23c   : > { %3313 = vst [vmem:[#allocation2 + $0x40] sm:$0xf] %v3043_v15  ;;  %3316 = vst [vmem:[#allocation2 + $0x44] sm:$0x1] %v3315_v17  ;;  %v8268_v60 = vpack.c.bf16 %v2733_v48, %v2733_v48  ;;  %v8271_v31 = vpack.c.bf16 %v2736_v6, %v2736_v6  ;;  %v8269_v37 = vpack.c.bf16 %v2734_v1, %v2734_v1  ;;  %v11578_v45 = vrot.slane %v4051_v42, 4  ;;  %v11588_v39 = vpop.f32.mrb[137].mxu0 }
 0x23d   : > { %13747 = vst [vmem:[#allocation36_spill] sm:$0xff] %v11580_v56  ;;  %v3332_v3 = vsel %vm11416_vm13, %v3085_v20, %v3331_v62  ;;  %v11584_v26 = vrot.slane %v4054_v18, 5  ;;  %v4060_v13 = vshll.u32 %v4003_v50, 16  ;;  %v4064_v47 = vshrl.u32 %v4003_v50, 16  ;;  %v11586_v59 = vpop.f32.mrb[136].mxu1  ;;  %13749 = vst [vmem:[#allocation38_spill] sm:$0xff] %v11588_v39  ;;  %8993 = vmatprep.subr.bf16.mxu1 %v9630_v63 }
 0x23e   : > { %13748 = vst [vmem:[#allocation37_spill] sm:$0xff] %v11586_v59  ;;  %v3086_v27 = vrot.slane %v11569_v21, 4  ;;  %3333 = vst [vmem:[#allocation2 + $0x60] sm:$0xf] %v3332_v3  ;;  %v3063_v6 = vshrl.u32 %v8268_v60, 16  ;;  %v3066_v48 = vshll.u32 %v8268_v60, 16  ;;  %v8071_v60 = vcombine.low %v11550_v12, %v4003_v50 }
 0x23f   : > { %v3088_v1 = vshrl.u32 %v8271_v31, 16  ;;  %v11591_v42 = vpop.f32.mrb[137].mxu1  ;;  %v11593_v15 = vpop.f32.mrb[138].mxu0  ;;  %v3091_v62 = vshll.u32 %v8271_v31, 16  ;;  %v3071_v18 = vshrl.u32 %v8269_v37, 16  ;;  %v3074_v17 = vshll.u32 %v8269_v37, 16 }
 0x240   : > { %13750 = vst [vmem:[#allocation39_spill] sm:$0xff] %v11591_v42  ;;  %13751 = vst [vmem:[#allocation40_spill] sm:$0xff] %v11593_v15  ;;  %v11595_v20 = vrot.slane %v4060_v13, 5  ;;  %v11597_v56 = vpop.f32.mrb[138].mxu1  ;;  %v11599_v59 = vpop.f32.mrb[139].mxu0  ;;  %v3065_v39 = vrot.slane %v3063_v6, 7  ;;  %v4057_v37 = vor.u32 %v11584_v26, %v11578_v45  ;;  %v2428_v13 = vadd.f32 %v11411_v32, %v11273_v53  ;;  %6612 = vmatprep.mubr.bf16.mxu0 %v8071_v60 }
 0x241   : > { %13752 = vst [vmem:[#allocation41_spill] sm:$0xff] %v11597_v56  ;;  %13753 = vst [vmem:[#allocation42_spill] sm:$0xff] %v11599_v59  ;;  %v3090_v21 = vrot.slane %v3088_v1, 7  ;;  %v4066_v3 = vrot.slane %v4064_v47, 4  ;;  %v11602_v34 = vpop.f32.mrb[139].mxu1  ;;  %v3073_v31 = vrot.slane %v3071_v18, 7  ;;  %v11610_v63 = vadd.f32 %v11499_v57, %v11495_v2 }
 0x242   : > { %13754 = vst [vmem:[#allocation43_spill] sm:$0xff] %v11602_v34  ;;  %v3324_v42 = vld [vmem:[#allocation2 + $0x54] sm:$0xf]  ;;  %v3335_v15 = vld [vmem:[#allocation2 + $0x68] sm:$0x1]  ;;  %v9608_v6 = vld [vmem:[#allocation3 + $0x1c8] sm:$0xff]   ;;  %v3068_v47 = vor.u32 %v3066_v48, %v3065_v39  ;;  %v2589_v45 = vadd.f32 %v11488_v35, %v2428_v13  ;;  %v13755_v53 = vcombine.low %v11257_v49, %v11261_v23 }
 0x243   : > { %v3069_v1 = vrot.slane %v3065_v39, 4  ;;  %v3093_v12 = vor.u32 %v3091_v62, %v3090_v21  ;;  %v3095_v50 = vrot.slane %v3090_v21, 4  ;;  %v3328_v59 = vld [vmem:[#allocation2 + $0x5c] sm:$0x1]  ;;  %v3076_v34 = vor.u32 %v3074_v17, %v3073_v31  ;;  %v9609_v35 = vld [vmem:[#allocation3 + $0x188] sm:$0xff]   ;;  %v11627_v62 = vpop.f32.mrb[140].mxu0 }
 0x244   : > { %v3078_v56 = vrot.slane %v3073_v31, 4  ;;  %v4067_v18 = vor.u32 %v4066_v3, %v11595_v20  ;;  %6613 = vmatmul.mubr.bf16.vlgmr.msra.gmra.mrb[144].mxu0 %v13755_v53  ;;  %v9631_v32 = vld [vmem:[#allocation3 + $0x120] sm:$0xff]   ;;  %v3325_v57 = vsel %vm11416_vm13, %v3068_v47, %v3324_v42  ;;  %v2581_v39 = vadd.f32 %v11497_v5, %v11395_v55  ;;  %v9616_v5 = vld [vmem:[#allocation3 + $0x1d0] sm:$0xff]   ;;  %v11660_v13 = vld [vmem:[#allocation2 + $0x10] sm:$0xf] }
 0x245   : > { %v3094_v2 = vsel %vm11423_vm14, %v3086_v27, %v3093_v12  ;;  %v3336_v26 = vsel %vm11100_vm8, %v3095_v50, %v3335_v15  ;;  %v11625_v48 = vld [vmem:[#allocation2 + $0x1c] sm:$0xf]  ;;  %9098 = vmatpush3.bf16.msra.mxu0 %v9601_v54  ;;  %3326 = vst [vmem:[#allocation2 + $0x54] sm:$0xf] %v3325_v57  ;;  %v3077_v49 = vsel %vm11423_vm14, %v3069_v1, %v3076_v34  ;;  %v11634_v42 = vld [vmem:[#allocation2 + $0x18] sm:$0xf] }
 0x246   : > { %13756 = vst [vmem:[#allocation44_spill] sm:$0xff] %v11625_v48  ;;  %3334 = vst [vmem:[#allocation2 + $0x64] sm:$0xf] %v3094_v2  ;;  %v3329_v23 = vsel %vm11100_vm8, %v3078_v56, %v3328_v59  ;;  %v2668_v27 = vmul.f32 %v11379_v19, %v2589_v45  ;;  %9099 = vmatprep.subr.bf16.mxu0 %v9608_v6  ;;  %v11636_v55 = vpop.f32.mrb[140].mxu1  ;;  %v11638_v54 = vpop.f32.mrb[141].mxu0  ;;  %8994 = vmatpush3.bf16.msra.mxu1 %v9631_v32  ;;  %v11640_v15 = vrot.slane %v4057_v37, 4 }
 0x247   : > { %3337 = vst [vmem:[#allocation2 + $0x68] sm:$0x1] %v3336_v26  ;;  %3327 = vst [vmem:[#allocation2 + $0x58] sm:$0xf] %v3077_v49  ;;  %v11642_v17 = vrot.slane %v4067_v18, 4  ;;  %v2666_v34 = vmul.f32 %v11379_v19, %v2581_v39  ;;  %v11647_v56 = vpop.f32.mrb[141].mxu1  ;;  %v8072_v60 = vcombine.low %v11634_v42, %v11625_v48  ;;  %v2431_v31 = vadd.f32 %v11443_v33, %v11279_v28 }
 0x248   : > { %3330 = vst [vmem:[#allocation2 + $0x5c] sm:$0x1] %v3329_v23  ;;  %v11645_v59 = vld [vmem:[#allocation2 + $0xc] sm:$0xf]  ;;  %v11649_v21 = vpop.f32.mrb[142].mxu0  ;;  %v2707_v3 = vadd.f32 %v11385_v9, %v2668_v27  ;;  %v11658_v37 = vadd.f32 %v11517_v30, %v11505_v25  ;;  %v11662_v6 = vpop.f32.mrb[142].mxu1  ;;  %v2584_v18 = vadd.f32 %v11507_v41, %v11401_v16  ;;  %v2444_v45 = vadd.f32 %v11493_v8, %v11303_v22 }
 0x249   : > { %13757 = vst [vmem:[#allocation45_spill] sm:$0xff] %v11642_v17  ;;  %v11664_v47 = vpop.f32.mrb[143].mxu0  ;;  %v2705_v1 = vadd.f32 %v11385_v9, %v2666_v34  ;;  %v4075_v12 = vshrl.u32 %v11634_v42, 16  ;;  %9100 = vmatpush3.bf16.msra.mxu0 %v9609_v35  ;;  %v11671_v28 = vpop.f32.mrb[143].mxu1  ;;  %v9617_v33 = vld [vmem:[#allocation3 + $0x190] sm:$0xff]   ;;  %6620 = vmatprep.mubr.bf16.mxu0 %v8072_v60  ;;  %v2592_v30 = vadd.f32 %v11501_v11, %v2431_v31  ;;  %v3467_v53 = vshrl.u32 %v11645_v59, 16 }
 0x24a   : > { %v2739_v25 = vmax.f32 %v2707_v3, 0.0  ;;  %9101 = vmatprep.subr.bf16.mxu0 %v9616_v5  ;;  %v9624_v32 = vld [vmem:[#allocation3 + $0x1d8] sm:$0xff]   ;;  %v2667_v2 = vmul.f32 %v11379_v19, %v2584_v18  ;;  %v3470_v16 = vshll.u32 %v11645_v59, 16  ;;  %v3476_v41 = vshll.u32 %v11660_v13, 16  ;;  %v9632_v31 = vld [vmem:[#allocation3 + $0x1e0] sm:$0xff]   ;;  %v9639_v48 = vld [vmem:[#allocation3 + $0x128] sm:$0xff]  }
 0x24b   : > { %v2737_v57 = vmax.f32 %v2705_v1, 0.0  ;;  %v2669_v39 = vmul.f32 %v11379_v19, %v2592_v30  ;;  %v2605_v35 = vadd.f32 %v11541_v24, %v2444_v45  ;;  %v3469_v11 = vrot.slane %v3467_v53, 4  ;;  %v9625_v27 = vld [vmem:[#allocation3 + $0x198] sm:$0xff]   ;;  %v9638_v30 = vld [vmem:[#allocation3 + $0x168] sm:$0xff]  }
 0x24c   : > { %v8274_v26 = vpack.c.bf16 %v2739_v25, %v2739_v25  ;;  %v2706_v8 = vadd.f32 %v11385_v9, %v2667_v2  ;;  %v3472_v23 = vrot.slane %v3470_v16, 5  ;;  %v11684_v34 = vrot.slane %v4075_v12, 4  ;;  %v11691_v2 = vld [vmem:[#allocation2 + $0x14] sm:$0x1]  ;;  %v3345_v12 = vld [vmem:[#allocation2 + $0x78] sm:$0xf]  ;;  %8995 = vmatprep.subr.bf16.mxu1 %v9638_v30 }
 0x24d   : > { %v8272_v49 = vpack.c.bf16 %v2737_v57, %v2737_v57  ;;  %9102 = vmatpush3.bf16.msra.mxu0 %v9617_v33  ;;  %v2708_v3 = vadd.f32 %v11385_v9, %v2669_v39  ;;  %v2672_v60 = vmul.f32 %v11379_v19, %v2605_v35  ;;  %v11688_v25 = vrot.slane %v3476_v41, 5  ;;  %v9633_v35 = vld [vmem:[#allocation3 + $0x1a0] sm:$0xff]   ;;  %v3338_v41 = vld [vmem:[#allocation2 + $0x6c] sm:$0xf]  ;;  %8996 = vmatpush3.bf16.msra.mxu1 %v9639_v48 }
 0x24e   : > { %v3114_v5 = vshrl.u32 %v8274_v26, 16  ;;  %13758 = vst [vmem:[#allocation46_spill] sm:$0xff] %v11684_v34  ;;  %9103 = vmatprep.subr.bf16.mxu0 %v9624_v32  ;;  %v2738_v24 = vmax.f32 %v2706_v8, 0.0  ;;  %v3473_v18 = vor.u32 %v3472_v23, %v3469_v11  ;;  %v3117_v53 = vshll.u32 %v8274_v26, 16 }
 0x24f   : > { %v3097_v1 = vshrl.u32 %v8272_v49, 16  ;;  %v2740_v57 = vmax.f32 %v2708_v3, 0.0  ;;  %v2711_v33 = vadd.f32 %v11385_v9, %v2672_v60  ;;  %v3100_v39 = vshll.u32 %v8272_v49, 16 }
 0x250   : > { %v3116_v45 = vrot.slane %v3114_v5, 7  ;;  %v8273_v22 = vpack.c.bf16 %v2738_v24, %v2738_v24  ;;  %v3480_v32 = vshrl.u32 %v11660_v13, 16  ;;  %v3474_v5 = vrot.slane %v3473_v18, 4 }
 0x251   : > { %v3099_v16 = vrot.slane %v3097_v1, 7  ;;  %9104 = vmatpush3.bf16.msra.mxu0 %v9625_v27  ;;  %v8275_v8 = vpack.c.bf16 %v2740_v57, %v2740_v57  ;;  %v2743_v23 = vmax.f32 %v2711_v33, 0.0  ;;  %v3486_v50 = vshll.u32 %v11691_v2, 16  ;;  %v9640_v1 = vld [vmem:[#allocation3 + $0x1e8] sm:$0xff]  }
 0x252   : > { %v3119_v11 = vor.u32 %v3117_v53, %v3116_v45  ;;  %9105 = vmatprep.subr.bf16.mxu0 %v9632_v31  ;;  %v3120_v26 = vrot.slane %v3116_v45, 4  ;;  %v3105_v60 = vshrl.u32 %v8273_v22, 16  ;;  %v3108_v18 = vshll.u32 %v8273_v22, 16  ;;  %v9641_v45 = vld [vmem:[#allocation3 + $0x1a8] sm:$0xff]  }
 0x253   : > { %v3102_v3 = vor.u32 %v3100_v39, %v3099_v16  ;;  %v3103_v24 = vrot.slane %v3099_v16, 4  ;;  %v3122_v27 = vshrl.u32 %v8275_v8, 16  ;;  %v8278_v34 = vpack.c.bf16 %v2743_v23, %v2743_v23  ;;  %v3342_v39 = vld [vmem:[#allocation2 + $0x74] sm:$0x1]  ;;  %v3349_v16 = vld [vmem:[#allocation2 + $0x80] sm:$0x1] }
 0x254   : > { %v3346_v49 = vsel %vm11416_vm13, %v3119_v11, %v3345_v12  ;;  %v3107_v53 = vrot.slane %v3105_v60, 7  ;;  %v3482_v31 = vrot.slane %v3480_v32, 4  ;;  %v3125_v33 = vshll.u32 %v8275_v8, 16  ;;  %v3827_v32 = vld [vmem:[#allocation2 + $0xc] sm:$0xe] }
 0x255   : > { %3347 = vst [vmem:[#allocation2 + $0x78] sm:$0xf] %v3346_v49  ;;  %v3339_v30 = vsel %vm11416_vm13, %v3102_v3, %v3338_v41  ;;  %9106 = vmatpush3.bf16.msra.mxu0 %v9633_v35  ;;  %v3124_v57 = vrot.slane %v3122_v27, 7  ;;  %v3148_v17 = vshrl.u32 %v8278_v34, 16  ;;  %v3479_v12 = vsel %vm10053_vm2, %v3474_v5, %v11688_v25 }
 0x256   : > { %3340 = vst [vmem:[#allocation2 + $0x6c] sm:$0xf] %v3339_v30  ;;  %9107 = vmatprep.subr.bf16.mxu0 %v9640_v1  ;;  %v3110_v11 = vor.u32 %v3108_v18, %v3107_v53  ;;  %v3112_v23 = vrot.slane %v3107_v53, 4  ;;  %v3151_v41 = vshll.u32 %v8278_v34, 16  ;;  %v3483_v22 = vor.u32 %v3482_v31, %v11688_v25  ;;  %v3359_v1 = vld [vmem:[#allocation2 + $0x90] sm:$0xf] }
 0x257   : > { %v3127_v35 = vor.u32 %v3125_v33, %v3124_v57  ;;  %v3129_v48 = vrot.slane %v3124_v57, 4  ;;  %v11703_v3 = vrot.slane %v3148_v17, 7  ;;  %v3899_v8 = vrot.slane %v11660_v13, 5 }
 0x258   : > { %v3111_v60 = vsel %vm11423_vm14, %v3103_v24, %v3110_v11  ;;  %v3343_v5 = vsel %vm11100_vm8, %v3112_v23, %v3342_v39  ;;  %v3484_v49 = vrot.slane %v3483_v22, 4  ;;  %v3488_v27 = vrot.slane %v3486_v50, 5  ;;  %v11732_v11 = vld [vmem:[#allocation2 + $0x18] sm:$0xf]  ;;  %v11747_v22 = vld [vmem:[#allocation2 + $0x20] sm:$0x1] }
 0x259   : > { %9108 = vmatpush3.bf16.msra.mxu0 %v9641_v45  ;;  %v3128_v34 = vsel %vm11423_vm14, %v3120_v26, %v3127_v35  ;;  %v3350_v25 = vsel %vm11100_vm8, %v3129_v48, %v3349_v16  ;;  %3341 = vst [vmem:[#allocation2 + $0x70] sm:$0xf] %v3111_v60  ;;  %3344 = vst [vmem:[#allocation2 + $0x74] sm:$0x1] %v3343_v5  ;;  %v3153_v17 = vor.u32 %v3151_v41, %v11703_v3  ;;  %v11720_v26 = vld [vmem:[#allocation2 + $0x24] sm:$0xf] }
 0x25a   : > { %v7976_v30 = vrot.slane %v3827_v32, 9  ;;  %3348 = vst [vmem:[#allocation2 + $0x7c] sm:$0xf] %v3128_v34  ;;  %3351 = vst [vmem:[#allocation2 + $0x80] sm:$0x1] %v3350_v25  ;;  %v3489_v24 = vsel %vm10053_vm2, %v3484_v49, %v3488_v27  ;;  %v3901_v53 = vrot.slane %v3899_v8, 4  ;;  %v8721_v18 = vadd.f32 %v11552_v52, %v11544_v29 }
 0x25b   : > { %v3902_v50 = vrot.slane %v11691_v2, 5  ;;  %v13759_v31 = vshll.u32 %v11634_v42, 16  ;;  %v3360_v57 = vsel %vm11416_vm13, %v3153_v17, %v3359_v1  ;;  %v8040_v33 = vcombine.low %v3479_v12, %v3489_v24  ;;  %v11730_v16 = vld [vmem:[#allocation2 + $0x28] sm:$0xf]  ;;  %v11741_v12 = vld [vmem:[#allocation2 + $0x1c] sm:$0xf] }
 0x25c   : > { %v2436_v39 = vadd.f32 %v11448_v38, %v11289_v51  ;;  %v3154_v2 = vrot.slane %v11703_v3, 4  ;;  %3361 = vst [vmem:[#allocation2 + $0x90] sm:$0xf] %v3360_v57  ;;  %v3900_v29 = vsel %vm10252_vm5, %v7976_v30, %v3899_v8  ;;  %v8024_v42 = vcombine.low %v11645_v59, %v11660_v13  ;;  %v9646_v32 = vld [vmem:[#allocation3 + $0x170] sm:$0xff]   ;;  %v13760_v24 = vld [vmem:[#allocation34_spill] sm:$0xff] }
 0x25d   : > { %v11724_v45 = vrot.slane %v13759_v31, 5  ;;  %v3903_v52 = vsel %vm10252_vm5, %v3901_v53, %v3902_v50  ;;  %6459 = vmatprep.mubr.bf16.mxu1 %v8040_v33  ;;  %v4099_v23 = vshrl.u32 %v11720_v26, 16  ;;  %v2447_v41 = vadd.f32 %v11537_v7, %v11309_v0  ;;  %8997 = vmatprep.subr.bf16.mxu1 %v9646_v32  ;;  %v13761_v50 = vld [vmem:[#allocation26_spill] sm:$0xff]  ;;  %v3828_v57 = vld [vmem:[#allocation2 + $0x18] sm:$0xe] }
 0x25e   : > { %v8056_v51 = vcombine.low %v3900_v29, %v3903_v52  ;;  %v2597_v38 = vadd.f32 %v11546_v61, %v2436_v39  ;;  %6460 = vmatmul.mubr.bf16.gmra.mrb[148].mxu1 %v8024_v42  ;;  %v4102_v35 = vshll.u32 %v11720_v26, 16  ;;  %v8073_v59 = vcombine.low %v11720_v26, %v11730_v16  ;;  %v13762_v52 = vld [vmem:[#allocation35_spill] sm:$0xff] }
 0x25f   : > { %v3491_v13 = vshrl.u32 %v11732_v11, 16  ;;  %v3494_v48 = vshll.u32 %v11732_v11, 16  ;;  %v2608_v8 = vadd.f32 %v11554_v4, %v2447_v41  ;;  %v3500_v0 = vshll.u32 %v11741_v12, 16 }
 0x260   : > { %6621 = vmatmul.mubr.bf16.gmra.mrb[148].mxu0 %v8056_v51  ;;  %v2670_v61 = vmul.f32 %v11379_v19, %v2597_v38  ;;  %v3504_v7 = vshrl.u32 %v11741_v12, 16  ;;  %v3510_v1 = vshll.u32 %v11747_v22, 16  ;;  %v11761_v49 = vadd.f32 %v11567_v36, %v11557_v10 }
 0x261   : > { %6628 = vmatprep.mubr.bf16.mxu0 %v8073_v59  ;;  %v3493_v60 = vrot.slane %v3491_v13, 4  ;;  %v3496_v5 = vrot.slane %v3494_v48, 5  ;;  %v2673_v34 = vmul.f32 %v11379_v19, %v2608_v8  ;;  %v3502_v25 = vrot.slane %v3500_v0, 5  ;;  %v13763_v19 = vld [vmem:[#allocation36_spill] sm:$0xff]  ;;  %v9647_v8 = vld [vmem:[#allocation3 + $0x130] sm:$0xff]  }
 0x262   : > { %v2709_v27 = vadd.f32 %v11385_v9, %v2670_v61  ;;  %v3506_v4 = vrot.slane %v3504_v7, 4  ;;  %v2439_v53 = vadd.f32 %v13760_v24, %v11295_v43  ;;  %v2460_v31 = vadd.f32 %v8721_v18, %v13761_v50  ;;  %v9648_v0 = vld [vmem:[#allocation3 + $0x1f0] sm:$0xff]   ;;  %8998 = vmatpush3.bf16.msra.mxu1 %v9647_v8 }
 0x263   : > { %v3497_v30 = vor.u32 %v3496_v5, %v3493_v60  ;;  %v2712_v39 = vadd.f32 %v11385_v9, %v2673_v34  ;;  %v3512_v36 = vrot.slane %v3510_v1, 5  ;;  %v3906_v38 = vrot.slane %v11741_v12, 5  ;;  %v11778_v9 = vld [vmem:[%s13597_s2] ss:$0 sm:$0xff]  ;;  %v9649_v7 = vld [vmem:[#allocation3 + $0x1b0] sm:$0xff]   ;;  %9109 = vmatprep.subr.bf16.mxu0 %v9648_v0 }
 0x264   : > { %v2741_v33 = vmax.f32 %v2709_v27, 0.0  ;;  %v3507_v10 = vor.u32 %v3506_v4, %v3502_v25  ;;  %v2600_v42 = vadd.f32 %v13762_v52, %v2439_v53  ;;  %v2621_v51 = vadd.f32 %v13763_v19, %v2460_v31  ;;  %v13764_v31 = vld [vmem:[#allocation37_spill] sm:$0xff]  ;;  %9110 = vmatpush3.bf16.msra.mxu0 %v9649_v7  ;;  %v13766_v52 = vld [vmem:[#allocation19_spill] sm:$0xff] }
 0x265   : > { %v3498_v29 = vrot.slane %v3497_v30, 4  ;;  %v2744_v32 = vmax.f32 %v2712_v39, 0.0  ;;  %v7977_v13 = vrot.slane %v3828_v57, 9  ;;  %v3909_v61 = vrot.slane %v11747_v22, 5  ;;  %v13765_v57 = vld [vmem:[#allocation39_spill] sm:$0xff] }
 0x266   : > { %v8276_v41 = vpack.c.bf16 %v2741_v33, %v2741_v33  ;;  %v3508_v59 = vrot.slane %v3507_v10, 4  ;;  %v2671_v18 = vmul.f32 %v11778_v9, %v2600_v42  ;;  %v2676_v48 = vmul.f32 %v11778_v9, %v2621_v51  ;;  %v3352_v39 = vld [vmem:[#allocation2 + $0x84] sm:$0xf] }
 0x267   : > { %v3503_v43 = vsel %vm10053_vm2, %v3498_v29, %v3502_v25  ;;  %v8279_v5 = vpack.c.bf16 %v2744_v32, %v2744_v32  ;;  %v3907_v27 = vsel %vm10252_vm5, %v7977_v13, %v3906_v38  ;;  %v11790_v25 = vld [vmem:[%s13598_s3] ss:$0 sm:$0xff]  ;;  %v3908_v30 = vrot.slane %v3906_v38, 4 }
 0x268   : > { %v3131_v60 = vshrl.u32 %v8276_v41, 16  ;;  %v3513_v1 = vsel %vm10053_vm2, %v3508_v59, %v3512_v36  ;;  %v2710_v4 = vadd.f32 %v11790_v25, %v2671_v18  ;;  %v2715_v22 = vadd.f32 %v11790_v25, %v2676_v48  ;;  %v11805_v32 = vld [vmem:[#allocation2 + $0x30] sm:$0xf]  ;;  %v3363_v59 = vld [vmem:[#allocation2 + $0x98] sm:$0x1]  ;;  %v13767_v18 = vld [vmem:[#allocation38_spill] sm:$0xff] }
 0x269   : > { %v8041_v34 = vcombine.low %v3503_v43, %v3513_v1  ;;  %v3134_v53 = vshll.u32 %v8276_v41, 16  ;;  %v3156_v50 = vshrl.u32 %v8279_v5, 16  ;;  %v11798_v33 = vadd.f32 %v13765_v57, %v13764_v31  ;;  %v3373_v31 = vld [vmem:[#allocation2 + $0xa8] sm:$0xf] }
 0x26a   : > { %v11794_v24 = vrot.slane %v3131_v60, 7  ;;  %v2742_v10 = vmax.f32 %v2710_v4, 0.0  ;;  %v2747_v36 = vmax.f32 %v2715_v22, 0.0  ;;  %v3910_v29 = vsel %vm10252_vm5, %v3908_v30, %v3909_v61  ;;  %v11816_v60 = vld [vmem:[#allocation2 + $0x24] sm:$0xf] }
 0x26b   : > { %6467 = vmatprep.mubr.bf16.mxu1 %v8041_v34  ;;  %v2452_v42 = vadd.f32 %v11610_v63, %v13766_v52  ;;  %v3158_v51 = vrot.slane %v3156_v50, 7  ;;  %v3159_v38 = vshll.u32 %v8279_v5, 16  ;;  %v8057_v41 = vcombine.low %v3907_v27, %v3910_v29  ;;  %v3356_v50 = vld [vmem:[#allocation2 + $0x8c] sm:$0x1] }
 0x26c   : > { %v3136_v19 = vor.u32 %v3134_v53, %v11794_v24  ;;  %v8277_v13 = vpack.c.bf16 %v2742_v10, %v2742_v10  ;;  %v8282_v43 = vpack.c.bf16 %v2747_v36, %v2747_v36  ;;  %v8025_v8 = vcombine.low %v11732_v11, %v11741_v12  ;;  %v11822_v11 = vld [vmem:[#allocation2 + $0x34] sm:$0xf] }
 0x26d   : > { %v2613_v48 = vadd.f32 %v13767_v18, %v2452_v42  ;;  %v11814_v63 = vrot.slane %v4099_v23, 4  ;;  %v3161_v0 = vor.u32 %v3159_v38, %v3158_v51  ;;  %v3163_v7 = vrot.slane %v3158_v51, 4  ;;  %6629 = vmatmul.mubr.bf16.gmra.mrb[152].mxu0 %v8057_v41  ;;  %v9654_v10 = vld [vmem:[#allocation3 + $0x178] sm:$0xff]  }
 0x26e   : > { %v3353_v61 = vsel %vm11416_vm13, %v3136_v19, %v3352_v39  ;;  %v11820_v5 = vrot.slane %v4102_v35, 5  ;;  %v3139_v1 = vshrl.u32 %v8277_v13, 16  ;;  %v3182_v27 = vshrl.u32 %v8282_v43, 16  ;;  %6468 = vmatmul.mubr.bf16.gmra.mrb[152].mxu1 %v8025_v8  ;;  %v11844_v19 = vld [vmem:[#allocation2 + $0x28] sm:$0xf]  ;;  %v13769_v41 = vld [vmem:[#allocation40_spill] sm:$0xff]  ;;  %8999 = vmatprep.subr.bf16.mxu1 %v9654_v10 }
 0x26f   : > { %3354 = vst [vmem:[#allocation2 + $0x84] sm:$0xf] %v3353_v61  ;;  %v4123_v12 = vshrl.u32 %v11805_v32, 16  ;;  %v3137_v23 = vrot.slane %v11794_v24, 4  ;;  %v3162_v34 = vsel %vm11423_vm14, %v3154_v2, %v3161_v0  ;;  %v3364_v4 = vsel %vm11100_vm8, %v3163_v7, %v3363_v59  ;;  %v13768_v2 = vld [vmem:[#allocation9_spill] sm:$0xff] }
 0x270   : > { %v2674_v26 = vmul.f32 %v11778_v9, %v2613_v48  ;;  %3362 = vst [vmem:[#allocation2 + $0x94] sm:$0xf] %v3162_v34  ;;  %3365 = vst [vmem:[#allocation2 + $0x98] sm:$0x1] %v3364_v4  ;;  %v3141_v35 = vrot.slane %v3139_v1, 7  ;;  %v3142_v22 = vshll.u32 %v8277_v13, 16  ;;  %v8074_v3 = vcombine.low %v11805_v32, %v11822_v11 }
 0x271   : > { %v11833_v30 = vrot.slane %v3182_v27, 7  ;;  %v3185_v53 = vshll.u32 %v8282_v43, 16  ;;  %v2463_v57 = vadd.f32 %v11761_v49, %v13768_v2  ;;  %v3515_v39 = vshrl.u32 %v11816_v60, 16  ;;  %v3429_v13 = vld [vmem:[#allocation2 + $0x2c] sm:$0x1] }
 0x272   : > { %v2713_v24 = vadd.f32 %v11790_v25, %v2674_v26  ;;  %v3144_v36 = vor.u32 %v3142_v22, %v3141_v35  ;;  %v3146_v29 = vrot.slane %v3141_v35, 4  ;;  %v11842_v42 = vrot.slane %v4123_v12, 4  ;;  %6636 = vmatprep.mubr.bf16.mxu0 %v8074_v3  ;;  %v13771_v34 = vld [vmem:[#allocation43_spill] sm:$0xff]  ;;  %v13772_v26 = vld [vmem:[#allocation21_spill] sm:$0xff]  ;;  %v3829_v22 = vld [vmem:[#allocation2 + $0x24] sm:$0xe] }
 0x273   : > { %v3187_v52 = vor.u32 %v3185_v53, %v11833_v30  ;;  %v4126_v38 = vshll.u32 %v11805_v32, 16  ;;  %v2624_v59 = vadd.f32 %v13769_v41, %v2463_v57  ;;  %v3517_v43 = vrot.slane %v3515_v39, 4  ;;  %v13773_v39 = vld [vmem:[#allocation42_spill] sm:$0xff]  ;;  %v9655_v41 = vld [vmem:[#allocation3 + $0x138] sm:$0xff]  }
 0x274   : > { %v2745_v51 = vmax.f32 %v2713_v24, 0.0  ;;  %v3145_v49 = vsel %vm11423_vm14, %v3137_v23, %v3144_v36  ;;  %v3357_v18 = vsel %vm11100_vm8, %v3146_v29, %v3356_v50  ;;  %v3518_v8 = vshll.u32 %v11816_v60, 16  ;;  %v13770_v23 = vld [vmem:[#allocation41_spill] sm:$0xff]  ;;  %9000 = vmatpush3.bf16.msra.mxu1 %v9655_v41 }
 0x275   : > { %v3374_v48 = vsel %vm11416_vm13, %v3187_v52, %v3373_v31  ;;  %3355 = vst [vmem:[#allocation2 + $0x88] sm:$0xf] %v3145_v49  ;;  %3358 = vst [vmem:[#allocation2 + $0x8c] sm:$0x1] %v3357_v18  ;;  %v2677_v0 = vmul.f32 %v11778_v9, %v2624_v59  ;;  %v3524_v7 = vshll.u32 %v11844_v19, 16  ;;  %v3528_v1 = vshrl.u32 %v11844_v19, 16 }
 0x276   : > { %3375 = vst [vmem:[#allocation2 + $0xa8] sm:$0xf] %v3374_v48  ;;  %v8280_v61 = vpack.c.bf16 %v2745_v51, %v2745_v51  ;;  %v3520_v27 = vrot.slane %v3518_v8, 5  ;;  %v3534_v12 = vshll.u32 %v3429_v13, 16  ;;  %v11860_v4 = vadd.f32 %v13771_v34, %v13770_v23  ;;  %v3366_v59 = vld [vmem:[#allocation2 + $0x9c] sm:$0xf] }
 0x277   : > { %v2455_v35 = vadd.f32 %v11658_v37, %v13772_v26  ;;  %v2716_v31 = vadd.f32 %v11790_v25, %v2677_v0  ;;  %v3526_v24 = vrot.slane %v3524_v7, 5  ;;  %v3530_v57 = vrot.slane %v3528_v1, 4  ;;  %v9656_v37 = vld [vmem:[#allocation3 + $0x1f8] sm:$0xff]  }
 0x278   : > { %v3165_v53 = vshrl.u32 %v8280_v61, 16  ;;  %v3168_v3 = vshll.u32 %v8280_v61, 16  ;;  %v3521_v2 = vor.u32 %v3520_v27, %v3517_v43  ;;  %v7978_v52 = vrot.slane %v3829_v22, 9  ;;  %v9657_v0 = vld [vmem:[#allocation3 + $0x1b8] sm:$0xff]   ;;  %9111 = vmatprep.subr.bf16.mxu0 %v9656_v37 }
 0x279   : > { %v2616_v10 = vadd.f32 %v13773_v39, %v2455_v35  ;;  %v2748_v29 = vmax.f32 %v2716_v31, 0.0  ;;  %v3913_v51 = vrot.slane %v11844_v19, 5  ;;  %v3531_v18 = vor.u32 %v3530_v57, %v3526_v24  ;;  %9112 = vmatpush3.bf16.msra.mxu0 %v9657_v0 }
 0x27a   : > { %v11867_v36 = vrot.slane %v3165_v53, 7  ;;  %v3522_v49 = vrot.slane %v3521_v2, 4  ;;  %v3536_v48 = vrot.slane %v3534_v12, 5  ;;  %v3916_v1 = vrot.slane %v3429_v13, 5 }
 0x27b   : > { %v2675_v8 = vmul.f32 %v11778_v9, %v2616_v10  ;;  %v8283_v61 = vpack.c.bf16 %v2748_v29, %v2748_v29  ;;  %v3914_v7 = vsel %vm10252_vm5, %v7978_v52, %v3913_v51  ;;  %v3532_v23 = vrot.slane %v3531_v18, 4  ;;  %v13775_v29 = vld [vmem:[#allocation32_spill] sm:$0xff] }
 0x27c   : > { %v3170_v43 = vor.u32 %v3168_v3, %v11867_v36  ;;  %v3527_v27 = vsel %vm10053_vm2, %v3522_v49, %v3526_v24  ;;  %v3915_v26 = vrot.slane %v3913_v51, 4  ;;  %v8733_v53 = vadd.f32 %v11647_v56, %v11636_v55  ;;  %v13774_v3 = vld [vmem:[#allocation30_spill] sm:$0xff]  ;;  %v11888_v51 = vld [vmem:[#allocation2 + $0x3c] sm:$0xf]  ;;  %v3377_v56 = vld [vmem:[#allocation2 + $0xb0] sm:$0x1] }
 0x27d   : > { %v2714_v34 = vadd.f32 %v11790_v25, %v2675_v8  ;;  %v3190_v35 = vshrl.u32 %v8283_v61, 16  ;;  %v3193_v22 = vshll.u32 %v8283_v61, 16  ;;  %v3537_v13 = vsel %vm10053_vm2, %v3532_v23, %v3536_v48  ;;  %v11899_v8 = vld [vmem:[#allocation2 + $0x40] sm:$0xf]  ;;  %v3370_v23 = vld [vmem:[#allocation2 + $0xa4] sm:$0x1] }
 0x27e   : > { %v3367_v12 = vsel %vm11416_vm13, %v3170_v43, %v3366_v59  ;;  %v3917_v24 = vsel %vm10252_vm5, %v3915_v26, %v3916_v1  ;;  %v2468_v2 = vadd.f32 %v11798_v33, %v13774_v3  ;;  %v8042_v39 = vcombine.low %v3527_v27, %v3537_v13 }
 0x27f   : > { %3368 = vst [vmem:[#allocation2 + $0x9c] sm:$0xf] %v3367_v12  ;;  %v2746_v31 = vmax.f32 %v2714_v34, 0.0  ;;  %v3192_v57 = vrot.slane %v3190_v35, 7  ;;  %v8058_v10 = vcombine.low %v3914_v7, %v3917_v24  ;;  %v2476_v52 = vadd.f32 %v8733_v53, %v13775_v29 }
 0x280   : > { %v3188_v55 = vrot.slane %v11833_v30, 4  ;;  %v2629_v37 = vadd.f32 %v11638_v54, %v2468_v2  ;;  %v8026_v59 = vcombine.low %v11816_v60, %v11844_v19  ;;  %v11896_v49 = vrot.slane %v4126_v38, 5  ;;  %6475 = vmatprep.mubr.bf16.mxu1 %v8042_v39  ;;  %v11901_v30 = vld [vmem:[#allocation2 + $0x30] sm:$0xf]  ;;  %v11906_v60 = vld [vmem:[#allocation2 + $0x34] sm:$0xf] }
 0x281   : > { %v8281_v41 = vpack.c.bf16 %v2746_v31, %v2746_v31  ;;  %v3195_v33 = vor.u32 %v3193_v22, %v3192_v57  ;;  %v3197_v18 = vrot.slane %v3192_v57, 4  ;;  %6637 = vmatmul.mubr.bf16.gmra.mrb[156].mxu0 %v8058_v10  ;;  %v2637_v48 = vadd.f32 %v11627_v62, %v2476_v52  ;;  %v11921_v31 = vld [vmem:[#allocation2 + $0x38] sm:$0x1] }
 0x282   : > { %v3171_v0 = vrot.slane %v11867_v36, 4  ;;  %v2678_v43 = vmul.f32 %v11778_v9, %v2629_v37  ;;  %6476 = vmatmul.mubr.bf16.gmra.mrb[156].mxu1 %v8026_v59  ;;  %v4147_v32 = vshrl.u32 %v11888_v51, 16  ;;  %v4150_v61 = vshll.u32 %v11888_v51, 16 }
 0x283   : > { %v3173_v54 = vshrl.u32 %v8281_v41, 16  ;;  %v3196_v19 = vsel %vm11423_vm14, %v3188_v55, %v3195_v33  ;;  %v3378_v62 = vsel %vm11100_vm8, %v3197_v18, %v3377_v56  ;;  %v2680_v38 = vmul.f32 %v11778_v9, %v2637_v48  ;;  %v9660_v55 = vld [vmem:[#allocation3 + $0x200] sm:$0xff]   ;;  %v9661_v56 = vld [vmem:[%s13602_s7] sm:$0xff]  }
 0x284   : > { %3376 = vst [vmem:[#allocation2 + $0xac] sm:$0xf] %v3196_v19  ;;  %3379 = vst [vmem:[#allocation2 + $0xb0] sm:$0x1] %v3378_v62  ;;  %v3176_v7 = vshll.u32 %v8281_v41, 16  ;;  %v2717_v1 = vadd.f32 %v11790_v25, %v2678_v43  ;;  %v8075_v27 = vcombine.low %v11888_v51, %v11899_v8  ;;  %v3539_v26 = vshrl.u32 %v11901_v30, 16  ;;  %9305 = vmatprep.subr.bf16.mxu1 %v9660_v55 }
 0x285   : > { %v3175_v36 = vrot.slane %v3173_v54, 7  ;;  %v2719_v34 = vadd.f32 %v11790_v25, %v2680_v38  ;;  %v3542_v12 = vshll.u32 %v11901_v30, 16  ;;  %v3548_v35 = vshll.u32 %v11906_v60, 16  ;;  %v13776_v54 = vld [vmem:[#allocation31_spill] sm:$0xff]  ;;  %v2856_v19 = vld [vmem:[#allocation2 + $0xbc] sm:$0x1]  ;;  %9353 = vmatprep.subr.bf16.mxu0 %v9661_v56 }
 0x286   : > { %v2749_v13 = vmax.f32 %v2717_v1, 0.0  ;;  %6644 = vmatprep.mubr.bf16.mxu0 %v8075_v27  ;;  %v3552_v24 = vshrl.u32 %v11906_v60, 16  ;;  %v3541_v2 = vrot.slane %v3539_v26, 4  ;;  %v3558_v59 = vshll.u32 %v11921_v31, 16  ;;  %v3380_v27 = vld [vmem:[#allocation2 + $0xb4] sm:$0xf] }
 0x287   : > { %v3178_v22 = vor.u32 %v3176_v7, %v3175_v36  ;;  %v3180_v53 = vrot.slane %v3175_v36, 4  ;;  %v2751_v3 = vmax.f32 %v2719_v34, 0.0  ;;  %v3544_v57 = vrot.slane %v3542_v12, 5  ;;  %v13777_v34 = vld [vmem:[#allocation33_spill] sm:$0xff]  ;;  %v11961_v55 = vld [vmem:[#allocation2 + $0x48] sm:$0xf] }
 0x288   : > { %v3550_v39 = vrot.slane %v3548_v35, 5  ;;  %v8284_v52 = vpack.c.bf16 %v2749_v13, %v2749_v13  ;;  %v3554_v51 = vrot.slane %v3552_v24, 4  ;;  %v8736_v33 = vadd.f32 %v11671_v28, %v11662_v6 }
 0x289   : > { %v3179_v10 = vsel %vm11423_vm14, %v3171_v0, %v3178_v22  ;;  %v3371_v29 = vsel %vm11100_vm8, %v3180_v53, %v3370_v23  ;;  %v8286_v41 = vpack.c.bf16 %v2751_v3, %v2751_v3  ;;  %v3545_v37 = vor.u32 %v3544_v57, %v3541_v2  ;;  %v3830_v22 = vld [vmem:[#allocation2 + $0x30] sm:$0xe]  ;;  %v3387_v53 = vld [vmem:[#allocation2 + $0xc0] sm:$0xf] }
 0x28a   : > { %3369 = vst [vmem:[#allocation2 + $0xa0] sm:$0xf] %v3179_v10  ;;  %3372 = vst [vmem:[#allocation2 + $0xa4] sm:$0x1] %v3371_v29  ;;  %v3199_v18 = vshrl.u32 %v8284_v52, 16  ;;  %v11934_v48 = vrot.slane %v4147_v32, 4  ;;  %v3555_v0 = vor.u32 %v3554_v51, %v3550_v39  ;;  %v2471_v43 = vadd.f32 %v11860_v4, %v13776_v54 }
 0x28b   : > { %v3216_v62 = vshrl.u32 %v8286_v41, 16  ;;  %v3202_v38 = vshll.u32 %v8284_v52, 16  ;;  %v3546_v36 = vrot.slane %v3545_v37, 4  ;;  %v3560_v7 = vrot.slane %v3558_v59, 5  ;;  %v11969_v59 = vld [vmem:[#allocation2 + $0x4c] sm:$0xf] }
 0x28c   : > { %v11938_v1 = vrot.slane %v3199_v18, 7  ;;  %v3556_v23 = vrot.slane %v3555_v0, 4  ;;  %v2479_v6 = vadd.f32 %v8736_v33, %v13777_v34  ;;  %v2632_v28 = vadd.f32 %v11664_v47, %v2471_v43  ;;  %v11976_v54 = vld [vmem:[#allocation2 + $0x40] sm:$0xf] }
 0x28d   : > { %v11942_v32 = vrot.slane %v3216_v62, 7  ;;  %v3219_v26 = vshll.u32 %v8286_v41, 16  ;;  %v11944_v12 = vrot.slane %v4150_v61, 5  ;;  %v2857_v35 = vsel %vm11107_vm10, 0, %v2856_v19  ;;  %v3431_v62 = vld [vmem:[#allocation2 + $0x44] sm:$0x1] }
 0x28e   : > { %v3204_v13 = vor.u32 %v3202_v38, %v11938_v1  ;;  %v3551_v24 = vsel %vm10053_vm2, %v3546_v36, %v3550_v39  ;;  %v3561_v3 = vsel %vm10053_vm2, %v3556_v23, %v3560_v7  ;;  %v2640_v47 = vadd.f32 %v11649_v21, %v2479_v6  ;;  %2858 = vst [vmem:[#allocation2 + $0xbc] sm:$0x1] %v2857_v35 }
 0x28f   : > { %v3221_v2 = vor.u32 %v3219_v26, %v11942_v32  ;;  %v8043_v57 = vcombine.low %v3551_v24, %v3561_v3  ;;  %v2679_v10 = vmul.f32 %v11778_v9, %v2632_v28  ;;  %v7979_v51 = vrot.slane %v3830_v22, 9  ;;  %v3831_v26 = vld [vmem:[#allocation2 + $0x3c] sm:$0xe] }
 0x290   : > { %v3381_v29 = vsel %vm11416_vm13, %v3204_v13, %v3380_v27  ;;  %v2681_v52 = vmul.f32 %v11778_v9, %v2640_v47  ;;  %v3920_v39 = vrot.slane %v11906_v60, 5  ;;  %v3205_v56 = vrot.slane %v11938_v1, 4  ;;  %v11971_v9 = vld [vmem:[#allocation2 + $0x3c] sm:$0xf] }
 0x291   : > { %v3388_v21 = vsel %vm11416_vm13, %v3221_v2, %v3387_v53  ;;  %3382 = vst [vmem:[#allocation2 + $0xb4] sm:$0xf] %v3381_v29  ;;  %6483 = vmatprep.mubr.bf16.mxu1 %v8043_v57  ;;  %v2718_v41 = vadd.f32 %v11790_v25, %v2679_v10  ;;  %v8027_v37 = vcombine.low %v11901_v30, %v11906_v60  ;;  %v3222_v33 = vrot.slane %v11942_v32, 4 }
 0x292   : > { %3389 = vst [vmem:[#allocation2 + $0xc0] sm:$0xf] %v3388_v21  ;;  %v2720_v18 = vadd.f32 %v11790_v25, %v2681_v52  ;;  %v3922_v58 = vrot.slane %v3920_v39, 4  ;;  %v3923_v0 = vrot.slane %v11921_v31, 5  ;;  %v3921_v19 = vsel %vm10252_vm5, %v7979_v51, %v3920_v39  ;;  %v4014_v52 = vld [vmem:[#allocation2 + $0x54] sm:$0xf] }
 0x293   : > { %v2750_v43 = vmax.f32 %v2718_v41, 0.0  ;;  %6484 = vmatmul.mubr.bf16.gmra.mrb[160].mxu1 %v8027_v37  ;;  %v4171_v30 = vshrl.u32 %v11961_v55, 16  ;;  %v4174_v60 = vshll.u32 %v11961_v55, 16  ;;  %v8076_v25 = vcombine.low %v11961_v55, %v11969_v59 }
 0x294   : > { %v2752_v38 = vmax.f32 %v2720_v18, 0.0  ;;  %v3924_v36 = vsel %vm10252_vm5, %v3922_v58, %v3923_v0  ;;  %v3563_v31 = vshrl.u32 %v11971_v9, 16  ;;  %v3566_v27 = vshll.u32 %v11971_v9, 16  ;;  %v3391_v18 = vld [vmem:[#allocation2 + $0xc8] sm:$0x1] }
 0x295   : > { %v8285_v7 = vpack.c.bf16 %v2750_v43, %v2750_v43  ;;  %v8059_v1 = vcombine.low %v3921_v19, %v3924_v36  ;;  %v3572_v23 = vshll.u32 %v11976_v54, 16  ;;  %v3576_v28 = vshrl.u32 %v11976_v54, 16  ;;  %v3384_v39 = vld [vmem:[#allocation2 + $0xbc] sm:$0x1] }
 0x296   : > { %v8287_v34 = vpack.c.bf16 %v2752_v38, %v2752_v38  ;;  %v3565_v6 = vrot.slane %v3563_v31, 4  ;;  %v3582_v32 = vshll.u32 %v3431_v62, 16  ;;  %v11990_v35 = vrot.slane %v4171_v30, 4 }
 0x297   : > { %v3207_v4 = vshrl.u32 %v8285_v7, 16  ;;  %6645 = vmatmul.mubr.bf16.gmra.mrb[160].mxu0 %v8059_v1  ;;  %v3568_v22 = vrot.slane %v3566_v27, 5  ;;  %v3574_v53 = vrot.slane %v3572_v23, 5  ;;  %v3210_v3 = vshll.u32 %v8285_v7, 16  ;;  %v12001_v1 = vld [vmem:[#allocation2 + $0x58] sm:$0xf] }
 0x298   : > { %v3224_v13 = vshrl.u32 %v8287_v34, 16  ;;  %v3227_v24 = vshll.u32 %v8287_v34, 16  ;;  %6652 = vmatprep.mubr.bf16.mxu0 %v8076_v25  ;;  %v3578_v47 = vrot.slane %v3576_v28, 4  ;;  %v7980_v10 = vrot.slane %v3831_v26, 9  ;;  %v12003_v23 = vld [vmem:[#allocation2 + $0x48] sm:$0xf] }
 0x299   : > { %v3209_v2 = vrot.slane %v3207_v4, 7  ;;  %v3569_v57 = vor.u32 %v3568_v22, %v3565_v6  ;;  %v3927_v29 = vrot.slane %v11976_v54, 5  ;;  %v3584_v41 = vrot.slane %v3582_v32, 5  ;;  %v12013_v32 = vld [vmem:[#allocation2 + $0x4c] sm:$0xf] }
 0x29a   : > { %v3226_v51 = vrot.slane %v3224_v13, 7  ;;  %v3579_v21 = vor.u32 %v3578_v47, %v3574_v53  ;;  %v3930_v37 = vrot.slane %v3431_v62, 5  ;;  %v4195_v27 = vshrl.u32 %v4014_v52, 16  ;;  %v3432_v26 = vld [vmem:[#allocation2 + $0x50] sm:$0x1] }
 0x29b   : > { %v3212_v58 = vor.u32 %v3210_v3, %v3209_v2  ;;  %v3214_v0 = vrot.slane %v3209_v2, 4  ;;  %v3570_v43 = vrot.slane %v3569_v57, 4  ;;  %v3928_v19 = vsel %vm10252_vm5, %v7980_v10, %v3927_v29  ;;  %v3832_v3 = vld [vmem:[#allocation2 + $0x48] sm:$0xe] }
 0x29c   : > { %v3229_v30 = vor.u32 %v3227_v24, %v3226_v51  ;;  %v3231_v38 = vrot.slane %v3226_v51, 4  ;;  %v3580_v36 = vrot.slane %v3579_v21, 4  ;;  %v3929_v25 = vrot.slane %v3927_v29, 4  ;;  %v4016_v51 = vld [vmem:[#allocation2 + $0x60] sm:$0xf] }
 0x29d   : > { %v3213_v31 = vsel %vm11423_vm14, %v3205_v56, %v3212_v58  ;;  %v3385_v7 = vsel %vm11100_vm8, %v3214_v0, %v3384_v39  ;;  %v3575_v62 = vsel %vm10053_vm2, %v3570_v43, %v3574_v53  ;;  %v8028_v14 = vcombine.low %v11971_v9, %v11976_v54  ;;  %v12035_v43 = vld [vmem:[#allocation2 + $0x64] sm:$0xf] }
 0x29e   : > { %v3230_v34 = vsel %vm11423_vm14, %v3222_v33, %v3229_v30  ;;  %v3392_v6 = vsel %vm11100_vm8, %v3231_v38, %v3391_v18  ;;  %3383 = vst [vmem:[#allocation2 + $0xb8] sm:$0xf] %v3213_v31  ;;  %3386 = vst [vmem:[#allocation2 + $0xbc] sm:$0x1] %v3385_v7  ;;  %v3585_v56 = vsel %vm10053_vm2, %v3580_v36, %v3584_v41  ;;  %v4198_v22 = vshll.u32 %v4014_v52, 16 }
 0x29f   : > { %v3931_v28 = vsel %vm10252_vm5, %v3929_v25, %v3930_v37  ;;  %3390 = vst [vmem:[#allocation2 + $0xc4] sm:$0xf] %v3230_v34  ;;  %3393 = vst [vmem:[#allocation2 + $0xc8] sm:$0x1] %v3392_v6  ;;  %v8044_v46 = vcombine.low %v3575_v62, %v3585_v56  ;;  %v8077_v53 = vcombine.low %v4014_v52, %v12001_v1  ;;  %v3587_v13 = vshrl.u32 %v12003_v23, 16 }
 0x2a0   : > { %v8060_v33 = vcombine.low %v3928_v19, %v3931_v28  ;;  %v3590_v24 = vshll.u32 %v12003_v23, 16  ;;  %v12023_v47 = vrot.slane %v4174_v60, 5  ;;  %v3596_v2 = vshll.u32 %v12013_v32, 16  ;;  %v12031_v41 = vld [vmem:[#allocation2 + $0x54] sm:$0xf] }
 0x2a1   : > { %6491 = vmatprep.mubr.bf16.mxu1 %v8044_v46  ;;  %v3600_v57 = vshrl.u32 %v12013_v32, 16  ;;  %v3606_v10 = vshll.u32 %v3432_v26, 16  ;;  %v12027_v9 = vrot.slane %v4195_v27, 4  ;;  %v3589_v54 = vrot.slane %v3587_v13, 4  ;;  %v12041_v25 = vld [vmem:[#allocation2 + $0x58] sm:$0xf] }
 0x2a2   : > { %6653 = vmatmul.mubr.bf16.gmra.mrb[164].mxu0 %v8060_v33  ;;  %6492 = vmatmul.mubr.bf16.gmra.mrb[164].mxu1 %v8028_v14  ;;  %v3592_v29 = vrot.slane %v3590_v24, 5  ;;  %v3934_v52 = vrot.slane %v12013_v32, 5  ;;  %v3598_v60 = vrot.slane %v3596_v2, 5  ;;  %v7981_v21 = vrot.slane %v3832_v3, 9  ;;  %v3433_v27 = vld [vmem:[#allocation2 + $0x5c] sm:$0x1] }
 0x2a3   : > { %6660 = vmatprep.mubr.bf16.mxu0 %v8077_v53  ;;  %v3602_v39 = vrot.slane %v3600_v57, 4  ;;  %v12033_v37 = vrot.slane %v4198_v22, 5  ;;  %v3937_v0 = vrot.slane %v3432_v26, 5  ;;  %v3608_v30 = vrot.slane %v3606_v10, 5  ;;  %v3833_v14 = vld [vmem:[#allocation2 + $0x54] sm:$0xe] }
 0x2a4   : > { %v3593_v18 = vor.u32 %v3592_v29, %v3589_v54  ;;  %v3936_v58 = vrot.slane %v3934_v52, 4  ;;  %v3935_v38 = vsel %vm10252_vm5, %v7981_v21, %v3934_v52  ;;  %v8029_v36 = vcombine.low %v12003_v23, %v12013_v32  ;;  %v4018_v54 = vld [vmem:[#allocation2 + $0x6c] sm:$0xf] }
 0x2a5   : > { %v3603_v19 = vor.u32 %v3602_v39, %v3598_v60  ;;  %v4219_v62 = vshrl.u32 %v4016_v51, 16  ;;  %v3611_v34 = vshrl.u32 %v12031_v41, 16  ;;  %v4222_v28 = vshll.u32 %v4016_v51, 16  ;;  %v12060_v39 = vld [vmem:[#allocation2 + $0x60] sm:$0xf] }
 0x2a6   : > { %v3594_v31 = vrot.slane %v3593_v18, 4  ;;  %v3938_v7 = vsel %vm10252_vm5, %v3936_v58, %v3937_v0  ;;  %v8078_v46 = vcombine.low %v4016_v51, %v12035_v43  ;;  %v3614_v23 = vshll.u32 %v12031_v41, 16 }
 0x2a7   : > { %v3604_v6 = vrot.slane %v3603_v19, 4  ;;  %v8061_v56 = vcombine.low %v3935_v38, %v3938_v7  ;;  %v3613_v33 = vrot.slane %v3611_v34, 4  ;;  %v3620_v32 = vshll.u32 %v12041_v25, 16  ;;  %v12062_v19 = vld [vmem:[#allocation2 + $0x70] sm:$0xf] }
 0x2a8   : > { %v3599_v22 = vsel %vm10053_vm2, %v3594_v31, %v3598_v60  ;;  %v3624_v13 = vshrl.u32 %v12041_v25, 16  ;;  %v3630_v24 = vshll.u32 %v3433_v27, 16  ;;  %v3616_v2 = vrot.slane %v3614_v23, 5 }
 0x2a9   : > { %v3609_v53 = vsel %vm10053_vm2, %v3604_v6, %v3608_v30  ;;  %v3622_v57 = vrot.slane %v3620_v32, 5  ;;  %v3941_v10 = vrot.slane %v12041_v25, 5  ;;  %v12056_v29 = vrot.slane %v4219_v62, 4  ;;  %v12068_v62 = vld [vmem:[#allocation2 + $0x64] sm:$0xf] }
 0x2aa   : > { %6661 = vmatmul.mubr.bf16.gmra.mrb[168].mxu0 %v8061_v56  ;;  %v8045_v3 = vcombine.low %v3599_v22, %v3609_v53  ;;  %v12058_v52 = vrot.slane %v4222_v28, 5  ;;  %v3626_v51 = vrot.slane %v3624_v13, 4  ;;  %v7982_v60 = vrot.slane %v3833_v14, 9  ;;  %v3434_v28 = vld [vmem:[#allocation2 + $0x68] sm:$0x1] }
 0x2ab   : > { %6668 = vmatprep.mubr.bf16.mxu0 %v8078_v46  ;;  %v3617_v21 = vor.u32 %v3616_v2, %v3613_v33  ;;  %v3632_v18 = vrot.slane %v3630_v24, 5  ;;  %v3943_v58 = vrot.slane %v3941_v10, 4  ;;  %v3944_v0 = vrot.slane %v3433_v27, 5  ;;  %v3834_v22 = vld [vmem:[#allocation2 + $0x60] sm:$0xe] }
 0x2ac   : > { %6499 = vmatprep.mubr.bf16.mxu1 %v8045_v3  ;;  %v3627_v30 = vor.u32 %v3626_v51, %v3622_v57  ;;  %v3942_v38 = vsel %vm10252_vm5, %v7982_v60, %v3941_v10  ;;  %v8030_v31 = vcombine.low %v12031_v41, %v12041_v25  ;;  %v4243_v7 = vshrl.u32 %v4018_v54, 16  ;;  %v4020_v60 = vld [vmem:[#allocation2 + $0x78] sm:$0xf] }
 0x2ad   : > { %6500 = vmatmul.mubr.bf16.gmra.mrb[168].mxu1 %v8029_v36  ;;  %v3618_v34 = vrot.slane %v3617_v21, 4  ;;  %v3945_v6 = vsel %vm10252_vm5, %v3943_v58, %v3944_v0  ;;  %v4246_v56 = vshll.u32 %v4018_v54, 16  ;;  %v3635_v27 = vshrl.u32 %v12060_v39, 16 }
 0x2ae   : > { %v3628_v46 = vrot.slane %v3627_v30, 4  ;;  %v8062_v36 = vcombine.low %v3942_v38, %v3945_v6  ;;  %v3638_v23 = vshll.u32 %v12060_v39, 16  ;;  %v8079_v32 = vcombine.low %v4018_v54, %v12062_v19 }
 0x2af   : > { %v3637_v41 = vrot.slane %v3635_v27, 4  ;;  %v3644_v25 = vshll.u32 %v12068_v62, 16  ;;  %v3648_v14 = vshrl.u32 %v12068_v62, 16  ;;  %v3623_v53 = vsel %vm10053_vm2, %v3618_v34, %v3622_v57  ;;  %v12087_v57 = vld [vmem:[#allocation2 + $0x6c] sm:$0xf] }
 0x2b0   : > { %v3633_v13 = vsel %vm10053_vm2, %v3628_v46, %v3632_v18  ;;  %v3640_v24 = vrot.slane %v3638_v23, 5  ;;  %v3654_v3 = vshll.u32 %v3434_v28, 16  ;;  %v3948_v54 = vrot.slane %v12068_v62, 5  ;;  %v12089_v27 = vld [vmem:[#allocation2 + $0x7c] sm:$0xf] }
 0x2b1   : > { %v8046_v2 = vcombine.low %v3623_v53, %v3633_v13  ;;  %v3646_v10 = vrot.slane %v3644_v25, 5  ;;  %v3650_v51 = vrot.slane %v3648_v14, 4  ;;  %v12083_v21 = vrot.slane %v4243_v7, 4  ;;  %v12095_v23 = vld [vmem:[#allocation2 + $0x70] sm:$0xf] }
 0x2b2   : > { %6669 = vmatmul.mubr.bf16.gmra.mrb[172].mxu0 %v8062_v36  ;;  %v12085_v58 = vrot.slane %v4246_v56, 5  ;;  %v3641_v0 = vor.u32 %v3640_v24, %v3637_v41  ;;  %v7983_v30 = vrot.slane %v3834_v22, 9  ;;  %v3656_v38 = vrot.slane %v3654_v3, 5  ;;  %v3435_v14 = vld [vmem:[#allocation2 + $0x74] sm:$0x1] }
 0x2b3   : > { %6676 = vmatprep.mubr.bf16.mxu0 %v8079_v32  ;;  %6507 = vmatprep.mubr.bf16.mxu1 %v8046_v2  ;;  %v3651_v18 = vor.u32 %v3650_v51, %v3646_v10  ;;  %v3950_v34 = vrot.slane %v3948_v54, 4  ;;  %v3951_v6 = vrot.slane %v3434_v28, 5  ;;  %v8031_v7 = vcombine.low %v12060_v39, %v12068_v62  ;;  %v3835_v2 = vld [vmem:[#allocation2 + $0x6c] sm:$0xe] }
 0x2b4   : > { %v3642_v46 = vrot.slane %v3641_v0, 4  ;;  %v3949_v36 = vsel %vm10252_vm5, %v7983_v30, %v3948_v54  ;;  %v4267_v56 = vshrl.u32 %v4020_v60, 16  ;;  %v4270_v25 = vshll.u32 %v4020_v60, 16  ;;  %v12109_v30 = vld [vmem:[#allocation2 + $0x78] sm:$0xf] }
 0x2b5   : > { %6508 = vmatmul.mubr.bf16.gmra.mrb[172].mxu1 %v8030_v31  ;;  %v3652_v32 = vrot.slane %v3651_v18, 4  ;;  %v3952_v41 = vsel %vm10252_vm5, %v3950_v34, %v3951_v6  ;;  %v3659_v28 = vshrl.u32 %v12087_v57, 16  ;;  %v8080_v53 = vcombine.low %v4020_v60, %v12089_v27  ;;  %v4022_v6 = vld [vmem:[#allocation2 + $0x84] sm:$0xf] }
 0x2b6   : > { %v3647_v31 = vsel %vm10053_vm2, %v3642_v46, %v3646_v10  ;;  %v8063_v22 = vcombine.low %v3949_v36, %v3952_v41  ;;  %v3662_v13 = vshll.u32 %v12087_v57, 16  ;;  %v3668_v24 = vshll.u32 %v12095_v23, 16 }
 0x2b7   : > { %v3657_v39 = vsel %vm10053_vm2, %v3652_v32, %v3656_v38  ;;  %v3661_v62 = vrot.slane %v3659_v28, 4  ;;  %v3672_v3 = vshrl.u32 %v12095_v23, 16  ;;  %v3678_v10 = vshll.u32 %v3435_v14, 16  ;;  %v12116_v28 = vld [vmem:[#allocation2 + $0x88] sm:$0xf] }
 0x2b8   : > { %v8047_v51 = vcombine.low %v3647_v31, %v3657_v39  ;;  %v3664_v0 = vrot.slane %v3662_v13, 5  ;;  %v12111_v60 = vrot.slane %v4267_v56, 4  ;;  %v3670_v18 = vrot.slane %v3668_v24, 5 }
 0x2b9   : > { %v3674_v34 = vrot.slane %v3672_v3, 4  ;;  %v3955_v38 = vrot.slane %v12095_v23, 5  ;;  %v12114_v46 = vrot.slane %v4270_v25, 5  ;;  %v7984_v32 = vrot.slane %v3835_v2, 9 }
 0x2ba   : > { %6677 = vmatmul.mubr.bf16.gmra.mrb[176].mxu0 %v8063_v22  ;;  %6515 = vmatprep.mubr.bf16.mxu1 %v8047_v51  ;;  %v3665_v36 = vor.u32 %v3664_v0, %v3661_v62  ;;  %v3958_v41 = vrot.slane %v3435_v14, 5  ;;  %v3680_v22 = vrot.slane %v3678_v10, 5  ;;  %v8032_v56 = vcombine.low %v12087_v57, %v12095_v23  ;;  %v3436_v62 = vld [vmem:[#allocation2 + $0x80] sm:$0x1] }
 0x2bb   : > { %6684 = vmatprep.mubr.bf16.mxu0 %v8080_v53  ;;  %v3675_v31 = vor.u32 %v3674_v34, %v3670_v18  ;;  %v3957_v13 = vrot.slane %v3955_v38, 4  ;;  %v12120_v53 = vld [vmem:[#allocation2 + $0x7c] sm:$0xf]  ;;  %v3956_v24 = vsel %vm10252_vm5, %v7984_v32, %v3955_v38  ;;  %v4291_v25 = vshrl.u32 %v4022_v6, 16 }
 0x2bc   : > { %v3666_v39 = vrot.slane %v3665_v36, 4  ;;  %v4294_v3 = vshll.u32 %v4022_v6, 16  ;;  %v8081_v51 = vcombine.low %v4022_v6, %v12116_v28  ;;  %v3683_v0 = vshrl.u32 %v12109_v30, 16 }
 0x2bd   : > { %6516 = vmatmul.mubr.bf16.gmra.mrb[176].mxu1 %v8031_v7  ;;  %v3676_v2 = vrot.slane %v3675_v31, 4  ;;  %v3959_v14 = vsel %vm10252_vm5, %v3957_v13, %v3958_v41  ;;  %v3686_v7 = vshll.u32 %v12109_v30, 16  ;;  %v3692_v10 = vshll.u32 %v12120_v53, 16  ;;  %v3836_v41 = vld [vmem:[#allocation2 + $0x78] sm:$0xe] }
 0x2be   : > { %v3671_v57 = vsel %vm10053_vm2, %v3666_v39, %v3670_v18  ;;  %v8064_v23 = vcombine.low %v3956_v24, %v3959_v14  ;;  %v3685_v38 = vrot.slane %v3683_v0, 4  ;;  %v3696_v36 = vshrl.u32 %v12120_v53, 16  ;;  %v12137_v18 = vld [vmem:[#allocation2 + $0x90] sm:$0xf] }
 0x2bf   : > { %v3681_v34 = vsel %vm10053_vm2, %v3676_v2, %v3680_v22  ;;  %v3702_v32 = vshll.u32 %v3436_v62, 16  ;;  %v12135_v6 = vrot.slane %v4291_v25, 4  ;;  %v3688_v13 = vrot.slane %v3686_v7, 5  ;;  %v12143_v2 = vld [vmem:[#allocation2 + $0x94] sm:$0xf] }
 0x2c0   : > { %v8048_v31 = vcombine.low %v3671_v57, %v3681_v34  ;;  %v3694_v54 = vrot.slane %v3692_v10, 5  ;;  %v12139_v39 = vrot.slane %v4294_v3, 5  ;;  %v3698_v14 = vrot.slane %v3696_v36, 4  ;;  %13779 = vst [vmem:[#allocation34_spill] sm:$0xff] %v12143_v2  ;;  %v12145_v34 = vld [vmem:[#allocation2 + $0x84] sm:$0xf] }
 0x2c1   : > { %v3962_v22 = vrot.slane %v12120_v53, 5  ;;  %v3689_v0 = vor.u32 %v3688_v13, %v3685_v38  ;;  %v3704_v57 = vrot.slane %v3702_v32, 5  ;;  %v3965_v25 = vrot.slane %v3436_v62, 5  ;;  %v3437_v32 = vld [vmem:[#allocation2 + $0x8c] sm:$0x1] }
 0x2c2   : > { %6685 = vmatmul.mubr.bf16.gmra.mrb[180].mxu0 %v8064_v23  ;;  %6523 = vmatprep.mubr.bf16.mxu1 %v8048_v31  ;;  %v7985_v23 = vrot.slane %v3836_v41, 9  ;;  %v3699_v7 = vor.u32 %v3698_v14, %v3694_v54  ;;  %v8033_v3 = vcombine.low %v12109_v30, %v12120_v53  ;;  %v4315_v24 = vshrl.u32 %v12137_v18, 16 }
 0x2c3   : > { %6692 = vmatprep.mubr.bf16.mxu0 %v8081_v51  ;;  %v3964_v10 = vrot.slane %v3962_v22, 4  ;;  %v12150_v51 = vld [vmem:[#allocation2 + $0x88] sm:$0xf]  ;;  %v3690_v36 = vrot.slane %v3689_v0, 4  ;;  %v8082_v62 = vcombine.low %v12137_v18, %v12143_v2  ;;  %v3707_v30 = vshrl.u32 %v12145_v34, 16 }
 0x2c4   : > { %v3963_v31 = vsel %vm10252_vm5, %v7985_v23, %v3962_v22  ;;  %v3700_v41 = vrot.slane %v3699_v7, 4  ;;  %v3710_v53 = vshll.u32 %v12145_v34, 16  ;;  %v3716_v22 = vshll.u32 %v12150_v51, 16  ;;  %v3837_v23 = vld [vmem:[#allocation2 + $0x84] sm:$0xe] }
 0x2c5   : > { %6524 = vmatmul.mubr.bf16.gmra.mrb[180].mxu1 %v8032_v56  ;;  %v3966_v13 = vsel %vm10252_vm5, %v3964_v10, %v3965_v25  ;;  %v3695_v56 = vsel %vm10053_vm2, %v3690_v36, %v3694_v54  ;;  %v3720_v0 = vshrl.u32 %v12150_v51, 16  ;;  %v3709_v7 = vrot.slane %v3707_v30, 4  ;;  %v4026_v25 = vld [vmem:[#allocation2 + $0x9c] sm:$0xf]  ;;  %v4027_v54 = vld [vmem:[#allocation2 + $0xa0] sm:$0xf] }
 0x2c6   : > { %v8065_v14 = vcombine.low %v3963_v31, %v3966_v13  ;;  %v3705_v33 = vsel %vm10053_vm2, %v3700_v41, %v3704_v57  ;;  %v3712_v26 = vrot.slane %v3710_v53, 5  ;;  %v3726_v55 = vshll.u32 %v3437_v32, 16 }
 0x2c7   : > { %v8049_v10 = vcombine.low %v3695_v56, %v3705_v33  ;;  %v3718_v61 = vrot.slane %v3716_v22, 5  ;;  %v3722_v50 = vrot.slane %v3720_v0, 4  ;;  %v7986_v13 = vrot.slane %v3837_v23, 9  ;;  %v12171_v22 = vld [vmem:[#allocation2 + $0x90] sm:$0xf] }
 0x2c8   : > { %v3713_v36 = vor.u32 %v3712_v26, %v3709_v7  ;;  %v3728_v31 = vrot.slane %v3726_v55, 5  ;;  %v3969_v17 = vrot.slane %v12150_v51, 5  ;;  %v3972_v57 = vrot.slane %v3437_v32, 5  ;;  %v12173_v23 = vld [vmem:[#allocation2 + $0x94] sm:$0xf] }
 0x2c9   : > { %6531 = vmatprep.mubr.bf16.mxu1 %v8049_v10  ;;  %v3723_v38 = vor.u32 %v3722_v50, %v3718_v61  ;;  %v4339_v41 = vshrl.u32 %v4026_v25, 16  ;;  %v4342_v30 = vshll.u32 %v4026_v25, 16  ;;  %v4352_v0 = vshrl.u32 %v4027_v54, 16 }
 0x2ca   : > { %6693 = vmatmul.mubr.bf16.gmra.mrb[184].mxu0 %v8065_v14  ;;  %v3714_v53 = vrot.slane %v3713_v36, 4  ;;  %v3970_v33 = vsel %vm10252_vm5, %v7986_v13, %v3969_v17  ;;  %v3971_v56 = vrot.slane %v3969_v17, 4  ;;  %v4348_v14 = vshll.u32 %v4027_v54, 16  ;;  %v3438_v17 = vld [vmem:[#allocation2 + $0x98] sm:$0x1] }
 0x2cb   : > { %6700 = vmatprep.mubr.bf16.mxu0 %v8082_v62  ;;  %v3724_v62 = vrot.slane %v3723_v38, 4  ;;  %v4341_v26 = vrot.slane %v4339_v41, 4  ;;  %v4344_v55 = vrot.slane %v4342_v30, 5  ;;  %v8083_v10 = vcombine.low %v4026_v25, %v4027_v54 }
 0x2cc   : > { %v3719_v50 = vsel %vm10053_vm2, %v3714_v53, %v3718_v61  ;;  %v3973_v32 = vsel %vm10252_vm5, %v3971_v56, %v3972_v57  ;;  %v12179_v7 = vrot.slane %v4348_v14, 5  ;;  %v4354_v13 = vrot.slane %v4352_v0, 4  ;;  %v3838_v53 = vld [vmem:[#allocation2 + $0x90] sm:$0xe] }
 0x2cd   : > { %6532 = vmatmul.mubr.bf16.gmra.mrb[184].mxu1 %v8033_v3  ;;  %v3729_v36 = vsel %vm10053_vm2, %v3724_v62, %v3728_v31  ;;  %v8066_v3 = vcombine.low %v3970_v33, %v3973_v32  ;;  %v4345_v38 = vor.u32 %v4344_v55, %v4341_v26  ;;  %v3731_v30 = vshrl.u32 %v12171_v22, 16  ;;  %v4028_v31 = vld [vmem:[#allocation2 + $0xa8] sm:$0xf]  ;;  %v4029_v55 = vld [vmem:[#allocation2 + $0xac] sm:$0xf] }
 0x2ce   : > { %13780 = vst [vmem:[#allocation26_spill] sm:$0xff] %v12179_v7  ;;  %v8050_v41 = vcombine.low %v3719_v50, %v3729_v36  ;;  %v3734_v4 = vshll.u32 %v12171_v22, 16  ;;  %v3740_v61 = vshll.u32 %v12173_v23, 16  ;;  %v12186_v2 = vrot.slane %v4315_v24, 4 }
 0x2cf   : > { %v12188_v57 = vrot.slane %v4345_v38, 4  ;;  %v3744_v25 = vshrl.u32 %v12173_v23, 16  ;;  %v3750_v54 = vshll.u32 %v3438_v17, 16  ;;  %v13783_v33 = vshll.u32 %v12137_v18, 16 }
 0x2d0   : > { %13781 = vst [vmem:[#allocation35_spill] sm:$0xff] %v12186_v2  ;;  %6539 = vmatprep.mubr.bf16.mxu1 %v8050_v41  ;;  %v3733_v14 = vrot.slane %v3731_v30, 4  ;;  %v3736_v62 = vrot.slane %v3734_v4, 5  ;;  %v3742_v26 = vrot.slane %v3740_v61, 5  ;;  %v8034_v24 = vcombine.low %v12145_v34, %v12150_v51 }
 0x2d1   : > { %13782 = vst [vmem:[#allocation36_spill] sm:$0xff] %v12188_v57  ;;  %v12193_v56 = vrot.slane %v13783_v33, 5  ;;  %v4355_v0 = vor.u32 %v4354_v13, %v12179_v7  ;;  %v3746_v50 = vrot.slane %v3744_v25, 4  ;;  %v7987_v32 = vrot.slane %v3838_v53, 9  ;;  %v12203_v25 = vld [vmem:[#allocation2 + $0x9c] sm:$0xf] }
 0x2d2   : > { %6701 = vmatmul.mubr.bf16.gmra.mrb[188].mxu0 %v8066_v3  ;;  %v3737_v36 = vor.u32 %v3736_v62, %v3733_v14  ;;  %v3752_v3 = vrot.slane %v3750_v54, 5  ;;  %v4363_v38 = vshrl.u32 %v4028_v31, 16  ;;  %v4366_v41 = vshll.u32 %v4028_v31, 16  ;;  %v12207_v54 = vld [vmem:[#allocation2 + $0xa0] sm:$0xf] }
 0x2d3   : > { %13784 = vst [vmem:[#allocation37_spill] sm:$0xff] %v12193_v56  ;;  %6708 = vmatprep.mubr.bf16.mxu0 %v8083_v10  ;;  %v3976_v10 = vrot.slane %v12173_v23, 5  ;;  %v3747_v4 = vor.u32 %v3746_v50, %v3742_v26  ;;  %v4372_v30 = vshll.u32 %v4029_v55, 16  ;;  %v3979_v51 = vrot.slane %v3438_v17, 5  ;;  %v3440_v56 = vld [vmem:[#allocation2 + $0xb0] sm:$0x1] }
 0x2d4   : > { %v3738_v61 = vrot.slane %v3737_v36, 4  ;;  %v4376_v13 = vshrl.u32 %v4029_v55, 16  ;;  %v4365_v18 = vrot.slane %v4363_v38, 4  ;;  %v4368_v14 = vrot.slane %v4366_v41, 5  ;;  %v3439_v36 = vld [vmem:[#allocation2 + $0xa4] sm:$0x1] }
 0x2d5   : > { %6540 = vmatmul.mubr.bf16.gmra.mrb[188].mxu1 %v8034_v24  ;;  %v3978_v34 = vrot.slane %v3976_v10, 4  ;;  %v3748_v53 = vrot.slane %v3747_v4, 4  ;;  %v3977_v33 = vsel %vm10252_vm5, %v7987_v32, %v3976_v10  ;;  %v12213_v50 = vrot.slane %v4372_v30, 5 }
 0x2d6   : > { %v3743_v62 = vsel %vm10053_vm2, %v3738_v61, %v3742_v26  ;;  %v12215_v17 = vrot.slane %v4376_v13, 4  ;;  %v4369_v32 = vor.u32 %v4368_v14, %v4365_v18  ;;  %v3755_v10 = vshrl.u32 %v12203_v25, 16  ;;  %v3839_v61 = vld [vmem:[#allocation2 + $0x9c] sm:$0xe] }
 0x2d7   : > { %v3980_v24 = vsel %vm10252_vm5, %v3978_v34, %v3979_v51  ;;  %13785 = vst [vmem:[#allocation39_spill] sm:$0xff] %v12213_v50  ;;  %v3753_v4 = vsel %vm10053_vm2, %v3748_v53, %v3752_v3  ;;  %v8084_v41 = vcombine.low %v4028_v31, %v4029_v55  ;;  %v3758_v57 = vshll.u32 %v12203_v25, 16  ;;  %v4030_v3 = vld [vmem:[#allocation2 + $0xb4] sm:$0xf] }
 0x2d8   : > { %v8067_v7 = vcombine.low %v3977_v33, %v3980_v24  ;;  %v8051_v38 = vcombine.low %v3743_v62, %v3753_v4  ;;  %v3764_v26 = vshll.u32 %v12207_v54, 16  ;;  %v8035_v30 = vcombine.low %v12171_v22, %v12173_v23  ;;  %v4031_v23 = vld [vmem:[#allocation2 + $0xb8] sm:$0xf] }
 0x2d9   : > { %v3757_v34 = vrot.slane %v3755_v10, 4  ;;  %v3768_v51 = vshrl.u32 %v12207_v54, 16  ;;  %v3774_v13 = vshll.u32 %v3439_v36, 16  ;;  %v12225_v53 = vrot.slane %v4355_v0, 4 }
 0x2da   : > { %6709 = vmatmul.mubr.bf16.gmra.mrb[192].mxu0 %v8067_v7  ;;  %6547 = vmatprep.mubr.bf16.mxu1 %v8051_v38  ;;  %v4379_v31 = vor.u32 %v12215_v17, %v12213_v50  ;;  %v3760_v55 = vrot.slane %v3758_v57, 5  ;;  %v3766_v18 = vrot.slane %v3764_v26, 5  ;;  %v12229_v33 = vrot.slane %v4369_v32, 4  ;;  %v3841_v50 = vld [vmem:[#allocation2 + $0xb4] sm:$0xe] }
 0x2db   : > { %13786 = vst [vmem:[#allocation19_spill] sm:$0xff] %v12225_v53  ;;  %6716 = vmatprep.mubr.bf16.mxu0 %v8084_v41  ;;  %v3770_v7 = vrot.slane %v3768_v51, 4  ;;  %v7988_v14 = vrot.slane %v3839_v61, 9  ;;  %v3983_v22 = vrot.slane %v12207_v54, 5  ;;  %v3776_v24 = vrot.slane %v3774_v13, 5 }
 0x2dc   : > { %13787 = vst [vmem:[#allocation38_spill] sm:$0xff] %v12229_v33  ;;  %v3761_v62 = vor.u32 %v3760_v55, %v3757_v34  ;;  %v3986_v4 = vrot.slane %v3439_v36, 5  ;;  %v4387_v0 = vshrl.u32 %v4030_v3, 16  ;;  %v4390_v41 = vshll.u32 %v4030_v3, 16  ;;  %v12234_v53 = vld [vmem:[#allocation2 + $0xa8] sm:$0xf] }
 0x2dd   : > { %6548 = vmatmul.mubr.bf16.gmra.mrb[192].mxu1 %v8035_v30  ;;  %v3771_v10 = vor.u32 %v3770_v7, %v3766_v18  ;;  %v3984_v38 = vsel %vm10252_vm5, %v7988_v14, %v3983_v22  ;;  %v3985_v17 = vrot.slane %v3983_v22, 4  ;;  %v4396_v30 = vshll.u32 %v4031_v23, 16  ;;  %v12238_v36 = vld [vmem:[#allocation2 + $0xac] sm:$0xf] }
 0x2de   : > { %v3762_v57 = vrot.slane %v3761_v62, 4  ;;  %v4389_v26 = vrot.slane %v4387_v0, 4  ;;  %v4400_v32 = vshrl.u32 %v4031_v23, 16  ;;  %v4392_v34 = vrot.slane %v4390_v41, 5 }
 0x2df   : > { %v3772_v61 = vrot.slane %v3771_v10, 4  ;;  %v3987_v51 = vsel %vm10252_vm5, %v3985_v17, %v3986_v4  ;;  %v8085_v13 = vcombine.low %v4030_v3, %v4031_v23  ;;  %v12242_v14 = vrot.slane %v4396_v30, 5  ;;  %v4032_v30 = vld [vmem:[#allocation2 + $0xc0] sm:$0xf] }
 0x2e0   : > { %v3767_v55 = vsel %vm10053_vm2, %v3762_v57, %v3766_v18  ;;  %v8068_v7 = vcombine.low %v3984_v38, %v3987_v51  ;;  %v4402_v22 = vrot.slane %v4400_v32, 4  ;;  %v4393_v0 = vor.u32 %v4392_v34, %v4389_v26  ;;  %v3840_v38 = vld [vmem:[#allocation2 + $0xa8] sm:$0xe] }
 0x2e1   : > { %13788 = vst [vmem:[#allocation9_spill] sm:$0xff] %v12242_v14  ;;  %v3777_v62 = vsel %vm10053_vm2, %v3772_v61, %v3776_v24  ;;  %v3779_v10 = vshrl.u32 %v12234_v53, 16  ;;  %v3782_v4 = vshll.u32 %v12234_v53, 16  ;;  %v3788_v23 = vshll.u32 %v12238_v36, 16 }
 0x2e2   : > { %v8052_v17 = vcombine.low %v3767_v55, %v3777_v62  ;;  %6717 = vmatmul.mubr.bf16.gmra.mrb[196].mxu0 %v8068_v7  ;;  %v4403_v3 = vor.u32 %v4402_v22, %v12242_v14  ;;  %v3792_v18 = vshrl.u32 %v12238_v36, 16  ;;  %v8036_v41 = vcombine.low %v12203_v25, %v12207_v54  ;;  %v4033_v62 = vld [vmem:[#allocation2 + $0xc4] sm:$0xf]  ;;  %v12272_v55 = vld [vmem:[#allocation2 + $0xb8] sm:$0xf] }
 0x2e3   : > { %v12253_v57 = vrot.slane %v4393_v0, 4  ;;  %6724 = vmatprep.mubr.bf16.mxu0 %v8085_v13  ;;  %v3781_v24 = vrot.slane %v3779_v10, 4  ;;  %v3784_v26 = vrot.slane %v3782_v4, 5  ;;  %v12255_v32 = vrot.slane %v4379_v31, 4 }
 0x2e4   : > { %6555 = vmatprep.mubr.bf16.mxu1 %v8052_v17  ;;  %v3790_v61 = vrot.slane %v3788_v23, 5  ;;  %v3794_v51 = vrot.slane %v3792_v18, 4  ;;  %v3798_v34 = vshll.u32 %v3440_v56, 16  ;;  %v12261_v7 = vrot.slane %v4403_v3, 4  ;;  %v12268_v18 = vld [vmem:[#allocation2 + $0xb4] sm:$0xf] }
 0x2e5   : > { %13789 = vst [vmem:[#allocation40_spill] sm:$0xff] %v12253_v57  ;;  %13790 = vst [vmem:[#allocation41_spill] sm:$0xff] %v12255_v32  ;;  %6556 = vmatmul.mubr.bf16.gmra.mrb[196].mxu1 %v8036_v41  ;;  %v3785_v25 = vor.u32 %v3784_v26, %v3781_v24  ;;  %v3990_v54 = vrot.slane %v12238_v36, 5  ;;  %v7989_v22 = vrot.slane %v3840_v38, 9  ;;  %v4411_v0 = vshrl.u32 %v4032_v30, 16 }
 0x2e6   : > { %13791 = vst [vmem:[#allocation43_spill] sm:$0xff] %v12261_v7  ;;  %v3795_v13 = vor.u32 %v3794_v51, %v3790_v61  ;;  %v3993_v17 = vrot.slane %v3440_v56, 5  ;;  %v4414_v23 = vshll.u32 %v4032_v30, 16  ;;  %v3800_v41 = vrot.slane %v3798_v34, 5 }
 0x2e7   : > { %v3786_v10 = vrot.slane %v3785_v25, 4  ;;  %v3992_v4 = vrot.slane %v3990_v54, 4  ;;  %v3991_v24 = vsel %vm10252_vm5, %v7989_v22, %v3990_v54  ;;  %v4413_v26 = vrot.slane %v4411_v0, 4  ;;  %v3441_v25 = vld [vmem:[#allocation2 + $0xbc] sm:$0x1] }
 0x2e8   : > { %v3796_v3 = vrot.slane %v3795_v13, 4  ;;  %v4416_v38 = vrot.slane %v4414_v23, 5  ;;  %v4420_v31 = vshll.u32 %v4033_v62, 16  ;;  %v4424_v14 = vshrl.u32 %v4033_v62, 16 }
 0x2e9   : > { %v3994_v51 = vsel %vm10252_vm5, %v3992_v4, %v3993_v17  ;;  %v3791_v56 = vsel %vm10053_vm2, %v3786_v10, %v3790_v61  ;;  %v8086_v57 = vcombine.low %v4032_v30, %v4033_v62  ;;  %v3803_v22 = vshrl.u32 %v12268_v18, 16  ;;  %v12282_v4 = vld [vmem:[#allocation2 + $0x18] sm:$0xf]  ;;  %v12284_v17 = vpop.f32.mrb[144].mxu1  ;;  %v12290_v62 = vld [vmem:[#allocation2 + $0x1c] sm:$0xf] }
 0x2ea   : > { %v3801_v13 = vsel %vm10053_vm2, %v3796_v3, %v3800_v41  ;;  %v8069_v34 = vcombine.low %v3991_v24, %v3994_v51  ;;  %v4417_v54 = vor.u32 %v4416_v38, %v4413_v26  ;;  %v3806_v0 = vshll.u32 %v12268_v18, 16  ;;  %13792 = vst [vmem:[#allocation21_spill] sm:$0xff] %v12284_v17  ;;  %v12292_v3 = vpop.f32.mrb[145].mxu1 }
 0x2eb   : > { %v8053_v7 = vcombine.low %v3791_v56, %v3801_v13  ;;  %v8037_v61 = vcombine.low %v12234_v53, %v12238_v36  ;;  %v3812_v10 = vshll.u32 %v12272_v55, 16  ;;  %v3816_v23 = vshrl.u32 %v12272_v55, 16  ;;  %13793 = vst [vmem:[#allocation42_spill] sm:$0xff] %v12292_v3  ;;  %v12298_v38 = vpop.f32.mrb[146].mxu1 }
 0x2ec   : > { %6725 = vmatmul.mubr.bf16.gmra.mrb[200].mxu0 %v8069_v34  ;;  %v3822_v30 = vshll.u32 %v3441_v25, 16  ;;  %v12294_v41 = vrot.slane %v4420_v31, 5  ;;  %v12296_v24 = vrot.slane %v4424_v14, 4  ;;  %v3805_v26 = vrot.slane %v3803_v22, 4  ;;  %13796 = vst [vmem:[#allocation31_spill] sm:$0xff] %v12298_v38  ;;  %v12302_v34 = vpop.f32.mrb[147].mxu1 }
 0x2ed   : > { %6563 = vmatprep.mubr.bf16.mxu1 %v8053_v7  ;;  %6732 = vmatprep.mubr.bf16.mxu0 %v8086_v57  ;;  %v3808_v51 = vrot.slane %v3806_v0, 5  ;;  %v12300_v53 = vrot.slane %v4417_v54, 4  ;;  %v3814_v36 = vrot.slane %v3812_v10, 5  ;;  %v3818_v56 = vrot.slane %v3816_v23, 4  ;;  %13798 = vst [vmem:[#allocation16_spill] sm:$0xff] %v12302_v34 }
 0x2ee   : > { %13794 = vst [vmem:[#allocation30_spill] sm:$0xff] %v12294_v41  ;;  %13795 = vst [vmem:[#allocation32_spill] sm:$0xff] %v12296_v24  ;;  %6564 = vmatmul.mubr.bf16.gmra.mrb[200].mxu1 %v8037_v61  ;;  %v7990_v13 = vrot.slane %v3841_v50, 9  ;;  %v3824_v32 = vrot.slane %v3822_v30, 5  ;;  %v3997_v7 = vrot.slane %v12272_v55, 5  ;;  %v4000_v31 = vrot.slane %v3441_v25, 5 }
 0x2ef   : > { %13797 = vst [vmem:[#allocation33_spill] sm:$0xff] %v12300_v53  ;;  %v3809_v33 = vor.u32 %v3808_v51, %v3805_v26  ;;  %v3819_v14 = vor.u32 %v3818_v56, %v3814_v36  ;;  %v8038_v57 = vcombine.low %v12268_v18, %v12272_v55  ;;  %v4643_v22 = vld [vmem:[#allocation2 + $0x20] sm:$0x1]  ;;  %v4660_v0 = vshrl.u32 %v12282_v4, 16  ;;  %v4434_v30 = vld [vmem:[#allocation2 + $0xc] sm:$0xe] }
 0x2f0   : > { %v4663_v54 = vshll.u32 %v12282_v4, 16  ;;  %v3998_v50 = vsel %vm10252_vm5, %v7990_v13, %v3997_v7  ;;  %v3999_v10 = vrot.slane %v3997_v7, 4  ;;  %v4669_v23 = vshll.u32 %v12290_v62, 16  ;;  %v4034_v53 = vld [vmem:[#allocation2 + $0x14] sm:$0x1] }
 0x2f1   : > { %v3810_v61 = vrot.slane %v3809_v33, 4  ;;  %v3820_v26 = vrot.slane %v3819_v14, 4  ;;  %v4662_v51 = vrot.slane %v4660_v0, 4  ;;  %v4673_v56 = vshrl.u32 %v12290_v62, 16  ;;  %v12319_v14 = vld [vmem:[#allocation2 + $0x24] sm:$0xf] }
 0x2f2   : > { %v4665_v25 = vrot.slane %v4663_v54, 5  ;;  %v4001_v18 = vsel %vm10252_vm5, %v3999_v10, %v4000_v31  ;;  %v4671_v33 = vrot.slane %v4669_v23, 5  ;;  %v4679_v24 = vshll.u32 %v4643_v22, 16  ;;  %v12321_v10 = vld [vmem:[#allocation2 + $0x28] sm:$0xf] }
 0x2f3   : > { %v3815_v55 = vsel %vm10053_vm2, %v3810_v61, %v3814_v36  ;;  %v3825_v13 = vsel %vm10053_vm2, %v3820_v26, %v3824_v32  ;;  %v8070_v7 = vcombine.low %v3998_v50, %v4001_v18  ;;  %v4675_v2 = vrot.slane %v4673_v56, 4  ;;  %v9704_v61 = vld [vmem:[#allocation2 + $0x10] sm:$0xf] }
 0x2f4   : > { %v4666_v41 = vor.u32 %v4665_v25, %v4662_v51  ;;  %v8054_v0 = vcombine.low %v3815_v55, %v3825_v13  ;;  %v4681_v54 = vrot.slane %v4679_v24, 5  ;;  %v4070_v34 = vshll.u32 %v4034_v53, 16 }
 0x2f5   : > { %v7991_v38 = vrot.slane %v4434_v30, 9  ;;  %6733 = vmatmul.mubr.bf16.gmra.mrb[204].mxu0 %v8070_v7  ;;  %v4676_v36 = vor.u32 %v4675_v2, %v4671_v33  ;;  %v4500_v17 = vrot.slane %v9704_v61, 5  ;;  %v4503_v31 = vrot.slane %v4034_v53, 5  ;;  %v13799_v30 = vld [vmem:[#allocation45_spill] sm:$0xff] }
 0x2f6   : > { %v4667_v3 = vrot.slane %v4666_v41, 4  ;;  %6571 = vmatprep.mubr.bf16.mxu1 %v8054_v0  ;;  %v4072_v22 = vrot.slane %v4070_v34, 5  ;;  %v8119_v32 = vcombine.low %v12282_v4, %v12290_v62  ;;  %v4063_v24 = vsel %vm10053_vm2, %v11640_v15, %v11595_v20  ;;  %v5044_v34 = vld [vmem:[#allocation2 + $0x24] sm:$0xe]  ;;  %v4644_v62 = vld [vmem:[#allocation2 + $0x2c] sm:$0x1] }
 0x2f7   : > { %v4684_v50 = vshrl.u32 %v12319_v14, 16  ;;  %6572 = vmatmul.mubr.bf16.gmra.mrb[204].mxu1 %v8038_v57  ;;  %v4677_v41 = vrot.slane %v4676_v36, 4  ;;  %v4501_v53 = vsel %vm10252_vm5, %v7991_v38, %v4500_v17  ;;  %v4502_v23 = vrot.slane %v4500_v17, 4  ;;  %v4435_v38 = vld [vmem:[#allocation2 + $0x18] sm:$0xe] }
 0x2f8   : > { %v4672_v2 = vsel %vm10053_vm2, %v4667_v3, %v4671_v33  ;;  %v4073_v4 = vsel %vm10053_vm2, %v13799_v30, %v4072_v22  ;;  %v4687_v20 = vshll.u32 %v12319_v14, 16  ;;  %v4693_v15 = vshll.u32 %v12321_v10, 16  ;;  %v12344_v33 = vld [vmem:[#allocation2 + $0x20] sm:$0x1] }
 0x2f9   : > { %v4686_v26 = vrot.slane %v4684_v50, 4  ;;  %v4682_v57 = vsel %vm10053_vm2, %v4677_v41, %v4681_v54  ;;  %v4504_v3 = vsel %vm10252_vm5, %v4502_v23, %v4503_v31  ;;  %v8087_v51 = vcombine.low %v4063_v24, %v4073_v4  ;;  %v9665_v54 = vld [vmem:[%s13602_s7 + $0x8] sm:$0xff]  }
 0x2fa   : > { %v4697_v17 = vshrl.u32 %v12321_v10, 16  ;;  %v8135_v25 = vcombine.low %v4672_v2, %v4682_v57  ;;  %v8103_v56 = vcombine.low %v4501_v53, %v4504_v3  ;;  %v4689_v55 = vrot.slane %v4687_v20, 5  ;;  %v9705_v24 = vld [vmem:[#allocation2 + $0x1c] sm:$0xf]  ;;  %v13802_v3 = vld [vmem:[#allocation46_spill] sm:$0xff] }
 0x2fb   : > { %v4695_v18 = vrot.slane %v4693_v15, 5  ;;  %v4703_v7 = vshll.u32 %v4644_v62, 16  ;;  %v8008_v0 = vrot.slane %v5044_v34, 9  ;;  %v5116_v36 = vrot.slane %v12321_v10, 5  ;;  %v9664_v34 = vld [vmem:[#allocation3 + $0x208] sm:$0xff]  }
 0x2fc   : > { %v4699_v13 = vrot.slane %v4697_v17, 4  ;;  %6934 = vmatprep.mubr.bf16.mxu0 %v8135_v25  ;;  %6773 = vmatprep.mubr.bf16.mxu1 %v8103_v56  ;;  %v4690_v61 = vor.u32 %v4689_v55, %v4686_v26  ;;  %v5119_v31 = vrot.slane %v4644_v62, 5  ;;  %v7992_v22 = vrot.slane %v4435_v38, 9  ;;  %v9706_v62 = vld [vmem:[%s13602_s7] sm:$0xff]   ;;  %v9669_v25 = vld [vmem:[%s13602_s7 + $0x10] sm:$0xff]  }
 0x2fd   : > { %v4507_v50 = vrot.slane %v9705_v24, 5  ;;  %6935 = vmatmul.mubr.bf16.vlgmr.msra.gmra.mrb[208].mxu0 %v8119_v32  ;;  %v4705_v41 = vrot.slane %v4703_v7, 5  ;;  %v12352_v53 = vsel %vm10252_vm5, %v8008_v0, %v5116_v36  ;;  %v5118_v23 = vrot.slane %v5116_v36, 4  ;;  %v12368_v38 = vld [vmem:[#allocation2 + $0x30] sm:$0xf] }
 0x2fe   : > { %v4700_v2 = vor.u32 %v4699_v13, %v4695_v18  ;;  %13800 = vst [vmem:[#allocation45_spill] sm:$0xff] %v12352_v53  ;;  %v4691_v30 = vrot.slane %v4690_v61, 4  ;;  %v4510_v26 = vrot.slane %v12344_v33, 5  ;;  %9354 = vmatpush3.bf16.msra.mxu0 %v9706_v62  ;;  %v8120_v57 = vcombine.low %v12319_v14, %v12321_v10  ;;  %v9707_v14 = vld [vmem:[#allocation3 + $0x200] sm:$0xff]   ;;  %v13803_v61 = vld [vmem:[#allocation44_spill] sm:$0xff] }
 0x2ff   : > { %v4508_v4 = vsel %vm10252_vm5, %v7992_v22, %v4507_v50  ;;  %v4509_v20 = vrot.slane %v4507_v50, 4  ;;  %6774 = vmatmul.mubr.bf16.vlgmr.msra.gmra.mrb[208].mxu1 %v8087_v51  ;;  %v12362_v15 = vsel %vm10252_vm5, %v5118_v23, %v5119_v31  ;;  %v4081_v17 = vor.u32 %v11724_v45, %v13802_v3  ;;  %9355 = vmatprep.subr.bf16.mxu0 %v9665_v54  ;;  %v12379_v45 = vld [vmem:[#allocation2 + $0x34] sm:$0xf]  ;;  %v4645_v13 = vld [vmem:[#allocation2 + $0x38] sm:$0x1]  ;;  %v9668_v50 = vld [vmem:[#allocation3 + $0x210] sm:$0xff]  }
 0x300   : > { %v4701_v32 = vrot.slane %v4700_v2, 4  ;;  %13801 = vst [vmem:[#allocation47_spill] sm:$0xff] %v12362_v15  ;;  %v4696_v51 = vsel %vm10053_vm2, %v4691_v30, %v4695_v18  ;;  %9306 = vmatpush3.bf16.msra.mxu1 %v9707_v14  ;;  %v4084_v10 = vshll.u32 %v9705_v24, 16  ;;  %v13804_v31 = vshrl.u32 %v13803_v61, 16  ;;  %v12385_v22 = vld [vmem:[#allocation2 + $0x2c] sm:$0x1] }
 0x301   : > { %v4511_v55 = vsel %vm10252_vm5, %v4509_v20, %v4510_v26  ;;  %v4082_v36 = vrot.slane %v4081_v17, 4  ;;  %9307 = vmatprep.subr.bf16.mxu1 %v9664_v34  ;;  %v4094_v30 = vshll.u32 %v12344_v33, 16  ;;  %v4708_v24 = vshrl.u32 %v12368_v38, 16  ;;  %v4436_v20 = vld [vmem:[#allocation2 + $0x24] sm:$0xe] }
 0x302   : > { %v4706_v7 = vsel %vm10053_vm2, %v4701_v32, %v4705_v41  ;;  %v8104_v0 = vcombine.low %v4508_v4, %v4511_v55  ;;  %v4090_v18 = vrot.slane %v13804_v31, 4  ;;  %v4086_v23 = vrot.slane %v4084_v10, 5  ;;  %9356 = vmatpush3.bf16.msra.mxu0 %v9665_v54  ;;  %v9673_v32 = vld [vmem:[%s13602_s7 + $0x18] sm:$0xff]  }
 0x303   : > { %v8136_v2 = vcombine.low %v4696_v51, %v4706_v7  ;;  %v4711_v41 = vshll.u32 %v12368_v38, 16  ;;  %v4717_v4 = vshll.u32 %v12379_v45, 16  ;;  %v4721_v26 = vshrl.u32 %v12379_v45, 16  ;;  %9357 = vmatprep.subr.bf16.mxu0 %v9669_v25  ;;  %v9708_v61 = vld [vmem:[#allocation2 + $0x28] sm:$0xf] }
 0x304   : > { %6781 = vmatprep.mubr.bf16.mxu1 %v8104_v0  ;;  %v4727_v62 = vshll.u32 %v4645_v13, 16  ;;  %v4087_v33 = vsel %vm10053_vm2, %v4082_v36, %v4086_v23  ;;  %v4091_v3 = vor.u32 %v4090_v18, %v4086_v23  ;;  %v4096_v17 = vrot.slane %v4094_v30, 5  ;;  %9308 = vmatpush3.bf16.msra.mxu1 %v9664_v34  ;;  %v9672_v13 = vld [vmem:[#allocation3 + $0x218] sm:$0xff]  }
 0x305   : > { %6942 = vmatprep.mubr.bf16.mxu0 %v8136_v2  ;;  %v4710_v54 = vrot.slane %v4708_v24, 4  ;;  %v4713_v51 = vrot.slane %v4711_v41, 5  ;;  %v4719_v55 = vrot.slane %v4717_v4, 5  ;;  %v4723_v14 = vrot.slane %v4721_v26, 4  ;;  %9309 = vmatprep.subr.bf16.mxu1 %v9668_v50 }
 0x306   : > { %6943 = vmatmul.mubr.bf16.gmra.mrb[212].mxu0 %v8120_v57  ;;  %v4729_v10 = vrot.slane %v4727_v62, 5  ;;  %v4092_v7 = vrot.slane %v4091_v3, 4  ;;  %v7993_v0 = vrot.slane %v4436_v20, 9  ;;  %v4514_v31 = vrot.slane %v9708_v61, 5  ;;  %v9677_v57 = vld [vmem:[%s13602_s7 + $0x20] sm:$0xff]  }
 0x307   : > { %v4517_v2 = vrot.slane %v12385_v22, 5  ;;  %9358 = vmatpush3.bf16.msra.mxu0 %v9669_v25  ;;  %v4714_v56 = vor.u32 %v4713_v51, %v4710_v54  ;;  %v4724_v36 = vor.u32 %v4723_v14, %v4719_v55  ;;  %v8121_v18 = vcombine.low %v12368_v38, %v12379_v45  ;;  %v12409_v20 = vld [vmem:[#allocation2 + $0x3c] sm:$0xf]  ;;  %v12416_v54 = vld [vmem:[#allocation2 + $0x40] sm:$0xf] }
 0x308   : > { %v4105_v34 = vor.u32 %v11820_v5, %v11814_v63  ;;  %9359 = vmatprep.subr.bf16.mxu0 %v9673_v32  ;;  %v4097_v23 = vsel %vm10053_vm2, %v4092_v7, %v4096_v17  ;;  %v4515_v30 = vsel %vm10252_vm5, %v7993_v0, %v4514_v31  ;;  %v4516_v25 = vrot.slane %v4514_v31, 4  ;;  %9310 = vmatpush3.bf16.msra.mxu1 %v9668_v50  ;;  %v9676_v5 = vld [vmem:[#allocation3 + $0x220] sm:$0xff]   ;;  %v4646_v51 = vld [vmem:[#allocation2 + $0x44] sm:$0x1] }
 0x309   : > { %v4108_v24 = vshll.u32 %v9708_v61, 16  ;;  %v8088_v38 = vcombine.low %v4087_v33, %v4097_v23  ;;  %v4715_v45 = vrot.slane %v4714_v56, 4  ;;  %v4725_v41 = vrot.slane %v4724_v36, 4  ;;  %9311 = vmatprep.subr.bf16.mxu1 %v9672_v13  ;;  %v5046_v7 = vld [vmem:[#allocation2 + $0x3c] sm:$0xe] }
 0x30a   : > { %v4106_v63 = vrot.slane %v4105_v34, 4  ;;  %v4518_v4 = vsel %vm10252_vm5, %v4516_v25, %v4517_v2  ;;  %v13805_v62 = vshrl.u32 %v11730_v16, 16  ;;  %v4118_v17 = vshll.u32 %v12385_v22, 16  ;;  %v9681_v16 = vld [vmem:[%s13602_s7 + $0x28] sm:$0xff]   ;;  %v9680_v34 = vld [vmem:[#allocation3 + $0x228] sm:$0xff]  }
 0x30b   : > { %v4110_v26 = vrot.slane %v4108_v24, 5  ;;  %9360 = vmatpush3.bf16.msra.mxu0 %v9673_v32  ;;  %6782 = vmatmul.mubr.bf16.gmra.mrb[212].mxu1 %v8088_v38  ;;  %v4720_v56 = vsel %vm10053_vm2, %v4715_v45, %v4719_v55  ;;  %v4730_v50 = vsel %vm10053_vm2, %v4725_v41, %v4729_v10  ;;  %v8105_v33 = vcombine.low %v4515_v30, %v4518_v4  ;;  %v4437_v55 = vld [vmem:[#allocation2 + $0x30] sm:$0xe]  ;;  %v4037_v38 = vld [vmem:[#allocation2 + $0x38] sm:$0x1]  ;;  %v9686_v4 = vld [vmem:[%s13602_s7 + $0x30] sm:$0xff]  }
 0x30c   : > { %v4114_v3 = vrot.slane %v13805_v62, 4  ;;  %v4732_v14 = vshrl.u32 %v12409_v20, 16  ;;  %9361 = vmatprep.subr.bf16.mxu0 %v9677_v57  ;;  %v8137_v22 = vcombine.low %v4720_v56, %v4730_v50  ;;  %v4120_v61 = vrot.slane %v4118_v17, 5  ;;  %9312 = vmatpush3.bf16.msra.mxu1 %v9672_v13 }
 0x30d   : > { %v4111_v32 = vsel %vm10053_vm2, %v4106_v63, %v4110_v26  ;;  %6789 = vmatprep.mubr.bf16.mxu1 %v8105_v33  ;;  %v4735_v31 = vshll.u32 %v12409_v20, 16  ;;  %v4741_v2 = vshll.u32 %v12416_v54, 16  ;;  %v4745_v36 = vshrl.u32 %v12416_v54, 16  ;;  %9313 = vmatprep.subr.bf16.mxu1 %v9676_v5  ;;  %v9685_v33 = vld [vmem:[#allocation3 + $0x230] sm:$0xff]  }
 0x30e   : > { %v4115_v0 = vor.u32 %v4114_v3, %v4110_v26  ;;  %v4734_v10 = vrot.slane %v4732_v14, 4  ;;  %6950 = vmatprep.mubr.bf16.mxu0 %v8137_v22  ;;  %v4751_v30 = vshll.u32 %v4646_v51, 16  ;;  %v8010_v25 = vrot.slane %v5046_v7, 9  ;;  %v9709_v14 = vld [vmem:[#allocation2 + $0x34] sm:$0xf] }
 0x30f   : > { %v5130_v24 = vrot.slane %v12416_v54, 5  ;;  %9362 = vmatpush3.bf16.msra.mxu0 %v9677_v57  ;;  %v4737_v13 = vrot.slane %v4735_v31, 5  ;;  %v4743_v45 = vrot.slane %v4741_v2, 5  ;;  %v4747_v41 = vrot.slane %v4745_v36, 4  ;;  %v9689_v2 = vld [vmem:[%s13602_s7 + $0x38] sm:$0xff]  }
 0x310   : > { %v4116_v23 = vrot.slane %v4115_v0, 4  ;;  %6951 = vmatmul.mubr.bf16.gmra.mrb[216].mxu0 %v8121_v18  ;;  %v5133_v63 = vrot.slane %v4646_v51, 5  ;;  %9363 = vmatprep.subr.bf16.mxu0 %v9681_v16  ;;  %v4753_v62 = vrot.slane %v4751_v30, 5  ;;  %v7994_v50 = vrot.slane %v4437_v55, 9  ;;  %v12462_v30 = vld [vmem:[#allocation2 + $0x4c] sm:$0xf] }
 0x311   : > { %v12439_v3 = vsel %vm10252_vm5, %v8010_v25, %v5130_v24  ;;  %v5132_v17 = vrot.slane %v5130_v24, 4  ;;  %9314 = vmatpush3.bf16.msra.mxu1 %v9676_v5  ;;  %v4738_v57 = vor.u32 %v4737_v13, %v4734_v10  ;;  %v4748_v56 = vor.u32 %v4747_v41, %v4743_v45  ;;  %v12451_v10 = vld [vmem:[#allocation2 + $0x48] sm:$0xf]  ;;  %v4438_v41 = vld [vmem:[#allocation2 + $0x3c] sm:$0xe] }
 0x312   : > { %v4121_v26 = vsel %vm10053_vm2, %v4116_v23, %v4120_v61  ;;  %13806 = vst [vmem:[#allocation46_spill] sm:$0xff] %v12439_v3  ;;  %9315 = vmatprep.subr.bf16.mxu1 %v9680_v34  ;;  %v4521_v7 = vrot.slane %v9709_v14, 5  ;;  %v4524_v22 = vrot.slane %v4037_v38, 5  ;;  %v8122_v0 = vcombine.low %v12409_v20, %v12416_v54 }
 0x313   : > { %v8089_v18 = vcombine.low %v4111_v32, %v4121_v26  ;;  %v12443_v51 = vsel %vm10252_vm5, %v5132_v17, %v5133_v63  ;;  %9364 = vmatpush3.bf16.msra.mxu0 %v9681_v16  ;;  %v4739_v61 = vrot.slane %v4738_v57, 4  ;;  %v4749_v5 = vrot.slane %v4748_v56, 4 }
 0x314   : > { %13807 = vst [vmem:[#allocation44_spill] sm:$0xff] %v12443_v51  ;;  %v4129_v55 = vor.u32 %v11896_v49, %v11842_v42  ;;  %9365 = vmatprep.subr.bf16.mxu0 %v9686_v4  ;;  %v4522_v20 = vsel %vm10252_vm5, %v7994_v50, %v4521_v7  ;;  %v4523_v54 = vrot.slane %v4521_v7, 4  ;;  %v4132_v16 = vshll.u32 %v9709_v14, 16  ;;  %v4038_v14 = vld [vmem:[#allocation2 + $0x44] sm:$0x1] }
 0x315   : > { %6790 = vmatmul.mubr.bf16.gmra.mrb[216].mxu1 %v8089_v18  ;;  %v13808_v36 = vshrl.u32 %v11822_v11, 16  ;;  %v4744_v49 = vsel %vm10053_vm2, %v4739_v61, %v4743_v45  ;;  %v4754_v25 = vsel %vm10053_vm2, %v4749_v5, %v4753_v62  ;;  %v4142_v13 = vshll.u32 %v4037_v38, 16  ;;  %v9688_v45 = vld [vmem:[#allocation3 + $0x238] sm:$0xff]  }
 0x316   : > { %9316 = vmatpush3.bf16.msra.mxu1 %v9680_v34  ;;  %v4130_v24 = vrot.slane %v4129_v55, 4  ;;  %v8138_v26 = vcombine.low %v4744_v49, %v4754_v25  ;;  %v4525_v11 = vsel %vm10252_vm5, %v4523_v54, %v4524_v22  ;;  %v4134_v17 = vrot.slane %v4132_v16, 5  ;;  %v4647_v34 = vld [vmem:[#allocation2 + $0x50] sm:$0x1]  ;;  %v9710_v49 = vld [vmem:[#allocation2 + $0x40] sm:$0xf] }
 0x317   : > { %v12453_v31 = vpop.f32.mrb[144].mxu0  ;;  %v4138_v23 = vrot.slane %v13808_v36, 4  ;;  %9317 = vmatprep.subr.bf16.mxu1 %v9685_v33  ;;  %v4756_v18 = vshrl.u32 %v12451_v10, 16  ;;  %9366 = vmatpush3.bf16.msra.mxu0 %v9686_v4  ;;  %v8106_v56 = vcombine.low %v4522_v20, %v4525_v11  ;;  %v4144_v62 = vrot.slane %v4142_v13, 5 }
 0x318   : > { %v12464_v42 = vpop.f32.mrb[145].mxu0  ;;  %v4759_v38 = vshll.u32 %v12451_v10, 16  ;;  %v4765_v50 = vshll.u32 %v12462_v30, 16  ;;  %9367 = vmatprep.subr.bf16.mxu0 %v9689_v2  ;;  %6958 = vmatprep.mubr.bf16.mxu0 %v8138_v26  ;;  %v4135_v7 = vsel %vm10053_vm2, %v4130_v24, %v4134_v17  ;;  %v4769_v5 = vshrl.u32 %v12462_v30, 16 }
 0x319   : > { %v12470_v63 = vpop.f32.mrb[146].mxu0  ;;  %v4139_v22 = vor.u32 %v4138_v23, %v4134_v17  ;;  %v4758_v61 = vrot.slane %v4756_v18, 4  ;;  %6797 = vmatprep.mubr.bf16.mxu1 %v8106_v56  ;;  %6959 = vmatmul.mubr.bf16.gmra.mrb[220].mxu0 %v8122_v0  ;;  %v4775_v20 = vshll.u32 %v4647_v34, 16  ;;  %v7995_v54 = vrot.slane %v4438_v41, 9  ;;  %v12490_v34 = vld [vmem:[#allocation2 + $0x54] sm:$0xf] }
 0x31a   : > { %v12475_v57 = vpop.f32.mrb[147].mxu0  ;;  %9318 = vmatpush3.bf16.msra.mxu1 %v9685_v33  ;;  %v4761_v4 = vrot.slane %v4759_v38, 5  ;;  %v4767_v55 = vrot.slane %v4765_v50, 5  ;;  %v4771_v36 = vrot.slane %v4769_v5, 4  ;;  %v4528_v25 = vrot.slane %v9710_v49, 5 }
 0x31b   : > { %v4140_v16 = vrot.slane %v4139_v22, 4  ;;  %v4531_v13 = vrot.slane %v4038_v14, 5  ;;  %9319 = vmatprep.subr.bf16.mxu1 %v9688_v45  ;;  %9368 = vmatpush3.bf16.msra.mxu0 %v9689_v2  ;;  %v4777_v24 = vrot.slane %v4775_v20, 5  ;;  %v8123_v23 = vcombine.low %v12451_v10, %v12462_v30  ;;  %v12492_v50 = vld [vmem:[#allocation2 + $0x58] sm:$0xf] }
 0x31c   : > { %v4762_v26 = vor.u32 %v4761_v4, %v4758_v61  ;;  %v4153_v33 = vor.u32 %v11944_v12, %v11934_v48  ;;  %v4772_v11 = vor.u32 %v4771_v36, %v4767_v55  ;;  %v4529_v41 = vsel %vm10252_vm5, %v7995_v54, %v4528_v25 }
 0x31d   : > { %v4145_v0 = vsel %vm10053_vm2, %v4140_v16, %v4144_v62  ;;  %v4530_v17 = vrot.slane %v4528_v25, 4  ;;  %v4156_v38 = vshll.u32 %v9710_v49, 16  ;;  %v13809_v12 = vshrl.u32 %v11899_v8, 16  ;;  %v5048_v8 = vld [vmem:[#allocation2 + $0x54] sm:$0xe] }
 0x31e   : > { %9320 = vmatpush3.bf16.msra.mxu1 %v9688_v45  ;;  %v8090_v2 = vcombine.low %v4135_v7, %v4145_v0  ;;  %v4763_v18 = vrot.slane %v4762_v26, 4  ;;  %v4154_v56 = vrot.slane %v4153_v33, 4  ;;  %v4773_v10 = vrot.slane %v4772_v11, 4  ;;  %v4648_v7 = vld [vmem:[#allocation2 + $0x5c] sm:$0x1] }
 0x31f   : > { %v4532_v48 = vsel %vm10252_vm5, %v4530_v17, %v4531_v13  ;;  %v4162_v30 = vrot.slane %v13809_v12, 4  ;;  %v4166_v62 = vshll.u32 %v4038_v14, 16  ;;  %v4158_v45 = vrot.slane %v4156_v38, 5  ;;  %v4439_v25 = vld [vmem:[#allocation2 + $0x48] sm:$0xe] }
 0x320   : > { %6798 = vmatmul.mubr.bf16.gmra.mrb[220].mxu1 %v8090_v2  ;;  %v4768_v22 = vsel %vm10053_vm2, %v4763_v18, %v4767_v55  ;;  %v8107_v61 = vcombine.low %v4529_v41, %v4532_v48  ;;  %v4780_v5 = vshrl.u32 %v12490_v34, 16  ;;  %v4778_v4 = vsel %vm10053_vm2, %v4773_v10, %v4777_v24  ;;  %v4039_v2 = vld [vmem:[#allocation2 + $0x50] sm:$0x1] }
 0x321   : > { %v4168_v20 = vrot.slane %v4166_v62, 5  ;;  %v4783_v54 = vshll.u32 %v12490_v34, 16  ;;  %v4789_v16 = vshll.u32 %v12492_v50, 16  ;;  %v8139_v36 = vcombine.low %v4768_v22, %v4778_v4  ;;  %v9711_v62 = vld [vmem:[#allocation2 + $0x4c] sm:$0xf] }
 0x322   : > { %6805 = vmatprep.mubr.bf16.mxu1 %v8107_v61  ;;  %v4159_v14 = vsel %vm10053_vm2, %v4154_v56, %v4158_v45  ;;  %v4163_v55 = vor.u32 %v4162_v30, %v4158_v45  ;;  %v4782_v49 = vrot.slane %v4780_v5, 4  ;;  %v4793_v33 = vshrl.u32 %v12492_v50, 16 }
 0x323   : > { %v4785_v13 = vrot.slane %v4783_v54, 5  ;;  %v4791_v26 = vrot.slane %v4789_v16, 5  ;;  %v4799_v0 = vshll.u32 %v4648_v7, 16  ;;  %6966 = vmatprep.mubr.bf16.mxu0 %v8139_v36  ;;  %v8012_v11 = vrot.slane %v5048_v8, 9  ;;  %v12523_v16 = vld [vmem:[#allocation2 + $0x60] sm:$0xf] }
 0x324   : > { %v4164_v24 = vrot.slane %v4163_v55, 4  ;;  %v5144_v41 = vrot.slane %v12492_v50, 5  ;;  %v5147_v17 = vrot.slane %v4648_v7, 5  ;;  %6967 = vmatmul.mubr.bf16.gmra.mrb[224].mxu0 %v8123_v23  ;;  %v4795_v38 = vrot.slane %v4793_v33, 4 }
 0x325   : > { %v4786_v18 = vor.u32 %v4785_v13, %v4782_v49  ;;  %v4801_v10 = vrot.slane %v4799_v0, 5  ;;  %v7996_v56 = vrot.slane %v4439_v25, 9  ;;  %v4535_v22 = vrot.slane %v9711_v62, 5  ;;  %v12531_v49 = vld [vmem:[#allocation2 + $0x64] sm:$0xf] }
 0x326   : > { %v4169_v48 = vsel %vm10053_vm2, %v4164_v24, %v4168_v20  ;;  %v12513_v12 = vsel %vm10252_vm5, %v8012_v11, %v5144_v41  ;;  %v5146_v30 = vrot.slane %v5144_v41, 4  ;;  %v4796_v5 = vor.u32 %v4795_v38, %v4791_v26  ;;  %v4649_v0 = vld [vmem:[#allocation2 + $0x68] sm:$0x1] }
 0x327   : > { %13810 = vst [vmem:[#allocation48_spill] sm:$0xff] %v12513_v12  ;;  %v8091_v61 = vcombine.low %v4159_v14, %v4169_v48  ;;  %v4787_v45 = vrot.slane %v4786_v18, 4  ;;  %v4538_v7 = vrot.slane %v4039_v2, 5  ;;  %v4536_v4 = vsel %vm10252_vm5, %v7996_v56, %v4535_v22 }
 0x328   : > { %v12517_v23 = vsel %vm10252_vm5, %v5146_v30, %v5147_v17  ;;  %v4537_v54 = vrot.slane %v4535_v22, 4  ;;  %v8124_v20 = vcombine.low %v12490_v34, %v12492_v50  ;;  %v4797_v36 = vrot.slane %v4796_v5, 4  ;;  %v4440_v17 = vld [vmem:[#allocation2 + $0x54] sm:$0xe]  ;;  %v4040_v30 = vld [vmem:[#allocation2 + $0x5c] sm:$0x1] }
 0x329   : > { %13811 = vst [vmem:[#allocation49_spill] sm:$0xff] %v12517_v23  ;;  %6806 = vmatmul.mubr.bf16.gmra.mrb[224].mxu1 %v8091_v61  ;;  %v4792_v8 = vsel %vm10053_vm2, %v4787_v45, %v4791_v26  ;;  %v4177_v55 = vor.u32 %v12023_v47, %v11990_v35  ;;  %v4180_v13 = vshll.u32 %v9711_v62, 16  ;;  %v13812_v34 = vshrl.u32 %v11969_v59, 16 }
 0x32a   : > { %v4539_v25 = vsel %vm10252_vm5, %v4537_v54, %v4538_v7  ;;  %v4190_v33 = vshll.u32 %v4039_v2, 16  ;;  %v4802_v26 = vsel %vm10053_vm2, %v4797_v36, %v4801_v10  ;;  %v4804_v41 = vshrl.u32 %v12523_v16, 16 }
 0x32b   : > { %v4186_v50 = vrot.slane %v13812_v34, 4  ;;  %v8108_v24 = vcombine.low %v4536_v4, %v4539_v25  ;;  %v4178_v11 = vrot.slane %v4177_v55, 4  ;;  %v8140_v35 = vcombine.low %v4792_v8, %v4802_v26  ;;  %v9712_v4 = vld [vmem:[#allocation2 + $0x58] sm:$0xf]  ;;  %v12549_v34 = vld [vmem:[#allocation2 + $0x6c] sm:$0xf] }
 0x32c   : > { %v4182_v47 = vrot.slane %v4180_v13, 5  ;;  %v4192_v18 = vrot.slane %v4190_v33, 5  ;;  %v4807_v38 = vshll.u32 %v12523_v16, 16  ;;  %v4806_v56 = vrot.slane %v4804_v41, 4 }
 0x32d   : > { %6813 = vmatprep.mubr.bf16.mxu1 %v8108_v24  ;;  %v4813_v59 = vshll.u32 %v12531_v49, 16  ;;  %v4817_v2 = vshrl.u32 %v12531_v49, 16  ;;  %v4823_v48 = vshll.u32 %v4649_v0, 16  ;;  %6974 = vmatprep.mubr.bf16.mxu0 %v8140_v35  ;;  %v7997_v61 = vrot.slane %v4440_v17, 9 }
 0x32e   : > { %v4183_v10 = vsel %vm10053_vm2, %v4178_v11, %v4182_v47  ;;  %v4187_v62 = vor.u32 %v4186_v50, %v4182_v47  ;;  %v4809_v22 = vrot.slane %v4807_v38, 5  ;;  %6975 = vmatmul.mubr.bf16.gmra.mrb[228].mxu0 %v8124_v20  ;;  %v4542_v54 = vrot.slane %v9712_v4, 5  ;;  %v12559_v11 = vld [vmem:[#allocation2 + $0x70] sm:$0xf] }
 0x32f   : > { %v4815_v45 = vrot.slane %v4813_v59, 5  ;;  %v4819_v5 = vrot.slane %v4817_v2, 4  ;;  %v4825_v7 = vrot.slane %v4823_v48, 5  ;;  %v4545_v25 = vrot.slane %v4040_v30, 5 }
 0x330   : > { %v4188_v36 = vrot.slane %v4187_v62, 4  ;;  %v4810_v55 = vor.u32 %v4809_v22, %v4806_v56  ;;  %v8125_v13 = vcombine.low %v12523_v16, %v12531_v49  ;;  %v4543_v0 = vsel %vm10252_vm5, %v7997_v61, %v4542_v54 }
 0x331   : > { %v12545_v8 = vpop.f32.mrb[148].mxu1  ;;  %v4820_v20 = vor.u32 %v4819_v5, %v4815_v45  ;;  %v4544_v26 = vrot.slane %v4542_v54, 4  ;;  %v4201_v24 = vor.u32 %v12033_v37, %v12027_v9  ;;  %v4204_v35 = vshll.u32 %v9712_v4, 16  ;;  %v4650_v54 = vld [vmem:[#allocation2 + $0x74] sm:$0x1] }
 0x332   : > { %v12553_v50 = vpop.f32.mrb[149].mxu1  ;;  %v4193_v16 = vsel %vm10053_vm2, %v4188_v36, %v4192_v18  ;;  %v4811_v49 = vrot.slane %v4810_v55, 4  ;;  %v13813_v47 = vshrl.u32 %v12001_v1, 16  ;;  %v4214_v5 = vshll.u32 %v4040_v30, 16  ;;  %v5050_v1 = vld [vmem:[#allocation2 + $0x6c] sm:$0xe] }
 0x333   : > { %v12551_v33 = vpop.f32.mrb[148].mxu0  ;;  %v12563_v17 = vpop.f32.mrb[150].mxu1  ;;  %v8092_v2 = vcombine.low %v4183_v10, %v4193_v16  ;;  %v4821_v9 = vrot.slane %v4820_v20, 4  ;;  %v4546_v37 = vsel %vm10252_vm5, %v4544_v26, %v4545_v25  ;;  %v4202_v48 = vrot.slane %v4201_v24, 4  ;;  %v4441_v30 = vld [vmem:[#allocation2 + $0x60] sm:$0xe] }
 0x334   : > { %v12561_v41 = vpop.f32.mrb[149].mxu0  ;;  %v4210_v38 = vrot.slane %v13813_v47, 4  ;;  %v12571_v59 = vpop.f32.mrb[151].mxu1  ;;  %v4816_v18 = vsel %vm10053_vm2, %v4811_v49, %v4815_v45  ;;  %v8109_v22 = vcombine.low %v4543_v0, %v4546_v37  ;;  %v4206_v61 = vrot.slane %v4204_v35, 5 }
 0x335   : > { %v12569_v56 = vpop.f32.mrb[150].mxu0  ;;  %6814 = vmatmul.mubr.bf16.gmra.mrb[228].mxu1 %v8092_v2  ;;  %v4826_v4 = vsel %vm10053_vm2, %v4821_v9, %v4825_v7  ;;  %v4828_v10 = vshrl.u32 %v12549_v34, 16  ;;  %v4831_v36 = vshll.u32 %v12549_v34, 16  ;;  %v4837_v55 = vshll.u32 %v12559_v11, 16 }
 0x336   : > { %v12575_v62 = vpop.f32.mrb[151].mxu0  ;;  %v8141_v25 = vcombine.low %v4816_v18, %v4826_v4  ;;  %6821 = vmatprep.mubr.bf16.mxu1 %v8109_v22  ;;  %v4207_v45 = vsel %vm10053_vm2, %v4202_v48, %v4206_v61  ;;  %v4211_v20 = vor.u32 %v4210_v38, %v4206_v61  ;;  %v4216_v0 = vrot.slane %v4214_v5, 5  ;;  %v4041_v22 = vld [vmem:[#allocation2 + $0x68] sm:$0x1] }
 0x337   : > { %v4830_v26 = vrot.slane %v4828_v10, 4  ;;  %v4833_v24 = vrot.slane %v4831_v36, 5  ;;  %v4839_v16 = vrot.slane %v4837_v55, 5  ;;  %v4841_v7 = vshrl.u32 %v12559_v11, 16  ;;  %v9713_v55 = vld [vmem:[#allocation2 + $0x64] sm:$0xf] }
 0x338   : > { %6982 = vmatprep.mubr.bf16.mxu0 %v8141_v25  ;;  %v4212_v49 = vrot.slane %v4211_v20, 4  ;;  %v4847_v35 = vshll.u32 %v4650_v54, 16  ;;  %v8014_v47 = vrot.slane %v5050_v1, 9  ;;  %v5158_v2 = vrot.slane %v12559_v11, 5 }
 0x339   : > { %6983 = vmatmul.mubr.bf16.gmra.mrb[232].mxu0 %v8125_v13  ;;  %v4834_v9 = vor.u32 %v4833_v24, %v4830_v26  ;;  %v4843_v37 = vrot.slane %v4841_v7, 4  ;;  %v5161_v18 = vrot.slane %v4650_v54, 5  ;;  %v7998_v48 = vrot.slane %v4441_v30, 9  ;;  %v12602_v30 = vld [vmem:[#allocation2 + $0x78] sm:$0xf] }
 0x33a   : > { %v4217_v38 = vsel %vm10053_vm2, %v4212_v49, %v4216_v0  ;;  %v4849_v61 = vrot.slane %v4847_v35, 5  ;;  %v12592_v5 = vsel %vm10252_vm5, %v8014_v47, %v5158_v2  ;;  %v5160_v4 = vrot.slane %v5158_v2, 4  ;;  %v12610_v49 = vld [vmem:[#allocation2 + $0x7c] sm:$0xf]  ;;  %v4651_v47 = vld [vmem:[#allocation2 + $0x80] sm:$0x1] }
 0x33b   : > { %13814 = vst [vmem:[#allocation50_spill] sm:$0xff] %v12592_v5  ;;  %v8093_v10 = vcombine.low %v4207_v45, %v4217_v38  ;;  %v4835_v36 = vrot.slane %v4834_v9, 4  ;;  %v4844_v1 = vor.u32 %v4843_v37, %v4839_v16  ;;  %v4549_v25 = vrot.slane %v9713_v55, 5  ;;  %v4442_v2 = vld [vmem:[#allocation2 + $0x6c] sm:$0xe] }
 0x33c   : > { %v12596_v13 = vsel %vm10252_vm5, %v5160_v4, %v5161_v18  ;;  %v4552_v54 = vrot.slane %v4041_v22, 5  ;;  %v8126_v20 = vcombine.low %v12549_v34, %v12559_v11  ;;  %v4225_v0 = vor.u32 %v12058_v52, %v12056_v29 }
 0x33d   : > { %13815 = vst [vmem:[#allocation51_spill] sm:$0xff] %v12596_v13  ;;  %6822 = vmatmul.mubr.bf16.gmra.mrb[232].mxu1 %v8093_v10  ;;  %v4840_v45 = vsel %vm10053_vm2, %v4835_v36, %v4839_v16  ;;  %v4845_v26 = vrot.slane %v4844_v1, 4  ;;  %v4550_v7 = vsel %vm10252_vm5, %v7998_v48, %v4549_v25  ;;  %v4551_v35 = vrot.slane %v4549_v25, 4 }
 0x33e   : > { %v4226_v34 = vrot.slane %v4225_v0, 4  ;;  %v4228_v11 = vshll.u32 %v9713_v55, 16  ;;  %v13816_v29 = vshrl.u32 %v12035_v43, 16  ;;  %v4238_v37 = vshll.u32 %v4041_v22, 16  ;;  %v4042_v55 = vld [vmem:[#allocation2 + $0x74] sm:$0x1] }
 0x33f   : > { %v4850_v16 = vsel %vm10053_vm2, %v4845_v26, %v4849_v61  ;;  %v4852_v18 = vshrl.u32 %v12602_v30, 16  ;;  %v4855_v48 = vshll.u32 %v12602_v30, 16  ;;  %v4553_v43 = vsel %vm10252_vm5, %v4551_v35, %v4552_v54 }
 0x340   : > { %v4234_v52 = vrot.slane %v13816_v29, 4  ;;  %v12614_v9 = vpop.f32.mrb[152].mxu0  ;;  %v8142_v10 = vcombine.low %v4840_v45, %v4850_v16  ;;  %v4230_v36 = vrot.slane %v4228_v11, 5  ;;  %v4861_v1 = vshll.u32 %v12610_v49, 16 }
 0x341   : > { %v12620_v38 = vpop.f32.mrb[152].mxu1  ;;  %v12622_v4 = vpop.f32.mrb[153].mxu0  ;;  %v8110_v22 = vcombine.low %v4550_v7, %v4553_v43  ;;  %v4240_v0 = vrot.slane %v4238_v37, 5  ;;  %v4854_v26 = vrot.slane %v4852_v18, 4  ;;  %v4857_v29 = vrot.slane %v4855_v48, 5 }
 0x342   : > { %v12627_v25 = vpop.f32.mrb[153].mxu1  ;;  %v12629_v61 = vpop.f32.mrb[154].mxu0  ;;  %6990 = vmatprep.mubr.bf16.mxu0 %v8142_v10  ;;  %v4231_v54 = vsel %vm10053_vm2, %v4226_v34, %v4230_v36  ;;  %v4235_v45 = vor.u32 %v4234_v52, %v4230_v36  ;;  %v4863_v35 = vrot.slane %v4861_v1, 5  ;;  %v4865_v11 = vshrl.u32 %v12610_v49, 16  ;;  %v9714_v48 = vld [vmem:[#allocation2 + $0x70] sm:$0xf] }
 0x343   : > { %v12631_v24 = vpop.f32.mrb[154].mxu1  ;;  %v12633_v14 = vpop.f32.mrb[155].mxu0  ;;  %6829 = vmatprep.mubr.bf16.mxu1 %v8110_v22  ;;  %6991 = vmatmul.mubr.bf16.gmra.mrb[236].mxu0 %v8126_v20  ;;  %v4858_v7 = vor.u32 %v4857_v29, %v4854_v26  ;;  %v4871_v37 = vshll.u32 %v4651_v47, 16  ;;  %v7999_v18 = vrot.slane %v4442_v2, 9  ;;  %v4556_v43 = vrot.slane %v9714_v48, 5 }
 0x344   : > { %v12638_v16 = vpop.f32.mrb[155].mxu1  ;;  %v4236_v32 = vrot.slane %v4235_v45, 4  ;;  %v4867_v13 = vrot.slane %v4865_v11, 4  ;;  %v4559_v5 = vrot.slane %v4042_v55, 5  ;;  %v8127_v10 = vcombine.low %v12602_v30, %v12610_v49  ;;  %v12648_v26 = vld [vmem:[#allocation2 + $0x84] sm:$0xf] }
 0x345   : > { %v4859_v34 = vrot.slane %v4858_v7, 4  ;;  %v4873_v52 = vrot.slane %v4871_v37, 5  ;;  %v4557_v36 = vsel %vm10252_vm5, %v7999_v18, %v4556_v43  ;;  %v4558_v1 = vrot.slane %v4556_v43, 4  ;;  %v12650_v29 = vld [vmem:[#allocation2 + $0x88] sm:$0xf] }
 0x346   : > { %v4241_v20 = vsel %vm10053_vm2, %v4236_v32, %v4240_v0  ;;  %v4868_v22 = vor.u32 %v4867_v13, %v4863_v35  ;;  %v4249_v47 = vor.u32 %v12085_v58, %v12083_v21  ;;  %v4252_v2 = vshll.u32 %v9714_v48, 16  ;;  %v4652_v58 = vld [vmem:[#allocation2 + $0x8c] sm:$0x1] }
 0x347   : > { %v8094_v45 = vcombine.low %v4231_v54, %v4241_v20  ;;  %v4864_v30 = vsel %vm10053_vm2, %v4859_v34, %v4863_v35  ;;  %v4560_v49 = vsel %vm10252_vm5, %v4558_v1, %v4559_v5  ;;  %v13817_v11 = vshrl.u32 %v12062_v19, 16  ;;  %v5052_v34 = vld [vmem:[#allocation2 + $0x84] sm:$0xe] }
 0x348   : > { %v4869_v32 = vrot.slane %v4868_v22, 4  ;;  %v8111_v13 = vcombine.low %v4557_v36, %v4560_v49  ;;  %v4250_v0 = vrot.slane %v4249_v47, 4  ;;  %v4254_v37 = vrot.slane %v4252_v2, 5  ;;  %v4443_v22 = vld [vmem:[#allocation2 + $0x78] sm:$0xe] }
 0x349   : > { %v4258_v7 = vrot.slane %v13817_v11, 4  ;;  %6830 = vmatmul.mubr.bf16.gmra.mrb[236].mxu1 %v8094_v45  ;;  %v4262_v21 = vshll.u32 %v4042_v55, 16  ;;  %v4876_v18 = vshrl.u32 %v12648_v26, 16  ;;  %v4879_v54 = vshll.u32 %v12648_v26, 16 }
 0x34a   : > { %v4885_v48 = vshll.u32 %v12650_v29, 16  ;;  %v4874_v35 = vsel %vm10053_vm2, %v4869_v32, %v4873_v52  ;;  %6837 = vmatprep.mubr.bf16.mxu1 %v8111_v13  ;;  %v4255_v19 = vsel %vm10053_vm2, %v4250_v0, %v4254_v37  ;;  %v4889_v43 = vshrl.u32 %v12650_v29, 16  ;;  %v4043_v0 = vld [vmem:[#allocation2 + $0x80] sm:$0x1] }
 0x34b   : > { %v4259_v5 = vor.u32 %v4258_v7, %v4254_v37  ;;  %v8143_v36 = vcombine.low %v4864_v30, %v4874_v35  ;;  %v4264_v55 = vrot.slane %v4262_v21, 5  ;;  %v4878_v1 = vrot.slane %v4876_v18, 4 }
 0x34c   : > { %v4881_v20 = vrot.slane %v4879_v54, 5  ;;  %v4887_v2 = vrot.slane %v4885_v48, 5  ;;  %v4891_v45 = vrot.slane %v4889_v43, 4  ;;  %v4895_v49 = vshll.u32 %v4652_v58, 16  ;;  %v9715_v43 = vld [vmem:[#allocation2 + $0x7c] sm:$0xf] }
 0x34d   : > { %v4260_v47 = vrot.slane %v4259_v5, 4  ;;  %6998 = vmatprep.mubr.bf16.mxu0 %v8143_v36  ;;  %v8016_v52 = vrot.slane %v5052_v34, 9  ;;  %v5172_v32 = vrot.slane %v12650_v29, 5  ;;  %v5175_v13 = vrot.slane %v4652_v58, 5 }
 0x34e   : > { %v4882_v11 = vor.u32 %v4881_v20, %v4878_v1  ;;  %6999 = vmatmul.mubr.bf16.gmra.mrb[240].mxu0 %v8127_v10  ;;  %v4892_v30 = vor.u32 %v4891_v45, %v4887_v2  ;;  %v4897_v37 = vrot.slane %v4895_v49, 5  ;;  %v8000_v21 = vrot.slane %v4443_v22, 9  ;;  %v12683_v20 = vld [vmem:[#allocation2 + $0x90] sm:$0xf]  ;;  %v12693_v45 = vld [vmem:[#allocation2 + $0x98] sm:$0x1] }
 0x34f   : > { %v4265_v7 = vsel %vm10053_vm2, %v4260_v47, %v4264_v55  ;;  %v12671_v48 = vsel %vm10252_vm5, %v8016_v52, %v5172_v32  ;;  %v5174_v35 = vrot.slane %v5172_v32, 4  ;;  %v4563_v34 = vrot.slane %v9715_v43, 5  ;;  %13821 = vst [vmem:[#allocation55_spill] sm:$0xff] %v12693_v45  ;;  %v4444_v49 = vld [vmem:[#allocation2 + $0x84] sm:$0xe] }
 0x350   : > { %v8095_v18 = vcombine.low %v4255_v19, %v4265_v7  ;;  %v4883_v54 = vrot.slane %v4882_v11, 4  ;;  %13818 = vst [vmem:[#allocation52_spill] sm:$0xff] %v12671_v48  ;;  %v4893_v5 = vrot.slane %v4892_v30, 4  ;;  %v4566_v36 = vrot.slane %v4043_v0, 5 }
 0x351   : > { %v8128_v10 = vcombine.low %v12648_v26, %v12650_v29  ;;  %v12679_v19 = vsel %vm10252_vm5, %v5174_v35, %v5175_v13  ;;  %v4273_v55 = vor.u32 %v12114_v46, %v12111_v60  ;;  %v4276_v1 = vshll.u32 %v9715_v43, 16 }
 0x352   : > { %6838 = vmatmul.mubr.bf16.gmra.mrb[240].mxu1 %v8095_v18  ;;  %v4888_v58 = vsel %vm10053_vm2, %v4883_v54, %v4887_v2  ;;  %13819 = vst [vmem:[#allocation53_spill] sm:$0xff] %v12679_v19  ;;  %v4898_v22 = vsel %vm10053_vm2, %v4893_v5, %v4897_v37  ;;  %v4564_v29 = vsel %vm10252_vm5, %v8000_v21, %v4563_v34  ;;  %v4565_v47 = vrot.slane %v4563_v34, 4  ;;  %v12691_v2 = vld [vmem:[#allocation2 + $0x94] sm:$0xf]  ;;  %v9716_v19 = vld [vmem:[#allocation2 + $0x88] sm:$0xf] }
 0x353   : > { %13820 = vst [vmem:[#allocation54_spill] sm:$0xff] %v12691_v2  ;;  %v8144_v60 = vcombine.low %v4888_v58, %v4898_v22  ;;  %v4274_v46 = vrot.slane %v4273_v55, 4  ;;  %v4278_v52 = vrot.slane %v4276_v1, 5  ;;  %v13822_v32 = vshrl.u32 %v12089_v27, 16  ;;  %v4044_v55 = vld [vmem:[#allocation2 + $0x8c] sm:$0x1] }
 0x354   : > { %v12695_v11 = vpop.f32.mrb[156].mxu0  ;;  %v4567_v37 = vsel %vm10252_vm5, %v4565_v47, %v4566_v36  ;;  %v4286_v21 = vshll.u32 %v4043_v0, 16  ;;  %v4900_v18 = vshrl.u32 %v12683_v20, 16  ;;  %v4903_v54 = vshll.u32 %v12683_v20, 16 }
 0x355   : > { %v4282_v13 = vrot.slane %v13822_v32, 4  ;;  %v12699_v7 = vpop.f32.mrb[156].mxu1  ;;  %v12701_v30 = vpop.f32.mrb[157].mxu0  ;;  %7006 = vmatprep.mubr.bf16.mxu0 %v8144_v60  ;;  %v8112_v43 = vcombine.low %v4564_v29, %v4567_v37  ;;  %v4279_v27 = vsel %vm10053_vm2, %v4274_v46, %v4278_v52  ;;  %v4909_v58 = vshll.u32 %v12691_v2, 16 }
 0x356   : > { %v12707_v35 = vpop.f32.mrb[157].mxu1  ;;  %v12709_v5 = vpop.f32.mrb[158].mxu0  ;;  %7007 = vmatmul.mubr.bf16.gmra.mrb[244].mxu0 %v8128_v10  ;;  %v4288_v36 = vrot.slane %v4286_v21, 5  ;;  %v4902_v22 = vrot.slane %v4900_v18, 4  ;;  %v4905_v47 = vrot.slane %v4903_v54, 5  ;;  %v4913_v32 = vshrl.u32 %v12691_v2, 16 }
 0x357   : > { %v4283_v34 = vor.u32 %v4282_v13, %v4278_v52  ;;  %v12714_v1 = vpop.f32.mrb[158].mxu1  ;;  %v12716_v0 = vpop.f32.mrb[159].mxu0  ;;  %6845 = vmatprep.mubr.bf16.mxu1 %v8112_v43  ;;  %v4911_v60 = vrot.slane %v4909_v58, 5  ;;  %v4919_v46 = vshll.u32 %v12693_v45, 16  ;;  %v8001_v52 = vrot.slane %v4444_v49, 9 }
 0x358   : > { %v12719_v26 = vpop.f32.mrb[159].mxu1  ;;  %v4906_v13 = vor.u32 %v4905_v47, %v4902_v22  ;;  %v4915_v37 = vrot.slane %v4913_v32, 4  ;;  %v4570_v48 = vrot.slane %v9716_v19, 5  ;;  %v4573_v23 = vrot.slane %v4044_v55, 5  ;;  %v12728_v43 = vld [vmem:[#allocation2 + $0x9c] sm:$0xf] }
 0x359   : > { %v4284_v29 = vrot.slane %v4283_v34, 4  ;;  %v4921_v21 = vrot.slane %v4919_v46, 5  ;;  %v8129_v18 = vcombine.low %v12683_v20, %v12691_v2  ;;  %v4297_v54 = vor.u32 %v12139_v39, %v12135_v6  ;;  %v12732_v47 = vld [vmem:[#allocation2 + $0xa0] sm:$0xf]  ;;  %v4445_v2 = vld [vmem:[#allocation2 + $0x90] sm:$0xe] }
 0x35a   : > { %v4907_v58 = vrot.slane %v4906_v13, 4  ;;  %v4916_v49 = vor.u32 %v4915_v37, %v4911_v60  ;;  %v4571_v22 = vsel %vm10252_vm5, %v8001_v52, %v4570_v48  ;;  %v4572_v32 = vrot.slane %v4570_v48, 4  ;;  %v5054_v13 = vld [vmem:[#allocation2 + $0x9c] sm:$0xe] }
 0x35b   : > { %v4289_v10 = vsel %vm10053_vm2, %v4284_v29, %v4288_v36  ;;  %v4298_v45 = vrot.slane %v4297_v54, 4  ;;  %v4300_v36 = vshll.u32 %v9716_v19, 16  ;;  %v13823_v29 = vshrl.u32 %v12116_v28, 16 }
 0x35c   : > { %v8096_v34 = vcombine.low %v4279_v27, %v4289_v10  ;;  %v4912_v6 = vsel %vm10053_vm2, %v4907_v58, %v4911_v60  ;;  %v4917_v39 = vrot.slane %v4916_v49, 4  ;;  %v4310_v20 = vshll.u32 %v4044_v55, 16  ;;  %v4654_v10 = vld [vmem:[#allocation2 + $0xa4] sm:$0x1] }
 0x35d   : > { %v4306_v46 = vrot.slane %v13823_v29, 4  ;;  %v4924_v27 = vshrl.u32 %v12728_v43, 16  ;;  %v4574_v52 = vsel %vm10252_vm5, %v4572_v32, %v4573_v23  ;;  %v4302_v37 = vrot.slane %v4300_v36, 5 }
 0x35e   : > { %6846 = vmatmul.mubr.bf16.gmra.mrb[244].mxu1 %v8096_v34  ;;  %v4927_v48 = vshll.u32 %v12728_v43, 16  ;;  %v4933_v19 = vshll.u32 %v12732_v47, 16  ;;  %v4922_v28 = vsel %vm10053_vm2, %v4917_v39, %v4921_v21  ;;  %v8113_v54 = vcombine.low %v4571_v22, %v4574_v52 }
 0x35f   : > { %v4312_v34 = vrot.slane %v4310_v20, 5  ;;  %v4926_v60 = vrot.slane %v4924_v27, 4  ;;  %v8145_v58 = vcombine.low %v4912_v6, %v4922_v28  ;;  %v4303_v55 = vsel %vm10053_vm2, %v4298_v45, %v4302_v37  ;;  %v4045_v20 = vld [vmem:[#allocation2 + $0x98] sm:$0x1] }
 0x360   : > { %v4307_v49 = vor.u32 %v4306_v46, %v4302_v37  ;;  %v4929_v29 = vrot.slane %v4927_v48, 5  ;;  %6853 = vmatprep.mubr.bf16.mxu1 %v8113_v54  ;;  %v4935_v23 = vrot.slane %v4933_v19, 5  ;;  %v4937_v32 = vshrl.u32 %v12732_v47, 16  ;;  %v9717_v46 = vld [vmem:[#allocation2 + $0x94] sm:$0xf] }
 0x361   : > { %v4943_v36 = vshll.u32 %v4654_v10, 16  ;;  %v8018_v12 = vrot.slane %v5054_v13, 9  ;;  %7014 = vmatprep.mubr.bf16.mxu0 %v8145_v58  ;;  %v5186_v21 = vrot.slane %v12732_v47, 5  ;;  %v5189_v22 = vrot.slane %v4654_v10, 5 }
 0x362   : > { %v4308_v51 = vrot.slane %v4307_v49, 4  ;;  %v4930_v3 = vor.u32 %v4929_v29, %v4926_v60  ;;  %7015 = vmatmul.mubr.bf16.gmra.mrb[248].mxu0 %v8129_v18  ;;  %v4939_v6 = vrot.slane %v4937_v32, 4  ;;  %v8002_v45 = vrot.slane %v4445_v2, 9  ;;  %v13828_v32 = vld [vmem:[#allocation31_spill] sm:$0xff] }
 0x363   : > { %v4945_v39 = vrot.slane %v4943_v36, 5  ;;  %v4577_v27 = vrot.slane %v9717_v46, 5  ;;  %v12753_v13 = vsel %vm10252_vm5, %v8018_v12, %v5186_v21  ;;  %v5188_v48 = vrot.slane %v5186_v21, 4  ;;  %v13827_v12 = vld [vmem:[#allocation42_spill] sm:$0xff] }
 0x364   : > { %v4313_v52 = vsel %vm10053_vm2, %v4308_v51, %v4312_v34  ;;  %v4931_v37 = vrot.slane %v4930_v3, 4  ;;  %13824 = vst [vmem:[#allocation56_spill] sm:$0xff] %v12753_v13  ;;  %v4940_v28 = vor.u32 %v4939_v6, %v4935_v23  ;;  %v4580_v3 = vrot.slane %v4045_v20, 5  ;;  %v13826_v34 = vld [vmem:[#allocation21_spill] sm:$0xff] }
 0x365   : > { %v8097_v19 = vcombine.low %v4303_v55, %v4313_v52  ;;  %v4578_v18 = vsel %vm10252_vm5, %v8002_v45, %v4577_v27  ;;  %v4579_v10 = vrot.slane %v4577_v27, 4  ;;  %v12763_v51 = vsel %vm10252_vm5, %v5188_v48, %v5189_v22  ;;  %v13830_v27 = vld [vmem:[#allocation35_spill] sm:$0xff]  ;;  %v13831_v52 = vld [vmem:[#allocation37_spill] sm:$0xff] }
 0x366   : > { %v12757_v54 = vpop.f32.mrb[160].mxu1  ;;  %v4936_v2 = vsel %vm10053_vm2, %v4931_v37, %v4935_v23  ;;  %13825 = vst [vmem:[#allocation57_spill] sm:$0xff] %v12763_v51  ;;  %v8779_v60 = vadd.f32 %v13827_v12, %v13826_v34  ;;  %v4941_v55 = vrot.slane %v4940_v28, 4  ;;  %v8891_v29 = vadd.f32 %v12464_v42, %v12453_v31  ;;  %v13829_v23 = vld [vmem:[#allocation16_spill] sm:$0xff]  ;;  %v12785_v48 = vld [vmem:[#allocation2 + $0xa8] sm:$0xf] }
 0x367   : > { %v12767_v58 = vpop.f32.mrb[161].mxu1  ;;  %6854 = vmatmul.mubr.bf16.gmra.mrb[248].mxu1 %v8097_v19  ;;  %v8782_v36 = vadd.f32 %v13829_v23, %v13828_v32  ;;  %v4581_v22 = vsel %vm10252_vm5, %v4579_v10, %v4580_v3  ;;  %v8894_v6 = vadd.f32 %v12475_v57, %v12470_v63  ;;  %v8130_v45 = vcombine.low %v12728_v43, %v12732_v47  ;;  %v12793_v3 = vld [vmem:[#allocation2 + $0xac] sm:$0xf]  ;;  %v12795_v63 = vld [vmem:[#allocation2 + $0xb0] sm:$0x1]  ;;  %v13836_v12 = vld [vmem:[#allocation34_spill] sm:$0xff] }
 0x368   : > { %v12775_v21 = vpop.f32.mrb[162].mxu1  ;;  %v4321_v37 = vor.u32 %v13831_v52, %v13830_v27  ;;  %v4946_v42 = vsel %vm10053_vm2, %v4941_v55, %v4945_v39  ;;  %v8114_v19 = vcombine.low %v4578_v18, %v4581_v22  ;;  %v12791_v28 = vadd.f32 %v8891_v29, %v8779_v60  ;;  %13834 = vst [vmem:[#allocation31_spill] sm:$0xff] %v12795_v63  ;;  %v13838_v29 = vld [vmem:[#allocation30_spill] sm:$0xff]  ;;  %v13839_v22 = vld [vmem:[#allocation32_spill] sm:$0xff] }
 0x369   : > { %v12787_v31 = vpop.f32.mrb[163].mxu1  ;;  %v4324_v10 = vshll.u32 %v9717_v46, 16  ;;  %v8146_v43 = vcombine.low %v4936_v2, %v4946_v42  ;;  %v12799_v47 = vadd.f32 %v8894_v6, %v8782_v36  ;;  %v13837_v32 = vshrl.u32 %v13836_v12, 16 }
 0x36a   : > { %13832 = vst [vmem:[#allocation21_spill] sm:$0xff] %v12787_v31  ;;  %13833 = vst [vmem:[#allocation42_spill] sm:$0xff] %v12791_v28  ;;  %v12797_v57 = vpop.f32.mrb[160].mxu0  ;;  %v4322_v34 = vrot.slane %v4321_v37, 4  ;;  %6861 = vmatprep.mubr.bf16.mxu1 %v8114_v19  ;;  %v4334_v18 = vshll.u32 %v4045_v20, 16  ;;  %v4948_v46 = vshrl.u32 %v12785_v48, 16  ;;  %v8131_v12 = vcombine.low %v12785_v48, %v12793_v3 }
 0x36b   : > { %13835 = vst [vmem:[#allocation16_spill] sm:$0xff] %v12799_v47  ;;  %v4330_v23 = vrot.slane %v13837_v32, 4  ;;  %v12803_v27 = vpop.f32.mrb[161].mxu0  ;;  %v4326_v39 = vrot.slane %v4324_v10, 5  ;;  %v4951_v60 = vshll.u32 %v12785_v48, 16  ;;  %7022 = vmatprep.mubr.bf16.mxu0 %v8146_v43  ;;  %v4957_v36 = vshll.u32 %v12793_v3, 16 }
 0x36c   : > { %v12807_v55 = vpop.f32.mrb[162].mxu0  ;;  %v4961_v6 = vshrl.u32 %v12793_v3, 16  ;;  %v4967_v52 = vshll.u32 %v12795_v63, 16  ;;  %v4046_v37 = vld [vmem:[#allocation2 + $0xa4] sm:$0x1]  ;;  %7023 = vmatmul.mubr.bf16.gmra.mrb[252].mxu0 %v8130_v45  ;;  %v4950_v10 = vrot.slane %v4948_v46, 4 }
 0x36d   : > { %v12814_v42 = vpop.f32.mrb[163].mxu0  ;;  %v4327_v20 = vsel %vm10053_vm2, %v4322_v34, %v4326_v39  ;;  %v4331_v19 = vor.u32 %v4330_v23, %v4326_v39  ;;  %v4446_v32 = vld [vmem:[#allocation2 + $0x9c] sm:$0xe]  ;;  %v4336_v43 = vrot.slane %v4334_v18, 5  ;;  %v4953_v49 = vrot.slane %v4951_v60, 5 }
 0x36e   : > { %v4959_v2 = vrot.slane %v4957_v36, 5  ;;  %v4963_v47 = vrot.slane %v4961_v6, 4  ;;  %v4969_v51 = vrot.slane %v4967_v52, 5  ;;  %v4358_v13 = vshll.u32 %v4046_v37, 16  ;;  %v9718_v63 = vld [vmem:[#allocation2 + $0xa0] sm:$0xf] }
 0x36f   : > { %v4332_v28 = vrot.slane %v4331_v19, 4  ;;  %v4584_v15 = vrot.slane %v9718_v63, 5  ;;  %v4954_v53 = vor.u32 %v4953_v49, %v4950_v10  ;;  %v8003_v31 = vrot.slane %v4446_v32, 9  ;;  %v12826_v52 = vld [vmem:[#allocation2 + $0xb4] sm:$0xf] }
 0x370   : > { %v4964_v45 = vor.u32 %v4963_v47, %v4959_v2  ;;  %v8897_v34 = vadd.f32 %v12561_v41, %v12551_v33  ;;  %v4360_v48 = vrot.slane %v4358_v13, 5  ;;  %v4587_v18 = vrot.slane %v4046_v37, 5  ;;  %v4047_v19 = vld [vmem:[#allocation2 + $0xb0] sm:$0x1] }
 0x371   : > { %v4337_v23 = vsel %vm10053_vm2, %v4332_v28, %v4336_v43  ;;  %v4586_v39 = vrot.slane %v4584_v15, 4  ;;  %v4955_v60 = vrot.slane %v4954_v53, 4  ;;  %v8785_v6 = vadd.f32 %v12553_v50, %v12545_v8  ;;  %v12836_v28 = vld [vmem:[#allocation2 + $0xb8] sm:$0xf]  ;;  %v4656_v53 = vld [vmem:[#allocation2 + $0xbc] sm:$0x1] }
 0x372   : > { %v8098_v46 = vcombine.low %v4327_v20, %v4337_v23  ;;  %v4965_v36 = vrot.slane %v4964_v45, 4  ;;  %v4585_v49 = vsel %vm10252_vm5, %v8003_v31, %v4584_v15  ;;  %v8900_v41 = vadd.f32 %v12575_v62, %v12569_v56  ;;  %v13840_v50 = vld [vmem:[#allocation19_spill] sm:$0xff]  ;;  %v5056_v62 = vld [vmem:[#allocation2 + $0xb4] sm:$0xe] }
 0x373   : > { %v4588_v33 = vsel %vm10252_vm5, %v4586_v39, %v4587_v18  ;;  %v8788_v13 = vadd.f32 %v12571_v59, %v12563_v17  ;;  %v4960_v8 = vsel %vm10053_vm2, %v4955_v60, %v4959_v2  ;;  %v4361_v31 = vsel %vm10053_vm2, %v13840_v50, %v4360_v48  ;;  %v13843_v39 = vld [vmem:[#allocation36_spill] sm:$0xff]  ;;  %v13844_v18 = vld [vmem:[#allocation26_spill] sm:$0xff]  ;;  %v4447_v50 = vld [vmem:[#allocation2 + $0xa8] sm:$0xe] }
 0x374   : > { %6862 = vmatmul.mubr.bf16.gmra.mrb[252].mxu1 %v8098_v46  ;;  %v4970_v15 = vsel %vm10053_vm2, %v4965_v36, %v4969_v51  ;;  %v8115_v56 = vcombine.low %v4585_v49, %v4588_v33  ;;  %v12851_v37 = vadd.f32 %v8897_v34, %v8785_v6  ;;  %v4972_v2 = vshrl.u32 %v12826_v52, 16 }
 0x375   : > { %v12838_v63 = vpop.f32.mrb[164].mxu0  ;;  %v12847_v47 = vpop.f32.mrb[164].mxu1  ;;  %v8147_v59 = vcombine.low %v4960_v8, %v4970_v15  ;;  %v12853_v20 = vadd.f32 %v8900_v41, %v8788_v13  ;;  %v4975_v32 = vshll.u32 %v12826_v52, 16  ;;  %v4981_v43 = vshll.u32 %v12836_v28, 16 }
 0x376   : > { %v12849_v17 = vpop.f32.mrb[165].mxu0  ;;  %13841 = vst [vmem:[#allocation35_spill] sm:$0xff] %v12851_v37  ;;  %v12856_v10 = vpop.f32.mrb[165].mxu1  ;;  %6869 = vmatprep.mubr.bf16.mxu1 %v8115_v56  ;;  %v4985_v45 = vshrl.u32 %v12836_v28, 16  ;;  %v4991_v23 = vshll.u32 %v4656_v53, 16  ;;  %v13845_v46 = vsel %vm10053_vm2, %v13843_v39, %v13844_v18  ;;  %v4974_v36 = vrot.slane %v4972_v2, 4 }
 0x377   : > { %13842 = vst [vmem:[#allocation37_spill] sm:$0xff] %v12853_v20  ;;  %v12858_v51 = vpop.f32.mrb[166].mxu0  ;;  %v12863_v48 = vpop.f32.mrb[166].mxu1  ;;  %7030 = vmatprep.mubr.bf16.mxu0 %v8147_v59  ;;  %v8099_v60 = vcombine.low %v13845_v46, %v4361_v31  ;;  %v8020_v6 = vrot.slane %v5056_v62, 9  ;;  %v5200_v49 = vrot.slane %v12836_v28, 5  ;;  %v4977_v41 = vrot.slane %v4975_v32, 5 }
 0x378   : > { %v12865_v34 = vpop.f32.mrb[167].mxu0  ;;  %v12873_v33 = vpop.f32.mrb[167].mxu1  ;;  %7031 = vmatmul.mubr.bf16.gmra.mrb[0].mxu0 %v8131_v12  ;;  %v4983_v13 = vrot.slane %v4981_v43, 5  ;;  %v4987_v8 = vrot.slane %v4985_v45, 4  ;;  %v5203_v15 = vrot.slane %v4656_v53, 5  ;;  %v4993_v56 = vrot.slane %v4991_v23, 5 }
 0x379   : > { %v12877_v59 = vsel %vm10252_vm5, %v8020_v6, %v5200_v49  ;;  %v5202_v20 = vrot.slane %v5200_v49, 4  ;;  %v4382_v39 = vshll.u32 %v4047_v19, 16  ;;  %v4978_v31 = vor.u32 %v4977_v41, %v4974_v36  ;;  %v9719_v18 = vld [vmem:[#allocation2 + $0xac] sm:$0xf] }
 0x37a   : > { %13846 = vst [vmem:[#allocation34_spill] sm:$0xff] %v12877_v59  ;;  %v4988_v2 = vor.u32 %v4987_v8, %v4983_v13  ;;  %v8132_v62 = vcombine.low %v12826_v52, %v12836_v28  ;;  %v4591_v46 = vrot.slane %v9719_v18, 5  ;;  %v8004_v32 = vrot.slane %v4447_v50, 9  ;;  %v12891_v28 = vld [vmem:[#allocation2 + $0xc0] sm:$0xf]  ;;  %v13848_v50 = vld [vmem:[#allocation41_spill] sm:$0xff] }
 0x37b   : > { %v12883_v12 = vsel %vm10252_vm5, %v5202_v20, %v5203_v15  ;;  %v4384_v53 = vrot.slane %v4382_v39, 5  ;;  %v8903_v43 = vadd.f32 %v12622_v4, %v12614_v9  ;;  %v4979_v23 = vrot.slane %v4978_v31, 4 }
 0x37c   : > { %13847 = vst [vmem:[#allocation30_spill] sm:$0xff] %v12883_v12  ;;  %6870 = vmatmul.mubr.bf16.gmra.mrb[0].mxu1 %v8099_v60  ;;  %v4989_v36 = vrot.slane %v4988_v2, 4  ;;  %v4594_v52 = vrot.slane %v4047_v19, 5  ;;  %v4592_v20 = vsel %vm10252_vm5, %v8004_v32, %v4591_v46  ;;  %v4593_v41 = vrot.slane %v4591_v46, 4  ;;  %v12901_v60 = vld [vmem:[#allocation2 + $0xc4] sm:$0xf] }
 0x37d   : > { %v12887_v45 = vpop.f32.mrb[168].mxu0  ;;  %v8791_v9 = vadd.f32 %v12627_v25, %v12620_v38  ;;  %v8906_v4 = vadd.f32 %v12633_v14, %v12629_v61  ;;  %v4984_v19 = vsel %vm10053_vm2, %v4979_v23, %v4983_v13  ;;  %v4385_v39 = vsel %vm10053_vm2, %v13848_v50, %v4384_v53  ;;  %v12914_v25 = vld [vmem:[#allocation2 + $0xc8] sm:$0x1]  ;;  %v4448_v32 = vld [vmem:[#allocation2 + $0xb4] sm:$0xe] }
 0x37e   : > { %v12893_v49 = vpop.f32.mrb[169].mxu0  ;;  %v4994_v15 = vsel %vm10053_vm2, %v4989_v36, %v4993_v56  ;;  %v8794_v38 = vadd.f32 %v12638_v16, %v12631_v24  ;;  %v4595_v31 = vsel %vm10252_vm5, %v4593_v41, %v4594_v52  ;;  %v4996_v13 = vshrl.u32 %v12891_v28, 16  ;;  %v4048_v56 = vld [vmem:[#allocation2 + $0xbc] sm:$0x1] }
 0x37f   : > { %v12903_v8 = vpop.f32.mrb[170].mxu0  ;;  %v8148_v61 = vcombine.low %v4984_v19, %v4994_v15  ;;  %v12920_v2 = vadd.f32 %v8903_v43, %v8791_v9  ;;  %v8116_v46 = vcombine.low %v4592_v20, %v4595_v31  ;;  %v4999_v24 = vshll.u32 %v12891_v28, 16  ;;  %v13853_v19 = vld [vmem:[#allocation39_spill] sm:$0xff] }
 0x380   : > { %v12916_v14 = vpop.f32.mrb[171].mxu0  ;;  %v12923_v18 = vpop.f32.mrb[168].mxu1  ;;  %v12925_v53 = vadd.f32 %v8906_v4, %v8794_v38  ;;  %v5005_v16 = vshll.u32 %v12901_v60, 16  ;;  %v13851_v36 = vor.u32 %v13839_v22, %v13838_v29  ;;  %v4998_v52 = vrot.slane %v4996_v13, 4  ;;  %v13852_v4 = vld [vmem:[#allocation38_spill] sm:$0xff] }
 0x381   : > { %13849 = vst [vmem:[#allocation32_spill] sm:$0xff] %v12920_v2  ;;  %v12929_v23 = vpop.f32.mrb[169].mxu1  ;;  %7038 = vmatprep.mubr.bf16.mxu0 %v8148_v61  ;;  %v5009_v41 = vshrl.u32 %v12901_v60, 16  ;;  %v5015_v20 = vshll.u32 %v12914_v25, 16  ;;  %v13854_v15 = vsel %vm10053_vm2, %v13852_v4, %v13853_v19  ;;  %6877 = vmatprep.mubr.bf16.mxu1 %v8116_v46  ;;  %v5001_v38 = vrot.slane %v4999_v24, 5 }
 0x382   : > { %13850 = vst [vmem:[#allocation19_spill] sm:$0xff] %v12925_v53  ;;  %v12934_v43 = vrot.slane %v13851_v36, 4  ;;  %v12938_v9 = vpop.f32.mrb[170].mxu1  ;;  %v8100_v50 = vcombine.low %v13854_v15, %v4385_v39  ;;  %7039 = vmatmul.mubr.bf16.gmra.mrb[4].mxu0 %v8132_v62  ;;  %v5007_v22 = vrot.slane %v5005_v16, 5  ;;  %v4406_v31 = vshll.u32 %v4048_v56, 16 }
 0x383   : > { %v12945_v36 = vpop.f32.mrb[171].mxu1  ;;  %v5011_v61 = vrot.slane %v5009_v41, 4  ;;  %v5017_v13 = vrot.slane %v5015_v20, 5  ;;  %v8005_v6 = vrot.slane %v4448_v32, 9  ;;  %v9720_v53 = vld [vmem:[#allocation2 + $0xb8] sm:$0xf]  ;;  %v5002_v12 = vor.u32 %v5001_v38, %v4998_v52 }
 0x384   : > { %v4598_v2 = vrot.slane %v9720_v53, 5  ;;  %6878 = vmatmul.mubr.bf16.gmra.mrb[4].mxu1 %v8100_v50  ;;  %v4408_v59 = vrot.slane %v4406_v31, 5  ;;  %v8909_v39 = vadd.f32 %v12701_v30, %v12695_v11  ;;  %v8797_v62 = vadd.f32 %v12707_v35, %v12699_v7  ;;  %v4049_v46 = vld [vmem:[#allocation2 + $0xc8] sm:$0x1]  ;;  %v4449_v30 = vld [vmem:[#allocation2 + $0xc0] sm:$0xe] }
 0x385   : > { %v12947_v37 = vpop.f32.mrb[172].mxu0  ;;  %v5012_v16 = vor.u32 %v5011_v61, %v5007_v22  ;;  %v4601_v20 = vrot.slane %v4048_v56, 5  ;;  %v8912_v53 = vadd.f32 %v12716_v0, %v12709_v5  ;;  %v5003_v4 = vrot.slane %v5002_v12, 4  ;;  %v13855_v52 = vld [vmem:[#allocation43_spill] sm:$0xff]  ;;  %v13856_v50 = vld [vmem:[#allocation40_spill] sm:$0xff] }
 0x386   : > { %v12953_v24 = vpop.f32.mrb[173].mxu0  ;;  %v4600_v41 = vrot.slane %v4598_v2, 4  ;;  %v4409_v19 = vsel %vm10053_vm2, %v13855_v52, %v4408_v59  ;;  %v12962_v11 = vadd.f32 %v8909_v39, %v8797_v62  ;;  %v8800_v7 = vadd.f32 %v12719_v26, %v12714_v1  ;;  %v13857_v26 = vld [vmem:[#allocation9_spill] sm:$0xff] }
 0x387   : > { %v12957_v32 = vpop.f32.mrb[174].mxu0  ;;  %v5013_v15 = vrot.slane %v5012_v16, 4  ;;  %v4599_v56 = vsel %vm10252_vm5, %v8005_v6, %v4598_v2  ;;  %v4430_v0 = vshll.u32 %v4049_v46, 16  ;;  %v8133_v59 = vcombine.low %v12891_v28, %v12901_v60  ;;  %v9721_v16 = vld [vmem:[#allocation2 + $0xc4] sm:$0xf] }
 0x388   : > { %v12966_v35 = vpop.f32.mrb[175].mxu0  ;;  %v4602_v5 = vsel %vm10252_vm5, %v4600_v41, %v4601_v20  ;;  %v12972_v12 = vpop.f32.mrb[172].mxu1  ;;  %v13858_v1 = vsel %vm10053_vm2, %v13856_v50, %v13857_v26  ;;  %v12981_v61 = vadd.f32 %v8912_v53, %v8800_v7  ;;  %v5008_v6 = vsel %vm10053_vm2, %v5003_v4, %v5007_v22  ;;  %v12989_v41 = vld [vmem:[#allocation2 + $0xcc] sm:$0xf]  ;;  %v12999_v4 = vld [vmem:[#allocation2 + $0xd0] sm:$0xf] }
 0x389   : > { %v8101_v38 = vcombine.low %v13858_v1, %v4409_v19  ;;  %v8117_v31 = vcombine.low %v4599_v56, %v4602_v5  ;;  %v12983_v39 = vpop.f32.mrb[173].mxu1  ;;  %v5018_v2 = vsel %vm10053_vm2, %v5013_v15, %v5017_v13  ;;  %v8006_v62 = vrot.slane %v4449_v30, 9  ;;  %v13859_v56 = vld [vmem:[#allocation21_spill] sm:$0xff]  ;;  %v13005_v50 = vld [vmem:[#allocation2 + $0xd4] sm:$0x1] }
 0x38a   : > { %v4605_v28 = vrot.slane %v9721_v16, 5  ;;  %v12991_v20 = vpop.f32.mrb[174].mxu1  ;;  %v8149_v52 = vcombine.low %v5008_v6, %v5018_v2  ;;  %v8915_v53 = vadd.f32 %v12803_v27, %v12797_v57  ;;  %v8803_v19 = vadd.f32 %v12767_v58, %v12757_v54 }
 0x38b   : > { %6885 = vmatprep.mubr.bf16.mxu1 %v8117_v31  ;;  %v8918_v22 = vadd.f32 %v12814_v42, %v12807_v55  ;;  %v13001_v13 = vpop.f32.mrb[175].mxu1  ;;  %v4432_v7 = vrot.slane %v4430_v0, 5  ;;  %v4608_v15 = vrot.slane %v4049_v46, 5  ;;  %v8806_v5 = vadd.f32 %v13859_v56, %v12775_v21 }
 0x38c   : > { %v4607_v30 = vrot.slane %v4605_v28, 4  ;;  %7046 = vmatprep.mubr.bf16.mxu0 %v8149_v52  ;;  %6886 = vmatmul.mubr.bf16.gmra.mrb[8].mxu1 %v8101_v38  ;;  %v4606_v54 = vsel %vm10252_vm5, %v8006_v62, %v4605_v28  ;;  %v13011_v58 = vadd.f32 %v8915_v53, %v8803_v19  ;;  %v5020_v57 = vshrl.u32 %v12989_v41, 16  ;;  %v5043_v19 = vld [vmem:[#allocation2 + $0x18] sm:$0xe] }
 0x38d   : > { %v13007_v26 = vpop.f32.mrb[176].mxu0  ;;  %v5023_v27 = vshll.u32 %v12989_v41, 16  ;;  %7047 = vmatmul.mubr.bf16.gmra.mrb[8].mxu0 %v8133_v59  ;;  %v13019_v42 = vadd.f32 %v8918_v22, %v8806_v5  ;;  %v5029_v46 = vshll.u32 %v12999_v4, 16  ;;  %v5033_v0 = vshrl.u32 %v12999_v4, 16 }
 0x38e   : > { %v13015_v55 = vpop.f32.mrb[177].mxu0  ;;  %v4609_v21 = vsel %vm10252_vm5, %v4607_v30, %v4608_v15  ;;  %v5022_v31 = vrot.slane %v5020_v57, 4  ;;  %v5039_v2 = vshll.u32 %v13005_v50, 16  ;;  %v4433_v59 = vsel %vm10053_vm2, %v12934_v43, %v4432_v7  ;;  %v13860_v30 = vld [vmem:[#allocation33_spill] sm:$0xff] }
 0x38f   : > { %v13023_v1 = vpop.f32.mrb[178].mxu0  ;;  %v8118_v38 = vcombine.low %v4606_v54, %v4609_v21  ;;  %v5025_v6 = vrot.slane %v5023_v27, 5  ;;  %v5031_v16 = vrot.slane %v5029_v46, 5  ;;  %v5035_v28 = vrot.slane %v5033_v0, 4  ;;  %v9722_v7 = vld [vmem:[#allocation2 + $0x1c] sm:$0xf] }
 0x390   : > { %v13026_v62 = vpop.f32.mrb[179].mxu0  ;;  %v13031_v52 = vpop.f32.mrb[176].mxu1  ;;  %v4423_v15 = vsel %vm10053_vm2, %v13860_v30, %v13838_v29  ;;  %v5041_v5 = vrot.slane %v5039_v2, 5  ;;  %v5109_v27 = vrot.slane %v9722_v7, 5  ;;  %v8921_v21 = vadd.f32 %v12849_v17, %v12838_v63  ;;  %v9723_v17 = vld [vmem:[#allocation2 + $0x20] sm:$0x1] }
 0x391   : > { %6893 = vmatprep.mubr.bf16.mxu1 %v8118_v38  ;;  %v5026_v53 = vor.u32 %v5025_v6, %v5022_v31  ;;  %v13033_v22 = vpop.f32.mrb[177].mxu1  ;;  %v5036_v56 = vor.u32 %v5035_v28, %v5031_v16  ;;  %v8102_v57 = vcombine.low %v4423_v15, %v4433_v59  ;;  %v8007_v38 = vrot.slane %v5043_v19, 9  ;;  %v5045_v6 = vld [vmem:[#allocation2 + $0x30] sm:$0xe] }
 0x392   : > { %v13039_v54 = vpop.f32.mrb[178].mxu1  ;;  %v8809_v31 = vadd.f32 %v12856_v10, %v12847_v47  ;;  %v8924_v29 = vadd.f32 %v12865_v34, %v12858_v51  ;;  %v8134_v28 = vcombine.low %v12989_v41, %v12999_v4  ;;  %v5111_v63 = vrot.slane %v5109_v27, 4 }
 0x393   : > { %v5027_v43 = vrot.slane %v5026_v53, 4  ;;  %v13043_v46 = vpop.f32.mrb[179].mxu1  ;;  %v5037_v0 = vrot.slane %v5036_v56, 4  ;;  %v5112_v53 = vrot.slane %v9723_v17, 5  ;;  %v5110_v10 = vsel %vm10252_vm5, %v8007_v38, %v5109_v27  ;;  %v9724_v56 = vld [vmem:[#allocation2 + $0x34] sm:$0xf] }
 0x394   : > { %6894 = vmatmul.mubr.bf16.gmra.mrb[12].mxu1 %v8102_v57  ;;  %v13061_v51 = vadd.f32 %v8921_v21, %v8809_v31  ;;  %v8812_v34 = vadd.f32 %v12873_v33, %v12863_v48  ;;  %v8009_v15 = vrot.slane %v5045_v6, 9  ;;  %v5123_v57 = vrot.slane %v9724_v56, 5  ;;  %v9725_v33 = vld [vmem:[#allocation2 + $0x38] sm:$0x1] }
 0x395   : > { %v13049_v2 = vpop.f32.mrb[180].mxu0  ;;  %v5032_v59 = vsel %vm10053_vm2, %v5027_v43, %v5031_v16  ;;  %v5042_v47 = vsel %vm10053_vm2, %v5037_v0, %v5041_v5  ;;  %v5113_v41 = vsel %vm10252_vm5, %v5111_v63, %v5112_v53  ;;  %v8927_v5 = vadd.f32 %v12893_v49, %v12887_v45 }
 0x396   : > { %v13055_v19 = vpop.f32.mrb[181].mxu0  ;;  %v8150_v30 = vcombine.low %v5032_v59, %v5042_v47  ;;  %v8151_v7 = vcombine.low %v5110_v10, %v5113_v41  ;;  %v13067_v40 = vadd.f32 %v8924_v29, %v8812_v34  ;;  %v8815_v27 = vadd.f32 %v12929_v23, %v12923_v18  ;;  %v9726_v18 = vld [vmem:[#allocation2 + $0x4c] sm:$0xf]  ;;  %v13862_v47 = vld [vmem:[#allocation45_spill] sm:$0xff] }
 0x397   : > { %v8946_v16 = vpop.f32.mrb[182].mxu0  ;;  %v5125_v48 = vrot.slane %v5123_v57, 4  ;;  %v5126_v0 = vrot.slane %v9725_v33, 5  ;;  %v8930_v38 = vadd.f32 %v12916_v14, %v12903_v8  ;;  %v8818_v31 = vadd.f32 %v12945_v36, %v12938_v9  ;;  %v13861_v59 = vld [vmem:[#allocation11_spill] sm:$0xff] }
 0x398   : > { %v8947_v43 = vpop.f32.mrb[183].mxu0  ;;  %v8831_v21 = vpop.f32.mrb[180].mxu1  ;;  %7054 = vmatprep.mubr.bf16.mxu0 %v8150_v30  ;;  %9321 = vmatprep.mubr.bf16.mxu1 %v8151_v7  ;;  %v5124_v45 = vsel %vm10252_vm5, %v8009_v15, %v5123_v57  ;;  %v13079_v49 = vadd.f32 %v8927_v5, %v8815_v27  ;;  %v5137_v23 = vrot.slane %v9726_v18, 5  ;;  %v8933_v14 = vadd.f32 %v12953_v24, %v12947_v37  ;;  %v13863_v10 = vld [vmem:[#allocation47_spill] sm:$0xff]  ;;  %v9728_v5 = vld [vmem:[#allocation2 + $0x64] sm:$0xf] }
 0x399   : > { %v8832_v6 = vpop.f32.mrb[181].mxu1  ;;  %7055 = vmatmul.mubr.bf16.gmra.mrb[12].mxu0 %v8134_v28  ;;  %v5127_v63 = vsel %vm10252_vm5, %v5125_v48, %v5126_v0  ;;  %v13084_v8 = vadd.f32 %v8930_v38, %v8818_v31  ;;  %v8821_v9 = vadd.f32 %v12983_v39, %v12972_v12  ;;  %v8936_v17 = vadd.f32 %v12966_v35, %v12957_v32  ;;  %v5047_v24 = vld [vmem:[#allocation2 + $0x48] sm:$0xe]  ;;  %v9727_v39 = vld [vmem:[#allocation2 + $0x50] sm:$0x1]  ;;  %v13865_v0 = vld [vmem:[#allocation14_spill] sm:$0xff] }
 0x39a   : > { %v8834_v29 = vpop.f32.mrb[182].mxu1  ;;  %9369 = vmatprep.mubr.bf16.mxu0 %v13861_v59  ;;  %v8153_v28 = vcombine.low %v5124_v45, %v5127_v63  ;;  %v13864_v34 = vcombine.low %v13862_v47, %v13863_v10  ;;  %v5139_v30 = vrot.slane %v5137_v23, 4  ;;  %v8824_v15 = vadd.f32 %v13001_v13, %v12991_v20  ;;  %v5049_v63 = vld [vmem:[#allocation2 + $0x60] sm:$0xe]  ;;  %v5055_v10 = vld [vmem:[#allocation2 + $0xa8] sm:$0xe] }
 0x39b   : > { %v8835_v36 = vpop.f32.mrb[183].mxu1  ;;  %v13095_v41 = vadd.f32 %v8933_v14, %v8821_v9  ;;  %v8939_v12 = vadd.f32 %v13015_v55, %v13007_v26  ;;  %v8827_v32 = vadd.f32 %v13033_v22, %v13031_v52  ;;  %v5140_v56 = vrot.slane %v9727_v39, 5 }
 0x39c   : > { %9322 = vmatmul.mubr.bf16.vlgmr.msra.gmra.mrb[16].mxu1 %v13864_v34  ;;  %v13103_v57 = vadd.f32 %v8936_v17, %v8824_v15  ;;  %v5151_v27 = vrot.slane %v9728_v5, 5  ;;  %v8942_v20 = vadd.f32 %v13026_v62, %v13023_v1  ;;  %v8830_v13 = vadd.f32 %v13043_v46, %v13039_v54  ;;  %v13866_v1 = vld [vmem:[#allocation17_spill] sm:$0xff]  ;;  %v13868_v17 = vld [vmem:[#allocation44_spill] sm:$0xff] }
 0x39d   : > { %v8949_v53 = vpop.f32.mrb[184].mxu0  ;;  %9325 = vmatprep.mubr.bf16.mxu1 %v8153_v28  ;;  %v13105_v48 = vadd.f32 %v8939_v12, %v8827_v32  ;;  %v8011_v55 = vrot.slane %v5047_v24, 9  ;;  %v5141_v52 = vsel %vm10252_vm5, %v5139_v30, %v5140_v56  ;;  %v8945_v22 = vadd.f32 %v13055_v19, %v13049_v2  ;;  %v13867_v28 = vld [vmem:[#allocation46_spill] sm:$0xff]  ;;  %v9730_v56 = vld [vmem:[#allocation2 + $0x7c] sm:$0xf] }
 0x39e   : > { %v8950_v37 = vpop.f32.mrb[185].mxu0  ;;  %v13116_v38 = vadd.f32 %v8942_v20, %v8830_v13  ;;  %v8833_v31 = vadd.f32 %v8832_v6, %v8831_v21  ;;  %v8948_v45 = vadd.f32 %v8947_v43, %v8946_v16  ;;  %v8836_v54 = vadd.f32 %v8835_v36, %v8834_v29  ;;  %v13870_v13 = vld [vmem:[#allocation31_spill] sm:$0xff] }
 0x39f   : > { %v8952_v35 = vpop.f32.mrb[186].mxu0  ;;  %v5138_v62 = vsel %vm10252_vm5, %v8011_v55, %v5137_v23  ;;  %v5153_v14 = vrot.slane %v5151_v27, 4  ;;  %v8951_v2 = vadd.f32 %v8950_v37, %v8949_v53  ;;  %v13869_v47 = vcombine.low %v13867_v28, %v13868_v17  ;;  %v9729_v23 = vld [vmem:[#allocation2 + $0x68] sm:$0x1] }
 0x3a0   : > { %v8953_v7 = vpop.f32.mrb[187].mxu0  ;;  %v8837_v26 = vpop.f32.mrb[184].mxu1  ;;  %v8155_v59 = vcombine.low %v5138_v62, %v5141_v52  ;;  %v13121_v9 = vadd.f32 %v8945_v22, %v8833_v31  ;;  %v13126_v16 = vadd.f32 %v8948_v45, %v8836_v54  ;;  %v5154_v29 = vrot.slane %v9729_v23, 5  ;;  %v13871_v52 = vld [vmem:[#allocation20_spill] sm:$0xff]  ;;  %v13872_v31 = vld [vmem:[#allocation22_spill] sm:$0xff] }
 0x3a1   : > { %v8838_v33 = vpop.f32.mrb[185].mxu1  ;;  %9370 = vmatmul.mubr.bf16.vlgmr.msra.gmra.mrb[16].mxu0 %v13865_v0  ;;  %v8954_v21 = vadd.f32 %v8953_v7, %v8952_v35  ;;  %v8013_v30 = vrot.slane %v5049_v63, 9  ;;  %v5193_v53 = vrot.slane %v12793_v3, 5  ;;  %v5165_v7 = vrot.slane %v9730_v56, 5  ;;  %v13873_v63 = vld [vmem:[#allocation48_spill] sm:$0xff] }
 0x3a2   : > { %v8840_v18 = vpop.f32.mrb[186].mxu1  ;;  %9373 = vmatprep.mubr.bf16.mxu0 %v13866_v1  ;;  %v8839_v43 = vadd.f32 %v8838_v33, %v8837_v26  ;;  %v5155_v24 = vsel %vm10252_vm5, %v5153_v14, %v5154_v29  ;;  %v8019_v5 = vrot.slane %v5055_v10, 9  ;;  %v5196_v26 = vrot.slane %v13870_v13, 5  ;;  %v5057_v33 = vld [vmem:[#allocation2 + $0xc0] sm:$0xe]  ;;  %v13874_v14 = vld [vmem:[#allocation49_spill] sm:$0xff] }
 0x3a3   : > { %v8841_v46 = vpop.f32.mrb[187].mxu1  ;;  %v5195_v20 = vrot.slane %v5193_v53, 4  ;;  %v5207_v0 = vrot.slane %v12901_v60, 5  ;;  %v5152_v45 = vsel %vm10252_vm5, %v8013_v30, %v5151_v27  ;;  %v5167_v27 = vrot.slane %v5165_v7, 4 }
 0x3a4   : > { %9326 = vmatmul.mubr.bf16.gmra.mrb[20].mxu1 %v13869_v47  ;;  %v8842_v36 = vadd.f32 %v8841_v46, %v8840_v18  ;;  %v13128_v15 = vadd.f32 %v8951_v2, %v8839_v43  ;;  %v13143_v18 = vsel %vm10252_vm5, %v8019_v5, %v5193_v53  ;;  %v8157_v54 = vcombine.low %v5152_v45, %v5155_v24  ;;  %v5051_v47 = vld [vmem:[#allocation2 + $0x78] sm:$0xe]  ;;  %v13877_v5 = vld [vmem:[#allocation23_spill] sm:$0xff] }
 0x3a5   : > { %v8955_v19 = vpop.f32.mrb[188].mxu0  ;;  %9329 = vmatprep.mubr.bf16.mxu1 %v8155_v59  ;;  %v13147_v1 = vsel %vm10252_vm5, %v5195_v20, %v5196_v26  ;;  %v13875_v2 = vcombine.low %v13873_v63, %v13874_v14  ;;  %v5209_v28 = vrot.slane %v5207_v0, 4  ;;  %v5210_v17 = vrot.slane %v12914_v25, 5  ;;  %v13880_v45 = vld [vmem:[#allocation51_spill] sm:$0xff] }
 0x3a6   : > { %v8956_v6 = vpop.f32.mrb[189].mxu0  ;;  %v13133_v12 = vadd.f32 %v8954_v21, %v8842_v36  ;;  %v8163_v46 = vcombine.low %v13143_v18, %v13147_v1  ;;  %v13882_v14 = vld [vmem:[#allocation55_spill] sm:$0xff]  ;;  %v13896_v18 = vld [vmem:[#allocation30_spill] sm:$0xff] }
 0x3a7   : > { %v8958_v34 = vpop.f32.mrb[190].mxu0  ;;  %v8957_v35 = vadd.f32 %v8956_v6, %v8955_v19  ;;  %v8021_v19 = vrot.slane %v5057_v33, 9  ;;  %v9731_v6 = vld [vmem:[#allocation2 + $0x80] sm:$0x1]  ;;  %v13165_v36 = vsel %vm10252_vm5, %v5209_v28, %v5210_v17 }
 0x3a8   : > { %v8959_v37 = vpop.f32.mrb[191].mxu0  ;;  %v8843_v32 = vpop.f32.mrb[188].mxu1  ;;  %v5168_v23 = vrot.slane %v9731_v6, 5 }
 0x3a9   : > { %v8960_v39 = vadd.f32 %v8959_v37, %v8958_v34  ;;  %v8844_v55 = vpop.f32.mrb[189].mxu1  ;;  %9374 = vmatmul.mubr.bf16.gmra.mrb[20].mxu0 %v13871_v52  ;;  %v13161_v29 = vsel %vm10252_vm5, %v8021_v19, %v5207_v0  ;;  %v8015_v37 = vrot.slane %v5051_v47, 9 }
 0x3aa   : > { %v8845_v22 = vadd.f32 %v8844_v55, %v8843_v32  ;;  %v8846_v3 = vpop.f32.mrb[190].mxu1  ;;  %9377 = vmatprep.mubr.bf16.mxu0 %v13872_v31  ;;  %v8165_v34 = vcombine.low %v13161_v29, %v13165_v36  ;;  %v5169_v24 = vsel %vm10252_vm5, %v5167_v27, %v5168_v23  ;;  %v13876_v32 = vld [vmem:[#allocation54_spill] sm:$0xff]  ;;  %v13878_v55 = vld [vmem:[#allocation24_spill] sm:$0xff] }
 0x3ab   : > { %v8847_v62 = vpop.f32.mrb[191].mxu1  ;;  %v5166_v52 = vsel %vm10252_vm5, %v8015_v37, %v5165_v7  ;;  %v13879_v31 = vld [vmem:[#allocation50_spill] sm:$0xff] }
 0x3ac   : > { %v13151_v59 = vadd.f32 %v8957_v35, %v8845_v22  ;;  %v8848_v60 = vadd.f32 %v8847_v62, %v8846_v3  ;;  %9330 = vmatmul.mubr.bf16.gmra.mrb[24].mxu1 %v13875_v2  ;;  %v5179_v35 = vrot.slane %v13876_v32, 5  ;;  %v8159_v3 = vcombine.low %v5166_v52, %v5169_v24 }
 0x3ad   : > { %9333 = vmatprep.mubr.bf16.mxu1 %v8157_v54  ;;  %v8961_v21 = vpop.f32.mrb[192].mxu0  ;;  %v13881_v62 = vcombine.low %v13879_v31, %v13880_v45  ;;  %v5182_v2 = vrot.slane %v13882_v14, 5  ;;  %v13891_v14 = vld [vmem:[#allocation57_spill] sm:$0xff] }
 0x3ae   : > { %v13157_v43 = vadd.f32 %v8960_v39, %v8848_v60  ;;  %v8962_v10 = vpop.f32.mrb[193].mxu0  ;;  %v5181_v54 = vrot.slane %v5179_v35, 4  ;;  %v5053_v60 = vld [vmem:[#allocation2 + $0x90] sm:$0xe] }
 0x3af   : > { %v8963_v30 = vadd.f32 %v8962_v10, %v8961_v21  ;;  %v8964_v53 = vpop.f32.mrb[194].mxu0  ;;  %v8017_v28 = vrot.slane %v5053_v60, 9  ;;  %v13883_v21 = vld [vmem:[#allocation25_spill] sm:$0xff]  ;;  %v13884_v10 = vld [vmem:[#allocation27_spill] sm:$0xff]  ;;  %v13890_v60 = vld [vmem:[#allocation56_spill] sm:$0xff] }
 0x3b0   : > { %v8849_v25 = vpop.f32.mrb[192].mxu1  ;;  %v8965_v56 = vpop.f32.mrb[195].mxu0  ;;  %v5183_v7 = vsel %vm10252_vm5, %v5181_v54, %v5182_v2  ;;  %v13892_v2 = vcombine.low %v13890_v60, %v13891_v14 }
 0x3b1   : > { %v8850_v39 = vpop.f32.mrb[193].mxu1  ;;  %9378 = vmatmul.mubr.bf16.gmra.mrb[24].mxu0 %v13877_v5  ;;  %v8966_v26 = vadd.f32 %v8965_v56, %v8964_v53  ;;  %v13886_v56 = vld [vmem:[#allocation53_spill] sm:$0xff] }
 0x3b2   : > { %v8851_v20 = vadd.f32 %v8850_v39, %v8849_v25  ;;  %v8852_v13 = vpop.f32.mrb[194].mxu1  ;;  %9381 = vmatprep.mubr.bf16.mxu0 %v13878_v55  ;;  %v5180_v25 = vsel %vm10252_vm5, %v8017_v28, %v5179_v35  ;;  %v13885_v39 = vld [vmem:[#allocation52_spill] sm:$0xff] }
 0x3b3   : > { %v8853_v22 = vpop.f32.mrb[195].mxu1  ;;  %v8161_v37 = vcombine.low %v5180_v25, %v5183_v7  ;;  %v13887_v5 = vcombine.low %v13885_v39, %v13886_v56  ;;  %v5214_v7 = vrot.slane %v12999_v4, 5 }
 0x3b4   : > { %v13176_v33 = vadd.f32 %v8963_v30, %v8851_v20  ;;  %v8854_v0 = vadd.f32 %v8853_v22, %v8852_v13  ;;  %9334 = vmatmul.mubr.bf16.gmra.mrb[28].mxu1 %v13881_v62  ;;  %v13888_v22 = vld [vmem:[#allocation28_spill] sm:$0xff] }
 0x3b5   : > { %9337 = vmatprep.mubr.bf16.mxu1 %v8159_v3  ;;  %v8967_v27 = vpop.f32.mrb[196].mxu0  ;;  %v13889_v3 = vld [vmem:[#allocation29_spill] sm:$0xff]  ;;  %v5216_v25 = vrot.slane %v5214_v7, 4 }
 0x3b6   : > { %v13181_v63 = vadd.f32 %v8966_v26, %v8854_v0  ;;  %v8968_v19 = vpop.f32.mrb[197].mxu0 }
 0x3b7   : > { %v8969_v17 = vadd.f32 %v8968_v19, %v8967_v27  ;;  %v8970_v47 = vpop.f32.mrb[198].mxu0 }
 0x3b8   : > { %v8855_v6 = vpop.f32.mrb[196].mxu1  ;;  %v8971_v23 = vpop.f32.mrb[199].mxu0 }
 0x3b9   : > { %9382 = vmatmul.mubr.bf16.gmra.mrb[28].mxu0 %v13883_v21  ;;  %v8856_v30 = vpop.f32.mrb[197].mxu1  ;;  %v8972_v53 = vadd.f32 %v8971_v23, %v8970_v47  ;;  %v5058_v47 = vld [vmem:[#allocation2 + $0xcc] sm:$0xe] }
 0x3ba   : > { %9385 = vmatprep.mubr.bf16.mxu0 %v13884_v10  ;;  %v8857_v24 = vadd.f32 %v8856_v30, %v8855_v6  ;;  %v8858_v32 = vpop.f32.mrb[198].mxu1  ;;  %v8022_v10 = vrot.slane %v5058_v47, 9  ;;  %v5217_v30 = vrot.slane %v13005_v50, 5  ;;  %v13900_v47 = vld [vmem:[#allocation42_spill] sm:$0xff] }
 0x3bb   : > { %v8859_v20 = vpop.f32.mrb[199].mxu1 }
 0x3bc   : > { %9338 = vmatmul.mubr.bf16.gmra.mrb[32].mxu1 %v13887_v5  ;;  %v13193_v13 = vadd.f32 %v8969_v17, %v8857_v24  ;;  %v8860_v26 = vadd.f32 %v8859_v20, %v8858_v32  ;;  %v13895_v32 = vld [vmem:[#allocation34_spill] sm:$0xff]  ;;  %v5215_v5 = vsel %vm10252_vm5, %v8022_v10, %v5214_v7  ;;  %v5218_v20 = vsel %vm10252_vm5, %v5216_v25, %v5217_v30  ;;  %v13901_v25 = vld [vmem:[#allocation13_spill] sm:$0xff]  ;;  %v13902_v30 = vld [vmem:[#allocation16_spill] sm:$0xff] }
 0x3bd   : > { %9341 = vmatprep.mubr.bf16.mxu1 %v8161_v37  ;;  %v13894_v37 = vld [vmem:[#allocation12_spill] sm:$0xff]  ;;  %v13897_v1 = vcombine.low %v13895_v32, %v13896_v18 }
 0x3be   : > { %v13195_v55 = vadd.f32 %v8972_v53, %v8860_v26  ;;  %v13893_v53 = vld [vmem:[#allocation10_spill] sm:$0xff] }
 0x3bf   : > { %v8973_v52 = vpop.f32.mrb[200].mxu0 }
 0x3c0   : > { %v8974_v35 = vpop.f32.mrb[201].mxu0 }
 0x3c1   : > { %9386 = vmatmul.mubr.bf16.gmra.mrb[32].mxu0 %v13888_v22  ;;  %v8861_v0 = vpop.f32.mrb[200].mxu1  ;;  %v8975_v31 = vadd.f32 %v8974_v35, %v8973_v52  ;;  %v8976_v45 = vpop.f32.mrb[202].mxu0 }
 0x3c2   : > { %9389 = vmatprep.mubr.bf16.mxu0 %v13889_v3  ;;  %v8862_v62 = vpop.f32.mrb[201].mxu1  ;;  %v8977_v54 = vpop.f32.mrb[203].mxu0 }
 0x3c3   : > { %v8863_v27 = vadd.f32 %v8862_v62, %v8861_v0  ;;  %v8864_v19 = vpop.f32.mrb[202].mxu1  ;;  %v8978_v28 = vadd.f32 %v8977_v54, %v8976_v45  ;;  %v8166_v0 = vcombine.low %v5215_v5, %v5218_v20  ;;  %v13898_v62 = vld [vmem:[#allocation15_spill] sm:$0xff]  ;;  %v13899_v54 = vld [vmem:[#allocation18_spill] sm:$0xff] }
 0x3c4   : > { %9342 = vmatmul.mubr.bf16.gmra.mrb[36].mxu1 %v13892_v2  ;;  %v8865_v17 = vpop.f32.mrb[203].mxu1 }
 0x3c5   : > { %9345 = vmatprep.mubr.bf16.mxu1 %v8163_v46  ;;  %v13206_v21 = vadd.f32 %v8975_v31, %v8863_v27  ;;  %v8866_v6 = vadd.f32 %v8865_v17, %v8864_v19 }
 0x3c7   : > { %v13208_v23 = vadd.f32 %v8978_v28, %v8866_v6 }
 0x3c8   : > { %v8979_v4 = vpop.f32.mrb[204].mxu0 }
 0x3c9   : > { %9390 = vmatmul.mubr.bf16.gmra.mrb[36].mxu0 %v13893_v53  ;;  %v8980_v24 = vpop.f32.mrb[205].mxu0 }
 0x3ca   : > { %9393 = vmatprep.mubr.bf16.mxu0 %v13894_v37  ;;  %v8867_v46 = vpop.f32.mrb[204].mxu1  ;;  %v8981_v39 = vadd.f32 %v8980_v24, %v8979_v4  ;;  %v8982_v56 = vpop.f32.mrb[206].mxu0 }
 0x3cb   : > { %v8868_v50 = vpop.f32.mrb[205].mxu1  ;;  %v8983_v26 = vpop.f32.mrb[207].mxu0 }
 0x3cc   : > { %9346 = vmatmul.mubr.bf16.gmra.mrb[40].mxu1 %v13897_v1  ;;  %v8869_v52 = vadd.f32 %v8868_v50, %v8867_v46  ;;  %v8870_v22 = vpop.f32.mrb[206].mxu1  ;;  %v8984_v35 = vadd.f32 %v8983_v26, %v8982_v56  ;;  %v13903_v50 = vld [vmem:[#allocation35_spill] sm:$0xff] }
 0x3cd   : > { %9349 = vmatprep.mubr.bf16.mxu1 %v8165_v34  ;;  %v8871_v3 = vpop.f32.mrb[207].mxu1 }
 0x3ce   : > { %v13223_v31 = vadd.f32 %v8981_v39, %v8869_v52  ;;  %v8872_v45 = vadd.f32 %v8871_v3, %v8870_v22  ;;  %v13904_v3 = vld [vmem:[#allocation37_spill] sm:$0xff] }
 0x3d0   : > { %v13227_v44 = vadd.f32 %v8984_v35, %v8872_v45  ;;  %v9113_v60 = vpop.f32.mrb[208].mxu0 }
 0x3d1   : > { %9394 = vmatmul.mubr.bf16.gmra.mrb[40].mxu0 %v13898_v62  ;;  %v9114_v14 = vpop.f32.mrb[209].mxu0 }
 0x3d2   : > { %9397 = vmatprep.mubr.bf16.mxu0 %v13899_v54  ;;  %v9001_v29 = vpop.f32.mrb[208].mxu1  ;;  %v9115_v36 = vadd.f32 %v9114_v14, %v9113_v60  ;;  %v9116_v34 = vpop.f32.mrb[210].mxu0 }
 0x3d3   : > { %v9002_v2 = vpop.f32.mrb[209].mxu1  ;;  %v9117_v27 = vpop.f32.mrb[211].mxu0 }
 0x3d4   : > { %9350 = vmatmul.mubr.bf16.gmra.mrb[44].mxu1 %v8166_v0  ;;  %v9003_v19 = vadd.f32 %v9002_v2, %v9001_v29  ;;  %v9004_v28 = vpop.f32.mrb[210].mxu1  ;;  %v9118_v7 = vadd.f32 %v9117_v27, %v9116_v34 }
 0x3d5   : > { %v9005_v17 = vpop.f32.mrb[211].mxu1 }
 0x3d6   : > { %v6776_v6 = vadd.f32 %v9003_v19, %v13900_v47  ;;  %v9006_v10 = vadd.f32 %v9005_v17, %v9004_v28  ;;  %v13905_v19 = vld [vmem:[#allocation32_spill] sm:$0xff]  ;;  %v13906_v47 = vld [vmem:[#allocation19_spill] sm:$0xff] }
 0x3d8   : > { %v6779_v53 = vadd.f32 %v9006_v10, %v13902_v30 }
 0x3d9   : > { %9398 = vmatmul.mubr.bf16.gmra.mrb[44].mxu0 %v13901_v25  ;;  %v9119_v37 = vpop.f32.mrb[212].mxu0 }
 0x3da   : > { %v9120_v4 = vpop.f32.mrb[213].mxu0 }
 0x3db   : > { %v9121_v24 = vadd.f32 %v9120_v4, %v9119_v37  ;;  %v9122_v32 = vpop.f32.mrb[214].mxu0 }
 0x3dc   : > { %v9123_v18 = vpop.f32.mrb[215].mxu0 }
 0x3dd   : > { %v9124_v1 = vadd.f32 %v9123_v18, %v9122_v32 }
 0x3de   : > { %v9007_v46 = vpop.f32.mrb[212].mxu1 }
 0x3df   : > { %v9008_v39 = vpop.f32.mrb[213].mxu1 }
 0x3e0   : > { %v9009_v56 = vadd.f32 %v9008_v39, %v9007_v46  ;;  %v9010_v5 = vpop.f32.mrb[214].mxu1 }
 0x3e1   : > { %v9011_v20 = vpop.f32.mrb[215].mxu1 }
 0x3e2   : > { %v6784_v26 = vadd.f32 %v9009_v56, %v13903_v50  ;;  %v9012_v52 = vadd.f32 %v9011_v20, %v9010_v5 }
 0x3e3   : > { %v9125_v22 = vpop.f32.mrb[216].mxu0 }
 0x3e4   : > { %v9126_v35 = vpop.f32.mrb[217].mxu0  ;;  %v6787_v0 = vadd.f32 %v9012_v52, %v13904_v3  ;;  %v13236_v32 = vadd.f32 %v9121_v24, %v6784_v26  ;;  %v13240_v26 = vadd.f32 %v9115_v36, %v6776_v6 }
 0x3e5   : > { %v9127_v45 = vadd.f32 %v9126_v35, %v9125_v22  ;;  %v9128_v62 = vpop.f32.mrb[218].mxu0 }
 0x3e6   : > { %v9129_v54 = vpop.f32.mrb[219].mxu0 }
 0x3e7   : > { %v9130_v14 = vadd.f32 %v9129_v54, %v9128_v62 }
 0x3e8   : > { %v9013_v60 = vpop.f32.mrb[216].mxu1 }
 0x3e9   : > { %v9014_v29 = vpop.f32.mrb[217].mxu1 }
 0x3ea   : > { %v9015_v34 = vadd.f32 %v9014_v29, %v9013_v60  ;;  %v9016_v2 = vpop.f32.mrb[218].mxu1 }
 0x3eb   : > { %v9017_v27 = vpop.f32.mrb[219].mxu1 }
 0x3ec   : > { %v6792_v28 = vadd.f32 %v9015_v34, %v13905_v19  ;;  %v9018_v17 = vadd.f32 %v9017_v27, %v9016_v2  ;;  %v9131_v25 = vpop.f32.mrb[220].mxu0  ;;  %v13242_v27 = vadd.f32 %v9124_v1, %v6787_v0 }
 0x3ed   : > { %v9132_v30 = vpop.f32.mrb[221].mxu0 }
 0x3ee   : > { %v6795_v10 = vadd.f32 %v9018_v17, %v13906_v47  ;;  %v9133_v37 = vadd.f32 %v9132_v30, %v9131_v25  ;;  %v9134_v4 = vpop.f32.mrb[222].mxu0  ;;  %v13244_v47 = vadd.f32 %v9118_v7, %v6779_v53  ;;  %v13250_v6 = vadd.f32 %v9127_v45, %v6792_v28 }
 0x3ef   : > { %v9135_v18 = vpop.f32.mrb[223].mxu0 }
 0x3f0   : > { %v9136_v46 = vadd.f32 %v9135_v18, %v9134_v4  ;;  %v13254_v7 = vadd.f32 %v9130_v14, %v6795_v10 }
 0x3f3   : > { %v9019_v39 = vpop.f32.mrb[220].mxu1 }
 0x3f4   : > { %v9020_v56 = vpop.f32.mrb[221].mxu1 }
 0x3f5   : > { %v9021_v5 = vadd.f32 %v9020_v56, %v9019_v39  ;;  %v9022_v20 = vpop.f32.mrb[222].mxu1 }
 0x3f6   : > { %v9023_v50 = vpop.f32.mrb[223].mxu1 }
 0x3f7   : > { %v6800_v52 = vadd.f32 %v9021_v5, %v12962_v11  ;;  %v9024_v22 = vadd.f32 %v9023_v50, %v9022_v20  ;;  %v9137_v35 = vpop.f32.mrb[224].mxu0 }
 0x3f8   : > { %v9138_v62 = vpop.f32.mrb[225].mxu0 }
 0x3f9   : > { %v6803_v3 = vadd.f32 %v9024_v22, %v12981_v61  ;;  %v9139_v54 = vadd.f32 %v9138_v62, %v9137_v35  ;;  %v9140_v60 = vpop.f32.mrb[226].mxu0  ;;  %v13246_v25 = vadd.f32 %v9133_v37, %v6800_v52 }
 0x3fa   : > { %v9141_v29 = vpop.f32.mrb[227].mxu0 }
 0x3fb   : > { %v9142_v24 = vadd.f32 %v9141_v29, %v9140_v60  ;;  %v13252_v0 = vadd.f32 %v9136_v46, %v6803_v3 }
 0x3fc   : > { %v9025_v34 = vpop.f32.mrb[224].mxu1 }
 0x3fd   : > { %v9026_v2 = vpop.f32.mrb[225].mxu1 }
 0x3fe   : > { %v9027_v19 = vadd.f32 %v9026_v2, %v9025_v34  ;;  %v9028_v17 = vpop.f32.mrb[226].mxu1 }
 0x3ff   : > { %v9029_v11 = vpop.f32.mrb[227].mxu1 }
 0x400   : > { %v6808_v61 = vadd.f32 %v9027_v19, %v13011_v58  ;;  %v9030_v30 = vadd.f32 %v9029_v11, %v9028_v17 }
 0x401   : > { %v9143_v18 = vpop.f32.mrb[228].mxu0 }
 0x402   : > { %v6811_v4 = vadd.f32 %v9030_v30, %v13019_v42  ;;  %v9144_v39 = vpop.f32.mrb[229].mxu0  ;;  %v13257_v35 = vadd.f32 %v9139_v54, %v6808_v61 }
 0x403   : > { %v9145_v56 = vadd.f32 %v9144_v39, %v9143_v18  ;;  %v9146_v36 = vpop.f32.mrb[230].mxu0 }
 0x404   : > { %v9147_v1 = vpop.f32.mrb[231].mxu0  ;;  %v13262_v14 = vadd.f32 %v9142_v24, %v6811_v4 }
 0x405   : > { %v9148_v5 = vadd.f32 %v9147_v1, %v9146_v36 }
 0x408   : > { %v9031_v53 = vpop.f32.mrb[228].mxu1 }
 0x409   : > { %v9032_v37 = vpop.f32.mrb[229].mxu1 }
 0x40a   : > { %v9033_v20 = vadd.f32 %v9032_v37, %v9031_v53  ;;  %v9034_v50 = vpop.f32.mrb[230].mxu1 }
 0x40b   : > { %v9035_v58 = vpop.f32.mrb[231].mxu1 }
 0x40c   : > { %v6816_v52 = vadd.f32 %v9033_v20, %v13061_v51  ;;  %v9036_v42 = vadd.f32 %v9035_v58, %v9034_v50  ;;  %v9149_v22 = vpop.f32.mrb[232].mxu0 }
 0x40d   : > { %v9150_v62 = vpop.f32.mrb[233].mxu0 }
 0x40e   : > { %v6819_v45 = vadd.f32 %v9036_v42, %v13067_v40  ;;  %v9151_v28 = vadd.f32 %v9150_v62, %v9149_v22  ;;  %v9152_v46 = vpop.f32.mrb[234].mxu0  ;;  %v13260_v3 = vadd.f32 %v9145_v56, %v6816_v52 }
 0x40f   : > { %v9153_v10 = vpop.f32.mrb[235].mxu0 }
 0x410   : > { %v9037_v60 = vpop.f32.mrb[232].mxu1  ;;  %v9154_v29 = vadd.f32 %v9153_v10, %v9152_v46  ;;  %v13264_v34 = vadd.f32 %v9148_v5, %v6819_v45 }
 0x411   : > { %v9038_v2 = vpop.f32.mrb[233].mxu1 }
 0x412   : > { %v9039_v51 = vadd.f32 %v9038_v2, %v9037_v60  ;;  %v9040_v19 = vpop.f32.mrb[234].mxu1 }
 0x413   : > { %v9041_v17 = vpop.f32.mrb[235].mxu1 }
 0x414   : > { %v6824_v54 = vadd.f32 %v9039_v51, %v13079_v49  ;;  %v9042_v11 = vadd.f32 %v9041_v17, %v9040_v19 }
 0x416   : > { %v6827_v40 = vadd.f32 %v9042_v11, %v13084_v8  ;;  %v9155_v61 = vpop.f32.mrb[236].mxu0  ;;  %v13268_v30 = vadd.f32 %v9151_v28, %v6824_v54 }
 0x417   : > { %v9156_v18 = vpop.f32.mrb[237].mxu0 }
 0x418   : > { %v9157_v24 = vadd.f32 %v9156_v18, %v9155_v61  ;;  %v9158_v4 = vpop.f32.mrb[238].mxu0  ;;  %v13270_v39 = vadd.f32 %v9154_v29, %v6827_v40 }
 0x419   : > { %v9159_v56 = vpop.f32.mrb[239].mxu0 }
 0x41a   : > { %v9160_v36 = vadd.f32 %v9159_v56, %v9158_v4 }
 0x41c   : > { %v9043_v1 = vpop.f32.mrb[236].mxu1 }
 0x41d   : > { %v9044_v5 = vpop.f32.mrb[237].mxu1 }
 0x41e   : > { %v9045_v53 = vadd.f32 %v9044_v5, %v9043_v1  ;;  %v9046_v37 = vpop.f32.mrb[238].mxu1 }
 0x41f   : > { %v9047_v20 = vpop.f32.mrb[239].mxu1 }
 0x420   : > { %v6832_v49 = vadd.f32 %v9045_v53, %v13095_v41  ;;  %v9048_v50 = vadd.f32 %v9047_v20, %v9046_v37 }
 0x421   : > { %v9161_v58 = vpop.f32.mrb[240].mxu0 }
 0x422   : > { %v6835_v8 = vadd.f32 %v9048_v50, %v13103_v57  ;;  %v9162_v52 = vpop.f32.mrb[241].mxu0  ;;  %v13274_v42 = vadd.f32 %v9157_v24, %v6832_v49 }
 0x423   : > { %v9163_v22 = vadd.f32 %v9162_v52, %v9161_v58  ;;  %v9164_v62 = vpop.f32.mrb[242].mxu0 }
 0x424   : > { %v9165_v28 = vpop.f32.mrb[243].mxu0  ;;  %v13276_v46 = vadd.f32 %v9160_v36, %v6835_v8 }
 0x425   : > { %v9049_v45 = vpop.f32.mrb[240].mxu1  ;;  %v9166_v60 = vadd.f32 %v9165_v28, %v9164_v62 }
 0x426   : > { %v9050_v10 = vpop.f32.mrb[241].mxu1 }
 0x427   : > { %v9051_v29 = vadd.f32 %v9050_v10, %v9049_v45  ;;  %v9052_v2 = vpop.f32.mrb[242].mxu1 }
 0x428   : > { %v9053_v51 = vpop.f32.mrb[243].mxu1 }
 0x429   : > { %v6840_v41 = vadd.f32 %v9051_v29, %v13105_v48  ;;  %v9054_v19 = vadd.f32 %v9053_v51, %v9052_v2  ;;  %v9167_v17 = vpop.f32.mrb[244].mxu0 }
 0x42a   : > { %v9168_v54 = vpop.f32.mrb[245].mxu0 }
 0x42b   : > { %v6843_v57 = vadd.f32 %v9054_v19, %v13116_v38  ;;  %v13280_v11 = vadd.f32 %v9163_v22, %v6840_v41  ;;  %v9169_v40 = vadd.f32 %v9168_v54, %v9167_v17  ;;  %v9170_v61 = vpop.f32.mrb[246].mxu0 }
 0x42c   : > { %v9171_v18 = vpop.f32.mrb[247].mxu0 }
 0x42d   : > { %v13282_v24 = vadd.f32 %v9166_v60, %v6843_v57  ;;  %v9172_v4 = vadd.f32 %v9171_v18, %v9170_v61 }
 0x431   : > { %v9055_v56 = vpop.f32.mrb[244].mxu1 }
 0x432   : > { %v9056_v36 = vpop.f32.mrb[245].mxu1 }
 0x433   : > { %v9057_v1 = vadd.f32 %v9056_v36, %v9055_v56  ;;  %v9058_v5 = vpop.f32.mrb[246].mxu1 }
 0x434   : > { %v9059_v53 = vpop.f32.mrb[247].mxu1 }
 0x435   : > { %v6848_v48 = vadd.f32 %v9057_v1, %v13121_v9  ;;  %v9060_v37 = vadd.f32 %v9059_v53, %v9058_v5  ;;  %v9173_v38 = vpop.f32.mrb[248].mxu0 }
 0x436   : > { %v9174_v50 = vpop.f32.mrb[249].mxu0 }
 0x437   : > { %v6851_v20 = vadd.f32 %v9060_v37, %v13126_v16  ;;  %v13286_v49 = vadd.f32 %v9169_v40, %v6848_v48  ;;  %v9175_v58 = vadd.f32 %v9174_v50, %v9173_v38  ;;  %v9176_v8 = vpop.f32.mrb[250].mxu0 }
 0x438   : > { %v9177_v22 = vpop.f32.mrb[251].mxu0 }
 0x439   : > { %v13288_v52 = vadd.f32 %v9172_v4, %v6851_v20  ;;  %v9178_v45 = vadd.f32 %v9177_v22, %v9176_v8 }
 0x43a   : > { %v9061_v62 = vpop.f32.mrb[248].mxu1 }
 0x43b   : > { %v9062_v28 = vpop.f32.mrb[249].mxu1 }
 0x43c   : > { %v9063_v10 = vadd.f32 %v9062_v28, %v9061_v62  ;;  %v9064_v60 = vpop.f32.mrb[250].mxu1 }
 0x43d   : > { %v9065_v29 = vpop.f32.mrb[251].mxu1 }
 0x43e   : > { %v6856_v9 = vadd.f32 %v9063_v10, %v13128_v15  ;;  %v9066_v2 = vadd.f32 %v9065_v29, %v9064_v60 }
 0x43f   : > { %v9179_v51 = vpop.f32.mrb[252].mxu0 }
 0x440   : > { %v6859_v16 = vadd.f32 %v9066_v2, %v13133_v12  ;;  %v13292_v41 = vadd.f32 %v9175_v58, %v6856_v9  ;;  %v9180_v19 = vpop.f32.mrb[253].mxu0 }
 0x441   : > { %v9181_v17 = vadd.f32 %v9180_v19, %v9179_v51  ;;  %v9182_v57 = vpop.f32.mrb[254].mxu0 }
 0x442   : > { %v13294_v54 = vadd.f32 %v9178_v45, %v6859_v16  ;;  %v9183_v40 = vpop.f32.mrb[255].mxu0 }
 0x443   : > { %v9184_v61 = vadd.f32 %v9183_v40, %v9182_v57 }
 0x447   : > { %v9067_v18 = vpop.f32.mrb[252].mxu1 }
 0x448   : > { %v9068_v4 = vpop.f32.mrb[253].mxu1 }
 0x449   : > { %v9069_v56 = vadd.f32 %v9068_v4, %v9067_v18  ;;  %v9070_v36 = vpop.f32.mrb[254].mxu1 }
 0x44a   : > { %v9071_v1 = vpop.f32.mrb[255].mxu1 }
 0x44b   : > { %v6864_v15 = vadd.f32 %v9069_v56, %v13151_v59  ;;  %v9072_v5 = vadd.f32 %v9071_v1, %v9070_v36  ;;  %v9185_v53 = vpop.f32.mrb[0].mxu0 }
 0x44c   : > { %v9186_v12 = vpop.f32.mrb[1].mxu0 }
 0x44d   : > { %v6867_v48 = vadd.f32 %v9072_v5, %v13157_v43  ;;  %v9187_v37 = vadd.f32 %v9186_v12, %v9185_v53  ;;  %v9188_v20 = vpop.f32.mrb[2].mxu0  ;;  %v13298_v38 = vadd.f32 %v9181_v17, %v6864_v15 }
 0x44e   : > { %v9189_v50 = vpop.f32.mrb[3].mxu0 }
 0x44f   : > { %v9073_v58 = vpop.f32.mrb[0].mxu1  ;;  %v9190_v8 = vadd.f32 %v9189_v50, %v9188_v20  ;;  %v13300_v22 = vadd.f32 %v9184_v61, %v6867_v48 }
 0x450   : > { %v9074_v62 = vpop.f32.mrb[1].mxu1 }
 0x451   : > { %v9075_v45 = vadd.f32 %v9074_v62, %v9073_v58  ;;  %v9076_v28 = vpop.f32.mrb[2].mxu1 }
 0x452   : > { %v9077_v10 = vpop.f32.mrb[3].mxu1 }
 0x453   : > { %v6872_v59 = vadd.f32 %v9075_v45, %v13176_v33  ;;  %v9078_v60 = vadd.f32 %v9077_v10, %v9076_v28 }
 0x455   : > { %v6875_v29 = vadd.f32 %v9078_v60, %v13181_v63  ;;  %v9191_v9 = vpop.f32.mrb[4].mxu0  ;;  %v13304_v43 = vadd.f32 %v9187_v37, %v6872_v59 }
 0x456   : > { %v9192_v2 = vpop.f32.mrb[5].mxu0 }
 0x457   : > { %v9079_v16 = vpop.f32.mrb[4].mxu1  ;;  %v9193_v51 = vadd.f32 %v9192_v2, %v9191_v9  ;;  %v9194_v19 = vpop.f32.mrb[6].mxu0  ;;  %v13306_v17 = vadd.f32 %v9190_v8, %v6875_v29 }
 0x458   : > { %v9080_v57 = vpop.f32.mrb[5].mxu1  ;;  %v9195_v40 = vpop.f32.mrb[7].mxu0 }
 0x459   : > { %v9081_v61 = vadd.f32 %v9080_v57, %v9079_v16  ;;  %v9082_v18 = vpop.f32.mrb[6].mxu1  ;;  %v9196_v4 = vadd.f32 %v9195_v40, %v9194_v19 }
 0x45a   : > { %v9083_v56 = vpop.f32.mrb[7].mxu1 }
 0x45b   : > { %v6880_v33 = vadd.f32 %v9081_v61, %v13193_v13  ;;  %v9084_v36 = vadd.f32 %v9083_v56, %v9082_v18  ;;  %v13325_v56 = vld [vmem:[%s13600_s5] ss:$0 sm:$0xff] }
 0x45d   : > { %v6883_v63 = vadd.f32 %v9084_v36, %v13195_v55  ;;  %v13310_v1 = vadd.f32 %v9193_v51, %v6880_v33 }
 0x45f   : > { %v9085_v15 = vpop.f32.mrb[8].mxu1  ;;  %v13312_v5 = vadd.f32 %v9196_v4, %v6883_v63 }
 0x460   : > { %v9197_v53 = vpop.f32.mrb[8].mxu0  ;;  %v9086_v12 = vpop.f32.mrb[9].mxu1 }
 0x461   : > { %v9198_v48 = vpop.f32.mrb[9].mxu0  ;;  %v9087_v37 = vadd.f32 %v9086_v12, %v9085_v15  ;;  %v9088_v20 = vpop.f32.mrb[10].mxu1  ;;  %v13335_v12 = vld [vmem:[%s13601_s6] ss:$0 sm:$0xff] }
 0x462   : > { %v9199_v50 = vadd.f32 %v9198_v48, %v9197_v53  ;;  %v9200_v58 = vpop.f32.mrb[10].mxu0  ;;  %v9089_v8 = vpop.f32.mrb[11].mxu1  ;;  %v13340_v48 = vld [vmem:[%s13603_s8] ss:$0 sm:$0xff] }
 0x463   : > { %v6888_v62 = vadd.f32 %v9087_v37, %v13206_v21  ;;  %v9201_v45 = vpop.f32.mrb[11].mxu0  ;;  %v9090_v13 = vadd.f32 %v9089_v8, %v9088_v20  ;;  %v13351_v8 = vld [vmem:[%s13604_s9] ss:$0 sm:$0xff] }
 0x464   : > { %v9202_v28 = vadd.f32 %v9201_v45, %v9200_v58 }
 0x465   : > { %v6891_v55 = vadd.f32 %v9090_v13, %v13208_v23  ;;  %v13316_v10 = vadd.f32 %v9199_v50, %v6888_v62 }
 0x467   : > { %v9091_v59 = vpop.f32.mrb[12].mxu1  ;;  %v13318_v60 = vadd.f32 %v9202_v28, %v6891_v55 }
 0x468   : > { %v9092_v29 = vpop.f32.mrb[13].mxu1 }
 0x469   : > { %v9093_v9 = vadd.f32 %v9092_v29, %v9091_v59  ;;  %v9094_v2 = vpop.f32.mrb[14].mxu1 }
 0x46a   : > { %v9095_v16 = vpop.f32.mrb[15].mxu1 }
 0x46b   : > { %v6896_v51 = vadd.f32 %v9093_v9, %v13223_v31  ;;  %v9096_v19 = vadd.f32 %v9095_v16, %v9094_v2 }
 0x46c   : > { %v9203_v57 = vpop.f32.mrb[12].mxu0 }
 0x46d   : > { %v9204_v40 = vpop.f32.mrb[13].mxu0  ;;  %v6899_v21 = vadd.f32 %v9096_v19, %v13227_v44 }
 0x46e   : > { %v9205_v61 = vadd.f32 %v9204_v40, %v9203_v57  ;;  %v9206_v18 = vpop.f32.mrb[14].mxu0 }
 0x46f   : > { %v9207_v4 = vpop.f32.mrb[15].mxu0  ;;  %v9323_v23 = vpop.f32.mrb[16].mxu1 }
 0x470   : > { %v9208_v33 = vadd.f32 %v9207_v4, %v9206_v18  ;;  %v7106_v36 = vadd.f32 %v9323_v23, %v13236_v32  ;;  %v7097_v63 = vpop.f32.mrb[17].mxu1  ;;  %v13328_v31 = vadd.f32 %v9205_v61, %v6896_v51 }
 0x471   : > { %v7098_v15 = vadd.f32 %v7097_v63, %v13240_v26  ;;  %v9324_v53 = vpop.f32.mrb[18].mxu1 }
 0x472   : > { %v7233_v44 = vmul.f32 %v13325_v56, %v7106_v36  ;;  %v7109_v32 = vadd.f32 %v9324_v53, %v13242_v27  ;;  %v7100_v37 = vpop.f32.mrb[19].mxu1  ;;  %v13343_v20 = vadd.f32 %v9208_v33, %v6899_v21 }
 0x473   : > { %v7231_v26 = vmul.f32 %v13325_v56, %v7098_v15  ;;  %v7101_v50 = vadd.f32 %v7100_v37, %v13244_v47 }
 0x474   : > { %v9371_v58 = vpop.f32.mrb[16].mxu0  ;;  %v7234_v62 = vmul.f32 %v13325_v56, %v7109_v32  ;;  %v7272_v45 = vadd.f32 %v13335_v12, %v7233_v44 }
 0x475   : > { %v7536_v27 = vmul.f32 %v9371_v58, %v13340_v48  ;;  %v7400_v13 = vpop.f32.mrb[17].mxu0  ;;  %v7232_v28 = vmul.f32 %v13325_v56, %v7101_v50  ;;  %v7270_v55 = vadd.f32 %v13335_v12, %v7231_v26 }
 0x476   : > { %v7534_v47 = vmul.f32 %v13340_v48, %v7400_v13  ;;  %v9372_v59 = vpop.f32.mrb[18].mxu0  ;;  %v7273_v9 = vadd.f32 %v13335_v12, %v7234_v62 }
 0x477   : > { %v7575_v29 = vadd.f32 %v13351_v8, %v7536_v27  ;;  %v7537_v2 = vmul.f32 %v9372_v59, %v13340_v48  ;;  %v7403_v16 = vpop.f32.mrb[19].mxu0  ;;  %v9327_v51 = vpop.f32.mrb[20].mxu1  ;;  %v7271_v57 = vadd.f32 %v13335_v12, %v7232_v28 }
 0x478   : > { %v7573_v19 = vadd.f32 %v13351_v8, %v7534_v47  ;;  %v7535_v40 = vmul.f32 %v13340_v48, %v7403_v16  ;;  %v7122_v21 = vadd.f32 %v9327_v51, %v13246_v25  ;;  %v7113_v61 = vpop.f32.mrb[21].mxu1 }
 0x479   : > { %v7607_v18 = vadd.f32 %v7575_v29, %v7272_v45  ;;  %v7576_v4 = vadd.f32 %v13351_v8, %v7537_v2  ;;  %v7114_v23 = vadd.f32 %v7113_v61, %v13250_v6  ;;  %v9328_v33 = vpop.f32.mrb[22].mxu1 }
 0x47a   : > { %v7605_v36 = vadd.f32 %v7573_v19, %v7270_v55  ;;  %v7574_v63 = vadd.f32 %v13351_v8, %v7535_v40  ;;  %v7237_v15 = vmul.f32 %v13325_v56, %v7122_v21  ;;  %v7125_v53 = vadd.f32 %v9328_v33, %v13252_v0  ;;  %v7116_v44 = vpop.f32.mrb[23].mxu1 }
 0x47b   : > { %v7639_v32 = vmax.f32 %v7607_v18, 0.0  ;;  %v7608_v37 = vadd.f32 %v7576_v4, %v7273_v9  ;;  %v7235_v26 = vmul.f32 %v13325_v56, %v7114_v23  ;;  %v7117_v25 = vadd.f32 %v7116_v44, %v13254_v7 }
 0x47c   : > { %v7637_v50 = vmax.f32 %v7605_v36, 0.0  ;;  %v7606_v58 = vadd.f32 %v7574_v63, %v7271_v57  ;;  %v9375_v62 = vpop.f32.mrb[20].mxu0  ;;  %v7238_v6 = vmul.f32 %v13325_v56, %v7125_v53  ;;  %v7276_v0 = vadd.f32 %v13335_v12, %v7237_v15 }
 0x47d   : > { %7671 = vst [vmem:[%s13376_s12 + $0x10] sm:$0xff] %v7639_v32  ;;  %v7640_v45 = vmax.f32 %v7608_v37, 0.0  ;;  %v7540_v27 = vmul.f32 %v9375_v62, %v13340_v48  ;;  %v7416_v13 = vpop.f32.mrb[21].mxu0  ;;  %v7236_v7 = vmul.f32 %v13325_v56, %v7117_v25  ;;  %v7274_v55 = vadd.f32 %v13335_v12, %v7235_v26 }
 0x47e   : > { %7669 = vst [vmem:[%s13376_s12] sm:$0xff] %v7637_v50  ;;  %v7638_v28 = vmax.f32 %v7606_v58, 0.0  ;;  %v7538_v47 = vmul.f32 %v13340_v48, %v7416_v13  ;;  %v9376_v59 = vpop.f32.mrb[22].mxu0  ;;  %v7277_v9 = vadd.f32 %v13335_v12, %v7238_v6 }
 0x47f   : > { %7672 = vst [vmem:[%s13376_s12 + $0x18] sm:$0xff] %v7640_v45  ;;  %v7579_v29 = vadd.f32 %v13351_v8, %v7540_v27  ;;  %v7541_v2 = vmul.f32 %v9376_v59, %v13340_v48  ;;  %v7419_v16 = vpop.f32.mrb[23].mxu0  ;;  %v9331_v51 = vpop.f32.mrb[24].mxu1  ;;  %v7275_v57 = vadd.f32 %v13335_v12, %v7236_v7 }
 0x480   : > { %7670 = vst [vmem:[%s13376_s12 + $0x8] sm:$0xff] %v7638_v28  ;;  %v7577_v19 = vadd.f32 %v13351_v8, %v7538_v47  ;;  %v7539_v40 = vmul.f32 %v13340_v48, %v7419_v16  ;;  %v7138_v21 = vadd.f32 %v9331_v51, %v13260_v3  ;;  %v7129_v61 = vpop.f32.mrb[25].mxu1 }
 0x481   : > { %v7611_v18 = vadd.f32 %v7579_v29, %v7276_v0  ;;  %v7580_v4 = vadd.f32 %v13351_v8, %v7541_v2  ;;  %v7130_v23 = vadd.f32 %v7129_v61, %v13257_v35  ;;  %v9332_v33 = vpop.f32.mrb[26].mxu1 }
 0x482   : > { %v7609_v36 = vadd.f32 %v7577_v19, %v7274_v55  ;;  %v7578_v63 = vadd.f32 %v13351_v8, %v7539_v40  ;;  %v7241_v15 = vmul.f32 %v13325_v56, %v7138_v21  ;;  %v7141_v53 = vadd.f32 %v9332_v33, %v13264_v34  ;;  %v7132_v44 = vpop.f32.mrb[27].mxu1 }
 0x483   : > { %v7643_v32 = vmax.f32 %v7611_v18, 0.0  ;;  %v7612_v37 = vadd.f32 %v7580_v4, %v7277_v9  ;;  %v7239_v3 = vmul.f32 %v13325_v56, %v7130_v23  ;;  %v7133_v26 = vadd.f32 %v7132_v44, %v13262_v14 }
 0x484   : > { %v7641_v25 = vmax.f32 %v7609_v36, 0.0  ;;  %v7610_v50 = vadd.f32 %v7578_v63, %v7275_v57  ;;  %v9379_v35 = vpop.f32.mrb[24].mxu0  ;;  %v7242_v58 = vmul.f32 %v13325_v56, %v7141_v53  ;;  %v7280_v6 = vadd.f32 %v13335_v12, %v7241_v15 }
 0x485   : > { %7675 = vst [vmem:[%s13376_s12 + $0x30] sm:$0xff] %v7643_v32  ;;  %v7644_v62 = vmax.f32 %v7612_v37, 0.0  ;;  %v7544_v34 = vmul.f32 %v9379_v35, %v13340_v48  ;;  %v7432_v45 = vpop.f32.mrb[25].mxu0  ;;  %v7240_v0 = vmul.f32 %v13325_v56, %v7133_v26  ;;  %v7278_v14 = vadd.f32 %v13335_v12, %v7239_v3 }
 0x486   : > { %7673 = vst [vmem:[%s13376_s12 + $0x20] sm:$0xff] %v7641_v25  ;;  %v7642_v27 = vmax.f32 %v7610_v50, 0.0  ;;  %v7542_v13 = vmul.f32 %v13340_v48, %v7432_v45  ;;  %v9380_v7 = vpop.f32.mrb[26].mxu0  ;;  %v7281_v55 = vadd.f32 %v13335_v12, %v7242_v58 }
 0x487   : > { %7676 = vst [vmem:[%s13376_s12 + $0x38] sm:$0xff] %v7644_v62  ;;  %v7583_v28 = vadd.f32 %v13351_v8, %v7544_v34  ;;  %v7545_v47 = vmul.f32 %v9380_v7, %v13340_v48  ;;  %v7435_v59 = vpop.f32.mrb[27].mxu0  ;;  %v9335_v29 = vpop.f32.mrb[28].mxu1  ;;  %v7279_v2 = vadd.f32 %v13335_v12, %v7240_v0 }
 0x488   : > { %7674 = vst [vmem:[%s13376_s12 + $0x28] sm:$0xff] %v7642_v27  ;;  %v7581_v9 = vadd.f32 %v13351_v8, %v7542_v13  ;;  %v7543_v16 = vmul.f32 %v13340_v48, %v7435_v59  ;;  %v7154_v51 = vadd.f32 %v9335_v29, %v13274_v42  ;;  %v7145_v19 = vpop.f32.mrb[29].mxu1 }
 0x489   : > { %v7615_v57 = vadd.f32 %v7583_v28, %v7280_v6  ;;  %v7584_v40 = vadd.f32 %v13351_v8, %v7545_v47  ;;  %v7146_v21 = vadd.f32 %v7145_v19, %v13268_v30  ;;  %v9336_v61 = vpop.f32.mrb[30].mxu1 }
 0x48a   : > { %v7613_v18 = vadd.f32 %v7581_v9, %v7278_v14  ;;  %v7582_v4 = vadd.f32 %v13351_v8, %v7543_v16  ;;  %v7245_v23 = vmul.f32 %v13325_v56, %v7154_v51  ;;  %v7157_v33 = vadd.f32 %v9336_v61, %v13276_v46  ;;  %v7148_v36 = vpop.f32.mrb[31].mxu1 }
 0x48b   : > { %v7647_v63 = vmax.f32 %v7615_v57, 0.0  ;;  %v7616_v15 = vadd.f32 %v7584_v40, %v7281_v55  ;;  %v7243_v42 = vmul.f32 %v13325_v56, %v7146_v21  ;;  %v7149_v53 = vadd.f32 %v7148_v36, %v13270_v39 }
 0x48c   : > { %v7645_v44 = vmax.f32 %v7613_v18, 0.0  ;;  %v7614_v32 = vadd.f32 %v7582_v4, %v7279_v2  ;;  %v9383_v30 = vpop.f32.mrb[28].mxu0  ;;  %v7246_v37 = vmul.f32 %v13325_v56, %v7157_v33  ;;  %v7284_v26 = vadd.f32 %v13335_v12, %v7245_v23 }
 0x48d   : > { %7679 = vst [vmem:[%s13376_s12 + $0x50] sm:$0xff] %v7647_v63  ;;  %v7648_v3 = vmax.f32 %v7616_v15, 0.0  ;;  %v7548_v46 = vmul.f32 %v9383_v30, %v13340_v48  ;;  %v7448_v25 = vpop.f32.mrb[29].mxu0  ;;  %v7244_v50 = vmul.f32 %v13325_v56, %v7149_v53  ;;  %v7282_v39 = vadd.f32 %v13335_v12, %v7243_v42 }
 0x48e   : > { %7677 = vst [vmem:[%s13376_s12 + $0x40] sm:$0xff] %v7645_v44  ;;  %v7646_v35 = vmax.f32 %v7614_v32, 0.0  ;;  %v7546_v58 = vmul.f32 %v13340_v48, %v7448_v25  ;;  %v9384_v62 = vpop.f32.mrb[30].mxu0  ;;  %v7285_v34 = vadd.f32 %v13335_v12, %v7246_v37 }
 0x48f   : > { %7680 = vst [vmem:[%s13376_s12 + $0x58] sm:$0xff] %v7648_v3  ;;  %v7587_v6 = vadd.f32 %v13351_v8, %v7548_v46  ;;  %v7549_v45 = vmul.f32 %v9384_v62, %v13340_v48  ;;  %v7451_v0 = vpop.f32.mrb[31].mxu0  ;;  %v9339_v27 = vpop.f32.mrb[32].mxu1  ;;  %v7283_v13 = vadd.f32 %v13335_v12, %v7244_v50 }
 0x490   : > { %7678 = vst [vmem:[%s13376_s12 + $0x48] sm:$0xff] %v7646_v35  ;;  %v7585_v14 = vadd.f32 %v13351_v8, %v7546_v58  ;;  %v7547_v7 = vmul.f32 %v13340_v48, %v7451_v0  ;;  %v7170_v28 = vadd.f32 %v9339_v27, %v13286_v49  ;;  %v7161_v55 = vpop.f32.mrb[33].mxu1 }
 0x491   : > { %v7619_v47 = vadd.f32 %v7587_v6, %v7284_v26  ;;  %v7588_v59 = vadd.f32 %v13351_v8, %v7549_v45  ;;  %v7162_v29 = vadd.f32 %v7161_v55, %v13280_v11  ;;  %v9340_v9 = vpop.f32.mrb[34].mxu1 }
 0x492   : > { %v7617_v2 = vadd.f32 %v7585_v14, %v7282_v39  ;;  %v7586_v16 = vadd.f32 %v13351_v8, %v7547_v7  ;;  %v7249_v51 = vmul.f32 %v13325_v56, %v7170_v28  ;;  %v7173_v19 = vadd.f32 %v9340_v9, %v13288_v52  ;;  %v7164_v57 = vpop.f32.mrb[35].mxu1 }
 0x493   : > { %v7651_v40 = vmax.f32 %v7619_v47, 0.0  ;;  %v7620_v21 = vadd.f32 %v7588_v59, %v7285_v34  ;;  %v7247_v49 = vmul.f32 %v13325_v56, %v7162_v29  ;;  %v7165_v61 = vadd.f32 %v7164_v57, %v13282_v24 }
 0x494   : > { %v7649_v18 = vmax.f32 %v7617_v2, 0.0  ;;  %v7618_v4 = vadd.f32 %v7586_v16, %v7283_v13  ;;  %v9387_v11 = vpop.f32.mrb[32].mxu0  ;;  %v7250_v23 = vmul.f32 %v13325_v56, %v7173_v19  ;;  %v7288_v36 = vadd.f32 %v13335_v12, %v7249_v51 }
 0x495   : > { %7683 = vst [vmem:[%s13376_s12 + $0x70] sm:$0xff] %v7651_v40  ;;  %v7652_v33 = vmax.f32 %v7620_v21, 0.0  ;;  %v7552_v52 = vmul.f32 %v9387_v11, %v13340_v48  ;;  %v7464_v63 = vpop.f32.mrb[33].mxu0  ;;  %v7248_v15 = vmul.f32 %v13325_v56, %v7165_v61  ;;  %v7286_v24 = vadd.f32 %v13335_v12, %v7247_v49 }
 0x496   : > { %7681 = vst [vmem:[%s13376_s12 + $0x60] sm:$0xff] %v7649_v18  ;;  %v7650_v42 = vmax.f32 %v7618_v4, 0.0  ;;  %v7550_v53 = vmul.f32 %v13340_v48, %v7464_v63  ;;  %v9388_v44 = vpop.f32.mrb[34].mxu0  ;;  %v7289_v30 = vadd.f32 %v13335_v12, %v7250_v23 }
 0x497   : > { %7684 = vst [vmem:[%s13376_s12 + $0x78] sm:$0xff] %v7652_v33  ;;  %v7591_v32 = vadd.f32 %v13351_v8, %v7552_v52  ;;  %v7553_v37 = vmul.f32 %v9388_v44, %v13340_v48  ;;  %v7467_v3 = vpop.f32.mrb[35].mxu0  ;;  %v9343_v26 = vpop.f32.mrb[36].mxu1  ;;  %v7287_v25 = vadd.f32 %v13335_v12, %v7248_v15 }
 0x498   : > { %7682 = vst [vmem:[%s13376_s12 + $0x68] sm:$0xff] %v7650_v42  ;;  %v7589_v46 = vadd.f32 %v13351_v8, %v7550_v53  ;;  %v7551_v50 = vmul.f32 %v13340_v48, %v7467_v3  ;;  %v7186_v35 = vadd.f32 %v9343_v26, %v13298_v38  ;;  %v7177_v39 = vpop.f32.mrb[37].mxu1 }
 0x499   : > { %v7623_v58 = vadd.f32 %v7591_v32, %v7288_v36  ;;  %v7592_v62 = vadd.f32 %v13351_v8, %v7553_v37  ;;  %v7178_v6 = vadd.f32 %v7177_v39, %v13292_v41  ;;  %v9344_v34 = vpop.f32.mrb[38].mxu1 }
 0x49a   : > { %v7621_v45 = vadd.f32 %v7589_v46, %v7286_v24  ;;  %v7590_v0 = vadd.f32 %v13351_v8, %v7551_v50  ;;  %v7253_v27 = vmul.f32 %v13325_v56, %v7186_v35  ;;  %v7189_v14 = vadd.f32 %v9344_v34, %v13300_v22  ;;  %v7180_v13 = vpop.f32.mrb[39].mxu1 }
 0x49b   : > { %v7655_v7 = vmax.f32 %v7623_v58, 0.0  ;;  %v7624_v28 = vadd.f32 %v7592_v62, %v7289_v30  ;;  %v7251_v38 = vmul.f32 %v13325_v56, %v7178_v6  ;;  %v7181_v55 = vadd.f32 %v7180_v13, %v13294_v54 }
 0x49c   : > { %v7653_v47 = vmax.f32 %v7621_v45, 0.0  ;;  %v7622_v59 = vadd.f32 %v7590_v0, %v7287_v25  ;;  %v9391_v41 = vpop.f32.mrb[36].mxu0  ;;  %v7254_v29 = vmul.f32 %v13325_v56, %v7189_v14  ;;  %v7292_v2 = vadd.f32 %v13335_v12, %v7253_v27 }
 0x49d   : > { %7687 = vst [vmem:[%s13376_s12 + $0x90] sm:$0xff] %v7655_v7  ;;  %v7656_v9 = vmax.f32 %v7624_v28, 0.0  ;;  %v7556_v22 = vmul.f32 %v9391_v41, %v13340_v48  ;;  %v7480_v16 = vpop.f32.mrb[37].mxu0  ;;  %v7252_v51 = vmul.f32 %v13325_v56, %v7181_v55  ;;  %v7290_v54 = vadd.f32 %v13335_v12, %v7251_v38 }
 0x49e   : > { %7685 = vst [vmem:[%s13376_s12 + $0x80] sm:$0xff] %v7653_v47  ;;  %v7654_v19 = vmax.f32 %v7622_v59, 0.0  ;;  %v7554_v57 = vmul.f32 %v13340_v48, %v7480_v16  ;;  %v9392_v40 = vpop.f32.mrb[38].mxu0  ;;  %v7293_v49 = vadd.f32 %v13335_v12, %v7254_v29 }
 0x49f   : > { %7688 = vst [vmem:[%s13376_s12 + $0x98] sm:$0xff] %v7656_v9  ;;  %v7595_v21 = vadd.f32 %v13351_v8, %v7556_v22  ;;  %v7557_v61 = vmul.f32 %v9392_v40, %v13340_v48  ;;  %v7483_v18 = vpop.f32.mrb[39].mxu0  ;;  %v9347_v4 = vpop.f32.mrb[40].mxu1  ;;  %v7291_v23 = vadd.f32 %v13335_v12, %v7252_v51 }
 0x4a0   : > { %7686 = vst [vmem:[%s13376_s12 + $0x88] sm:$0xff] %v7654_v19  ;;  %v7593_v11 = vadd.f32 %v13351_v8, %v7554_v57  ;;  %v7555_v33 = vmul.f32 %v13340_v48, %v7483_v18  ;;  %v7202_v36 = vadd.f32 %v9347_v4, %v13310_v1  ;;  %v7193_v52 = vpop.f32.mrb[41].mxu1 }
 0x4a1   : > { %v7627_v63 = vadd.f32 %v7595_v21, %v7292_v2  ;;  %v7596_v15 = vadd.f32 %v13351_v8, %v7557_v61  ;;  %v7194_v42 = vadd.f32 %v7193_v52, %v13304_v43  ;;  %v9348_v24 = vpop.f32.mrb[42].mxu1 }
 0x4a2   : > { %v7625_v53 = vadd.f32 %v7593_v11, %v7290_v54  ;;  %v7594_v44 = vadd.f32 %v13351_v8, %v7555_v33  ;;  %v7257_v32 = vmul.f32 %v13325_v56, %v7202_v36  ;;  %v7205_v30 = vadd.f32 %v9348_v24, %v13312_v5  ;;  %v7196_v37 = vpop.f32.mrb[43].mxu1 }
 0x4a3   : > { %v7659_v3 = vmax.f32 %v7627_v63, 0.0  ;;  %v7628_v26 = vadd.f32 %v7596_v15, %v7293_v49  ;;  %v7255_v1 = vmul.f32 %v13325_v56, %v7194_v42  ;;  %v7197_v46 = vadd.f32 %v7196_v37, %v13306_v17 }
 0x4a4   : > { %v7657_v25 = vmax.f32 %v7625_v53, 0.0  ;;  %v7626_v50 = vadd.f32 %v7594_v44, %v7291_v23  ;;  %v9395_v43 = vpop.f32.mrb[40].mxu0  ;;  %v7258_v35 = vmul.f32 %v13325_v56, %v7205_v30  ;;  %v7296_v58 = vadd.f32 %v13335_v12, %v7257_v32 }
 0x4a5   : > { %7691 = vst [vmem:[%s13376_s12 + $0xb0] sm:$0xff] %v7659_v3  ;;  %v7660_v39 = vmax.f32 %v7628_v26, 0.0  ;;  %v7560_v5 = vmul.f32 %v9395_v43, %v13340_v48  ;;  %v7496_v62 = vpop.f32.mrb[41].mxu0  ;;  %v7256_v6 = vmul.f32 %v13325_v56, %v7197_v46  ;;  %v7294_v17 = vadd.f32 %v13335_v12, %v7255_v1 }
 0x4a6   : > { %7689 = vst [vmem:[%s13376_s12 + $0xa0] sm:$0xff] %v7657_v25  ;;  %v7658_v34 = vmax.f32 %v7626_v50, 0.0  ;;  %v7558_v45 = vmul.f32 %v13340_v48, %v7496_v62  ;;  %v9396_v0 = vpop.f32.mrb[42].mxu0  ;;  %v7297_v14 = vadd.f32 %v13335_v12, %v7258_v35 }
 0x4a7   : > { %7692 = vst [vmem:[%s13376_s12 + $0xb8] sm:$0xff] %v7660_v39  ;;  %v7599_v27 = vadd.f32 %v13351_v8, %v7560_v5  ;;  %v7561_v13 = vmul.f32 %v9396_v0, %v13340_v48  ;;  %v7499_v7 = vpop.f32.mrb[43].mxu0  ;;  %v9351_v28 = vpop.f32.mrb[44].mxu1  ;;  %v7295_v55 = vadd.f32 %v13335_v12, %v7256_v6 }
 0x4a8   : > { %7690 = vst [vmem:[%s13376_s12 + $0xa8] sm:$0xff] %v7658_v34  ;;  %v7597_v38 = vadd.f32 %v13351_v8, %v7558_v45  ;;  %v7559_v47 = vmul.f32 %v13340_v48, %v7499_v7  ;;  %v7218_v59 = vadd.f32 %v9351_v28, %v13328_v31  ;;  %v7209_v41 = vpop.f32.mrb[45].mxu1 }
 0x4a9   : > { %v7631_v29 = vadd.f32 %v7599_v27, %v7296_v58  ;;  %v7600_v9 = vadd.f32 %v13351_v8, %v7561_v13  ;;  %v7210_v2 = vadd.f32 %v7209_v41, %v13316_v10  ;;  %v9352_v22 = vpop.f32.mrb[46].mxu1 }
 0x4aa   : > { %v7629_v16 = vadd.f32 %v7597_v38, %v7294_v17  ;;  %v7598_v51 = vadd.f32 %v13351_v8, %v7559_v47  ;;  %v7261_v19 = vmul.f32 %v13325_v56, %v7218_v59  ;;  %v7221_v54 = vadd.f32 %v9352_v22, %v13343_v20  ;;  %v7212_v57 = vpop.f32.mrb[47].mxu1 }
 0x4ab   : > { %v7663_v40 = vmax.f32 %v7631_v29, 0.0  ;;  %v7632_v21 = vadd.f32 %v7600_v9, %v7297_v14  ;;  %v7259_v31 = vmul.f32 %v13325_v56, %v7210_v2  ;;  %v7213_v49 = vadd.f32 %v7212_v57, %v13318_v60 }
 0x4ac   : > { %v7661_v61 = vmax.f32 %v7629_v16, 0.0  ;;  %v7630_v18 = vadd.f32 %v7598_v51, %v7295_v55  ;;  %v9399_v10 = vpop.f32.mrb[44].mxu0  ;;  %v7262_v4 = vmul.f32 %v13325_v56, %v7221_v54  ;;  %v7300_v23 = vadd.f32 %v13335_v12, %v7261_v19 }
 0x4ad   : > { %7695 = vst [vmem:[%s13376_s12 + $0xd0] sm:$0xff] %v7663_v40  ;;  %v7664_v11 = vmax.f32 %v7632_v21, 0.0  ;;  %v7564_v20 = vmul.f32 %v9399_v10, %v13340_v48  ;;  %v7512_v33 = vpop.f32.mrb[45].mxu0  ;;  %v7260_v36 = vmul.f32 %v13325_v56, %v7213_v49  ;;  %v7298_v60 = vadd.f32 %v13335_v12, %v7259_v31 }
 0x4ae   : > { %7693 = vst [vmem:[%s13376_s12 + $0xc0] sm:$0xff] %v7661_v61  ;;  %v7662_v52 = vmax.f32 %v7630_v18, 0.0  ;;  %v7562_v63 = vmul.f32 %v13340_v48, %v7512_v33  ;;  %v9400_v15 = vpop.f32.mrb[46].mxu0  ;;  %v7301_v24 = vadd.f32 %v13335_v12, %v7262_v4 }
 0x4af   : > { %7696 = vst [vmem:[%s13376_s12 + $0xd8] sm:$0xff] %v7664_v11  ;;  %v7603_v42 = vadd.f32 %v13351_v8, %v7564_v20  ;;  %v7565_v53 = vmul.f32 %v9400_v15, %v13340_v48  ;;  %v7515_v44 = vpop.f32.mrb[47].mxu0  ;;  %v7299_v32 = vadd.f32 %v13335_v12, %v7260_v36 }
 0x4b0   : > { %7694 = vst [vmem:[%s13376_s12 + $0xc8] sm:$0xff] %v7662_v52  ;;  %v7601_v56 = vadd.f32 %v13351_v8, %v7562_v63  ;;  %v7563_v30 = vmul.f32 %v13340_v48, %v7515_v44 }
 0x4b1   : > { %v7635_v37 = vadd.f32 %v7603_v42, %v7300_v23  ;;  %v7604_v3 = vadd.f32 %v13351_v8, %v7565_v53 }
 0x4b2   : > { %v7633_v26 = vadd.f32 %v7601_v56, %v7298_v60  ;;  %v7602_v1 = vadd.f32 %v13351_v8, %v7563_v30 }
 0x4b3   : > { %v7667_v46 = vmax.f32 %v7635_v37, 0.0  ;;  %v7636_v25 = vadd.f32 %v7604_v3, %v7301_v24 }
 0x4b4   : > { %v7665_v50 = vmax.f32 %v7633_v26, 0.0  ;;  %v7634_v43 = vadd.f32 %v7602_v1, %v7299_v32 }
 0x4b5   : > { %7699 = vst [vmem:[%s13376_s12 + $0xf0] sm:$0xff] %v7667_v46  ;;  %v7668_v12 = vmax.f32 %v7636_v25, 0.0 }
 0x4b6   : > { %7697 = vst [vmem:[%s13376_s12 + $0xe0] sm:$0xff] %v7665_v50  ;;  %v7666_v48 = vmax.f32 %v7634_v43, 0.0 }
 0x4b7   : > { %7700 = vst [vmem:[%s13376_s12 + $0xf8] sm:$0xff] %v7668_v12 }
 0x4b8   : > { %7698 = vst [vmem:[%s13376_s12 + $0xe8] sm:$0xff] %v7666_v48 }
 0x4b9   : > { %9773 = shalt.err (!%p9770_p7)
}
 0x4ba   : > { %s9774_s26 = scalar_lea.hbm %s13545_s27, 4096  ;;  %s9778_s28 = scalar_lea.hbm %s13605_s10, 8192 }
 0x4bb   : > { %p9775_p8 = scmp.ne.s32.totalorder %s13545_s27, %s9774_s26  ;;  %p9779_p1 = scmp.lt.u32.totalorder %s13545_s27, %s13605_s10 }
 0x4bc   : > { %p9780_p0 = scmp.lt.u32.totalorder %s9778_s28, %s9774_s26  ;;  %p9782_p6 = scmp.lt.u32.totalorder %s9774_s26, %s13545_s27 }
 0x4bd   : > { %p9776_p11 = pnand %p9775_p8, %p13907_p9 }
 0x4be   : > { %p9781_p5 = por %p9780_p0, %p9779_p1 }
 0x4bf   : > { %p9777_p13 = pneg %p9776_p11 }
 0x4c0   : > { %p9783_p10 = por %p9782_p6, %p9781_p5 }
 0x4c2   : > { %p9784_p12 = pnand %p9783_p10, %p9777_p13 }
 0x4c4   : > { %9787 = shalt.err (!%p9784_p12)
}
 0x4c5   : > { %s9833_s25 = smov 128   ;;  %s9834_s29 = smov 8  }
 0x4c6   : > { %9422 = dma.vmem_to_hbm [thread:$0]  (%p13907_p9), %s13547_s18, 4096, %s13545_s27, %s13554_s17, %s9833_s25, %s9833_s25, %s9834_s29  }
 0x4c7 PF: > { %p9434_p2 = scmp.ge.s32.totalorder %s9826_s16, 2  ;;  %s7730_s30 = sand.u32 1, %s9814_s13  }
 0x4c8   : > { %p13908_p3 = scmp.ne.s32.totalorder %s13673_s24, 0  ;;  %s7731_s26 = scalar_lea.sflag [#allocation5], %s7730_s30 }
 0x4ca   : > { %p9429_p4 = pnand %p9434_p2, %p13908_p3 }
 0x4cc   : > { %9809 = dma.done.wait (!%p9429_p4), %s7731_s26, 4096  }
 0x4cd   : > { %9811 = vsyncadd (!%p9429_p4), %s7731_s26, 4294963200  ;;  %p21_p7 = scmp.ge.s32.totalorder %s9915_s19, 4   ;;  %s13909_s13 = smov %s9818_s14 }
 0x4ce   : > { %s13910_s14 = smov %s9822_s15  ;;  %s13911_s15 = smov %s9926_s22 }
 0x4cf   : > { %s13912_s16 = smov %s9915_s19  ;;  %23 = sbr.rel (!%p21_p7) target bundleno = 4 (0x4), region = 103 }
 0x4d6   :  { %7736 = vsyncpa [#allocation4], 1 }
 0x4d7   :  { %7738 = vsyncpa [#allocation4 + $0x1], 1 }
 0x4d8   :  { %7739 = vsyncpa [#allocation5], 1 }
 0x4d9   :  { %7741 = vsyncpa [#allocation5 + $0x1], 1 }

</bundles_post_ra>
